<compile_context>
chip_gen: v7x
topology: tpu7x:2x2x1
jax: 0.10.0
libtpu: 0.0.40
codegen_flags: <defaults>
</compile_context>

<pallas_src>
import jax
import jax.numpy as jnp
from jax import lax
from jax.experimental import pallas as pl
from jax.experimental.pallas import tpu as pltpu


def _round_up(x, m):
    return (x + m - 1) // m * m


def _cdiv(a, b):
    return -(-a // b)


# ------------------------------ Pallas kernels ------------------------------ #

def _make_kernel(has_res, relu_out, has_head):
    """Fused matmul kernel:  o = relu?(x@w + b [+ res])  [then fused 1x1 head]."""

    def kernel(*refs):
        if has_head:
            x_ref, w_ref, b_ref, res_ref, w2_ref, b2_ref, o_ref = refs
        elif has_res:
            x_ref, w_ref, b_ref, res_ref, o_ref = refs
            w2_ref = b2_ref = None
        else:
            x_ref, w_ref, b_ref, o_ref = refs
            res_ref = w2_ref = b2_ref = None

        acc = jnp.dot(x_ref[...], w_ref[...],
                      preferred_element_type=jnp.float32)   # bf16 x bf16 -> f32
        acc = acc + b_ref[...]
        if has_res:
            acc = acc + res_ref[...]
        if relu_out or has_head:
            acc = jnp.maximum(acc, 0.0)
        if has_head:
            # fused final 1x1 conv (out_channels == 1): lane reduce, no tiny matmul
            acc = jnp.sum(acc * w2_ref[...], axis=1, keepdims=True) + b2_ref[...]
        o_ref[...] = acc.astype(o_ref.dtype)

    return kernel


_MAX_TILE_M = 512


def _plan_row_tiles(m):
    """Adaptive row tiling: minimal 16-row padding, row tiles capped at 512."""
    mp = _round_up(m, 16)
    if mp <= _MAX_TILE_M:
        return mp, 1, mp
    n_tiles = _cdiv(mp, _MAX_TILE_M)
    tile = _round_up(_cdiv(mp, n_tiles), 16)
    return tile, n_tiles, tile * n_tiles


def _fused_matmul(x, w, b, *, res=None, relu_out=False, head=None):
    """o = relu?(x @ w + b [+ res]) ; with head=(w2_row, b2): o = relu(.) 1x1-conv.

    x:[M,K] (cast to bf16), w:[K,C] bf16, b:[1,C] f32, res:[M,C] f32 or None,
    head: ((1,C) f32, (1,1) f32) or None.  Returns f32 [M, C] (or [M, 1])."""
    assert head is None or res is not None
    m, k = x.shape
    c = w.shape[1]
    c_out = 1 if head is not None else c

    tile_m, n_tiles, mp = _plan_row_tiles(m)
    x = x.astype(jnp.bfloat16)
    if mp != m:
        x = jnp.pad(x, ((0, mp - m), (0, 0)))
        if res is not None:
            res = jnp.pad(res, ((0, mp - m), (0, 0)))

    args = [x, w, b]
    in_specs = [
        pl.BlockSpec((tile_m, k), lambda i: (i, 0)),
        pl.BlockSpec((k, c), lambda i: (0, 0)),
        pl.BlockSpec((1, c), lambda i: (0, 0)),
    ]
    if res is not None:
        args.append(res.astype(jnp.float32))
        in_specs.append(pl.BlockSpec((tile_m, c), lambda i: (i, 0)))
    if head is not None:
        w2_row, b2 = head
        args += [w2_row, b2]
        in_specs += [pl.BlockSpec((1, c), lambda i: (0, 0)),
                     pl.BlockSpec((1, 1), lambda i: (0, 0))]

    kernel = _make_kernel(res is not None, relu_out, head is not None)
    out = pl.pallas_call(
        kernel,
        out_shape=jax.ShapeDtypeStruct((mp, c_out), jnp.float32),
        grid_spec=pltpu.PrefetchScalarGridSpec(
            num_scalar_prefetch=0,
            grid=(n_tiles,),
            in_specs=in_specs,
            out_specs=pl.BlockSpec((tile_m, c_out), lambda i: (i, 0)),
        ),
        compiler_params=pltpu.CompilerParams(
            dimension_semantics=("parallel",)),
    )(*args)
    return out[:m]


# ------------------------------ im2col glue (NHWC) -------------------------- #

def _im2col_nhwc(x, kh, kw, pad):
    """x:[N,H,W,C] -> ([N*Ho*Wo, kh*kw*C], Ho, Wo) stride-1 patches.
    pad = ((top, bottom), (left, right)); K ordering is (ki, kj, c)."""
    n, h, w, c = x.shape
    (pt, pb), (pleft, pright) = pad
    xp = jnp.pad(x, ((0, 0), (pt, pb), (pleft, pright), (0, 0)))
    ho = h + pt + pb - kh + 1
    wo = w + pleft + pright - kw + 1
    cols = []
    for ki in range(kh):
        for kj in range(kw):
            cols.append(xp[:, ki:ki + ho, kj:kj + wo, :])
    patches = jnp.concatenate(cols, axis=-1)          # [N,Ho,Wo,kh*kw*C]
    return patches.reshape(n * ho * wo, kh * kw * c), ho, wo


def _dilate_nhwc(x, stride):
    if stride == 1:
        return x
    n, h, w, c = x.shape
    out = jnp.zeros((n, (h - 1) * stride + 1, (w - 1) * stride + 1, c), x.dtype)
    return out.at[:, ::stride, ::stride, :].set(x)


# ------------------------------ residual blocks ------------------------------ #

def _residual_block(x, blk, head=None):
    """One ResidualBlock (NHWC).  head = fused final 1x1 conv (last block only)."""
    n, h, w, c = x.shape
    xr = jax.nn.relu(x)

    # residual_layer_1: 3x3 conv, pad 1; ReLU of its output fused into the kernel
    p1, _, _ = _im2col_nhwc(xr, 3, 3, ((1, 1), (1, 1)))
    a1 = _fused_matmul(p1, blk["w1m"], blk["b1v"], relu_out=True).reshape(n, h, w, c)
    # TODO(synk): dropout between the two convs not implemented (module default
    #             dropout_probability=0.0 -> identity).

    if blk["resample"] is None:
        # shortcut = identity; its add is fused into the second conv kernel
        p2, ho, wo = _im2col_nhwc(a1, 3, 3, ((1, 1), (1, 1)))
        res = x.reshape(n * h * w, c)
        out = _fused_matmul(p2, blk["w2m"], blk["b2v"], res=res, head=head)
        c_out = c
    else:  # resample == "up": ConvTranspose2d via zero insertion + stride-1 conv
        op = blk["output_padding"]
        pad = ((1, 1 + op), (1, 1 + op))
        c_out = c // 2
        # shortcut path (raw inputs)
        ps, ho, wo = _im2col_nhwc(_dilate_nhwc(x, 2), 3, 3, pad)
        shortcut = _fused_matmul(ps, blk["wsm"], blk["bsv"])
        # residual path; the shortcut add is fused into this kernel
        p2, _, _ = _im2col_nhwc(_dilate_nhwc(a1, 2), 3, 3, pad)
        out = _fused_matmul(p2, blk["w2m"], blk["b2v"], res=shortcut, head=head)

    if head is not None:
        c_out = 1
    return out.reshape(n, ho, wo, c_out)


def conv_decoder_forward(z, params):
    """ConvDecoder.forward; z: [N, latent_features] -> [N, 1, 28, 28] (NCHW)."""
    n = z.shape[0]
    c0 = 8 * params["channels_multiplier"]

    # initial nn.Linear; weight columns pre-permuted so the output is already
    # the NHWC-flattened [N, 4, 4, 8*cm] feature map (no relayout glue).
    h = _fused_matmul(z, params["lin_w_packed"], params["lin_b_packed"])
    x = h.reshape(n, 4, 4, c0)

    blocks = params["blocks"]
    head = (params["final_w_row"], params["final_b2"])
    for bi, blk in enumerate(blocks):
        x = _residual_block(x, blk, head=head if bi == len(blocks) - 1 else None)

    # x: [N, 28, 28, 1]; the trailing ReLU + final 1x1 conv were fused into the
    # last block's kernel.  Single NHWC -> NCHW transpose at the very end.
    return x.transpose(0, 3, 1, 2)


# ------------------------------ params / packing ----------------------------- #

def _pack_conv(w):
    """Torch Conv2d weight [O,I,kh,kw] -> im2col matmul operand [kh*kw*I, O] bf16."""
    o, i, kh, kw = w.shape
    return w.transpose(2, 3, 1, 0).reshape(kh * kw * i, o).astype(jnp.bfloat16)


def _pack_conv_transpose(w_t):
    """Torch ConvTranspose2d weight [I,O,kh,kw] -> equivalent stride-1 conv
    matmul operand [kh*kw*I, O] bf16 (kernel spatially flipped, in/out swapped)."""
    i, o, kh, kw = w_t.shape
    wf = jnp.flip(w_t, axis=(2, 3))
    return wf.transpose(2, 3, 0, 1).reshape(kh * kw * i, o).astype(jnp.bfloat16)


def _bias_row(b):
    return b.reshape(1, -1).astype(jnp.float32)


def init_params(key, latent_features, channels_multiplier):
    cm = channels_multiplier
    c0 = 8 * cm

    def conv_w(k, o, i, kh, kw):
        wk, bk = jax.random.split(k)
        w = jax.random.normal(wk, (o, i, kh, kw), jnp.float32) / jnp.sqrt(i * kh * kw)
        b = 0.01 * jax.random.normal(bk, (o,), jnp.float32)
        return w, b

    def conv_t_w(k, i, o, kh, kw):
        wk, bk = jax.random.split(k)
        w = 2.0 * jax.random.normal(wk, (i, o, kh, kw), jnp.float32) / jnp.sqrt(i * kh * kw)
        b = 0.01 * jax.random.normal(bk, (o,), jnp.float32)
        return w, b

    keys = jax.random.split(key, 8)

    # initial linear (torch layout: w [out, in], b [out])
    wk, bk = jax.random.split(keys[0])
    lin_w = jax.random.normal(wk, (16 * c0, latent_features), jnp.float32) / jnp.sqrt(latent_features)
    lin_b = 0.01 * jax.random.normal(bk, (16 * c0,), jnp.float32)
    # permute columns: torch reshape (-1, C0, 4, 4) NCHW  ->  NHWC-flat order
    m = jnp.arange(16 * c0)
    hh, ww, cc = m // (4 * c0), (m // c0) % 4, m % c0
    perm = cc * 16 + hh * 4 + ww
    lin_w_packed = lin_w.T[:, perm].astype(jnp.bfloat16)
    lin_b_packed = lin_b[perm].reshape(1, -1).astype(jnp.float32)

    block_cfgs = [
        (c0, None, False),
        (c0, "up", True),
        (4 * cm, None, False),
        (4 * cm, "up", False),
        (2 * cm, None, False),
        (2 * cm, "up", False),
    ]
    blocks = []
    for (cin, resample, first), bkey in zip(block_cfgs, keys[1:7]):
        k1, k2, k3 = jax.random.split(bkey, 3)
        w1, b1 = conv_w(k1, cin, cin, 3, 3)
        blk = dict(resample=resample, w1=w1, b1=b1,
                   w1m=_pack_conv(w1), b1v=_bias_row(b1))
        if resample is None:
            w2, b2 = conv_w(k2, cin, cin, 3, 3)
            blk.update(w2=w2, b2=b2, w2m=_pack_conv(w2), b2v=_bias_row(b2),
                       output_padding=None)
        else:
            op = 0 if first else 1
            ws, bs = conv_t_w(k2, cin, cin // 2, 3, 3)
            w2, b2 = conv_t_w(k3, cin, cin // 2, 3, 3)
            blk.update(ws=ws, bs=bs, wsm=_pack_conv_transpose(ws), bsv=_bias_row(bs),
                       w2=w2, b2=b2, w2m=_pack_conv_transpose(w2), b2v=_bias_row(b2),
                       output_padding=op)
        blocks.append(blk)

    # final 1x1 conv (cm -> 1)
    wk, bk = jax.random.split(keys[7])
    fin_w = jax.random.normal(wk, (1, cm, 1, 1), jnp.float32) / jnp.sqrt(cm)
    fin_b = 0.01 * jax.random.normal(bk, (1,), jnp.float32)

    return dict(
        channels_multiplier=cm,
        latent_features=latent_features,
        lin_w=lin_w, lin_b=lin_b,
        lin_w_packed=lin_w_packed, lin_b_packed=lin_b_packed,
        blocks=blocks,
        final_w=fin_w, final_b=fin_b,
        final_w_row=fin_w.reshape(1, cm).astype(jnp.float32),
        final_b2=fin_b.reshape(1, 1).astype(jnp.float32),
    )


# ------------------------------ pure-JAX reference --------------------------- #

def _reference_forward(z, params):
    cm = params["channels_multiplier"]

    def conv3(x, w, b):
        y = lax.conv_general_dilated(x, w, (1, 1), [(1, 1), (1, 1)],
                                     dimension_numbers=("NCHW", "OIHW", "NCHW"))
        return y + b.reshape(1, -1, 1, 1)

    def conv_t(x, w_t, b, op):
        w_eq = jnp.flip(w_t, axis=(2, 3)).transpose(1, 0, 2, 3)
        y = lax.conv_general_dilated(x, w_eq, (1, 1),
                                     [(1, 1 + op), (1, 1 + op)],
                                     lhs_dilation=(2, 2),
                                     dimension_numbers=("NCHW", "OIHW", "NCHW"))
        return y + b.reshape(1, -1, 1, 1)

    x = (z @ params["lin_w"].T + params["lin_b"]).reshape(-1, 8 * cm, 4, 4)
    for blk in params["blocks"]:
        r = conv3(jax.nn.relu(x), blk["w1"], blk["b1"])
        if blk["resample"] is None:
            shortcut = x
            r = conv3(jax.nn.relu(r), blk["w2"], blk["b2"])
        else:
            op = blk["output_padding"]
            shortcut = conv_t(x, blk["ws"], blk["bs"], op)
            r = conv_t(jax.nn.relu(r), blk["w2"], blk["b2"], op)
        x = shortcut + r
    x = jax.nn.relu(x)
    y = lax.conv_general_dilated(x, params["final_w"], (1, 1), [(0, 0), (0, 0)],
                                 dimension_numbers=("NCHW", "OIHW", "NCHW"))
    return y + params["final_b"].reshape(1, -1, 1, 1)


if __name__ == "__main__":
    key = jax.random.PRNGKey(0)
    pkey, zkey = jax.random.split(key)

    latent_features = 8
    channels_multiplier = 4   # channels 32 -> 16 -> 8 -> 4 -> 1, spatial 4 -> 7 -> 14 -> 28
    params = init_params(pkey, latent_features, channels_multiplier)

    z = jax.random.normal(zkey, (2, latent_features), jnp.float32)

    fwd = jax.jit(lambda inp: conv_decoder_forward(inp, params))
    out = jax.block_until_ready(fwd(z))

    ref = _reference_forward(z, params)
    assert out.shape == (2, 1, 28, 28), out.shape
    err = float(jnp.max(jnp.abs(out - ref)))
    tol = 5e-2 + 5e-2 * float(jnp.max(jnp.abs(ref)))   # bf16 operands, f32 accumulate
    assert err <= tol, (err, tol)

    print("KERNEL_OK")
</pallas_src>

<mosaic_0001>
module attributes {stable_mosaic.version = 11 : i64} {
  func.func @kernel(%arg0: i32, %arg1: memref<16x8xbf16, #tpu.memory_space<vmem>>, %arg2: memref<8x512xbf16, #tpu.memory_space<vmem>>, %arg3: memref<1x512xf32, #tpu.memory_space<vmem>>, %arg4: memref<16x512xf32, #tpu.memory_space<vmem>>) attributes {dimension_semantics = [#tpu.dimension_semantics<parallel>], iteration_bounds = array<i64: 1>, scalar_prefetch = 0 : i64, scratch_operands = 0 : i64, tpu.core_type = #tpu.core_type<tc>, window_params = [{transform_indices = @transform_0, window_bounds = array<i64: 16, 8>}, {pipeline_mode = #tpu.pipeline_mode<synchronous>, transform_indices = @transform_1, window_bounds = array<i64: 8, 512>}, {pipeline_mode = #tpu.pipeline_mode<synchronous>, transform_indices = @transform_2, window_bounds = array<i64: 1, 512>}, {transform_indices = @transform_3, window_bounds = array<i64: 16, 512>}]} {
    %c0 = arith.constant 0 : index
    %c0_0 = arith.constant 0 : index
    %0 = vector.load %arg1[%c0, %c0_0] : memref<16x8xbf16, #tpu.memory_space<vmem>>, vector<16x8xbf16>
    %c0_1 = arith.constant 0 : index
    %c0_2 = arith.constant 0 : index
    %1 = vector.load %arg2[%c0_1, %c0_2] : memref<8x512xbf16, #tpu.memory_space<vmem>>, vector<8x512xbf16>
    %cst = arith.constant dense<0.000000e+00> : vector<16x512xf32>
    %2 = tpu.matmul %0, %1, %cst {dimension_numbers = #tpu.dot_dimension_numbers<[1], [0], [0], [1], [0, 0, 1, 1], [], []>} : vector<16x8xbf16>, vector<8x512xbf16>, vector<16x512xf32> -> vector<16x512xf32>
    %c0_3 = arith.constant 0 : index
    %c0_4 = arith.constant 0 : index
    %3 = vector.load %arg3[%c0_3, %c0_4] : memref<1x512xf32, #tpu.memory_space<vmem>>, vector<1x512xf32>
    %4 = vector.broadcast %3 : vector<1x512xf32> to vector<16x512xf32>
    %5 = arith.addf %2, %4 : vector<16x512xf32>
    %c0_5 = arith.constant 0 : index
    %c0_6 = arith.constant 0 : index
    %6 = vector.load %arg4[%c0_5, %c0_6] : memref<16x512xf32, #tpu.memory_space<vmem>>, vector<16x512xf32>
    tpu.vector_store %arg4[%c0_5, %c0_6], %5 {strides = array<i32>} : memref<16x512xf32, #tpu.memory_space<vmem>>, vector<16x512xf32>,
    return
  }
  func.func @transform_0(%arg0: i32) -> (i32, i32) {
    %c0_i32 = arith.constant 0 : i32
    %c0_i32_0 = arith.constant 0 : i32
    return %arg0, %c0_i32 : i32, i32
  }
  func.func @transform_1(%arg0: i32) -> (i32, i32) {
    %c0_i32 = arith.constant 0 : i32
    %c0_i32_0 = arith.constant 0 : i32
    %c0_i32_1 = arith.constant 0 : i32
    return %c0_i32, %c0_i32_0 : i32, i32
  }
  func.func @transform_2(%arg0: i32) -> (i32, i32) {
    %c0_i32 = arith.constant 0 : i32
    %c0_i32_0 = arith.constant 0 : i32
    %c0_i32_1 = arith.constant 0 : i32
    return %c0_i32, %c0_i32_0 : i32, i32
  }
  func.func @transform_3(%arg0: i32) -> (i32, i32) {
    %c0_i32 = arith.constant 0 : i32
    %c0_i32_0 = arith.constant 0 : i32
    return %arg0, %c0_i32 : i32, i32
  }
}

module attributes {stable_mosaic.version = 11 : i64} {
  func.func @kernel(%arg0: i32, %arg1: memref<32x288xbf16, #tpu.memory_space<vmem>>, %arg2: memref<288x32xbf16, #tpu.memory_space<vmem>>, %arg3: memref<1x32xf32, #tpu.memory_space<vmem>>, %arg4: memref<32x32xf32, #tpu.memory_space<vmem>>) attributes {dimension_semantics = [#tpu.dimension_semantics<parallel>], iteration_bounds = array<i64: 1>, scalar_prefetch = 0 : i64, scratch_operands = 0 : i64, tpu.core_type = #tpu.core_type<tc>, window_params = [{transform_indices = @transform_0, window_bounds = array<i64: 32, 288>}, {pipeline_mode = #tpu.pipeline_mode<synchronous>, transform_indices = @transform_1, window_bounds = array<i64: 288, 32>}, {pipeline_mode = #tpu.pipeline_mode<synchronous>, transform_indices = @transform_2, window_bounds = array<i64: 1, 32>}, {transform_indices = @transform_3, window_bounds = array<i64: 32, 32>}]} {
    %c0 = arith.constant 0 : index
    %c0_0 = arith.constant 0 : index
    %0 = vector.load %arg1[%c0, %c0_0] : memref<32x288xbf16, #tpu.memory_space<vmem>>, vector<32x288xbf16>
    %c0_1 = arith.constant 0 : index
    %c0_2 = arith.constant 0 : index
    %1 = vector.load %arg2[%c0_1, %c0_2] : memref<288x32xbf16, #tpu.memory_space<vmem>>, vector<288x32xbf16>
    %cst = arith.constant dense<0.000000e+00> : vector<32x32xf32>
    %2 = tpu.matmul %0, %1, %cst {dimension_numbers = #tpu.dot_dimension_numbers<[1], [0], [0], [1], [0, 0, 1, 1], [], []>} : vector<32x288xbf16>, vector<288x32xbf16>, vector<32x32xf32> -> vector<32x32xf32>
    %c0_3 = arith.constant 0 : index
    %c0_4 = arith.constant 0 : index
    %3 = vector.load %arg3[%c0_3, %c0_4] : memref<1x32xf32, #tpu.memory_space<vmem>>, vector<1x32xf32>
    %4 = vector.broadcast %3 : vector<1x32xf32> to vector<32x32xf32>
    %5 = arith.addf %2, %4 : vector<32x32xf32>
    %cst_5 = arith.constant 0.000000e+00 : f32
    %6 = vector.broadcast %cst_5 : f32 to vector<32x32xf32>
    %7 = arith.maximumf %5, %6 : vector<32x32xf32>
    %c0_6 = arith.constant 0 : index
    %c0_7 = arith.constant 0 : index
    %8 = vector.load %arg4[%c0_6, %c0_7] : memref<32x32xf32, #tpu.memory_space<vmem>>, vector<32x32xf32>
    tpu.vector_store %arg4[%c0_6, %c0_7], %7 {strides = array<i32>} : memref<32x32xf32, #tpu.memory_space<vmem>>, vector<32x32xf32>,
    return
  }
  func.func @transform_0(%arg0: i32) -> (i32, i32) {
    %c0_i32 = arith.constant 0 : i32
    %c0_i32_0 = arith.constant 0 : i32
    return %arg0, %c0_i32 : i32, i32
  }
  func.func @transform_1(%arg0: i32) -> (i32, i32) {
    %c0_i32 = arith.constant 0 : i32
    %c0_i32_0 = arith.constant 0 : i32
    %c0_i32_1 = arith.constant 0 : i32
    return %c0_i32, %c0_i32_0 : i32, i32
  }
  func.func @transform_2(%arg0: i32) -> (i32, i32) {
    %c0_i32 = arith.constant 0 : i32
    %c0_i32_0 = arith.constant 0 : i32
    %c0_i32_1 = arith.constant 0 : i32
    return %c0_i32, %c0_i32_0 : i32, i32
  }
  func.func @transform_3(%arg0: i32) -> (i32, i32) {
    %c0_i32 = arith.constant 0 : i32
    %c0_i32_0 = arith.constant 0 : i32
    return %arg0, %c0_i32 : i32, i32
  }
}

module attributes {stable_mosaic.version = 11 : i64} {
  func.func @kernel(%arg0: i32, %arg1: memref<32x288xbf16, #tpu.memory_space<vmem>>, %arg2: memref<288x32xbf16, #tpu.memory_space<vmem>>, %arg3: memref<1x32xf32, #tpu.memory_space<vmem>>, %arg4: memref<32x32xf32, #tpu.memory_space<vmem>>, %arg5: memref<32x32xf32, #tpu.memory_space<vmem>>) attributes {dimension_semantics = [#tpu.dimension_semantics<parallel>], iteration_bounds = array<i64: 1>, scalar_prefetch = 0 : i64, scratch_operands = 0 : i64, tpu.core_type = #tpu.core_type<tc>, window_params = [{transform_indices = @transform_0, window_bounds = array<i64: 32, 288>}, {pipeline_mode = #tpu.pipeline_mode<synchronous>, transform_indices = @transform_1, window_bounds = array<i64: 288, 32>}, {pipeline_mode = #tpu.pipeline_mode<synchronous>, transform_indices = @transform_2, window_bounds = array<i64: 1, 32>}, {transform_indices = @transform_3, window_bounds = array<i64: 32, 32>}, {transform_indices = @transform_4, window_bounds = array<i64: 32, 32>}]} {
    %c0 = arith.constant 0 : index
    %c0_0 = arith.constant 0 : index
    %0 = vector.load %arg1[%c0, %c0_0] : memref<32x288xbf16, #tpu.memory_space<vmem>>, vector<32x288xbf16>
    %c0_1 = arith.constant 0 : index
    %c0_2 = arith.constant 0 : index
    %1 = vector.load %arg2[%c0_1, %c0_2] : memref<288x32xbf16, #tpu.memory_space<vmem>>, vector<288x32xbf16>
    %cst = arith.constant dense<0.000000e+00> : vector<32x32xf32>
    %2 = tpu.matmul %0, %1, %cst {dimension_numbers = #tpu.dot_dimension_numbers<[1], [0], [0], [1], [0, 0, 1, 1], [], []>} : vector<32x288xbf16>, vector<288x32xbf16>, vector<32x32xf32> -> vector<32x32xf32>
    %c0_3 = arith.constant 0 : index
    %c0_4 = arith.constant 0 : index
    %3 = vector.load %arg3[%c0_3, %c0_4] : memref<1x32xf32, #tpu.memory_space<vmem>>, vector<1x32xf32>
    %4 = vector.broadcast %3 : vector<1x32xf32> to vector<32x32xf32>
    %5 = arith.addf %2, %4 : vector<32x32xf32>
    %c0_5 = arith.constant 0 : index
    %c0_6 = arith.constant 0 : index
    %6 = vector.load %arg4[%c0_5, %c0_6] : memref<32x32xf32, #tpu.memory_space<vmem>>, vector<32x32xf32>
    %7 = arith.addf %5, %6 : vector<32x32xf32>
    %c0_7 = arith.constant 0 : index
    %c0_8 = arith.constant 0 : index
    %8 = vector.load %arg5[%c0_7, %c0_8] : memref<32x32xf32, #tpu.memory_space<vmem>>, vector<32x32xf32>
    tpu.vector_store %arg5[%c0_7, %c0_8], %7 {strides = array<i32>} : memref<32x32xf32, #tpu.memory_space<vmem>>, vector<32x32xf32>,
    return
  }
  func.func @transform_0(%arg0: i32) -> (i32, i32) {
    %c0_i32 = arith.constant 0 : i32
    %c0_i32_0 = arith.constant 0 : i32
    return %arg0, %c0_i32 : i32, i32
  }
  func.func @transform_1(%arg0: i32) -> (i32, i32) {
    %c0_i32 = arith.constant 0 : i32
    %c0_i32_0 = arith.constant 0 : i32
    %c0_i32_1 = arith.constant 0 : i32
    return %c0_i32, %c0_i32_0 : i32, i32
  }
  func.func @transform_2(%arg0: i32) -> (i32, i32) {
    %c0_i32 = arith.constant 0 : i32
    %c0_i32_0 = arith.constant 0 : i32
    %c0_i32_1 = arith.constant 0 : i32
    return %c0_i32, %c0_i32_0 : i32, i32
  }
  func.func @transform_3(%arg0: i32) -> (i32, i32) {
    %c0_i32 = arith.constant 0 : i32
    %c0_i32_0 = arith.constant 0 : i32
    return %arg0, %c0_i32 : i32, i32
  }
  func.func @transform_4(%arg0: i32) -> (i32, i32) {
    %c0_i32 = arith.constant 0 : i32
    %c0_i32_0 = arith.constant 0 : i32
    return %arg0, %c0_i32 : i32, i32
  }
}

module attributes {stable_mosaic.version = 11 : i64} {
  func.func @kernel(%arg0: i32, %arg1: memref<112x288xbf16, #tpu.memory_space<vmem>>, %arg2: memref<288x16xbf16, #tpu.memory_space<vmem>>, %arg3: memref<1x16xf32, #tpu.memory_space<vmem>>, %arg4: memref<112x16xf32, #tpu.memory_space<vmem>>) attributes {dimension_semantics = [#tpu.dimension_semantics<parallel>], iteration_bounds = array<i64: 1>, scalar_prefetch = 0 : i64, scratch_operands = 0 : i64, tpu.core_type = #tpu.core_type<tc>, window_params = [{transform_indices = @transform_0, window_bounds = array<i64: 112, 288>}, {pipeline_mode = #tpu.pipeline_mode<synchronous>, transform_indices = @transform_1, window_bounds = array<i64: 288, 16>}, {pipeline_mode = #tpu.pipeline_mode<synchronous>, transform_indices = @transform_2, window_bounds = array<i64: 1, 16>}, {transform_indices = @transform_3, window_bounds = array<i64: 112, 16>}]} {
    %c0 = arith.constant 0 : index
    %c0_0 = arith.constant 0 : index
    %0 = vector.load %arg1[%c0, %c0_0] : memref<112x288xbf16, #tpu.memory_space<vmem>>, vector<112x288xbf16>
    %c0_1 = arith.constant 0 : index
    %c0_2 = arith.constant 0 : index
    %1 = vector.load %arg2[%c0_1, %c0_2] : memref<288x16xbf16, #tpu.memory_space<vmem>>, vector<288x16xbf16>
    %cst = arith.constant dense<0.000000e+00> : vector<112x16xf32>
    %2 = tpu.matmul %0, %1, %cst {dimension_numbers = #tpu.dot_dimension_numbers<[1], [0], [0], [1], [0, 0, 1, 1], [], []>} : vector<112x288xbf16>, vector<288x16xbf16>, vector<112x16xf32> -> vector<112x16xf32>
    %c0_3 = arith.constant 0 : index
    %c0_4 = arith.constant 0 : index
    %3 = vector.load %arg3[%c0_3, %c0_4] : memref<1x16xf32, #tpu.memory_space<vmem>>, vector<1x16xf32>
    %4 = vector.broadcast %3 : vector<1x16xf32> to vector<112x16xf32>
    %5 = arith.addf %2, %4 : vector<112x16xf32>
    %c0_5 = arith.constant 0 : index
    %c0_6 = arith.constant 0 : index
    %6 = vector.load %arg4[%c0_5, %c0_6] : memref<112x16xf32, #tpu.memory_space<vmem>>, vector<112x16xf32>
    tpu.vector_store %arg4[%c0_5, %c0_6], %5 {strides = array<i32>} : memref<112x16xf32, #tpu.memory_space<vmem>>, vector<112x16xf32>,
    return
  }
  func.func @transform_0(%arg0: i32) -> (i32, i32) {
    %c0_i32 = arith.constant 0 : i32
    %c0_i32_0 = arith.constant 0 : i32
    return %arg0, %c0_i32 : i32, i32
  }
  func.func @transform_1(%arg0: i32) -> (i32, i32) {
    %c0_i32 = arith.constant 0 : i32
    %c0_i32_0 = arith.constant 0 : i32
    %c0_i32_1 = arith.constant 0 : i32
    return %c0_i32, %c0_i32_0 : i32, i32
  }
  func.func @transform_2(%arg0: i32) -> (i32, i32) {
    %c0_i32 = arith.constant 0 : i32
    %c0_i32_0 = arith.constant 0 : i32
    %c0_i32_1 = arith.constant 0 : i32
    return %c0_i32, %c0_i32_0 : i32, i32
  }
  func.func @transform_3(%arg0: i32) -> (i32, i32) {
    %c0_i32 = arith.constant 0 : i32
    %c0_i32_0 = arith.constant 0 : i32
    return %arg0, %c0_i32 : i32, i32
  }
}

module attributes {stable_mosaic.version = 11 : i64} {
  func.func @kernel(%arg0: i32, %arg1: memref<112x288xbf16, #tpu.memory_space<vmem>>, %arg2: memref<288x16xbf16, #tpu.memory_space<vmem>>, %arg3: memref<1x16xf32, #tpu.memory_space<vmem>>, %arg4: memref<112x16xf32, #tpu.memory_space<vmem>>, %arg5: memref<112x16xf32, #tpu.memory_space<vmem>>) attributes {dimension_semantics = [#tpu.dimension_semantics<parallel>], iteration_bounds = array<i64: 1>, scalar_prefetch = 0 : i64, scratch_operands = 0 : i64, tpu.core_type = #tpu.core_type<tc>, window_params = [{transform_indices = @transform_0, window_bounds = array<i64: 112, 288>}, {pipeline_mode = #tpu.pipeline_mode<synchronous>, transform_indices = @transform_1, window_bounds = array<i64: 288, 16>}, {pipeline_mode = #tpu.pipeline_mode<synchronous>, transform_indices = @transform_2, window_bounds = array<i64: 1, 16>}, {transform_indices = @transform_3, window_bounds = array<i64: 112, 16>}, {transform_indices = @transform_4, window_bounds = array<i64: 112, 16>}]} {
    %c0 = arith.constant 0 : index
    %c0_0 = arith.constant 0 : index
    %0 = vector.load %arg1[%c0, %c0_0] : memref<112x288xbf16, #tpu.memory_space<vmem>>, vector<112x288xbf16>
    %c0_1 = arith.constant 0 : index
    %c0_2 = arith.constant 0 : index
    %1 = vector.load %arg2[%c0_1, %c0_2] : memref<288x16xbf16, #tpu.memory_space<vmem>>, vector<288x16xbf16>
    %cst = arith.constant dense<0.000000e+00> : vector<112x16xf32>
    %2 = tpu.matmul %0, %1, %cst {dimension_numbers = #tpu.dot_dimension_numbers<[1], [0], [0], [1], [0, 0, 1, 1], [], []>} : vector<112x288xbf16>, vector<288x16xbf16>, vector<112x16xf32> -> vector<112x16xf32>
    %c0_3 = arith.constant 0 : index
    %c0_4 = arith.constant 0 : index
    %3 = vector.load %arg3[%c0_3, %c0_4] : memref<1x16xf32, #tpu.memory_space<vmem>>, vector<1x16xf32>
    %4 = vector.broadcast %3 : vector<1x16xf32> to vector<112x16xf32>
    %5 = arith.addf %2, %4 : vector<112x16xf32>
    %c0_5 = arith.constant 0 : index
    %c0_6 = arith.constant 0 : index
    %6 = vector.load %arg4[%c0_5, %c0_6] : memref<112x16xf32, #tpu.memory_space<vmem>>, vector<112x16xf32>
    %7 = arith.addf %5, %6 : vector<112x16xf32>
    %c0_7 = arith.constant 0 : index
    %c0_8 = arith.constant 0 : index
    %8 = vector.load %arg5[%c0_7, %c0_8] : memref<112x16xf32, #tpu.memory_space<vmem>>, vector<112x16xf32>
    tpu.vector_store %arg5[%c0_7, %c0_8], %7 {strides = array<i32>} : memref<112x16xf32, #tpu.memory_space<vmem>>, vector<112x16xf32>,
    return
  }
  func.func @transform_0(%arg0: i32) -> (i32, i32) {
    %c0_i32 = arith.constant 0 : i32
    %c0_i32_0 = arith.constant 0 : i32
    return %arg0, %c0_i32 : i32, i32
  }
  func.func @transform_1(%arg0: i32) -> (i32, i32) {
    %c0_i32 = arith.constant 0 : i32
    %c0_i32_0 = arith.constant 0 : i32
    %c0_i32_1 = arith.constant 0 : i32
    return %c0_i32, %c0_i32_0 : i32, i32
  }
  func.func @transform_2(%arg0: i32) -> (i32, i32) {
    %c0_i32 = arith.constant 0 : i32
    %c0_i32_0 = arith.constant 0 : i32
    %c0_i32_1 = arith.constant 0 : i32
    return %c0_i32, %c0_i32_0 : i32, i32
  }
  func.func @transform_3(%arg0: i32) -> (i32, i32) {
    %c0_i32 = arith.constant 0 : i32
    %c0_i32_0 = arith.constant 0 : i32
    return %arg0, %c0_i32 : i32, i32
  }
  func.func @transform_4(%arg0: i32) -> (i32, i32) {
    %c0_i32 = arith.constant 0 : i32
    %c0_i32_0 = arith.constant 0 : i32
    return %arg0, %c0_i32 : i32, i32
  }
}

module attributes {stable_mosaic.version = 11 : i64} {
  func.func @kernel(%arg0: i32, %arg1: memref<112x144xbf16, #tpu.memory_space<vmem>>, %arg2: memref<144x16xbf16, #tpu.memory_space<vmem>>, %arg3: memref<1x16xf32, #tpu.memory_space<vmem>>, %arg4: memref<112x16xf32, #tpu.memory_space<vmem>>) attributes {dimension_semantics = [#tpu.dimension_semantics<parallel>], iteration_bounds = array<i64: 1>, scalar_prefetch = 0 : i64, scratch_operands = 0 : i64, tpu.core_type = #tpu.core_type<tc>, window_params = [{transform_indices = @transform_0, window_bounds = array<i64: 112, 144>}, {pipeline_mode = #tpu.pipeline_mode<synchronous>, transform_indices = @transform_1, window_bounds = array<i64: 144, 16>}, {pipeline_mode = #tpu.pipeline_mode<synchronous>, transform_indices = @transform_2, window_bounds = array<i64: 1, 16>}, {transform_indices = @transform_3, window_bounds = array<i64: 112, 16>}]} {
    %c0 = arith.constant 0 : index
    %c0_0 = arith.constant 0 : index
    %0 = vector.load %arg1[%c0, %c0_0] : memref<112x144xbf16, #tpu.memory_space<vmem>>, vector<112x144xbf16>
    %c0_1 = arith.constant 0 : index
    %c0_2 = arith.constant 0 : index
    %1 = vector.load %arg2[%c0_1, %c0_2] : memref<144x16xbf16, #tpu.memory_space<vmem>>, vector<144x16xbf16>
    %cst = arith.constant dense<0.000000e+00> : vector<112x16xf32>
    %2 = tpu.matmul %0, %1, %cst {dimension_numbers = #tpu.dot_dimension_numbers<[1], [0], [0], [1], [0, 0, 1, 1], [], []>} : vector<112x144xbf16>, vector<144x16xbf16>, vector<112x16xf32> -> vector<112x16xf32>
    %c0_3 = arith.constant 0 : index
    %c0_4 = arith.constant 0 : index
    %3 = vector.load %arg3[%c0_3, %c0_4] : memref<1x16xf32, #tpu.memory_space<vmem>>, vector<1x16xf32>
    %4 = vector.broadcast %3 : vector<1x16xf32> to vector<112x16xf32>
    %5 = arith.addf %2, %4 : vector<112x16xf32>
    %cst_5 = arith.constant 0.000000e+00 : f32
    %6 = vector.broadcast %cst_5 : f32 to vector<112x16xf32>
    %7 = arith.maximumf %5, %6 : vector<112x16xf32>
    %c0_6 = arith.constant 0 : index
    %c0_7 = arith.constant 0 : index
    %8 = vector.load %arg4[%c0_6, %c0_7] : memref<112x16xf32, #tpu.memory_space<vmem>>, vector<112x16xf32>
    tpu.vector_store %arg4[%c0_6, %c0_7], %7 {strides = array<i32>} : memref<112x16xf32, #tpu.memory_space<vmem>>, vector<112x16xf32>,
    return
  }
  func.func @transform_0(%arg0: i32) -> (i32, i32) {
    %c0_i32 = arith.constant 0 : i32
    %c0_i32_0 = arith.constant 0 : i32
    return %arg0, %c0_i32 : i32, i32
  }
  func.func @transform_1(%arg0: i32) -> (i32, i32) {
    %c0_i32 = arith.constant 0 : i32
    %c0_i32_0 = arith.constant 0 : i32
    %c0_i32_1 = arith.constant 0 : i32
    return %c0_i32, %c0_i32_0 : i32, i32
  }
  func.func @transform_2(%arg0: i32) -> (i32, i32) {
    %c0_i32 = arith.constant 0 : i32
    %c0_i32_0 = arith.constant 0 : i32
    %c0_i32_1 = arith.constant 0 : i32
    return %c0_i32, %c0_i32_0 : i32, i32
  }
  func.func @transform_3(%arg0: i32) -> (i32, i32) {
    %c0_i32 = arith.constant 0 : i32
    %c0_i32_0 = arith.constant 0 : i32
    return %arg0, %c0_i32 : i32, i32
  }
}

module attributes {stable_mosaic.version = 11 : i64} {
  func.func @kernel(%arg0: i32, %arg1: memref<112x144xbf16, #tpu.memory_space<vmem>>, %arg2: memref<144x16xbf16, #tpu.memory_space<vmem>>, %arg3: memref<1x16xf32, #tpu.memory_space<vmem>>, %arg4: memref<112x16xf32, #tpu.memory_space<vmem>>, %arg5: memref<112x16xf32, #tpu.memory_space<vmem>>) attributes {dimension_semantics = [#tpu.dimension_semantics<parallel>], iteration_bounds = array<i64: 1>, scalar_prefetch = 0 : i64, scratch_operands = 0 : i64, tpu.core_type = #tpu.core_type<tc>, window_params = [{transform_indices = @transform_0, window_bounds = array<i64: 112, 144>}, {pipeline_mode = #tpu.pipeline_mode<synchronous>, transform_indices = @transform_1, window_bounds = array<i64: 144, 16>}, {pipeline_mode = #tpu.pipeline_mode<synchronous>, transform_indices = @transform_2, window_bounds = array<i64: 1, 16>}, {transform_indices = @transform_3, window_bounds = array<i64: 112, 16>}, {transform_indices = @transform_4, window_bounds = array<i64: 112, 16>}]} {
    %c0 = arith.constant 0 : index
    %c0_0 = arith.constant 0 : index
    %0 = vector.load %arg1[%c0, %c0_0] : memref<112x144xbf16, #tpu.memory_space<vmem>>, vector<112x144xbf16>
    %c0_1 = arith.constant 0 : index
    %c0_2 = arith.constant 0 : index
    %1 = vector.load %arg2[%c0_1, %c0_2] : memref<144x16xbf16, #tpu.memory_space<vmem>>, vector<144x16xbf16>
    %cst = arith.constant dense<0.000000e+00> : vector<112x16xf32>
    %2 = tpu.matmul %0, %1, %cst {dimension_numbers = #tpu.dot_dimension_numbers<[1], [0], [0], [1], [0, 0, 1, 1], [], []>} : vector<112x144xbf16>, vector<144x16xbf16>, vector<112x16xf32> -> vector<112x16xf32>
    %c0_3 = arith.constant 0 : index
    %c0_4 = arith.constant 0 : index
    %3 = vector.load %arg3[%c0_3, %c0_4] : memref<1x16xf32, #tpu.memory_space<vmem>>, vector<1x16xf32>
    %4 = vector.broadcast %3 : vector<1x16xf32> to vector<112x16xf32>
    %5 = arith.addf %2, %4 : vector<112x16xf32>
    %c0_5 = arith.constant 0 : index
    %c0_6 = arith.constant 0 : index
    %6 = vector.load %arg4[%c0_5, %c0_6] : memref<112x16xf32, #tpu.memory_space<vmem>>, vector<112x16xf32>
    %7 = arith.addf %5, %6 : vector<112x16xf32>
    %c0_7 = arith.constant 0 : index
    %c0_8 = arith.constant 0 : index
    %8 = vector.load %arg5[%c0_7, %c0_8] : memref<112x16xf32, #tpu.memory_space<vmem>>, vector<112x16xf32>
    tpu.vector_store %arg5[%c0_7, %c0_8], %7 {strides = array<i32>} : memref<112x16xf32, #tpu.memory_space<vmem>>, vector<112x16xf32>,
    return
  }
  func.func @transform_0(%arg0: i32) -> (i32, i32) {
    %c0_i32 = arith.constant 0 : i32
    %c0_i32_0 = arith.constant 0 : i32
    return %arg0, %c0_i32 : i32, i32
  }
  func.func @transform_1(%arg0: i32) -> (i32, i32) {
    %c0_i32 = arith.constant 0 : i32
    %c0_i32_0 = arith.constant 0 : i32
    %c0_i32_1 = arith.constant 0 : i32
    return %c0_i32, %c0_i32_0 : i32, i32
  }
  func.func @transform_2(%arg0: i32) -> (i32, i32) {
    %c0_i32 = arith.constant 0 : i32
    %c0_i32_0 = arith.constant 0 : i32
    %c0_i32_1 = arith.constant 0 : i32
    return %c0_i32, %c0_i32_0 : i32, i32
  }
  func.func @transform_3(%arg0: i32) -> (i32, i32) {
    %c0_i32 = arith.constant 0 : i32
    %c0_i32_0 = arith.constant 0 : i32
    return %arg0, %c0_i32 : i32, i32
  }
  func.func @transform_4(%arg0: i32) -> (i32, i32) {
    %c0_i32 = arith.constant 0 : i32
    %c0_i32_0 = arith.constant 0 : i32
    return %arg0, %c0_i32 : i32, i32
  }
}

module attributes {stable_mosaic.version = 11 : i64} {
  func.func @kernel(%arg0: i32, %arg1: memref<400x144xbf16, #tpu.memory_space<vmem>>, %arg2: memref<144x8xbf16, #tpu.memory_space<vmem>>, %arg3: memref<1x8xf32, #tpu.memory_space<vmem>>, %arg4: memref<400x8xf32, #tpu.memory_space<vmem>>) attributes {dimension_semantics = [#tpu.dimension_semantics<parallel>], iteration_bounds = array<i64: 1>, scalar_prefetch = 0 : i64, scratch_operands = 0 : i64, tpu.core_type = #tpu.core_type<tc>, window_params = [{transform_indices = @transform_0, window_bounds = array<i64: 400, 144>}, {pipeline_mode = #tpu.pipeline_mode<synchronous>, transform_indices = @transform_1, window_bounds = array<i64: 144, 8>}, {pipeline_mode = #tpu.pipeline_mode<synchronous>, transform_indices = @transform_2, window_bounds = array<i64: 1, 8>}, {transform_indices = @transform_3, window_bounds = array<i64: 400, 8>}]} {
    %c0 = arith.constant 0 : index
    %c0_0 = arith.constant 0 : index
    %0 = vector.load %arg1[%c0, %c0_0] : memref<400x144xbf16, #tpu.memory_space<vmem>>, vector<400x144xbf16>
    %c0_1 = arith.constant 0 : index
    %c0_2 = arith.constant 0 : index
    %1 = vector.load %arg2[%c0_1, %c0_2] : memref<144x8xbf16, #tpu.memory_space<vmem>>, vector<144x8xbf16>
    %cst = arith.constant dense<0.000000e+00> : vector<400x8xf32>
    %2 = tpu.matmul %0, %1, %cst {dimension_numbers = #tpu.dot_dimension_numbers<[1], [0], [0], [1], [0, 0, 1, 1], [], []>} : vector<400x144xbf16>, vector<144x8xbf16>, vector<400x8xf32> -> vector<400x8xf32>
    %c0_3 = arith.constant 0 : index
    %c0_4 = arith.constant 0 : index
    %3 = vector.load %arg3[%c0_3, %c0_4] : memref<1x8xf32, #tpu.memory_space<vmem>>, vector<1x8xf32>
    %4 = vector.broadcast %3 : vector<1x8xf32> to vector<400x8xf32>
    %5 = arith.addf %2, %4 : vector<400x8xf32>
    %c0_5 = arith.constant 0 : index
    %c0_6 = arith.constant 0 : index
    %6 = vector.load %arg4[%c0_5, %c0_6] : memref<400x8xf32, #tpu.memory_space<vmem>>, vector<400x8xf32>
    tpu.vector_store %arg4[%c0_5, %c0_6], %5 {strides = array<i32>} : memref<400x8xf32, #tpu.memory_space<vmem>>, vector<400x8xf32>,
    return
  }
  func.func @transform_0(%arg0: i32) -> (i32, i32) {
    %c0_i32 = arith.constant 0 : i32
    %c0_i32_0 = arith.constant 0 : i32
    return %arg0, %c0_i32 : i32, i32
  }
  func.func @transform_1(%arg0: i32) -> (i32, i32) {
    %c0_i32 = arith.constant 0 : i32
    %c0_i32_0 = arith.constant 0 : i32
    %c0_i32_1 = arith.constant 0 : i32
    return %c0_i32, %c0_i32_0 : i32, i32
  }
  func.func @transform_2(%arg0: i32) -> (i32, i32) {
    %c0_i32 = arith.constant 0 : i32
    %c0_i32_0 = arith.constant 0 : i32
    %c0_i32_1 = arith.constant 0 : i32
    return %c0_i32, %c0_i32_0 : i32, i32
  }
  func.func @transform_3(%arg0: i32) -> (i32, i32) {
    %c0_i32 = arith.constant 0 : i32
    %c0_i32_0 = arith.constant 0 : i32
    return %arg0, %c0_i32 : i32, i32
  }
}

module attributes {stable_mosaic.version = 11 : i64} {
  func.func @kernel(%arg0: i32, %arg1: memref<400x144xbf16, #tpu.memory_space<vmem>>, %arg2: memref<144x8xbf16, #tpu.memory_space<vmem>>, %arg3: memref<1x8xf32, #tpu.memory_space<vmem>>, %arg4: memref<400x8xf32, #tpu.memory_space<vmem>>, %arg5: memref<400x8xf32, #tpu.memory_space<vmem>>) attributes {dimension_semantics = [#tpu.dimension_semantics<parallel>], iteration_bounds = array<i64: 1>, scalar_prefetch = 0 : i64, scratch_operands = 0 : i64, tpu.core_type = #tpu.core_type<tc>, window_params = [{transform_indices = @transform_0, window_bounds = array<i64: 400, 144>}, {pipeline_mode = #tpu.pipeline_mode<synchronous>, transform_indices = @transform_1, window_bounds = array<i64: 144, 8>}, {pipeline_mode = #tpu.pipeline_mode<synchronous>, transform_indices = @transform_2, window_bounds = array<i64: 1, 8>}, {transform_indices = @transform_3, window_bounds = array<i64: 400, 8>}, {transform_indices = @transform_4, window_bounds = array<i64: 400, 8>}]} {
    %c0 = arith.constant 0 : index
    %c0_0 = arith.constant 0 : index
    %0 = vector.load %arg1[%c0, %c0_0] : memref<400x144xbf16, #tpu.memory_space<vmem>>, vector<400x144xbf16>
    %c0_1 = arith.constant 0 : index
    %c0_2 = arith.constant 0 : index
    %1 = vector.load %arg2[%c0_1, %c0_2] : memref<144x8xbf16, #tpu.memory_space<vmem>>, vector<144x8xbf16>
    %cst = arith.constant dense<0.000000e+00> : vector<400x8xf32>
    %2 = tpu.matmul %0, %1, %cst {dimension_numbers = #tpu.dot_dimension_numbers<[1], [0], [0], [1], [0, 0, 1, 1], [], []>} : vector<400x144xbf16>, vector<144x8xbf16>, vector<400x8xf32> -> vector<400x8xf32>
    %c0_3 = arith.constant 0 : index
    %c0_4 = arith.constant 0 : index
    %3 = vector.load %arg3[%c0_3, %c0_4] : memref<1x8xf32, #tpu.memory_space<vmem>>, vector<1x8xf32>
    %4 = vector.broadcast %3 : vector<1x8xf32> to vector<400x8xf32>
    %5 = arith.addf %2, %4 : vector<400x8xf32>
    %c0_5 = arith.constant 0 : index
    %c0_6 = arith.constant 0 : index
    %6 = vector.load %arg4[%c0_5, %c0_6] : memref<400x8xf32, #tpu.memory_space<vmem>>, vector<400x8xf32>
    %7 = arith.addf %5, %6 : vector<400x8xf32>
    %c0_7 = arith.constant 0 : index
    %c0_8 = arith.constant 0 : index
    %8 = vector.load %arg5[%c0_7, %c0_8] : memref<400x8xf32, #tpu.memory_space<vmem>>, vector<400x8xf32>
    tpu.vector_store %arg5[%c0_7, %c0_8], %7 {strides = array<i32>} : memref<400x8xf32, #tpu.memory_space<vmem>>, vector<400x8xf32>,
    return
  }
  func.func @transform_0(%arg0: i32) -> (i32, i32) {
    %c0_i32 = arith.constant 0 : i32
    %c0_i32_0 = arith.constant 0 : i32
    return %arg0, %c0_i32 : i32, i32
  }
  func.func @transform_1(%arg0: i32) -> (i32, i32) {
    %c0_i32 = arith.constant 0 : i32
    %c0_i32_0 = arith.constant 0 : i32
    %c0_i32_1 = arith.constant 0 : i32
    return %c0_i32, %c0_i32_0 : i32, i32
  }
  func.func @transform_2(%arg0: i32) -> (i32, i32) {
    %c0_i32 = arith.constant 0 : i32
    %c0_i32_0 = arith.constant 0 : i32
    %c0_i32_1 = arith.constant 0 : i32
    return %c0_i32, %c0_i32_0 : i32, i32
  }
  func.func @transform_3(%arg0: i32) -> (i32, i32) {
    %c0_i32 = arith.constant 0 : i32
    %c0_i32_0 = arith.constant 0 : i32
    return %arg0, %c0_i32 : i32, i32
  }
  func.func @transform_4(%arg0: i32) -> (i32, i32) {
    %c0_i32 = arith.constant 0 : i32
    %c0_i32_0 = arith.constant 0 : i32
    return %arg0, %c0_i32 : i32, i32
  }
}

module attributes {stable_mosaic.version = 11 : i64} {
  func.func @kernel(%arg0: i32, %arg1: memref<400x72xbf16, #tpu.memory_space<vmem>>, %arg2: memref<72x8xbf16, #tpu.memory_space<vmem>>, %arg3: memref<1x8xf32, #tpu.memory_space<vmem>>, %arg4: memref<400x8xf32, #tpu.memory_space<vmem>>) attributes {dimension_semantics = [#tpu.dimension_semantics<parallel>], iteration_bounds = array<i64: 1>, scalar_prefetch = 0 : i64, scratch_operands = 0 : i64, tpu.core_type = #tpu.core_type<tc>, window_params = [{transform_indices = @transform_0, window_bounds = array<i64: 400, 72>}, {pipeline_mode = #tpu.pipeline_mode<synchronous>, transform_indices = @transform_1, window_bounds = array<i64: 72, 8>}, {pipeline_mode = #tpu.pipeline_mode<synchronous>, transform_indices = @transform_2, window_bounds = array<i64: 1, 8>}, {transform_indices = @transform_3, window_bounds = array<i64: 400, 8>}]} {
    %c0 = arith.constant 0 : index
    %c0_0 = arith.constant 0 : index
    %0 = vector.load %arg1[%c0, %c0_0] : memref<400x72xbf16, #tpu.memory_space<vmem>>, vector<400x72xbf16>
    %c0_1 = arith.constant 0 : index
    %c0_2 = arith.constant 0 : index
    %1 = vector.load %arg2[%c0_1, %c0_2] : memref<72x8xbf16, #tpu.memory_space<vmem>>, vector<72x8xbf16>
    %cst = arith.constant dense<0.000000e+00> : vector<400x8xf32>
    %2 = tpu.matmul %0, %1, %cst {dimension_numbers = #tpu.dot_dimension_numbers<[1], [0], [0], [1], [0, 0, 1, 1], [], []>} : vector<400x72xbf16>, vector<72x8xbf16>, vector<400x8xf32> -> vector<400x8xf32>
    %c0_3 = arith.constant 0 : index
    %c0_4 = arith.constant 0 : index
    %3 = vector.load %arg3[%c0_3, %c0_4] : memref<1x8xf32, #tpu.memory_space<vmem>>, vector<1x8xf32>
    %4 = vector.broadcast %3 : vector<1x8xf32> to vector<400x8xf32>
    %5 = arith.addf %2, %4 : vector<400x8xf32>
    %cst_5 = arith.constant 0.000000e+00 : f32
    %6 = vector.broadcast %cst_5 : f32 to vector<400x8xf32>
    %7 = arith.maximumf %5, %6 : vector<400x8xf32>
    %c0_6 = arith.constant 0 : index
    %c0_7 = arith.constant 0 : index
    %8 = vector.load %arg4[%c0_6, %c0_7] : memref<400x8xf32, #tpu.memory_space<vmem>>, vector<400x8xf32>
    tpu.vector_store %arg4[%c0_6, %c0_7], %7 {strides = array<i32>} : memref<400x8xf32, #tpu.memory_space<vmem>>, vector<400x8xf32>,
    return
  }
  func.func @transform_0(%arg0: i32) -> (i32, i32) {
    %c0_i32 = arith.constant 0 : i32
    %c0_i32_0 = arith.constant 0 : i32
    return %arg0, %c0_i32 : i32, i32
  }
  func.func @transform_1(%arg0: i32) -> (i32, i32) {
    %c0_i32 = arith.constant 0 : i32
    %c0_i32_0 = arith.constant 0 : i32
    %c0_i32_1 = arith.constant 0 : i32
    return %c0_i32, %c0_i32_0 : i32, i32
  }
  func.func @transform_2(%arg0: i32) -> (i32, i32) {
    %c0_i32 = arith.constant 0 : i32
    %c0_i32_0 = arith.constant 0 : i32
    %c0_i32_1 = arith.constant 0 : i32
    return %c0_i32, %c0_i32_0 : i32, i32
  }
  func.func @transform_3(%arg0: i32) -> (i32, i32) {
    %c0_i32 = arith.constant 0 : i32
    %c0_i32_0 = arith.constant 0 : i32
    return %arg0, %c0_i32 : i32, i32
  }
}

module attributes {stable_mosaic.version = 11 : i64} {
  func.func @kernel(%arg0: i32, %arg1: memref<400x72xbf16, #tpu.memory_space<vmem>>, %arg2: memref<72x8xbf16, #tpu.memory_space<vmem>>, %arg3: memref<1x8xf32, #tpu.memory_space<vmem>>, %arg4: memref<400x8xf32, #tpu.memory_space<vmem>>, %arg5: memref<400x8xf32, #tpu.memory_space<vmem>>) attributes {dimension_semantics = [#tpu.dimension_semantics<parallel>], iteration_bounds = array<i64: 1>, scalar_prefetch = 0 : i64, scratch_operands = 0 : i64, tpu.core_type = #tpu.core_type<tc>, window_params = [{transform_indices = @transform_0, window_bounds = array<i64: 400, 72>}, {pipeline_mode = #tpu.pipeline_mode<synchronous>, transform_indices = @transform_1, window_bounds = array<i64: 72, 8>}, {pipeline_mode = #tpu.pipeline_mode<synchronous>, transform_indices = @transform_2, window_bounds = array<i64: 1, 8>}, {transform_indices = @transform_3, window_bounds = array<i64: 400, 8>}, {transform_indices = @transform_4, window_bounds = array<i64: 400, 8>}]} {
    %c0 = arith.constant 0 : index
    %c0_0 = arith.constant 0 : index
    %0 = vector.load %arg1[%c0, %c0_0] : memref<400x72xbf16, #tpu.memory_space<vmem>>, vector<400x72xbf16>
    %c0_1 = arith.constant 0 : index
    %c0_2 = arith.constant 0 : index
    %1 = vector.load %arg2[%c0_1, %c0_2] : memref<72x8xbf16, #tpu.memory_space<vmem>>, vector<72x8xbf16>
    %cst = arith.constant dense<0.000000e+00> : vector<400x8xf32>
    %2 = tpu.matmul %0, %1, %cst {dimension_numbers = #tpu.dot_dimension_numbers<[1], [0], [0], [1], [0, 0, 1, 1], [], []>} : vector<400x72xbf16>, vector<72x8xbf16>, vector<400x8xf32> -> vector<400x8xf32>
    %c0_3 = arith.constant 0 : index
    %c0_4 = arith.constant 0 : index
    %3 = vector.load %arg3[%c0_3, %c0_4] : memref<1x8xf32, #tpu.memory_space<vmem>>, vector<1x8xf32>
    %4 = vector.broadcast %3 : vector<1x8xf32> to vector<400x8xf32>
    %5 = arith.addf %2, %4 : vector<400x8xf32>
    %c0_5 = arith.constant 0 : index
    %c0_6 = arith.constant 0 : index
    %6 = vector.load %arg4[%c0_5, %c0_6] : memref<400x8xf32, #tpu.memory_space<vmem>>, vector<400x8xf32>
    %7 = arith.addf %5, %6 : vector<400x8xf32>
    %c0_7 = arith.constant 0 : index
    %c0_8 = arith.constant 0 : index
    %8 = vector.load %arg5[%c0_7, %c0_8] : memref<400x8xf32, #tpu.memory_space<vmem>>, vector<400x8xf32>
    tpu.vector_store %arg5[%c0_7, %c0_8], %7 {strides = array<i32>} : memref<400x8xf32, #tpu.memory_space<vmem>>, vector<400x8xf32>,
    return
  }
  func.func @transform_0(%arg0: i32) -> (i32, i32) {
    %c0_i32 = arith.constant 0 : i32
    %c0_i32_0 = arith.constant 0 : i32
    return %arg0, %c0_i32 : i32, i32
  }
  func.func @transform_1(%arg0: i32) -> (i32, i32) {
    %c0_i32 = arith.constant 0 : i32
    %c0_i32_0 = arith.constant 0 : i32
    %c0_i32_1 = arith.constant 0 : i32
    return %c0_i32, %c0_i32_0 : i32, i32
  }
  func.func @transform_2(%arg0: i32) -> (i32, i32) {
    %c0_i32 = arith.constant 0 : i32
    %c0_i32_0 = arith.constant 0 : i32
    %c0_i32_1 = arith.constant 0 : i32
    return %c0_i32, %c0_i32_0 : i32, i32
  }
  func.func @transform_3(%arg0: i32) -> (i32, i32) {
    %c0_i32 = arith.constant 0 : i32
    %c0_i32_0 = arith.constant 0 : i32
    return %arg0, %c0_i32 : i32, i32
  }
  func.func @transform_4(%arg0: i32) -> (i32, i32) {
    %c0_i32 = arith.constant 0 : i32
    %c0_i32_0 = arith.constant 0 : i32
    return %arg0, %c0_i32 : i32, i32
  }
}

module attributes {stable_mosaic.version = 11 : i64} {
  func.func @kernel(%arg0: i32, %arg1: memref<400x72xbf16, #tpu.memory_space<vmem>>, %arg2: memref<72x4xbf16, #tpu.memory_space<vmem>>, %arg3: memref<1x4xf32, #tpu.memory_space<vmem>>, %arg4: memref<400x4xf32, #tpu.memory_space<vmem>>) attributes {dimension_semantics = [#tpu.dimension_semantics<parallel>], iteration_bounds = array<i64: 4>, scalar_prefetch = 0 : i64, scratch_operands = 0 : i64, tpu.core_type = #tpu.core_type<tc>, window_params = [{transform_indices = @transform_0, window_bounds = array<i64: 400, 72>}, {pipeline_mode = #tpu.pipeline_mode<synchronous>, transform_indices = @transform_1, window_bounds = array<i64: 72, 4>}, {pipeline_mode = #tpu.pipeline_mode<synchronous>, transform_indices = @transform_2, window_bounds = array<i64: 1, 4>}, {transform_indices = @transform_3, window_bounds = array<i64: 400, 4>}]} {
    %c0 = arith.constant 0 : index
    %c0_0 = arith.constant 0 : index
    %0 = vector.load %arg1[%c0, %c0_0] : memref<400x72xbf16, #tpu.memory_space<vmem>>, vector<400x72xbf16>
    %c0_1 = arith.constant 0 : index
    %c0_2 = arith.constant 0 : index
    %1 = vector.load %arg2[%c0_1, %c0_2] : memref<72x4xbf16, #tpu.memory_space<vmem>>, vector<72x4xbf16>
    %cst = arith.constant dense<0.000000e+00> : vector<400x4xf32>
    %2 = tpu.matmul %0, %1, %cst {dimension_numbers = #tpu.dot_dimension_numbers<[1], [0], [0], [1], [0, 0, 1, 1], [], []>} : vector<400x72xbf16>, vector<72x4xbf16>, vector<400x4xf32> -> vector<400x4xf32>
    %c0_3 = arith.constant 0 : index
    %c0_4 = arith.constant 0 : index
    %3 = vector.load %arg3[%c0_3, %c0_4] : memref<1x4xf32, #tpu.memory_space<vmem>>, vector<1x4xf32>
    %4 = vector.broadcast %3 : vector<1x4xf32> to vector<400x4xf32>
    %5 = arith.addf %2, %4 : vector<400x4xf32>
    %c0_5 = arith.constant 0 : index
    %c0_6 = arith.constant 0 : index
    %6 = vector.load %arg4[%c0_5, %c0_6] : memref<400x4xf32, #tpu.memory_space<vmem>>, vector<400x4xf32>
    tpu.vector_store %arg4[%c0_5, %c0_6], %5 {strides = array<i32>} : memref<400x4xf32, #tpu.memory_space<vmem>>, vector<400x4xf32>,
    return
  }
  func.func @transform_0(%arg0: i32) -> (i32, i32) {
    %c0_i32 = arith.constant 0 : i32
    %c0_i32_0 = arith.constant 0 : i32
    return %arg0, %c0_i32 : i32, i32
  }
  func.func @transform_1(%arg0: i32) -> (i32, i32) {
    %c0_i32 = arith.constant 0 : i32
    %c0_i32_0 = arith.constant 0 : i32
    %c0_i32_1 = arith.constant 0 : i32
    return %c0_i32, %c0_i32_0 : i32, i32
  }
  func.func @transform_2(%arg0: i32) -> (i32, i32) {
    %c0_i32 = arith.constant 0 : i32
    %c0_i32_0 = arith.constant 0 : i32
    %c0_i32_1 = arith.constant 0 : i32
    return %c0_i32, %c0_i32_0 : i32, i32
  }
  func.func @transform_3(%arg0: i32) -> (i32, i32) {
    %c0_i32 = arith.constant 0 : i32
    %c0_i32_0 = arith.constant 0 : i32
    return %arg0, %c0_i32 : i32, i32
  }
}

module attributes {stable_mosaic.version = 11 : i64} {
  func.func @kernel(%arg0: i32, %arg1: memref<400x72xbf16, #tpu.memory_space<vmem>>, %arg2: memref<72x4xbf16, #tpu.memory_space<vmem>>, %arg3: memref<1x4xf32, #tpu.memory_space<vmem>>, %arg4: memref<400x4xf32, #tpu.memory_space<vmem>>, %arg5: memref<1x4xf32, #tpu.memory_space<vmem>>, %arg6: memref<1x1xf32, #tpu.memory_space<vmem>>, %arg7: memref<400x1xf32, #tpu.memory_space<vmem>>) attributes {dimension_semantics = [#tpu.dimension_semantics<parallel>], iteration_bounds = array<i64: 4>, scalar_prefetch = 0 : i64, scratch_operands = 0 : i64, tpu.core_type = #tpu.core_type<tc>, window_params = [{transform_indices = @transform_0, window_bounds = array<i64: 400, 72>}, {pipeline_mode = #tpu.pipeline_mode<synchronous>, transform_indices = @transform_1, window_bounds = array<i64: 72, 4>}, {pipeline_mode = #tpu.pipeline_mode<synchronous>, transform_indices = @transform_2, window_bounds = array<i64: 1, 4>}, {transform_indices = @transform_3, window_bounds = array<i64: 400, 4>}, {pipeline_mode = #tpu.pipeline_mode<synchronous>, transform_indices = @transform_4, window_bounds = array<i64: 1, 4>}, {pipeline_mode = #tpu.pipeline_mode<synchronous>, transform_indices = @transform_5, window_bounds = array<i64: 1, 1>}, {transform_indices = @transform_6, window_bounds = array<i64: 400, 1>}]} {
    %c0 = arith.constant 0 : index
    %c0_0 = arith.constant 0 : index
    %0 = vector.load %arg1[%c0, %c0_0] : memref<400x72xbf16, #tpu.memory_space<vmem>>, vector<400x72xbf16>
    %c0_1 = arith.constant 0 : index
    %c0_2 = arith.constant 0 : index
    %1 = vector.load %arg2[%c0_1, %c0_2] : memref<72x4xbf16, #tpu.memory_space<vmem>>, vector<72x4xbf16>
    %cst = arith.constant dense<0.000000e+00> : vector<400x4xf32>
    %2 = tpu.matmul %0, %1, %cst {dimension_numbers = #tpu.dot_dimension_numbers<[1], [0], [0], [1], [0, 0, 1, 1], [], []>} : vector<400x72xbf16>, vector<72x4xbf16>, vector<400x4xf32> -> vector<400x4xf32>
    %c0_3 = arith.constant 0 : index
    %c0_4 = arith.constant 0 : index
    %3 = vector.load %arg3[%c0_3, %c0_4] : memref<1x4xf32, #tpu.memory_space<vmem>>, vector<1x4xf32>
    %4 = vector.broadcast %3 : vector<1x4xf32> to vector<400x4xf32>
    %5 = arith.addf %2, %4 : vector<400x4xf32>
    %c0_5 = arith.constant 0 : index
    %c0_6 = arith.constant 0 : index
    %6 = vector.load %arg4[%c0_5, %c0_6] : memref<400x4xf32, #tpu.memory_space<vmem>>, vector<400x4xf32>
    %7 = arith.addf %5, %6 : vector<400x4xf32>
    %cst_7 = arith.constant 0.000000e+00 : f32
    %8 = vector.broadcast %cst_7 : f32 to vector<400x4xf32>
    %9 = arith.maximumf %7, %8 : vector<400x4xf32>
    %c0_8 = arith.constant 0 : index
    %c0_9 = arith.constant 0 : index
    %10 = vector.load %arg5[%c0_8, %c0_9] : memref<1x4xf32, #tpu.memory_space<vmem>>, vector<1x4xf32>
    %11 = vector.broadcast %10 : vector<1x4xf32> to vector<400x4xf32>
    %12 = arith.mulf %9, %11 : vector<400x4xf32>
    %cst_10 = arith.constant dense<0.000000e+00> : vector<400xf32>
    %13 = vector.multi_reduction <add>, %12, %cst_10 [1] : vector<400x4xf32> to vector<400xf32>
    %14 = vector.shape_cast %13 : vector<400xf32> to vector<400x1xf32>
    %c0_11 = arith.constant 0 : index
    %c0_12 = arith.constant 0 : index
    %15 = vector.load %arg6[%c0_11, %c0_12] : memref<1x1xf32, #tpu.memory_space<vmem>>, vector<1x1xf32>
    %16 = vector.broadcast %15 : vector<1x1xf32> to vector<400x1xf32>
    %17 = arith.addf %14, %16 : vector<400x1xf32>
    %c0_13 = arith.constant 0 : index
    %c0_14 = arith.constant 0 : index
    %18 = vector.load %arg7[%c0_13, %c0_14] : memref<400x1xf32, #tpu.memory_space<vmem>>, vector<400x1xf32>
    tpu.vector_store %arg7[%c0_13, %c0_14], %17 {strides = array<i32>} : memref<400x1xf32, #tpu.memory_space<vmem>>, vector<400x1xf32>,
    return
  }
  func.func @transform_0(%arg0: i32) -> (i32, i32) {
    %c0_i32 = arith.constant 0 : i32
    %c0_i32_0 = arith.constant 0 : i32
    return %arg0, %c0_i32 : i32, i32
  }
  func.func @transform_1(%arg0: i32) -> (i32, i32) {
    %c0_i32 = arith.constant 0 : i32
    %c0_i32_0 = arith.constant 0 : i32
    %c0_i32_1 = arith.constant 0 : i32
    return %c0_i32, %c0_i32_0 : i32, i32
  }
  func.func @transform_2(%arg0: i32) -> (i32, i32) {
    %c0_i32 = arith.constant 0 : i32
    %c0_i32_0 = arith.constant 0 : i32
    %c0_i32_1 = arith.constant 0 : i32
    return %c0_i32, %c0_i32_0 : i32, i32
  }
  func.func @transform_3(%arg0: i32) -> (i32, i32) {
    %c0_i32 = arith.constant 0 : i32
    %c0_i32_0 = arith.constant 0 : i32
    return %arg0, %c0_i32 : i32, i32
  }
  func.func @transform_4(%arg0: i32) -> (i32, i32) {
    %c0_i32 = arith.constant 0 : i32
    %c0_i32_0 = arith.constant 0 : i32
    %c0_i32_1 = arith.constant 0 : i32
    return %c0_i32, %c0_i32_0 : i32, i32
  }
  func.func @transform_5(%arg0: i32) -> (i32, i32) {
    %c0_i32 = arith.constant 0 : i32
    %c0_i32_0 = arith.constant 0 : i32
    %c0_i32_1 = arith.constant 0 : i32
    return %c0_i32, %c0_i32_0 : i32, i32
  }
  func.func @transform_6(%arg0: i32) -> (i32, i32) {
    %c0_i32 = arith.constant 0 : i32
    %c0_i32_0 = arith.constant 0 : i32
    return %arg0, %c0_i32 : i32, i32
  }
}

</mosaic_0001>

<bundles_post_ra>
// kernel: _lambda_.16
= control target key start
LH: loop header
LB: loop body
LE: loop exit
PB: predicated region body
PF: predicated region fallthrough
CT: control target
= control target key end

     0   :  { %vm60_vm0 = vcmask 1043456   ;;  %v186_v2 = vmov 0   ;;  %vm56_vm1 = vcmask 64512   ;;  %v21_v10 = vlaneseq  ;;  %s243_s1 = inlined_call_operand.vmem [shape: bf16[8,512], index: 1, kind: input, shape index: {}]   ;;  %s244_s0 = inlined_call_operand.vmem [shape: bf16[16,8], index: 0, kind: input, shape index: {}]   ;;  %s245_s2 = inlined_call_operand.vmem [shape: f32[1,512], index: 2, kind: input, shape index: {}]   ;;  %s246_s3 = inlined_call_operand.vmem [shape: f32[16,512], index: 3, kind: output, shape index: {}]  }
   0x1   :  { %v17_v0 = vld [vmem:[%s243_s1] sm:$0xff]  ;;  %v18_v1 = vld [vmem:[%s243_s1 + $0x8] sm:$0xff]  ;;  %105 = vmatprep.mubr.bf16.mxu0 %v186_v2  ;;  %148 = vmatprep.mubr.bf16.mxu1 %v186_v2 }
   0x2   :  { %v173_v3 = vcombine.high %v17_v0, %v17_v0  ;;  %v175_v4 = vcombine.high %v18_v1, %v18_v1  ;;  %v172_v5 = vcombine.low %v17_v0, %v17_v0  ;;  %v174_v6 = vcombine.low %v18_v1, %v18_v1  ;;  %v185_v9 = vld [vmem:[%s244_s0] sm:$0xff]  }
   0x3   :  { %v22_v11 = vshrl.u32 %v21_v10, 7  ;;  %v19_v14 = vld [vmem:[%s245_s2] sm:$0xf] }
   0x4   :  { %176 = vmatprep.subr.msk.bf16.mxu0 %vm60_vm0, %v173_v3  ;;  %178 = vmatprep.subr.msk.bf16.mxu1 %vm60_vm0, %v175_v4  ;;  %v62_v7 = vsel %vm60_vm0, %v172_v5, 0  ;;  %v68_v8 = vsel %vm60_vm0, %v174_v6, 0 }
   0x5   :  { %74 = vmatpush1.bf16.msra.mxu0 %v62_v7  ;;  %117 = vmatpush1.bf16.msra.mxu1 %v68_v8  ;;  %v23_v12 = vsub.s32 0, %v22_v11  ;;  %v31_v13 = vsub.s32 2, %v22_v11  ;;  %v27_v15 = vsub.s32 1, %v22_v11  ;;  %v35_v16 = vsub.s32 3, %v22_v11 }
   0x7   :  { %v24_v17 = vrot.slane %v19_v14, %v23_v12  ;;  %v32_v18 = vrot.slane %v19_v14, %v31_v13  ;;  %v28_v19 = vrot.slane %v19_v14, %v27_v15  ;;  %v36_v20 = vrot.slane %v19_v14, %v35_v16 }
   0x8   :  { %177 = vmatmul.mubr.msk.bf16.vlgmr.msra.gmra.mrb[0].mxu0 %vm56_vm1, %v185_v9  ;;  %179 = vmatmul.mubr.msk.bf16.vlgmr.msra.gmra.mrb[0].mxu1 %vm56_vm1, %v185_v9 }
  0xdb   :  { %v107_v21 = vpop.f32.mrb[0].mxu0  ;;  %v150_v22 = vpop.f32.mrb[0].mxu1 }
  0xdc   :  { %v108_v23 = vadd.f32 %v107_v21, %v24_v17  ;;  %v151_v24 = vadd.f32 %v150_v22, %v32_v18  ;;  %v109_v25 = vpop.f32.mrb[1].mxu0  ;;  %v152_v26 = vpop.f32.mrb[1].mxu1 }
  0xdd   :  { %v110_v27 = vadd.f32 %v109_v25, %v28_v19  ;;  %v153_v28 = vadd.f32 %v152_v26, %v36_v20  ;;  %v111_v29 = vpop.f32.mrb[2].mxu0  ;;  %v154_v30 = vpop.f32.mrb[2].mxu1 }
  0xde   :  { %159 = vst [vmem:[%s246_s3] sm:$0xff] %v108_v23  ;;  %161 = vst [vmem:[%s246_s3 + $0x10] sm:$0xff] %v151_v24  ;;  %v112_v31 = vadd.f32 %v111_v29, %v24_v17  ;;  %v155_v32 = vadd.f32 %v154_v30, %v32_v18  ;;  %v113_v33 = vpop.f32.mrb[3].mxu0  ;;  %v156_v34 = vpop.f32.mrb[3].mxu1 }
  0xdf   :  { %160 = vst [vmem:[%s246_s3 + $0x8] sm:$0xff] %v110_v27  ;;  %162 = vst [vmem:[%s246_s3 + $0x18] sm:$0xff] %v153_v28  ;;  %v114_v35 = vadd.f32 %v113_v33, %v28_v19  ;;  %v157_v36 = vadd.f32 %v156_v34, %v36_v20 }
  0xe0   :  { %163 = vst [vmem:[%s246_s3 + $0x20] sm:$0xff] %v112_v31  ;;  %165 = vst [vmem:[%s246_s3 + $0x30] sm:$0xff] %v155_v32 }
  0xe1   :  { %164 = vst [vmem:[%s246_s3 + $0x28] sm:$0xff] %v114_v35  ;;  %166 = vst [vmem:[%s246_s3 + $0x38] sm:$0xff] %v157_v36 }

// kernel: _lambda_.17
= control target key start
LH: loop header
LB: loop body
LE: loop exit
PB: predicated region body
PF: predicated region fallthrough
CT: control target
= control target key end

     0   :  { %vm204_vm0 = vcmask 261120   ;;  %s527_s1 = inlined_call_operand.vmem [shape: bf16[288,32], index: 1, kind: input, shape index: {}]   ;;  %s528_s0 = inlined_call_operand.vmem [shape: bf16[32,288], index: 0, kind: input, shape index: {}]   ;;  %s529_s2 = inlined_call_operand.vmem [shape: f32[1,32], index: 2, kind: input, shape index: {}]   ;;  %s530_s3 = inlined_call_operand.vmem [shape: f32[32,32], index: 3, kind: output, shape index: {}]  }
   0x1   :  { %v388_v0 = vld [vmem:[%s527_s1 + $0x40] sm:$0xff]   ;;  %v390_v2 = vld [vmem:[%s527_s1 + $0x48] sm:$0xff]   ;;  %v392_v4 = vld [vmem:[%s527_s1 + $0x50] sm:$0xff]  }
   0x2   :  { %v389_v1 = vld [vmem:[%s527_s1] sm:$0xff]   ;;  %348 = vmatprep.subr.bf16.mxu0 %v388_v0  ;;  %v391_v3 = vld [vmem:[%s527_s1 + $0x8] sm:$0xff]   ;;  %v393_v5 = vld [vmem:[%s527_s1 + $0x10] sm:$0xff]  }
   0x3   :  { %349 = vmatpush3.bf16.msra.mxu0 %v389_v1  ;;  %v394_v6 = vld [vmem:[%s527_s1 + $0x58] sm:$0xff]   ;;  %v396_v8 = vld [vmem:[%s527_s1 + $0x60] sm:$0xff]   ;;  %v398_v11 = vld [vmem:[%s527_s1 + $0x68] sm:$0xff]  }
   0x4   :  { %350 = vmatprep.subr.bf16.mxu0 %v390_v2  ;;  %v395_v7 = vld [vmem:[%s527_s1 + $0x18] sm:$0xff]   ;;  %v397_v9 = vld [vmem:[%s527_s1 + $0x20] sm:$0xff]   ;;  %v399_v12 = vld [vmem:[%s527_s1 + $0x28] sm:$0xff]  }
   0x5   :  { %v403_v10 = vld [vmem:[%s527_s1 + $0x80] sm:$0xff]   ;;  %v400_v13 = vld [vmem:[%s527_s1 + $0x70] sm:$0xff]   ;;  %v408_v15 = vld [vmem:[%s527_s1 + $0x88] sm:$0xff]  }
   0x6   :  { %380 = vmatprep.subr.bf16.mxu1 %v403_v10  ;;  %v407_v14 = vld [vmem:[%s528_s0 + $0x4] ss:$12 sps:$4 sm:$0xff]   ;;  %v409_v16 = vld [vmem:[%s528_s0 + $0x8] ss:$12 sps:$4 sm:$0xff]   ;;  %v410_v17 = vld [vmem:[%s528_s0 + $0x20] ss:$12 sps:$4 sm:$0xff]  }
   0x7   :  { %351 = vmatpush3.bf16.msra.mxu0 %v391_v3  ;;  %381 = vmatpush3.bf16.msra.mxu1 %v403_v10  ;;  %v401_v18 = vld [vmem:[%s527_s1 + $0x30] sm:$0xff]   ;;  %v402_v19 = vld [vmem:[%s527_s1 + $0x78] sm:$0xff]   ;;  %v405_v21 = vld [vmem:[%s528_s0] ss:$12 sps:$4 sm:$0xff]  }
   0x8   :  { %352 = vmatprep.subr.bf16.mxu0 %v392_v4  ;;  %243 = vmatprep.mubr.bf16.mxu0 %v407_v14  ;;  %v404_v20 = vld [vmem:[%s527_s1 + $0x38] sm:$0xff]   ;;  %v321_v30 = vld [vmem:[%s529_s2] ss:$0 sm:$0xff] }
   0x9   :  { %382 = vmatprep.subr.bf16.mxu1 %v408_v15  ;;  %384 = vmatprep.mubr.msk.bf16.mxu1 %vm204_vm0, %v409_v16  ;;  %v411_v22 = vld [vmem:[%s528_s0 + $0x1c] ss:$12 sps:$4 sm:$0xff]   ;;  %v413_v23 = vld [vmem:[%s528_s0 + $0x18] ss:$12 sps:$4 sm:$0xff]  }
   0xb   :  { %353 = vmatpush3.bf16.msra.mxu0 %v393_v5  ;;  %383 = vmatpush3.bf16.msra.mxu1 %v408_v15 }
   0xc   :  { %354 = vmatprep.subr.bf16.mxu0 %v394_v6 }
   0xe   :  { %385 = vmatmul.mubr.msk.bf16.vlgmr.msra.gmra.mrb[0].mxu1 %vm204_vm0, %v410_v17 }
   0xf   :  { %355 = vmatpush3.bf16.msra.mxu0 %v395_v7 }
  0x10   :  { %356 = vmatprep.subr.bf16.mxu0 %v396_v8 }
  0x13   :  { %357 = vmatpush3.bf16.msra.mxu0 %v397_v9 }
  0x14   :  { %358 = vmatprep.subr.bf16.mxu0 %v398_v11 }
  0x17   :  { %359 = vmatpush3.bf16.msra.mxu0 %v399_v12 }
  0x18   :  { %360 = vmatprep.subr.bf16.mxu0 %v400_v13 }
  0x1b   :  { %361 = vmatpush3.bf16.msra.mxu0 %v401_v18 }
  0x1c   :  { %362 = vmatprep.subr.bf16.mxu0 %v402_v19 }
  0x1f   :  { %363 = vmatpush3.bf16.msra.mxu0 %v404_v20 }
  0x22   :  { %244 = vmatmul.mubr.bf16.vlgmr.msra.gmra.mrb[0].mxu0 %v405_v21 }
  0x23   :  { %251 = vmatprep.mubr.bf16.mxu0 %v411_v22 }
  0x2a   :  { %252 = vmatmul.mubr.bf16.gmra.mrb[4].mxu0 %v413_v23 }
  0xe1   :  { %v386_v24 = vpop.f32.mrb[0].mxu1 }
  0xe2   :  { %v294_v25 = vpop.f32.mrb[1].mxu1 }
  0xe3   :  { %v387_v26 = vpop.f32.mrb[2].mxu1 }
  0xe4   :  { %v297_v27 = vpop.f32.mrb[3].mxu1 }
  0xf5   :  { %v364_v28 = vpop.f32.mrb[0].mxu0 }
  0xf6   :  { %v365_v29 = vpop.f32.mrb[1].mxu0 }
  0xf7   :  { %v366_v31 = vadd.f32 %v365_v29, %v364_v28  ;;  %v367_v32 = vpop.f32.mrb[2].mxu0 }
  0xf8   :  { %v368_v33 = vpop.f32.mrb[3].mxu0 }
  0xf9   :  { %v369_v34 = vadd.f32 %v368_v33, %v367_v32  ;;  %v246_v35 = vadd.f32 %v366_v31, %v321_v30 }
  0xfb   :  { %v295_v36 = vadd.f32 %v294_v25, %v246_v35  ;;  %v249_v37 = vadd.f32 %v369_v34, %v321_v30 }
  0xfd   :  { %v309_v38 = vmax.f32 %v295_v36, 0.0  ;;  %v298_v39 = vadd.f32 %v297_v27, %v249_v37  ;;  %v370_v40 = vpop.f32.mrb[4].mxu0 }
  0xfe   :  { %v371_v41 = vpop.f32.mrb[5].mxu0 }
  0xff   :  { %313 = vst.msk [vmem:[%s530_s3] sm:$0xff] %vm204_vm0, %v309_v38  ;;  %v310_v42 = vmax.f32 %v298_v39, 0.0  ;;  %v372_v43 = vadd.f32 %v371_v41, %v370_v40  ;;  %v373_v44 = vpop.f32.mrb[6].mxu0 }
 0x100   :  { %v374_v45 = vpop.f32.mrb[7].mxu0 }
 0x101   :  { %314 = vst.msk [vmem:[%s530_s3 + $0x8] sm:$0xff] %vm204_vm0, %v310_v42  ;;  %v254_v46 = vadd.f32 %v372_v43, %v321_v30  ;;  %v375_v47 = vadd.f32 %v374_v45, %v373_v44 }
 0x103   :  { %v303_v48 = vadd.f32 %v386_v24, %v254_v46  ;;  %v257_v49 = vadd.f32 %v375_v47, %v321_v30 }
 0x105   :  { %v311_v50 = vmax.f32 %v303_v48, 0.0  ;;  %v306_v51 = vadd.f32 %v387_v26, %v257_v49 }
 0x107   :  { %315 = vst.msk [vmem:[%s530_s3 + $0x10] sm:$0xff] %vm204_vm0, %v311_v50  ;;  %v312_v52 = vmax.f32 %v306_v51, 0.0 }
 0x109   :  { %316 = vst.msk [vmem:[%s530_s3 + $0x18] sm:$0xff] %vm204_vm0, %v312_v52 }

// kernel: _lambda_.18
= control target key start
LH: loop header
LB: loop body
LE: loop exit
PB: predicated region body
PF: predicated region fallthrough
CT: control target
= control target key end

     0   :  { %vm207_vm0 = vcmask 261120   ;;  %s551_s1 = inlined_call_operand.vmem [shape: bf16[288,32], index: 1, kind: input, shape index: {}]   ;;  %s552_s0 = inlined_call_operand.vmem [shape: bf16[32,288], index: 0, kind: input, shape index: {}]   ;;  %s553_s2 = inlined_call_operand.vmem [shape: f32[1,32], index: 2, kind: input, shape index: {}]   ;;  %s554_s3 = inlined_call_operand.vmem [shape: f32[32,32], index: 3, kind: input, shape index: {}]   ;;  %s555_s4 = inlined_call_operand.vmem [shape: f32[32,32], index: 4, kind: output, shape index: {}]  }
   0x1   :  { %v395_v0 = vld [vmem:[%s551_s1 + $0x40] sm:$0xff]   ;;  %v397_v2 = vld [vmem:[%s551_s1 + $0x48] sm:$0xff]   ;;  %v399_v4 = vld [vmem:[%s551_s1 + $0x50] sm:$0xff]  }
   0x2   :  { %v396_v1 = vld [vmem:[%s551_s1] sm:$0xff]   ;;  %355 = vmatprep.subr.bf16.mxu0 %v395_v0  ;;  %v398_v3 = vld [vmem:[%s551_s1 + $0x8] sm:$0xff]   ;;  %v400_v5 = vld [vmem:[%s551_s1 + $0x10] sm:$0xff]  }
   0x3   :  { %356 = vmatpush3.bf16.msra.mxu0 %v396_v1  ;;  %v401_v6 = vld [vmem:[%s551_s1 + $0x58] sm:$0xff]   ;;  %v403_v8 = vld [vmem:[%s551_s1 + $0x60] sm:$0xff]   ;;  %v405_v11 = vld [vmem:[%s551_s1 + $0x68] sm:$0xff]  }
   0x4   :  { %357 = vmatprep.subr.bf16.mxu0 %v397_v2  ;;  %v402_v7 = vld [vmem:[%s551_s1 + $0x18] sm:$0xff]   ;;  %v404_v9 = vld [vmem:[%s551_s1 + $0x20] sm:$0xff]   ;;  %v406_v12 = vld [vmem:[%s551_s1 + $0x28] sm:$0xff]  }
   0x5   :  { %v410_v10 = vld [vmem:[%s551_s1 + $0x80] sm:$0xff]   ;;  %v407_v13 = vld [vmem:[%s551_s1 + $0x70] sm:$0xff]   ;;  %v415_v15 = vld [vmem:[%s551_s1 + $0x88] sm:$0xff]  }
   0x6   :  { %387 = vmatprep.subr.bf16.mxu1 %v410_v10  ;;  %v414_v14 = vld [vmem:[%s552_s0 + $0x4] ss:$12 sps:$4 sm:$0xff]   ;;  %v416_v16 = vld [vmem:[%s552_s0 + $0x8] ss:$12 sps:$4 sm:$0xff]   ;;  %v417_v17 = vld [vmem:[%s552_s0 + $0x20] ss:$12 sps:$4 sm:$0xff]  }
   0x7   :  { %358 = vmatpush3.bf16.msra.mxu0 %v398_v3  ;;  %388 = vmatpush3.bf16.msra.mxu1 %v410_v10  ;;  %v408_v18 = vld [vmem:[%s551_s1 + $0x30] sm:$0xff]   ;;  %v409_v19 = vld [vmem:[%s551_s1 + $0x78] sm:$0xff]   ;;  %v412_v21 = vld [vmem:[%s552_s0] ss:$12 sps:$4 sm:$0xff]  }
   0x8   :  { %359 = vmatprep.subr.bf16.mxu0 %v399_v4  ;;  %246 = vmatprep.mubr.bf16.mxu0 %v414_v14  ;;  %v411_v20 = vld [vmem:[%s551_s1 + $0x38] sm:$0xff]   ;;  %v328_v30 = vld [vmem:[%s553_s2] ss:$0 sm:$0xff]  ;;  %v313_v39 = vld [vmem:[%s554_s3 + $0x8] sm:$0xff] }
   0x9   :  { %389 = vmatprep.subr.bf16.mxu1 %v415_v15  ;;  %391 = vmatprep.mubr.msk.bf16.mxu1 %vm207_vm0, %v416_v16  ;;  %v418_v22 = vld [vmem:[%s552_s0 + $0x1c] ss:$12 sps:$4 sm:$0xff]   ;;  %v420_v23 = vld [vmem:[%s552_s0 + $0x18] ss:$12 sps:$4 sm:$0xff]   ;;  %v314_v50 = vld [vmem:[%s554_s3 + $0x10] sm:$0xff] }
   0xa   :  { %v312_v36 = vld [vmem:[%s554_s3] sm:$0xff]  ;;  %v315_v53 = vld [vmem:[%s554_s3 + $0x18] sm:$0xff] }
   0xb   :  { %360 = vmatpush3.bf16.msra.mxu0 %v400_v5  ;;  %390 = vmatpush3.bf16.msra.mxu1 %v415_v15 }
   0xc   :  { %361 = vmatprep.subr.bf16.mxu0 %v401_v6 }
   0xe   :  { %392 = vmatmul.mubr.msk.bf16.vlgmr.msra.gmra.mrb[0].mxu1 %vm207_vm0, %v417_v17 }
   0xf   :  { %362 = vmatpush3.bf16.msra.mxu0 %v402_v7 }
  0x10   :  { %363 = vmatprep.subr.bf16.mxu0 %v403_v8 }
  0x13   :  { %364 = vmatpush3.bf16.msra.mxu0 %v404_v9 }
  0x14   :  { %365 = vmatprep.subr.bf16.mxu0 %v405_v11 }
  0x17   :  { %366 = vmatpush3.bf16.msra.mxu0 %v406_v12 }
  0x18   :  { %367 = vmatprep.subr.bf16.mxu0 %v407_v13 }
  0x1b   :  { %368 = vmatpush3.bf16.msra.mxu0 %v408_v18 }
  0x1c   :  { %369 = vmatprep.subr.bf16.mxu0 %v409_v19 }
  0x1f   :  { %370 = vmatpush3.bf16.msra.mxu0 %v411_v20 }
  0x22   :  { %247 = vmatmul.mubr.bf16.vlgmr.msra.gmra.mrb[0].mxu0 %v412_v21 }
  0x23   :  { %254 = vmatprep.mubr.bf16.mxu0 %v418_v22 }
  0x2a   :  { %255 = vmatmul.mubr.bf16.gmra.mrb[4].mxu0 %v420_v23 }
  0xe1   :  { %v393_v24 = vpop.f32.mrb[0].mxu1 }
  0xe2   :  { %v297_v25 = vpop.f32.mrb[1].mxu1 }
  0xe3   :  { %v394_v26 = vpop.f32.mrb[2].mxu1 }
  0xe4   :  { %v300_v27 = vpop.f32.mrb[3].mxu1 }
  0xf5   :  { %v371_v28 = vpop.f32.mrb[0].mxu0 }
  0xf6   :  { %v372_v29 = vpop.f32.mrb[1].mxu0 }
  0xf7   :  { %v373_v31 = vadd.f32 %v372_v29, %v371_v28  ;;  %v374_v32 = vpop.f32.mrb[2].mxu0 }
  0xf8   :  { %v375_v33 = vpop.f32.mrb[3].mxu0 }
  0xf9   :  { %v376_v34 = vadd.f32 %v375_v33, %v374_v32  ;;  %v249_v35 = vadd.f32 %v373_v31, %v328_v30 }
  0xfb   :  { %v298_v37 = vadd.f32 %v297_v25, %v249_v35  ;;  %v252_v38 = vadd.f32 %v376_v34, %v328_v30 }
  0xfd   :  { %v316_v40 = vadd.f32 %v312_v36, %v298_v37  ;;  %v301_v41 = vadd.f32 %v300_v27, %v252_v38  ;;  %v377_v42 = vpop.f32.mrb[4].mxu0 }
  0xfe   :  { %v378_v43 = vpop.f32.mrb[5].mxu0 }
  0xff   :  { %320 = vst.msk [vmem:[%s555_s4] sm:$0xff] %vm207_vm0, %v316_v40  ;;  %v317_v44 = vadd.f32 %v313_v39, %v301_v41  ;;  %v379_v45 = vadd.f32 %v378_v43, %v377_v42  ;;  %v380_v46 = vpop.f32.mrb[6].mxu0 }
 0x100   :  { %v381_v47 = vpop.f32.mrb[7].mxu0 }
 0x101   :  { %321 = vst.msk [vmem:[%s555_s4 + $0x8] sm:$0xff] %vm207_vm0, %v317_v44  ;;  %v257_v48 = vadd.f32 %v379_v45, %v328_v30  ;;  %v382_v49 = vadd.f32 %v381_v47, %v380_v46 }
 0x103   :  { %v306_v51 = vadd.f32 %v393_v24, %v257_v48  ;;  %v260_v52 = vadd.f32 %v382_v49, %v328_v30 }
 0x105   :  { %v318_v54 = vadd.f32 %v314_v50, %v306_v51  ;;  %v309_v55 = vadd.f32 %v394_v26, %v260_v52 }
 0x107   :  { %322 = vst.msk [vmem:[%s555_s4 + $0x10] sm:$0xff] %vm207_vm0, %v318_v54  ;;  %v319_v56 = vadd.f32 %v315_v53, %v309_v55 }
 0x109   :  { %323 = vst.msk [vmem:[%s555_s4 + $0x18] sm:$0xff] %vm207_vm0, %v319_v56 }

// kernel: _lambda_.20
= control target key start
LH: loop header
LB: loop body
LE: loop exit
PB: predicated region body
PF: predicated region fallthrough
CT: control target
= control target key end

     0   :  { %v712_v1 = vmov 0.0   ;;  %vm713_vm0 = vmmov 0   ;;  %vm299_vm1 = vcmask 261120   ;;  %vm499_vm2 = vcmask 130048   ;;  %s949_s1 = inlined_call_operand.vmem [shape: bf16[288,16], index: 1, kind: input, shape index: {}]   ;;  %s950_s0 = inlined_call_operand.vmem [shape: bf16[112,288], index: 0, kind: input, shape index: {}]   ;;  %s951_s2 = inlined_call_operand.vmem [shape: f32[1,16], index: 2, kind: input, shape index: {}]   ;;  %s952_s3 = inlined_call_operand.vmem [shape: f32[112,16], index: 3, kind: output, shape index: {}]  }
   0x1   :  { %v666_v0 = vld [vmem:[%s949_s1 + $0x40] sm:$0xff]   ;;  %632 = vmatprep.subr.bf16.mxu1 %v712_v1  ;;  %636 = vmatprep.mubr.msk.bf16.mxu1 %vm713_vm0, %v712_v1  ;;  %v668_v3 = vld [vmem:[%s949_s1 + $0x48] sm:$0xff]   ;;  %v670_v5 = vld [vmem:[%s949_s1 + $0x50] sm:$0xff]  }
   0x2   :  { %v667_v2 = vld [vmem:[%s949_s1] sm:$0xff]   ;;  %565 = vmatprep.subr.bf16.mxu0 %v666_v0  ;;  %v669_v4 = vld [vmem:[%s949_s1 + $0x8] sm:$0xff]   ;;  %v671_v6 = vld [vmem:[%s949_s1 + $0x10] sm:$0xff]  }
   0x3   :  { %566 = vmatpush3.bf16.msra.mxu0 %v667_v2  ;;  %v672_v7 = vld [vmem:[%s949_s1 + $0x58] sm:$0xff]   ;;  %v674_v9 = vld [vmem:[%s949_s1 + $0x60] sm:$0xff]   ;;  %v676_v12 = vld [vmem:[%s949_s1 + $0x68] sm:$0xff]  }
   0x4   :  { %567 = vmatprep.subr.bf16.mxu0 %v668_v3  ;;  %v673_v8 = vld [vmem:[%s949_s1 + $0x18] sm:$0xff]   ;;  %v680_v10 = vld [vmem:[%s949_s1 + $0x80] sm:$0xff]   ;;  %v677_v13 = vld [vmem:[%s949_s1 + $0x28] sm:$0xff]  }
   0x5   :  { %v675_v11 = vld [vmem:[%s949_s1 + $0x20] sm:$0xff]   ;;  %633 = vmatpush3.bf16.msra.mxu1 %v680_v10  ;;  %v678_v14 = vld [vmem:[%s949_s1 + $0x70] sm:$0xff]   ;;  %v686_v16 = vld [vmem:[%s949_s1 + $0x88] sm:$0xff]  }
   0x6   :  { %634 = vmatprep.subr.bf16.mxu1 %v712_v1  ;;  %v685_v15 = vld [vmem:[%s950_s0 + $0x4] ss:$12 sps:$4 sm:$0xff]   ;;  %v687_v17 = vld [vmem:[%s950_s0 + $0x8] ss:$12 sps:$4 sm:$0xff]   ;;  %v681_v19 = vld [vmem:[%s949_s1 + $0x78] sm:$0xff]  }
   0x7   :  { %568 = vmatpush3.bf16.msra.mxu0 %v669_v4  ;;  %353 = vmatprep.mubr.bf16.mxu0 %v685_v15  ;;  %v679_v18 = vld [vmem:[%s949_s1 + $0x30] sm:$0xff]   ;;  %v682_v20 = vld [vmem:[%s949_s1 + $0x38] sm:$0xff]   ;;  %v691_v21 = vld [vmem:[%s950_s0 + $0x20] ss:$12 sps:$4 sm:$0xff]  }
   0x8   :  { %569 = vmatprep.subr.bf16.mxu0 %v670_v5  ;;  %v683_v22 = vld [vmem:[%s950_s0] ss:$12 sps:$4 sm:$0xff]   ;;  %v688_v23 = vld [vmem:[%s950_s0 + $0x1c] ss:$12 sps:$4 sm:$0xff]   ;;  %v695_v24 = vld [vmem:[%s950_s0 + $0x38] ss:$12 sps:$4 sm:$0xff]  }
   0x9   :  { %635 = vmatpush3.bf16.msra.mxu1 %v686_v16  ;;  %v690_v25 = vld [vmem:[%s950_s0 + $0x18] ss:$12 sps:$4 sm:$0xff]   ;;  %v692_v26 = vld [vmem:[%s950_s0 + $0x34] ss:$12 sps:$4 sm:$0xff]   ;;  %v699_v27 = vld [vmem:[%s950_s0 + $0x50] ss:$12 sps:$4 sm:$0xff]  }
   0xa   :  { %v694_v28 = vld [vmem:[%s950_s0 + $0x30] ss:$12 sps:$4 sm:$0xff]   ;;  %v696_v29 = vld [vmem:[%s950_s0 + $0x4c] ss:$12 sps:$4 sm:$0xff]   ;;  %v703_v30 = vld [vmem:[%s950_s0 + $0x68] ss:$12 sps:$4 sm:$0xff]  }
   0xb   :  { %570 = vmatpush3.bf16.msra.mxu0 %v671_v6  ;;  %v698_v31 = vld [vmem:[%s950_s0 + $0x48] ss:$12 sps:$4 sm:$0xff]   ;;  %v700_v32 = vld [vmem:[%s950_s0 + $0x64] ss:$12 sps:$4 sm:$0xff]   ;;  %v707_v33 = vld [vmem:[%s950_s0 + $0x80] ss:$12 sps:$4 sm:$0xff]  }
   0xc   :  { %571 = vmatprep.subr.bf16.mxu0 %v672_v7  ;;  %637 = vmatmul.mubr.msk.bf16.vlgmr.msra.gmra.mrb[0].mxu1 %vm299_vm1, %v687_v17  ;;  %v702_v34 = vld [vmem:[%s950_s0 + $0x60] ss:$12 sps:$4 sm:$0xff]   ;;  %v704_v35 = vld [vmem:[%s950_s0 + $0x7c] ss:$12 sps:$4 sm:$0xff]   ;;  %v711_v36 = vld [vmem:[%s950_s0 + $0x98] ss:$12 sps:$4 sm:$0xff]  }
   0xd   :  { %640 = vmatprep.mubr.msk.bf16.mxu1 %vm713_vm0, %v712_v1  ;;  %v706_v37 = vld [vmem:[%s950_s0 + $0x78] ss:$12 sps:$4 sm:$0xff]   ;;  %v708_v38 = vld [vmem:[%s950_s0 + $0x94] ss:$12 sps:$4 sm:$0xff]   ;;  %v710_v39 = vld [vmem:[%s950_s0 + $0x90] ss:$12 sps:$4 sm:$0xff]  }
   0xe   :  { %v877_v49 = vld [vmem:[%s951_s2] ss:$0 sm:$0xff] }
   0xf   :  { %572 = vmatpush3.bf16.msra.mxu0 %v673_v8 }
  0x10   :  { %573 = vmatprep.subr.bf16.mxu0 %v674_v9 }
  0x13   :  { %574 = vmatpush3.bf16.msra.mxu0 %v675_v11 }
  0x14   :  { %575 = vmatprep.subr.bf16.mxu0 %v676_v12  ;;  %641 = vmatmul.mubr.msk.bf16.gmra.mrb[4].mxu1 %vm299_vm1, %v691_v21 }
  0x15   :  { %644 = vmatprep.mubr.msk.bf16.mxu1 %vm713_vm0, %v712_v1 }
  0x17   :  { %576 = vmatpush3.bf16.msra.mxu0 %v677_v13 }
  0x18   :  { %577 = vmatprep.subr.bf16.mxu0 %v678_v14 }
  0x1b   :  { %578 = vmatpush3.bf16.msra.mxu0 %v679_v18 }
  0x1c   :  { %579 = vmatprep.subr.bf16.mxu0 %v681_v19  ;;  %645 = vmatmul.mubr.msk.bf16.gmra.mrb[8].mxu1 %vm299_vm1, %v695_v24 }
  0x1d   :  { %648 = vmatprep.mubr.msk.bf16.mxu1 %vm713_vm0, %v712_v1 }
  0x1f   :  { %580 = vmatpush3.bf16.msra.mxu0 %v682_v20 }
  0x22   :  { %354 = vmatmul.mubr.bf16.vlgmr.msra.gmra.mrb[0].mxu0 %v683_v22 }
  0x23   :  { %361 = vmatprep.mubr.bf16.mxu0 %v688_v23 }
  0x24   :  { %649 = vmatmul.mubr.msk.bf16.gmra.mrb[12].mxu1 %vm299_vm1, %v699_v27 }
  0x25   :  { %652 = vmatprep.mubr.msk.bf16.mxu1 %vm713_vm0, %v712_v1 }
  0x2a   :  { %362 = vmatmul.mubr.bf16.gmra.mrb[4].mxu0 %v690_v25 }
  0x2b   :  { %369 = vmatprep.mubr.bf16.mxu0 %v692_v26 }
  0x2c   :  { %653 = vmatmul.mubr.msk.bf16.gmra.mrb[16].mxu1 %vm299_vm1, %v703_v30 }
  0x2d   :  { %656 = vmatprep.mubr.msk.bf16.mxu1 %vm713_vm0, %v712_v1 }
  0x32   :  { %370 = vmatmul.mubr.bf16.gmra.mrb[8].mxu0 %v694_v28 }
  0x33   :  { %377 = vmatprep.mubr.bf16.mxu0 %v696_v29 }
  0x34   :  { %657 = vmatmul.mubr.msk.bf16.gmra.mrb[20].mxu1 %vm299_vm1, %v707_v33 }
  0x35   :  { %660 = vmatprep.mubr.msk.bf16.mxu1 %vm713_vm0, %v712_v1 }
  0x3a   :  { %378 = vmatmul.mubr.bf16.gmra.mrb[12].mxu0 %v698_v31 }
  0x3b   :  { %385 = vmatprep.mubr.bf16.mxu0 %v700_v32 }
  0x3c   :  { %661 = vmatmul.mubr.msk.bf16.gmra.mrb[24].mxu1 %vm299_vm1, %v711_v36 }
  0x42   :  { %386 = vmatmul.mubr.bf16.gmra.mrb[16].mxu0 %v702_v34 }
  0x43   :  { %393 = vmatprep.mubr.bf16.mxu0 %v704_v35 }
  0x4a   :  { %394 = vmatmul.mubr.bf16.gmra.mrb[20].mxu0 %v706_v37 }
  0x4b   :  { %401 = vmatprep.mubr.bf16.mxu0 %v708_v38 }
  0x52   :  { %402 = vmatmul.mubr.bf16.gmra.mrb[24].mxu0 %v710_v39 }
  0xdf   :  { %v444_v40 = vpop.f32.mrb[0].mxu1 }
  0xe0   :  { %v638_v41 = vpop.f32.mrb[1].mxu1 }
  0xe1   :  { %v447_v42 = vpop.f32.mrb[2].mxu1 }
  0xe2   :  { %v639_v43 = vpop.f32.mrb[3].mxu1 }
  0xe7   :  { %v452_v44 = vpop.f32.mrb[4].mxu1 }
  0xe8   :  { %v642_v45 = vpop.f32.mrb[5].mxu1 }
  0xe9   :  { %v455_v47 = vpop.f32.mrb[6].mxu1 }
  0xea   :  { %v643_v50 = vpop.f32.mrb[7].mxu1 }
  0xef   :  { %v460_v58 = vpop.f32.mrb[8].mxu1 }
  0xf0   :  { %v646_v59 = vpop.f32.mrb[9].mxu1 }
  0xf1   :  { %v463_v62 = vpop.f32.mrb[10].mxu1 }
  0xf2   :  { %v647_v0 = vpop.f32.mrb[11].mxu1 }
  0xf5   :  { %v581_v46 = vpop.f32.mrb[0].mxu0 }
  0xf6   :  { %v582_v48 = vpop.f32.mrb[1].mxu0 }
  0xf7   :  { %v583_v51 = vadd.f32 %v582_v48, %v581_v46  ;;  %v584_v52 = vpop.f32.mrb[2].mxu0  ;;  %v468_v8 = vpop.f32.mrb[12].mxu1 }
  0xf8   :  { %v585_v53 = vpop.f32.mrb[3].mxu0  ;;  %v650_v9 = vpop.f32.mrb[13].mxu1 }
  0xf9   :  { %v356_v54 = vadd.f32 %v583_v51, %v877_v49  ;;  %v586_v55 = vadd.f32 %v585_v53, %v584_v52  ;;  %v471_v12 = vpop.f32.mrb[14].mxu1 }
  0xfa   :  { %v651_v14 = vpop.f32.mrb[15].mxu1 }
  0xfb   :  { %v445_v56 = vadd.f32 %v444_v40, %v356_v54  ;;  %v359_v57 = vadd.f32 %v586_v55, %v877_v49 }
  0xfd   :  { %500 = vst.msk [vmem:[%s952_s3] sm:$0xff] %vm499_vm2, %v445_v56  ;;  %v448_v60 = vadd.f32 %v447_v42, %v359_v57  ;;  %v587_v61 = vpop.f32.mrb[4].mxu0 }
  0xfe   :  { %v588_v63 = vpop.f32.mrb[5].mxu0 }
  0xff   :  { %501 = vst.msk [vmem:[%s952_s3 + $0x8] sm:$0xff] %vm499_vm2, %v448_v60  ;;  %v589_v1 = vadd.f32 %v588_v63, %v587_v61  ;;  %v590_v2 = vpop.f32.mrb[6].mxu0  ;;  %v476_v22 = vpop.f32.mrb[16].mxu1 }
 0x100   :  { %v591_v3 = vpop.f32.mrb[7].mxu0  ;;  %v654_v23 = vpop.f32.mrb[17].mxu1 }
 0x101   :  { %v364_v4 = vadd.f32 %v589_v1, %v877_v49  ;;  %v592_v5 = vadd.f32 %v591_v3, %v590_v2  ;;  %v479_v26 = vpop.f32.mrb[18].mxu1 }
 0x102   :  { %v655_v28 = vpop.f32.mrb[19].mxu1 }
 0x103   :  { %v453_v6 = vadd.f32 %v452_v44, %v364_v4  ;;  %v367_v7 = vadd.f32 %v592_v5, %v877_v49 }
 0x105   :  { %502 = vst.msk [vmem:[%s952_s3 + $0x10] sm:$0xff] %vm499_vm2, %v453_v6  ;;  %v456_v10 = vadd.f32 %v455_v47, %v367_v7  ;;  %v593_v11 = vpop.f32.mrb[8].mxu0 }
 0x106   :  { %v594_v13 = vpop.f32.mrb[9].mxu0 }
 0x107   :  { %503 = vst.msk [vmem:[%s952_s3 + $0x18] sm:$0xff] %vm499_vm2, %v456_v10  ;;  %v595_v15 = vadd.f32 %v594_v13, %v593_v11  ;;  %v596_v16 = vpop.f32.mrb[10].mxu0  ;;  %v484_v36 = vpop.f32.mrb[20].mxu1 }
 0x108   :  { %v597_v17 = vpop.f32.mrb[11].mxu0  ;;  %v658_v37 = vpop.f32.mrb[21].mxu1 }
 0x109   :  { %v372_v18 = vadd.f32 %v595_v15, %v877_v49  ;;  %v598_v19 = vadd.f32 %v597_v17, %v596_v16  ;;  %v487_v40 = vpop.f32.mrb[22].mxu1 }
 0x10a   :  { %v659_v42 = vpop.f32.mrb[23].mxu1 }
 0x10b   :  { %v461_v20 = vadd.f32 %v460_v58, %v372_v18  ;;  %v375_v21 = vadd.f32 %v598_v19, %v877_v49 }
 0x10d   :  { %504 = vst.msk [vmem:[%s952_s3 + $0x20] sm:$0xff] %vm499_vm2, %v461_v20  ;;  %v464_v24 = vadd.f32 %v463_v62, %v375_v21  ;;  %v599_v25 = vpop.f32.mrb[12].mxu0 }
 0x10e   :  { %v600_v27 = vpop.f32.mrb[13].mxu0 }
 0x10f   :  { %505 = vst.msk [vmem:[%s952_s3 + $0x28] sm:$0xff] %vm499_vm2, %v464_v24  ;;  %v601_v29 = vadd.f32 %v600_v27, %v599_v25  ;;  %v602_v30 = vpop.f32.mrb[14].mxu0  ;;  %v492_v51 = vpop.f32.mrb[24].mxu1 }
 0x110   :  { %v603_v31 = vpop.f32.mrb[15].mxu0  ;;  %v662_v52 = vpop.f32.mrb[25].mxu1 }
 0x111   :  { %v380_v32 = vadd.f32 %v601_v29, %v877_v49  ;;  %v604_v33 = vadd.f32 %v603_v31, %v602_v30  ;;  %v495_v55 = vpop.f32.mrb[26].mxu1 }
 0x112   :  { %v663_v57 = vpop.f32.mrb[27].mxu1 }
 0x113   :  { %v469_v34 = vadd.f32 %v468_v8, %v380_v32  ;;  %v383_v35 = vadd.f32 %v604_v33, %v877_v49 }
 0x115   :  { %506 = vst.msk [vmem:[%s952_s3 + $0x30] sm:$0xff] %vm499_vm2, %v469_v34  ;;  %v472_v38 = vadd.f32 %v471_v12, %v383_v35  ;;  %v605_v39 = vpop.f32.mrb[16].mxu0 }
 0x116   :  { %v606_v41 = vpop.f32.mrb[17].mxu0 }
 0x117   :  { %507 = vst.msk [vmem:[%s952_s3 + $0x38] sm:$0xff] %vm499_vm2, %v472_v38  ;;  %v607_v43 = vadd.f32 %v606_v41, %v605_v39  ;;  %v608_v44 = vpop.f32.mrb[18].mxu0 }
 0x118   :  { %v609_v45 = vpop.f32.mrb[19].mxu0 }
 0x119   :  { %v388_v46 = vadd.f32 %v607_v43, %v877_v49  ;;  %v610_v47 = vadd.f32 %v609_v45, %v608_v44 }
 0x11b   :  { %v477_v48 = vadd.f32 %v476_v22, %v388_v46  ;;  %v391_v50 = vadd.f32 %v610_v47, %v877_v49 }
 0x11d   :  { %508 = vst.msk [vmem:[%s952_s3 + $0x40] sm:$0xff] %vm499_vm2, %v477_v48  ;;  %v480_v53 = vadd.f32 %v479_v26, %v391_v50  ;;  %v611_v54 = vpop.f32.mrb[20].mxu0 }
 0x11e   :  { %v612_v56 = vpop.f32.mrb[21].mxu0 }
 0x11f   :  { %509 = vst.msk [vmem:[%s952_s3 + $0x48] sm:$0xff] %vm499_vm2, %v480_v53  ;;  %v613_v58 = vadd.f32 %v612_v56, %v611_v54  ;;  %v614_v59 = vpop.f32.mrb[22].mxu0 }
 0x120   :  { %v615_v60 = vpop.f32.mrb[23].mxu0 }
 0x121   :  { %v396_v61 = vadd.f32 %v613_v58, %v877_v49  ;;  %v616_v62 = vadd.f32 %v615_v60, %v614_v59 }
 0x123   :  { %v485_v63 = vadd.f32 %v484_v36, %v396_v61  ;;  %v399_v0 = vadd.f32 %v616_v62, %v877_v49 }
 0x125   :  { %510 = vst.msk [vmem:[%s952_s3 + $0x50] sm:$0xff] %vm499_vm2, %v485_v63  ;;  %v488_v1 = vadd.f32 %v487_v40, %v399_v0  ;;  %v617_v2 = vpop.f32.mrb[24].mxu0 }
 0x126   :  { %v618_v3 = vpop.f32.mrb[25].mxu0 }
 0x127   :  { %511 = vst.msk [vmem:[%s952_s3 + $0x58] sm:$0xff] %vm499_vm2, %v488_v1  ;;  %v619_v4 = vadd.f32 %v618_v3, %v617_v2  ;;  %v620_v5 = vpop.f32.mrb[26].mxu0 }
 0x128   :  { %v621_v6 = vpop.f32.mrb[27].mxu0 }
 0x129   :  { %v404_v7 = vadd.f32 %v619_v4, %v877_v49  ;;  %v622_v8 = vadd.f32 %v621_v6, %v620_v5 }
 0x12b   :  { %v493_v9 = vadd.f32 %v492_v51, %v404_v7  ;;  %v407_v10 = vadd.f32 %v622_v8, %v877_v49 }
 0x12d   :  { %512 = vst.msk [vmem:[%s952_s3 + $0x60] sm:$0xff] %vm499_vm2, %v493_v9  ;;  %v496_v11 = vadd.f32 %v495_v55, %v407_v10 }
 0x12f   :  { %513 = vst.msk [vmem:[%s952_s3 + $0x68] sm:$0xff] %vm499_vm2, %v496_v11 }

// kernel: _lambda_.21
= control target key start
LH: loop header
LB: loop body
LE: loop exit
PB: predicated region body
PF: predicated region fallthrough
CT: control target
= control target key end

     0   :  { %v743_v1 = vmov 0.0   ;;  %vm744_vm0 = vmmov 0   ;;  %vm302_vm1 = vcmask 261120   ;;  %vm530_vm2 = vcmask 130048   ;;  %s1027_s1 = inlined_call_operand.vmem [shape: bf16[288,16], index: 1, kind: input, shape index: {}]   ;;  %s1028_s0 = inlined_call_operand.vmem [shape: bf16[112,288], index: 0, kind: input, shape index: {}]   ;;  %s1029_s2 = inlined_call_operand.vmem [shape: f32[1,16], index: 2, kind: input, shape index: {}]   ;;  %s1030_s3 = inlined_call_operand.vmem [shape: f32[112,16], index: 3, kind: input, shape index: {}]   ;;  %s1031_s4 = inlined_call_operand.vmem [shape: f32[112,16], index: 4, kind: output, shape index: {}]  }
   0x1   :  { %v697_v0 = vld [vmem:[%s1027_s1 + $0x40] sm:$0xff]   ;;  %663 = vmatprep.subr.bf16.mxu1 %v743_v1  ;;  %667 = vmatprep.mubr.msk.bf16.mxu1 %vm744_vm0, %v743_v1  ;;  %v699_v3 = vld [vmem:[%s1027_s1 + $0x48] sm:$0xff]   ;;  %v701_v5 = vld [vmem:[%s1027_s1 + $0x50] sm:$0xff]  }
   0x2   :  { %v698_v2 = vld [vmem:[%s1027_s1] sm:$0xff]   ;;  %596 = vmatprep.subr.bf16.mxu0 %v697_v0  ;;  %v700_v4 = vld [vmem:[%s1027_s1 + $0x8] sm:$0xff]   ;;  %v702_v6 = vld [vmem:[%s1027_s1 + $0x10] sm:$0xff]  }
   0x3   :  { %597 = vmatpush3.bf16.msra.mxu0 %v698_v2  ;;  %v703_v7 = vld [vmem:[%s1027_s1 + $0x58] sm:$0xff]   ;;  %v705_v9 = vld [vmem:[%s1027_s1 + $0x60] sm:$0xff]   ;;  %v707_v12 = vld [vmem:[%s1027_s1 + $0x68] sm:$0xff]  }
   0x4   :  { %598 = vmatprep.subr.bf16.mxu0 %v699_v3  ;;  %v704_v8 = vld [vmem:[%s1027_s1 + $0x18] sm:$0xff]   ;;  %v711_v10 = vld [vmem:[%s1027_s1 + $0x80] sm:$0xff]   ;;  %v708_v13 = vld [vmem:[%s1027_s1 + $0x28] sm:$0xff]  }
   0x5   :  { %v706_v11 = vld [vmem:[%s1027_s1 + $0x20] sm:$0xff]   ;;  %664 = vmatpush3.bf16.msra.mxu1 %v711_v10  ;;  %v709_v14 = vld [vmem:[%s1027_s1 + $0x70] sm:$0xff]   ;;  %v717_v16 = vld [vmem:[%s1027_s1 + $0x88] sm:$0xff]  }
   0x6   :  { %665 = vmatprep.subr.bf16.mxu1 %v743_v1  ;;  %v716_v15 = vld [vmem:[%s1028_s0 + $0x4] ss:$12 sps:$4 sm:$0xff]   ;;  %v718_v17 = vld [vmem:[%s1028_s0 + $0x8] ss:$12 sps:$4 sm:$0xff]   ;;  %v712_v19 = vld [vmem:[%s1027_s1 + $0x78] sm:$0xff]  }
   0x7   :  { %599 = vmatpush3.bf16.msra.mxu0 %v700_v4  ;;  %356 = vmatprep.mubr.bf16.mxu0 %v716_v15  ;;  %v710_v18 = vld [vmem:[%s1027_s1 + $0x30] sm:$0xff]   ;;  %v713_v20 = vld [vmem:[%s1027_s1 + $0x38] sm:$0xff]   ;;  %v722_v21 = vld [vmem:[%s1028_s0 + $0x20] ss:$12 sps:$4 sm:$0xff]  }
   0x8   :  { %600 = vmatprep.subr.bf16.mxu0 %v701_v5  ;;  %v714_v22 = vld [vmem:[%s1028_s0] ss:$12 sps:$4 sm:$0xff]   ;;  %v719_v23 = vld [vmem:[%s1028_s0 + $0x1c] ss:$12 sps:$4 sm:$0xff]   ;;  %v726_v24 = vld [vmem:[%s1028_s0 + $0x38] ss:$12 sps:$4 sm:$0xff]  }
   0x9   :  { %666 = vmatpush3.bf16.msra.mxu1 %v717_v16  ;;  %v721_v25 = vld [vmem:[%s1028_s0 + $0x18] ss:$12 sps:$4 sm:$0xff]   ;;  %v723_v26 = vld [vmem:[%s1028_s0 + $0x34] ss:$12 sps:$4 sm:$0xff]   ;;  %v730_v27 = vld [vmem:[%s1028_s0 + $0x50] ss:$12 sps:$4 sm:$0xff]  }
   0xa   :  { %v725_v28 = vld [vmem:[%s1028_s0 + $0x30] ss:$12 sps:$4 sm:$0xff]   ;;  %v727_v29 = vld [vmem:[%s1028_s0 + $0x4c] ss:$12 sps:$4 sm:$0xff]   ;;  %v734_v30 = vld [vmem:[%s1028_s0 + $0x68] ss:$12 sps:$4 sm:$0xff]  }
   0xb   :  { %601 = vmatpush3.bf16.msra.mxu0 %v702_v6  ;;  %v729_v31 = vld [vmem:[%s1028_s0 + $0x48] ss:$12 sps:$4 sm:$0xff]   ;;  %v731_v32 = vld [vmem:[%s1028_s0 + $0x64] ss:$12 sps:$4 sm:$0xff]   ;;  %v738_v33 = vld [vmem:[%s1028_s0 + $0x80] ss:$12 sps:$4 sm:$0xff]  }
   0xc   :  { %602 = vmatprep.subr.bf16.mxu0 %v703_v7  ;;  %668 = vmatmul.mubr.msk.bf16.vlgmr.msra.gmra.mrb[0].mxu1 %vm302_vm1, %v718_v17  ;;  %v733_v34 = vld [vmem:[%s1028_s0 + $0x60] ss:$12 sps:$4 sm:$0xff]   ;;  %v735_v35 = vld [vmem:[%s1028_s0 + $0x7c] ss:$12 sps:$4 sm:$0xff]   ;;  %v742_v36 = vld [vmem:[%s1028_s0 + $0x98] ss:$12 sps:$4 sm:$0xff]  }
   0xd   :  { %671 = vmatprep.mubr.msk.bf16.mxu1 %vm744_vm0, %v743_v1  ;;  %v737_v37 = vld [vmem:[%s1028_s0 + $0x78] ss:$12 sps:$4 sm:$0xff]   ;;  %v739_v38 = vld [vmem:[%s1028_s0 + $0x94] ss:$12 sps:$4 sm:$0xff]   ;;  %v741_v39 = vld [vmem:[%s1028_s0 + $0x90] ss:$12 sps:$4 sm:$0xff]  }
   0xe   :  { %v913_v49 = vld [vmem:[%s1029_s2] ss:$0 sm:$0xff]  ;;  %v503_v60 = vld [vmem:[%s1030_s3 + $0x8] sm:$0xff]  ;;  %v504_v10 = vld [vmem:[%s1030_s3 + $0x10] sm:$0xff] }
   0xf   :  { %603 = vmatpush3.bf16.msra.mxu0 %v704_v8  ;;  %v502_v56 = vld [vmem:[%s1030_s3] sm:$0xff] }
  0x10   :  { %604 = vmatprep.subr.bf16.mxu0 %v705_v9 }
  0x13   :  { %605 = vmatpush3.bf16.msra.mxu0 %v706_v11 }
  0x14   :  { %606 = vmatprep.subr.bf16.mxu0 %v707_v12  ;;  %672 = vmatmul.mubr.msk.bf16.gmra.mrb[4].mxu1 %vm302_vm1, %v722_v21 }
  0x15   :  { %675 = vmatprep.mubr.msk.bf16.mxu1 %vm744_vm0, %v743_v1 }
  0x17   :  { %607 = vmatpush3.bf16.msra.mxu0 %v708_v13 }
  0x18   :  { %608 = vmatprep.subr.bf16.mxu0 %v709_v14  ;;  %v505_v14 = vld [vmem:[%s1030_s3 + $0x18] sm:$0xff] }
  0x1b   :  { %609 = vmatpush3.bf16.msra.mxu0 %v710_v18 }
  0x1c   :  { %610 = vmatprep.subr.bf16.mxu0 %v712_v19  ;;  %676 = vmatmul.mubr.msk.bf16.gmra.mrb[8].mxu1 %vm302_vm1, %v726_v24 }
  0x1d   :  { %679 = vmatprep.mubr.msk.bf16.mxu1 %vm744_vm0, %v743_v1 }
  0x1f   :  { %611 = vmatpush3.bf16.msra.mxu0 %v713_v20 }
  0x22   :  { %357 = vmatmul.mubr.bf16.vlgmr.msra.gmra.mrb[0].mxu0 %v714_v22 }
  0x23   :  { %364 = vmatprep.mubr.bf16.mxu0 %v719_v23 }
  0x24   :  { %680 = vmatmul.mubr.msk.bf16.gmra.mrb[12].mxu1 %vm302_vm1, %v730_v27 }
  0x25   :  { %683 = vmatprep.mubr.msk.bf16.mxu1 %vm744_vm0, %v743_v1 }
  0x2a   :  { %365 = vmatmul.mubr.bf16.gmra.mrb[4].mxu0 %v721_v25 }
  0x2b   :  { %372 = vmatprep.mubr.bf16.mxu0 %v723_v26 }
  0x2c   :  { %684 = vmatmul.mubr.msk.bf16.gmra.mrb[16].mxu1 %vm302_vm1, %v734_v30 }
  0x2d   :  { %687 = vmatprep.mubr.msk.bf16.mxu1 %vm744_vm0, %v743_v1 }
  0x32   :  { %373 = vmatmul.mubr.bf16.gmra.mrb[8].mxu0 %v725_v28  ;;  %v506_v28 = vld [vmem:[%s1030_s3 + $0x20] sm:$0xff] }
  0x33   :  { %380 = vmatprep.mubr.bf16.mxu0 %v727_v29 }
  0x34   :  { %688 = vmatmul.mubr.msk.bf16.gmra.mrb[20].mxu1 %vm302_vm1, %v738_v33 }
  0x35   :  { %691 = vmatprep.mubr.msk.bf16.mxu1 %vm744_vm0, %v743_v1 }
  0x3a   :  { %381 = vmatmul.mubr.bf16.gmra.mrb[12].mxu0 %v729_v31 }
  0x3b   :  { %388 = vmatprep.mubr.bf16.mxu0 %v731_v32  ;;  %v507_v32 = vld [vmem:[%s1030_s3 + $0x28] sm:$0xff] }
  0x3c   :  { %692 = vmatmul.mubr.msk.bf16.gmra.mrb[24].mxu1 %vm302_vm1, %v742_v36 }
  0x42   :  { %389 = vmatmul.mubr.bf16.gmra.mrb[16].mxu0 %v733_v34 }
  0x43   :  { %396 = vmatprep.mubr.bf16.mxu0 %v735_v35 }
  0x4a   :  { %397 = vmatmul.mubr.bf16.gmra.mrb[20].mxu0 %v737_v37 }
  0x4b   :  { %404 = vmatprep.mubr.bf16.mxu0 %v739_v38 }
  0x52   :  { %405 = vmatmul.mubr.bf16.gmra.mrb[24].mxu0 %v741_v39 }
  0xdf   :  { %v447_v40 = vpop.f32.mrb[0].mxu1 }
  0xe0   :  { %v669_v41 = vpop.f32.mrb[1].mxu1 }
  0xe1   :  { %v450_v42 = vpop.f32.mrb[2].mxu1 }
  0xe2   :  { %v670_v43 = vpop.f32.mrb[3].mxu1 }
  0xe7   :  { %v455_v44 = vpop.f32.mrb[4].mxu1 }
  0xe8   :  { %v673_v45 = vpop.f32.mrb[5].mxu1 }
  0xe9   :  { %v458_v47 = vpop.f32.mrb[6].mxu1 }
  0xea   :  { %v674_v50 = vpop.f32.mrb[7].mxu1 }
  0xef   :  { %v463_v59 = vpop.f32.mrb[8].mxu1 }
  0xf0   :  { %v677_v61 = vpop.f32.mrb[9].mxu1 }
  0xf1   :  { %v466_v1 = vpop.f32.mrb[10].mxu1 }
  0xf2   :  { %v678_v3 = vpop.f32.mrb[11].mxu1 }
  0xf5   :  { %v612_v46 = vpop.f32.mrb[0].mxu0 }
  0xf6   :  { %v613_v48 = vpop.f32.mrb[1].mxu0 }
  0xf7   :  { %v614_v51 = vadd.f32 %v613_v48, %v612_v46  ;;  %v615_v52 = vpop.f32.mrb[2].mxu0  ;;  %v471_v13 = vpop.f32.mrb[12].mxu1  ;;  %v508_v46 = vld [vmem:[%s1030_s3 + $0x30] sm:$0xff] }
  0xf8   :  { %v616_v53 = vpop.f32.mrb[3].mxu0  ;;  %v681_v15 = vpop.f32.mrb[13].mxu1 }
  0xf9   :  { %v359_v54 = vadd.f32 %v614_v51, %v913_v49  ;;  %v617_v55 = vadd.f32 %v616_v53, %v615_v52  ;;  %v474_v19 = vpop.f32.mrb[14].mxu1  ;;  %v509_v51 = vld [vmem:[%s1030_s3 + $0x38] sm:$0xff] }
  0xfa   :  { %v682_v21 = vpop.f32.mrb[15].mxu1 }
  0xfb   :  { %v448_v57 = vadd.f32 %v447_v40, %v359_v54  ;;  %v362_v58 = vadd.f32 %v617_v55, %v913_v49 }
  0xfd   :  { %v516_v62 = vadd.f32 %v502_v56, %v448_v57  ;;  %v451_v63 = vadd.f32 %v450_v42, %v362_v58  ;;  %v618_v0 = vpop.f32.mrb[4].mxu0 }
  0xfe   :  { %v619_v2 = vpop.f32.mrb[5].mxu0 }
  0xff   :  { %531 = vst.msk [vmem:[%s1031_s4] sm:$0xff] %vm530_vm2, %v516_v62  ;;  %v517_v4 = vadd.f32 %v503_v60, %v451_v63  ;;  %v620_v5 = vadd.f32 %v619_v2, %v618_v0  ;;  %v621_v6 = vpop.f32.mrb[6].mxu0  ;;  %v479_v31 = vpop.f32.mrb[16].mxu1 }
 0x100   :  { %v622_v7 = vpop.f32.mrb[7].mxu0  ;;  %v685_v33 = vpop.f32.mrb[17].mxu1 }
 0x101   :  { %532 = vst.msk [vmem:[%s1031_s4 + $0x8] sm:$0xff] %vm530_vm2, %v517_v4  ;;  %v367_v8 = vadd.f32 %v620_v5, %v913_v49  ;;  %v623_v9 = vadd.f32 %v622_v7, %v621_v6  ;;  %v482_v37 = vpop.f32.mrb[18].mxu1  ;;  %v511_v5 = vld [vmem:[%s1030_s3 + $0x48] sm:$0xff]  ;;  %v514_v33 = vld [vmem:[%s1030_s3 + $0x60] sm:$0xff] }
 0x102   :  { %v686_v39 = vpop.f32.mrb[19].mxu1 }
 0x103   :  { %v456_v11 = vadd.f32 %v455_v44, %v367_v8  ;;  %v370_v12 = vadd.f32 %v623_v9, %v913_v49 }
 0x105   :  { %v518_v16 = vadd.f32 %v504_v10, %v456_v11  ;;  %v459_v17 = vadd.f32 %v458_v47, %v370_v12  ;;  %v624_v18 = vpop.f32.mrb[8].mxu0 }
 0x106   :  { %v625_v20 = vpop.f32.mrb[9].mxu0 }
 0x107   :  { %533 = vst.msk [vmem:[%s1031_s4 + $0x10] sm:$0xff] %vm530_vm2, %v518_v16  ;;  %v519_v22 = vadd.f32 %v505_v14, %v459_v17  ;;  %v626_v23 = vadd.f32 %v625_v20, %v624_v18  ;;  %v627_v24 = vpop.f32.mrb[10].mxu0  ;;  %v487_v50 = vpop.f32.mrb[20].mxu1 }
 0x108   :  { %v628_v25 = vpop.f32.mrb[11].mxu0  ;;  %v689_v52 = vpop.f32.mrb[21].mxu1 }
 0x109   :  { %534 = vst.msk [vmem:[%s1031_s4 + $0x18] sm:$0xff] %vm530_vm2, %v519_v22  ;;  %v375_v26 = vadd.f32 %v626_v23, %v913_v49  ;;  %v629_v27 = vadd.f32 %v628_v25, %v627_v24  ;;  %v490_v56 = vpop.f32.mrb[22].mxu1  ;;  %v513_v22 = vld [vmem:[%s1030_s3 + $0x58] sm:$0xff] }
 0x10a   :  { %v690_v58 = vpop.f32.mrb[23].mxu1 }
 0x10b   :  { %v464_v29 = vadd.f32 %v463_v59, %v375_v26  ;;  %v378_v30 = vadd.f32 %v629_v27, %v913_v49 }
 0x10d   :  { %v520_v34 = vadd.f32 %v506_v28, %v464_v29  ;;  %v467_v35 = vadd.f32 %v466_v1, %v378_v30  ;;  %v630_v36 = vpop.f32.mrb[12].mxu0  ;;  %v510_v1 = vld [vmem:[%s1030_s3 + $0x40] sm:$0xff] }
 0x10e   :  { %v631_v38 = vpop.f32.mrb[13].mxu0 }
 0x10f   :  { %535 = vst.msk [vmem:[%s1031_s4 + $0x20] sm:$0xff] %vm530_vm2, %v520_v34  ;;  %v521_v40 = vadd.f32 %v507_v32, %v467_v35  ;;  %v632_v41 = vadd.f32 %v631_v38, %v630_v36  ;;  %v633_v42 = vpop.f32.mrb[14].mxu0  ;;  %v495_v4 = vpop.f32.mrb[24].mxu1  ;;  %v515_v36 = vld [vmem:[%s1030_s3 + $0x68] sm:$0xff] }
 0x110   :  { %v634_v43 = vpop.f32.mrb[15].mxu0  ;;  %v693_v6 = vpop.f32.mrb[25].mxu1 }
 0x111   :  { %536 = vst.msk [vmem:[%s1031_s4 + $0x28] sm:$0xff] %vm530_vm2, %v521_v40  ;;  %v383_v44 = vadd.f32 %v632_v41, %v913_v49  ;;  %v635_v45 = vadd.f32 %v634_v43, %v633_v42  ;;  %v498_v10 = vpop.f32.mrb[26].mxu1 }
 0x112   :  { %v694_v12 = vpop.f32.mrb[27].mxu1 }
 0x113   :  { %v472_v47 = vadd.f32 %v471_v13, %v383_v44  ;;  %v386_v48 = vadd.f32 %v635_v45, %v913_v49 }
 0x115   :  { %v522_v53 = vadd.f32 %v508_v46, %v472_v47  ;;  %v475_v54 = vadd.f32 %v474_v19, %v386_v48  ;;  %v636_v55 = vpop.f32.mrb[16].mxu0  ;;  %v512_v19 = vld [vmem:[%s1030_s3 + $0x50] sm:$0xff] }
 0x116   :  { %v637_v57 = vpop.f32.mrb[17].mxu0 }
 0x117   :  { %537 = vst.msk [vmem:[%s1031_s4 + $0x30] sm:$0xff] %vm530_vm2, %v522_v53  ;;  %v523_v59 = vadd.f32 %v509_v51, %v475_v54  ;;  %v638_v60 = vadd.f32 %v637_v57, %v636_v55  ;;  %v639_v61 = vpop.f32.mrb[18].mxu0 }
 0x118   :  { %v640_v62 = vpop.f32.mrb[19].mxu0 }
 0x119   :  { %538 = vst.msk [vmem:[%s1031_s4 + $0x38] sm:$0xff] %vm530_vm2, %v523_v59  ;;  %v391_v63 = vadd.f32 %v638_v60, %v913_v49  ;;  %v641_v0 = vadd.f32 %v640_v62, %v639_v61 }
 0x11b   :  { %v480_v2 = vadd.f32 %v479_v31, %v391_v63  ;;  %v394_v3 = vadd.f32 %v641_v0, %v913_v49 }
 0x11d   :  { %v524_v7 = vadd.f32 %v510_v1, %v480_v2  ;;  %v483_v8 = vadd.f32 %v482_v37, %v394_v3  ;;  %v642_v9 = vpop.f32.mrb[20].mxu0 }
 0x11e   :  { %v643_v11 = vpop.f32.mrb[21].mxu0 }
 0x11f   :  { %539 = vst.msk [vmem:[%s1031_s4 + $0x40] sm:$0xff] %vm530_vm2, %v524_v7  ;;  %v525_v13 = vadd.f32 %v511_v5, %v483_v8  ;;  %v644_v14 = vadd.f32 %v643_v11, %v642_v9  ;;  %v645_v15 = vpop.f32.mrb[22].mxu0 }
 0x120   :  { %v646_v16 = vpop.f32.mrb[23].mxu0 }
 0x121   :  { %540 = vst.msk [vmem:[%s1031_s4 + $0x48] sm:$0xff] %vm530_vm2, %v525_v13  ;;  %v399_v17 = vadd.f32 %v644_v14, %v913_v49  ;;  %v647_v18 = vadd.f32 %v646_v16, %v645_v15 }
 0x123   :  { %v488_v20 = vadd.f32 %v487_v50, %v399_v17  ;;  %v402_v21 = vadd.f32 %v647_v18, %v913_v49 }
 0x125   :  { %v526_v23 = vadd.f32 %v512_v19, %v488_v20  ;;  %v491_v24 = vadd.f32 %v490_v56, %v402_v21  ;;  %v648_v25 = vpop.f32.mrb[24].mxu0 }
 0x126   :  { %v649_v26 = vpop.f32.mrb[25].mxu0 }
 0x127   :  { %541 = vst.msk [vmem:[%s1031_s4 + $0x50] sm:$0xff] %vm530_vm2, %v526_v23  ;;  %v527_v27 = vadd.f32 %v513_v22, %v491_v24  ;;  %v650_v28 = vadd.f32 %v649_v26, %v648_v25  ;;  %v651_v29 = vpop.f32.mrb[26].mxu0 }
 0x128   :  { %v652_v30 = vpop.f32.mrb[27].mxu0 }
 0x129   :  { %542 = vst.msk [vmem:[%s1031_s4 + $0x58] sm:$0xff] %vm530_vm2, %v527_v27  ;;  %v407_v31 = vadd.f32 %v650_v28, %v913_v49  ;;  %v653_v32 = vadd.f32 %v652_v30, %v651_v29 }
 0x12b   :  { %v496_v34 = vadd.f32 %v495_v4, %v407_v31  ;;  %v410_v35 = vadd.f32 %v653_v32, %v913_v49 }
 0x12d   :  { %v528_v37 = vadd.f32 %v514_v33, %v496_v34  ;;  %v499_v38 = vadd.f32 %v498_v10, %v410_v35 }
 0x12f   :  { %543 = vst.msk [vmem:[%s1031_s4 + $0x60] sm:$0xff] %vm530_vm2, %v528_v37  ;;  %v529_v39 = vadd.f32 %v515_v36, %v499_v38 }
 0x131   :  { %544 = vst.msk [vmem:[%s1031_s4 + $0x68] sm:$0xff] %vm530_vm2, %v529_v39 }

// kernel: _lambda_.22
= control target key start
LH: loop header
LB: loop body
LE: loop exit
PB: predicated region body
PF: predicated region fallthrough
CT: control target
= control target key end

     0   :  { %v394_v0 = vmov 0   ;;  %vm171_vm0 = vcmask 130048   ;;  %s566_s1 = inlined_call_operand.vmem [shape: bf16[144,16], index: 1, kind: input, shape index: {}]   ;;  %s567_s0 = inlined_call_operand.vmem [shape: bf16[112,144], index: 0, kind: input, shape index: {}]   ;;  %s568_s2 = inlined_call_operand.vmem [shape: f32[1,16], index: 2, kind: input, shape index: {}]   ;;  %s569_s3 = inlined_call_operand.vmem [shape: f32[112,16], index: 3, kind: output, shape index: {}]  }
   0x1   :  { %193 = vmatprep.subr.bf16.mxu0 %v394_v0  ;;  %v364_v1 = vld [vmem:[%s566_s1] sm:$0xff]   ;;  %345 = vmatprep.subr.bf16.mxu1 %v394_v0  ;;  %v365_v2 = vld [vmem:[%s566_s1 + $0x8] sm:$0xff]   ;;  %v366_v3 = vld [vmem:[%s566_s1 + $0x10] sm:$0xff]  }
   0x2   :  { %194 = vmatpush1.bf16.msra.mxu0 %v364_v1  ;;  %354 = vmatpush1.bf16.msra.mxu1 %v364_v1  ;;  %v367_v4 = vld [vmem:[%s566_s1 + $0x18] sm:$0xff]   ;;  %v375_v5 = vld [vmem:[%s567_s0 + $0x4] ss:$8 sps:$4 sm:$0xff]   ;;  %v370_v9 = vld [vmem:[%s566_s1 + $0x30] sm:$0xff]  }
   0x3   :  { %195 = vmatprep.subr.bf16.mxu0 %v394_v0  ;;  %346 = vmatprep.subr.bf16.mxu1 %v394_v0  ;;  %v378_v6 = vld [vmem:[%s567_s0 + $0x44] ss:$8 sps:$4 sm:$0xff]   ;;  %v371_v10 = vld [vmem:[%s566_s1 + $0x38] sm:$0xff]   ;;  %v373_v12 = vld [vmem:[%s567_s0] ss:$8 sps:$4 sm:$0xff]  }
   0x4   :  { %338 = vmatprep.mubr.msk.bf16.mxu0 %vm171_vm0, %v375_v5  ;;  %342 = vmatprep.mubr.msk.bf16.mxu1 %vm171_vm0, %v378_v6  ;;  %v368_v7 = vld [vmem:[%s566_s1 + $0x20] sm:$0xff]   ;;  %v369_v8 = vld [vmem:[%s566_s1 + $0x28] sm:$0xff]   ;;  %v379_v14 = vld [vmem:[%s567_s0 + $0x14] ss:$8 sps:$4 sm:$0xff]  }
   0x5   :  { %v372_v11 = vld [vmem:[%s566_s1 + $0x40] sm:$0xff]   ;;  %v382_v15 = vld [vmem:[%s567_s0 + $0x54] ss:$8 sps:$4 sm:$0xff]   ;;  %v381_v16 = vld [vmem:[%s567_s0 + $0x10] ss:$8 sps:$4 sm:$0xff]  }
   0x6   :  { %196 = vmatpush1.bf16.msra.mxu0 %v365_v2  ;;  %355 = vmatpush1.bf16.msra.mxu1 %v365_v2  ;;  %v376_v13 = vld [vmem:[%s567_s0 + $0x40] ss:$8 sps:$4 sm:$0xff]   ;;  %v384_v17 = vld [vmem:[%s567_s0 + $0x50] ss:$8 sps:$4 sm:$0xff]   ;;  %v385_v18 = vld [vmem:[%s567_s0 + $0x24] ss:$8 sps:$4 sm:$0xff]  }
   0x7   :  { %197 = vmatprep.subr.bf16.mxu0 %v394_v0  ;;  %347 = vmatprep.subr.bf16.mxu1 %v394_v0  ;;  %v388_v19 = vld [vmem:[%s567_s0 + $0x64] ss:$8 sps:$4 sm:$0xff]   ;;  %v387_v20 = vld [vmem:[%s567_s0 + $0x20] ss:$8 sps:$4 sm:$0xff]   ;;  %v391_v22 = vld [vmem:[%s567_s0 + $0x34] ss:$8 sps:$4 sm:$0xff]  }
   0x8   :  { %v390_v21 = vld [vmem:[%s567_s0 + $0x60] ss:$8 sps:$4 sm:$0xff]   ;;  %v393_v23 = vld [vmem:[%s567_s0 + $0x30] ss:$8 sps:$4 sm:$0xff]  }
   0x9   :  { %v494_v24 = vld [vmem:[%s568_s2] ss:$0 sm:$0xff] }
   0xa   :  { %198 = vmatpush1.bf16.msra.mxu0 %v366_v3  ;;  %356 = vmatpush1.bf16.msra.mxu1 %v366_v3 }
   0xb   :  { %199 = vmatprep.subr.bf16.mxu0 %v394_v0  ;;  %348 = vmatprep.subr.bf16.mxu1 %v394_v0 }
   0xe   :  { %200 = vmatpush1.bf16.msra.mxu0 %v367_v4  ;;  %357 = vmatpush1.bf16.msra.mxu1 %v367_v4 }
   0xf   :  { %201 = vmatprep.subr.bf16.mxu0 %v394_v0  ;;  %349 = vmatprep.subr.bf16.mxu1 %v394_v0 }
  0x12   :  { %202 = vmatpush1.bf16.msra.mxu0 %v368_v7  ;;  %358 = vmatpush1.bf16.msra.mxu1 %v368_v7 }
  0x13   :  { %203 = vmatprep.subr.bf16.mxu0 %v394_v0  ;;  %350 = vmatprep.subr.bf16.mxu1 %v394_v0 }
  0x16   :  { %204 = vmatpush1.bf16.msra.mxu0 %v369_v8  ;;  %359 = vmatpush1.bf16.msra.mxu1 %v369_v8 }
  0x17   :  { %205 = vmatprep.subr.bf16.mxu0 %v394_v0  ;;  %351 = vmatprep.subr.bf16.mxu1 %v394_v0 }
  0x1a   :  { %206 = vmatpush1.bf16.msra.mxu0 %v370_v9  ;;  %360 = vmatpush1.bf16.msra.mxu1 %v370_v9 }
  0x1b   :  { %207 = vmatprep.subr.bf16.mxu0 %v394_v0  ;;  %352 = vmatprep.subr.bf16.mxu1 %v394_v0 }
  0x1e   :  { %208 = vmatpush1.bf16.msra.mxu0 %v371_v10  ;;  %361 = vmatpush1.bf16.msra.mxu1 %v371_v10 }
  0x1f   :  { %209 = vmatprep.subr.bf16.mxu0 %v394_v0  ;;  %353 = vmatprep.subr.bf16.mxu1 %v394_v0 }
  0x22   :  { %210 = vmatpush1.bf16.msra.mxu0 %v372_v11  ;;  %362 = vmatpush1.bf16.msra.mxu1 %v372_v11 }
  0x25   :  { %226 = vmatmul.mubr.bf16.vlgmr.msra.gmra.mrb[0].mxu0 %v373_v12  ;;  %258 = vmatmul.mubr.bf16.vlgmr.msra.gmra.mrb[0].mxu1 %v376_v13 }
  0x26   :  { %339 = vmatprep.mubr.msk.bf16.mxu0 %vm171_vm0, %v379_v14  ;;  %343 = vmatprep.mubr.msk.bf16.mxu1 %vm171_vm0, %v382_v15 }
  0x2d   :  { %234 = vmatmul.mubr.bf16.gmra.mrb[4].mxu0 %v381_v16  ;;  %266 = vmatmul.mubr.bf16.gmra.mrb[4].mxu1 %v384_v17 }
  0x2e   :  { %340 = vmatprep.mubr.msk.bf16.mxu0 %vm171_vm0, %v385_v18  ;;  %344 = vmatprep.mubr.msk.bf16.mxu1 %vm171_vm0, %v388_v19 }
  0x35   :  { %242 = vmatmul.mubr.bf16.gmra.mrb[8].mxu0 %v387_v20  ;;  %274 = vmatmul.mubr.bf16.gmra.mrb[8].mxu1 %v390_v21 }
  0x36   :  { %341 = vmatprep.mubr.msk.bf16.mxu0 %vm171_vm0, %v391_v22 }
  0x3d   :  { %250 = vmatmul.mubr.bf16.gmra.mrb[12].mxu0 %v393_v23 }
  0xf8   :  { %v227_v25 = vpop.f32.mrb[0].mxu0  ;;  %v259_v26 = vpop.f32.mrb[0].mxu1 }
  0xf9   :  { %v228_v27 = vadd.f32 %v494_v24, %v227_v25  ;;  %v229_v28 = vpop.f32.mrb[1].mxu0  ;;  %v260_v29 = vadd.f32 %v494_v24, %v259_v26  ;;  %v261_v30 = vpop.f32.mrb[1].mxu1 }
  0xfa   :  { %v230_v31 = vpop.f32.mrb[2].mxu0  ;;  %v262_v32 = vpop.f32.mrb[2].mxu1 }
  0xfb   :  { %v282_v33 = vmax.f32 %v228_v27, 0.0  ;;  %v231_v34 = vadd.f32 %v494_v24, %v230_v31  ;;  %v232_v35 = vpop.f32.mrb[3].mxu0  ;;  %v290_v36 = vmax.f32 %v260_v29, 0.0  ;;  %v263_v37 = vadd.f32 %v494_v24, %v262_v32  ;;  %v264_v38 = vpop.f32.mrb[3].mxu1 }
  0xfd   :  { %296 = vst.msk [vmem:[%s569_s3] sm:$0xff] %vm171_vm0, %v282_v33  ;;  %v283_v39 = vmax.f32 %v231_v34, 0.0  ;;  %304 = vst.msk [vmem:[%s569_s3 + $0x40] sm:$0xff] %vm171_vm0, %v290_v36  ;;  %v291_v40 = vmax.f32 %v263_v37, 0.0 }
  0xff   :  { %297 = vst.msk [vmem:[%s569_s3 + $0x8] sm:$0xff] %vm171_vm0, %v283_v39  ;;  %305 = vst.msk [vmem:[%s569_s3 + $0x48] sm:$0xff] %vm171_vm0, %v291_v40 }
 0x100   :  { %v235_v41 = vpop.f32.mrb[4].mxu0  ;;  %v267_v42 = vpop.f32.mrb[4].mxu1 }
 0x101   :  { %v236_v43 = vadd.f32 %v494_v24, %v235_v41  ;;  %v237_v44 = vpop.f32.mrb[5].mxu0  ;;  %v268_v45 = vadd.f32 %v494_v24, %v267_v42  ;;  %v269_v46 = vpop.f32.mrb[5].mxu1 }
 0x102   :  { %v238_v47 = vpop.f32.mrb[6].mxu0  ;;  %v270_v48 = vpop.f32.mrb[6].mxu1 }
 0x103   :  { %v284_v49 = vmax.f32 %v236_v43, 0.0  ;;  %v239_v50 = vadd.f32 %v494_v24, %v238_v47  ;;  %v240_v51 = vpop.f32.mrb[7].mxu0  ;;  %v292_v52 = vmax.f32 %v268_v45, 0.0  ;;  %v271_v53 = vadd.f32 %v494_v24, %v270_v48  ;;  %v272_v54 = vpop.f32.mrb[7].mxu1 }
 0x105   :  { %298 = vst.msk [vmem:[%s569_s3 + $0x10] sm:$0xff] %vm171_vm0, %v284_v49  ;;  %v285_v55 = vmax.f32 %v239_v50, 0.0  ;;  %306 = vst.msk [vmem:[%s569_s3 + $0x50] sm:$0xff] %vm171_vm0, %v292_v52  ;;  %v293_v56 = vmax.f32 %v271_v53, 0.0 }
 0x107   :  { %299 = vst.msk [vmem:[%s569_s3 + $0x18] sm:$0xff] %vm171_vm0, %v285_v55  ;;  %307 = vst.msk [vmem:[%s569_s3 + $0x58] sm:$0xff] %vm171_vm0, %v293_v56 }
 0x108   :  { %v243_v57 = vpop.f32.mrb[8].mxu0  ;;  %v275_v58 = vpop.f32.mrb[8].mxu1 }
 0x109   :  { %v244_v59 = vadd.f32 %v494_v24, %v243_v57  ;;  %v245_v60 = vpop.f32.mrb[9].mxu0  ;;  %v276_v61 = vadd.f32 %v494_v24, %v275_v58  ;;  %v277_v62 = vpop.f32.mrb[9].mxu1 }
 0x10a   :  { %v246_v63 = vpop.f32.mrb[10].mxu0  ;;  %v278_v0 = vpop.f32.mrb[10].mxu1 }
 0x10b   :  { %v286_v1 = vmax.f32 %v244_v59, 0.0  ;;  %v247_v2 = vadd.f32 %v494_v24, %v246_v63  ;;  %v248_v3 = vpop.f32.mrb[11].mxu0  ;;  %v294_v4 = vmax.f32 %v276_v61, 0.0  ;;  %v279_v5 = vadd.f32 %v494_v24, %v278_v0  ;;  %v280_v6 = vpop.f32.mrb[11].mxu1 }
 0x10d   :  { %300 = vst.msk [vmem:[%s569_s3 + $0x20] sm:$0xff] %vm171_vm0, %v286_v1  ;;  %v287_v7 = vmax.f32 %v247_v2, 0.0  ;;  %308 = vst.msk [vmem:[%s569_s3 + $0x60] sm:$0xff] %vm171_vm0, %v294_v4  ;;  %v295_v8 = vmax.f32 %v279_v5, 0.0 }
 0x10f   :  { %301 = vst.msk [vmem:[%s569_s3 + $0x28] sm:$0xff] %vm171_vm0, %v287_v7  ;;  %309 = vst.msk [vmem:[%s569_s3 + $0x68] sm:$0xff] %vm171_vm0, %v295_v8 }
 0x110   :  { %v251_v9 = vpop.f32.mrb[12].mxu0 }
 0x111   :  { %v252_v10 = vadd.f32 %v494_v24, %v251_v9  ;;  %v253_v11 = vpop.f32.mrb[13].mxu0 }
 0x112   :  { %v254_v12 = vpop.f32.mrb[14].mxu0 }
 0x113   :  { %v288_v13 = vmax.f32 %v252_v10, 0.0  ;;  %v255_v14 = vadd.f32 %v494_v24, %v254_v12  ;;  %v256_v15 = vpop.f32.mrb[15].mxu0 }
 0x115   :  { %302 = vst.msk [vmem:[%s569_s3 + $0x30] sm:$0xff] %vm171_vm0, %v288_v13  ;;  %v289_v16 = vmax.f32 %v255_v14, 0.0 }
 0x117   :  { %303 = vst.msk [vmem:[%s569_s3 + $0x38] sm:$0xff] %vm171_vm0, %v289_v16 }

// kernel: _lambda_.23
= control target key start
LH: loop header
LB: loop body
LE: loop exit
PB: predicated region body
PF: predicated region fallthrough
CT: control target
= control target key end

     0   :  { %v411_v0 = vmov 0   ;;  %vm174_vm0 = vcmask 130048   ;;  %s630_s1 = inlined_call_operand.vmem [shape: bf16[144,16], index: 1, kind: input, shape index: {}]   ;;  %s631_s0 = inlined_call_operand.vmem [shape: bf16[112,144], index: 0, kind: input, shape index: {}]   ;;  %s632_s2 = inlined_call_operand.vmem [shape: f32[1,16], index: 2, kind: input, shape index: {}]   ;;  %s633_s3 = inlined_call_operand.vmem [shape: f32[112,16], index: 3, kind: input, shape index: {}]   ;;  %s634_s4 = inlined_call_operand.vmem [shape: f32[112,16], index: 4, kind: output, shape index: {}]  }
   0x1   :  { %196 = vmatprep.subr.bf16.mxu0 %v411_v0  ;;  %v381_v1 = vld [vmem:[%s630_s1] sm:$0xff]   ;;  %362 = vmatprep.subr.bf16.mxu1 %v411_v0  ;;  %v382_v2 = vld [vmem:[%s630_s1 + $0x8] sm:$0xff]   ;;  %v383_v3 = vld [vmem:[%s630_s1 + $0x10] sm:$0xff]  }
   0x2   :  { %197 = vmatpush1.bf16.msra.mxu0 %v381_v1  ;;  %371 = vmatpush1.bf16.msra.mxu1 %v381_v1  ;;  %v384_v4 = vld [vmem:[%s630_s1 + $0x18] sm:$0xff]   ;;  %v392_v5 = vld [vmem:[%s631_s0 + $0x4] ss:$8 sps:$4 sm:$0xff]   ;;  %v387_v9 = vld [vmem:[%s630_s1 + $0x30] sm:$0xff]  }
   0x3   :  { %198 = vmatprep.subr.bf16.mxu0 %v411_v0  ;;  %363 = vmatprep.subr.bf16.mxu1 %v411_v0  ;;  %v395_v6 = vld [vmem:[%s631_s0 + $0x44] ss:$8 sps:$4 sm:$0xff]   ;;  %v388_v10 = vld [vmem:[%s630_s1 + $0x38] sm:$0xff]   ;;  %v390_v12 = vld [vmem:[%s631_s0] ss:$8 sps:$4 sm:$0xff]  }
   0x4   :  { %355 = vmatprep.mubr.msk.bf16.mxu0 %vm174_vm0, %v392_v5  ;;  %359 = vmatprep.mubr.msk.bf16.mxu1 %vm174_vm0, %v395_v6  ;;  %v385_v7 = vld [vmem:[%s630_s1 + $0x20] sm:$0xff]   ;;  %v386_v8 = vld [vmem:[%s630_s1 + $0x28] sm:$0xff]   ;;  %v396_v14 = vld [vmem:[%s631_s0 + $0x14] ss:$8 sps:$4 sm:$0xff]  }
   0x5   :  { %v389_v11 = vld [vmem:[%s630_s1 + $0x40] sm:$0xff]   ;;  %v399_v15 = vld [vmem:[%s631_s0 + $0x54] ss:$8 sps:$4 sm:$0xff]   ;;  %v398_v16 = vld [vmem:[%s631_s0 + $0x10] ss:$8 sps:$4 sm:$0xff]  }
   0x6   :  { %199 = vmatpush1.bf16.msra.mxu0 %v382_v2  ;;  %372 = vmatpush1.bf16.msra.mxu1 %v382_v2  ;;  %v393_v13 = vld [vmem:[%s631_s0 + $0x40] ss:$8 sps:$4 sm:$0xff]   ;;  %v401_v17 = vld [vmem:[%s631_s0 + $0x50] ss:$8 sps:$4 sm:$0xff]   ;;  %v402_v18 = vld [vmem:[%s631_s0 + $0x24] ss:$8 sps:$4 sm:$0xff]  }
   0x7   :  { %200 = vmatprep.subr.bf16.mxu0 %v411_v0  ;;  %364 = vmatprep.subr.bf16.mxu1 %v411_v0  ;;  %v405_v19 = vld [vmem:[%s631_s0 + $0x64] ss:$8 sps:$4 sm:$0xff]   ;;  %v404_v20 = vld [vmem:[%s631_s0 + $0x20] ss:$8 sps:$4 sm:$0xff]   ;;  %v408_v22 = vld [vmem:[%s631_s0 + $0x34] ss:$8 sps:$4 sm:$0xff]  }
   0x8   :  { %v407_v21 = vld [vmem:[%s631_s0 + $0x60] ss:$8 sps:$4 sm:$0xff]   ;;  %v410_v23 = vld [vmem:[%s631_s0 + $0x30] ss:$8 sps:$4 sm:$0xff]  }
   0x9   :  { %v516_v24 = vld [vmem:[%s632_s2] ss:$0 sm:$0xff]  ;;  %v286_v34 = vld [vmem:[%s633_s3 + $0x8] sm:$0xff]  ;;  %v287_v46 = vld [vmem:[%s633_s3 + $0x10] sm:$0xff] }
   0xa   :  { %201 = vmatpush1.bf16.msra.mxu0 %v383_v3  ;;  %373 = vmatpush1.bf16.msra.mxu1 %v383_v3  ;;  %v285_v26 = vld [vmem:[%s633_s3] sm:$0xff]  ;;  %v294_v36 = vld [vmem:[%s633_s3 + $0x48] sm:$0xff]  ;;  %v295_v48 = vld [vmem:[%s633_s3 + $0x50] sm:$0xff] }
   0xb   :  { %202 = vmatprep.subr.bf16.mxu0 %v411_v0  ;;  %365 = vmatprep.subr.bf16.mxu1 %v411_v0  ;;  %v293_v28 = vld [vmem:[%s633_s3 + $0x40] sm:$0xff]  ;;  %v288_v54 = vld [vmem:[%s633_s3 + $0x18] sm:$0xff] }
   0xc   :  { %v296_v56 = vld [vmem:[%s633_s3 + $0x58] sm:$0xff]  ;;  %v289_v2 = vld [vmem:[%s633_s3 + $0x20] sm:$0xff] }
   0xe   :  { %203 = vmatpush1.bf16.msra.mxu0 %v384_v4  ;;  %374 = vmatpush1.bf16.msra.mxu1 %v384_v4  ;;  %v297_v4 = vld [vmem:[%s633_s3 + $0x60] sm:$0xff] }
   0xf   :  { %204 = vmatprep.subr.bf16.mxu0 %v411_v0  ;;  %366 = vmatprep.subr.bf16.mxu1 %v411_v0 }
  0x12   :  { %205 = vmatpush1.bf16.msra.mxu0 %v385_v7  ;;  %375 = vmatpush1.bf16.msra.mxu1 %v385_v7 }
  0x13   :  { %206 = vmatprep.subr.bf16.mxu0 %v411_v0  ;;  %367 = vmatprep.subr.bf16.mxu1 %v411_v0 }
  0x16   :  { %207 = vmatpush1.bf16.msra.mxu0 %v386_v8  ;;  %376 = vmatpush1.bf16.msra.mxu1 %v386_v8 }
  0x17   :  { %208 = vmatprep.subr.bf16.mxu0 %v411_v0  ;;  %368 = vmatprep.subr.bf16.mxu1 %v411_v0 }
  0x1a   :  { %209 = vmatpush1.bf16.msra.mxu0 %v387_v9  ;;  %377 = vmatpush1.bf16.msra.mxu1 %v387_v9 }
  0x1b   :  { %210 = vmatprep.subr.bf16.mxu0 %v411_v0  ;;  %369 = vmatprep.subr.bf16.mxu1 %v411_v0 }
  0x1e   :  { %211 = vmatpush1.bf16.msra.mxu0 %v388_v10  ;;  %378 = vmatpush1.bf16.msra.mxu1 %v388_v10  ;;  %v290_v10 = vld [vmem:[%s633_s3 + $0x28] sm:$0xff] }
  0x1f   :  { %212 = vmatprep.subr.bf16.mxu0 %v411_v0  ;;  %370 = vmatprep.subr.bf16.mxu1 %v411_v0 }
  0x22   :  { %213 = vmatpush1.bf16.msra.mxu0 %v389_v11  ;;  %379 = vmatpush1.bf16.msra.mxu1 %v389_v11 }
  0x25   :  { %229 = vmatmul.mubr.bf16.vlgmr.msra.gmra.mrb[0].mxu0 %v390_v12  ;;  %261 = vmatmul.mubr.bf16.vlgmr.msra.gmra.mrb[0].mxu1 %v393_v13  ;;  %v298_v12 = vld [vmem:[%s633_s3 + $0x68] sm:$0xff] }
  0x26   :  { %356 = vmatprep.mubr.msk.bf16.mxu0 %vm174_vm0, %v396_v14  ;;  %360 = vmatprep.mubr.msk.bf16.mxu1 %vm174_vm0, %v399_v15 }
  0x2d   :  { %237 = vmatmul.mubr.bf16.gmra.mrb[4].mxu0 %v398_v16  ;;  %269 = vmatmul.mubr.bf16.gmra.mrb[4].mxu1 %v401_v17 }
  0x2e   :  { %357 = vmatprep.mubr.msk.bf16.mxu0 %vm174_vm0, %v402_v18  ;;  %361 = vmatprep.mubr.msk.bf16.mxu1 %vm174_vm0, %v405_v19 }
  0x35   :  { %245 = vmatmul.mubr.bf16.gmra.mrb[8].mxu0 %v404_v20  ;;  %277 = vmatmul.mubr.bf16.gmra.mrb[8].mxu1 %v407_v21 }
  0x36   :  { %358 = vmatprep.mubr.msk.bf16.mxu0 %vm174_vm0, %v408_v22  ;;  %v291_v22 = vld [vmem:[%s633_s3 + $0x30] sm:$0xff] }
  0x3d   :  { %253 = vmatmul.mubr.bf16.gmra.mrb[12].mxu0 %v410_v23 }
  0xf8   :  { %v230_v25 = vpop.f32.mrb[0].mxu0  ;;  %v262_v27 = vpop.f32.mrb[0].mxu1 }
  0xf9   :  { %v231_v29 = vadd.f32 %v516_v24, %v230_v25  ;;  %v232_v30 = vpop.f32.mrb[1].mxu0  ;;  %v263_v31 = vadd.f32 %v516_v24, %v262_v27  ;;  %v264_v32 = vpop.f32.mrb[1].mxu1  ;;  %v292_v27 = vld [vmem:[%s633_s3 + $0x38] sm:$0xff] }
  0xfa   :  { %v233_v33 = vpop.f32.mrb[2].mxu0  ;;  %v265_v35 = vpop.f32.mrb[2].mxu1 }
  0xfb   :  { %v299_v37 = vadd.f32 %v285_v26, %v231_v29  ;;  %v234_v38 = vadd.f32 %v516_v24, %v233_v33  ;;  %v235_v39 = vpop.f32.mrb[3].mxu0  ;;  %v307_v40 = vadd.f32 %v293_v28, %v263_v31  ;;  %v266_v41 = vadd.f32 %v516_v24, %v265_v35  ;;  %v267_v42 = vpop.f32.mrb[3].mxu1 }
  0xfd   :  { %313 = vst.msk [vmem:[%s634_s4] sm:$0xff] %vm174_vm0, %v299_v37  ;;  %v300_v43 = vadd.f32 %v286_v34, %v234_v38  ;;  %321 = vst.msk [vmem:[%s634_s4 + $0x40] sm:$0xff] %vm174_vm0, %v307_v40  ;;  %v308_v44 = vadd.f32 %v294_v36, %v266_v41 }
  0xff   :  { %314 = vst.msk [vmem:[%s634_s4 + $0x8] sm:$0xff] %vm174_vm0, %v300_v43  ;;  %322 = vst.msk [vmem:[%s634_s4 + $0x48] sm:$0xff] %vm174_vm0, %v308_v44 }
 0x100   :  { %v238_v45 = vpop.f32.mrb[4].mxu0  ;;  %v270_v47 = vpop.f32.mrb[4].mxu1 }
 0x101   :  { %v239_v49 = vadd.f32 %v516_v24, %v238_v45  ;;  %v240_v50 = vpop.f32.mrb[5].mxu0  ;;  %v271_v51 = vadd.f32 %v516_v24, %v270_v47  ;;  %v272_v52 = vpop.f32.mrb[5].mxu1 }
 0x102   :  { %v241_v53 = vpop.f32.mrb[6].mxu0  ;;  %v273_v55 = vpop.f32.mrb[6].mxu1 }
 0x103   :  { %v301_v57 = vadd.f32 %v287_v46, %v239_v49  ;;  %v242_v58 = vadd.f32 %v516_v24, %v241_v53  ;;  %v243_v59 = vpop.f32.mrb[7].mxu0  ;;  %v309_v60 = vadd.f32 %v295_v48, %v271_v51  ;;  %v274_v61 = vadd.f32 %v516_v24, %v273_v55  ;;  %v275_v62 = vpop.f32.mrb[7].mxu1 }
 0x105   :  { %315 = vst.msk [vmem:[%s634_s4 + $0x10] sm:$0xff] %vm174_vm0, %v301_v57  ;;  %v302_v63 = vadd.f32 %v288_v54, %v242_v58  ;;  %323 = vst.msk [vmem:[%s634_s4 + $0x50] sm:$0xff] %vm174_vm0, %v309_v60  ;;  %v310_v0 = vadd.f32 %v296_v56, %v274_v61 }
 0x107   :  { %316 = vst.msk [vmem:[%s634_s4 + $0x18] sm:$0xff] %vm174_vm0, %v302_v63  ;;  %324 = vst.msk [vmem:[%s634_s4 + $0x58] sm:$0xff] %vm174_vm0, %v310_v0 }
 0x108   :  { %v246_v1 = vpop.f32.mrb[8].mxu0  ;;  %v278_v3 = vpop.f32.mrb[8].mxu1 }
 0x109   :  { %v247_v5 = vadd.f32 %v516_v24, %v246_v1  ;;  %v248_v6 = vpop.f32.mrb[9].mxu0  ;;  %v279_v7 = vadd.f32 %v516_v24, %v278_v3  ;;  %v280_v8 = vpop.f32.mrb[9].mxu1 }
 0x10a   :  { %v249_v9 = vpop.f32.mrb[10].mxu0  ;;  %v281_v11 = vpop.f32.mrb[10].mxu1 }
 0x10b   :  { %v303_v13 = vadd.f32 %v289_v2, %v247_v5  ;;  %v250_v14 = vadd.f32 %v516_v24, %v249_v9  ;;  %v251_v15 = vpop.f32.mrb[11].mxu0  ;;  %v311_v16 = vadd.f32 %v297_v4, %v279_v7  ;;  %v282_v17 = vadd.f32 %v516_v24, %v281_v11  ;;  %v283_v18 = vpop.f32.mrb[11].mxu1 }
 0x10d   :  { %317 = vst.msk [vmem:[%s634_s4 + $0x20] sm:$0xff] %vm174_vm0, %v303_v13  ;;  %v304_v19 = vadd.f32 %v290_v10, %v250_v14  ;;  %325 = vst.msk [vmem:[%s634_s4 + $0x60] sm:$0xff] %vm174_vm0, %v311_v16  ;;  %v312_v20 = vadd.f32 %v298_v12, %v282_v17 }
 0x10f   :  { %318 = vst.msk [vmem:[%s634_s4 + $0x28] sm:$0xff] %vm174_vm0, %v304_v19  ;;  %326 = vst.msk [vmem:[%s634_s4 + $0x68] sm:$0xff] %vm174_vm0, %v312_v20 }
 0x110   :  { %v254_v21 = vpop.f32.mrb[12].mxu0 }
 0x111   :  { %v255_v23 = vadd.f32 %v516_v24, %v254_v21  ;;  %v256_v25 = vpop.f32.mrb[13].mxu0 }
 0x112   :  { %v257_v26 = vpop.f32.mrb[14].mxu0 }
 0x113   :  { %v305_v28 = vadd.f32 %v291_v22, %v255_v23  ;;  %v258_v29 = vadd.f32 %v516_v24, %v257_v26  ;;  %v259_v30 = vpop.f32.mrb[15].mxu0 }
 0x115   :  { %319 = vst.msk [vmem:[%s634_s4 + $0x30] sm:$0xff] %vm174_vm0, %v305_v28  ;;  %v306_v31 = vadd.f32 %v292_v27, %v258_v29 }
 0x117   :  { %320 = vst.msk [vmem:[%s634_s4 + $0x38] sm:$0xff] %vm174_vm0, %v306_v31 }

// kernel: _lambda_.25
= control target key start
LH: loop header
LB: loop body
LE: loop exit
PB: predicated region body
PF: predicated region fallthrough
CT: control target
= control target key end

     0   :  { %v921_v0 = vmov 0   ;;  %vm369_vm0 = vcmask 130048   ;;  %vm678_vm1 = vcmask 64512   ;;  %s1399_s1 = inlined_call_operand.vmem [shape: bf16[144,8], index: 1, kind: input, shape index: {}]   ;;  %s1400_s0 = inlined_call_operand.vmem [shape: bf16[400,144], index: 0, kind: input, shape index: {}]   ;;  %s1401_s2 = inlined_call_operand.vmem [shape: f32[1,8], index: 2, kind: input, shape index: {}]   ;;  %s1402_s3 = inlined_call_operand.vmem [shape: f32[400,8], index: 3, kind: output, shape index: {}]  }
   0x1   :  { %445 = vmatprep.subr.bf16.mxu0 %v921_v0  ;;  %v837_v1 = vld [vmem:[%s1399_s1] sm:$0xff]   ;;  %818 = vmatprep.subr.bf16.mxu1 %v921_v0  ;;  %v838_v2 = vld [vmem:[%s1399_s1 + $0x8] sm:$0xff]   ;;  %v839_v3 = vld [vmem:[%s1399_s1 + $0x10] sm:$0xff]  }
   0x2   :  { %446 = vmatpush1.bf16.msra.mxu0 %v837_v1  ;;  %827 = vmatpush1.bf16.msra.mxu1 %v837_v1  ;;  %v840_v4 = vld [vmem:[%s1399_s1 + $0x18] sm:$0xff]   ;;  %v848_v5 = vld [vmem:[%s1400_s0 + $0x4] ss:$8 sps:$4 sm:$0xff]   ;;  %v843_v9 = vld [vmem:[%s1399_s1 + $0x30] sm:$0xff]  }
   0x3   :  { %447 = vmatprep.subr.bf16.mxu0 %v921_v0  ;;  %819 = vmatprep.subr.bf16.mxu1 %v921_v0  ;;  %v851_v6 = vld [vmem:[%s1400_s0 + $0xd4] ss:$8 sps:$4 sm:$0xff]   ;;  %v841_v7 = vld [vmem:[%s1399_s1 + $0x20] sm:$0xff]   ;;  %v842_v8 = vld [vmem:[%s1399_s1 + $0x28] sm:$0xff]  }
   0x4   :  { %793 = vmatprep.mubr.msk.bf16.mxu0 %vm369_vm0, %v848_v5  ;;  %806 = vmatprep.mubr.msk.bf16.mxu1 %vm369_vm0, %v851_v6  ;;  %v844_v10 = vld [vmem:[%s1399_s1 + $0x38] sm:$0xff]   ;;  %v845_v11 = vld [vmem:[%s1399_s1 + $0x40] sm:$0xff]  }
   0x5   :  { %v846_v12 = vld [vmem:[%s1400_s0] ss:$8 sps:$4 sm:$0xff]   ;;  %v849_v13 = vld [vmem:[%s1400_s0 + $0xd0] ss:$8 sps:$4 sm:$0xff]   ;;  %v852_v14 = vld [vmem:[%s1400_s0 + $0x14] ss:$8 sps:$4 sm:$0xff]  }
   0x6   :  { %448 = vmatpush1.bf16.msra.mxu0 %v838_v2  ;;  %828 = vmatpush1.bf16.msra.mxu1 %v838_v2  ;;  %v855_v15 = vld [vmem:[%s1400_s0 + $0xe4] ss:$8 sps:$4 sm:$0xff]   ;;  %v854_v16 = vld [vmem:[%s1400_s0 + $0x10] ss:$8 sps:$4 sm:$0xff]   ;;  %v857_v17 = vld [vmem:[%s1400_s0 + $0xe0] ss:$8 sps:$4 sm:$0xff]  }
   0x7   :  { %449 = vmatprep.subr.bf16.mxu0 %v921_v0  ;;  %820 = vmatprep.subr.bf16.mxu1 %v921_v0  ;;  %v858_v18 = vld [vmem:[%s1400_s0 + $0x24] ss:$8 sps:$4 sm:$0xff]   ;;  %v861_v19 = vld [vmem:[%s1400_s0 + $0xf4] ss:$8 sps:$4 sm:$0xff]   ;;  %v860_v20 = vld [vmem:[%s1400_s0 + $0x20] ss:$8 sps:$4 sm:$0xff]  }
   0x8   :  { %v863_v21 = vld [vmem:[%s1400_s0 + $0xf0] ss:$8 sps:$4 sm:$0xff]   ;;  %v864_v22 = vld [vmem:[%s1400_s0 + $0x34] ss:$8 sps:$4 sm:$0xff]   ;;  %v867_v23 = vld [vmem:[%s1400_s0 + $0x104] ss:$8 sps:$4 sm:$0xff]  }
   0x9   :  { %v866_v24 = vld [vmem:[%s1400_s0 + $0x30] ss:$8 sps:$4 sm:$0xff]   ;;  %v869_v25 = vld [vmem:[%s1400_s0 + $0x100] ss:$8 sps:$4 sm:$0xff]   ;;  %v870_v26 = vld [vmem:[%s1400_s0 + $0x44] ss:$8 sps:$4 sm:$0xff]  }
   0xa   :  { %450 = vmatpush1.bf16.msra.mxu0 %v839_v3  ;;  %829 = vmatpush1.bf16.msra.mxu1 %v839_v3  ;;  %v873_v27 = vld [vmem:[%s1400_s0 + $0x114] ss:$8 sps:$4 sm:$0xff]   ;;  %v872_v28 = vld [vmem:[%s1400_s0 + $0x40] ss:$8 sps:$4 sm:$0xff]   ;;  %v875_v29 = vld [vmem:[%s1400_s0 + $0x110] ss:$8 sps:$4 sm:$0xff]  }
   0xb   :  { %451 = vmatprep.subr.bf16.mxu0 %v921_v0  ;;  %821 = vmatprep.subr.bf16.mxu1 %v921_v0  ;;  %v876_v30 = vld [vmem:[%s1400_s0 + $0x54] ss:$8 sps:$4 sm:$0xff]   ;;  %v879_v31 = vld [vmem:[%s1400_s0 + $0x124] ss:$8 sps:$4 sm:$0xff]   ;;  %v878_v32 = vld [vmem:[%s1400_s0 + $0x50] ss:$8 sps:$4 sm:$0xff]  }
   0xc   :  { %v881_v33 = vld [vmem:[%s1400_s0 + $0x120] ss:$8 sps:$4 sm:$0xff]   ;;  %v882_v34 = vld [vmem:[%s1400_s0 + $0x64] ss:$8 sps:$4 sm:$0xff]   ;;  %v885_v35 = vld [vmem:[%s1400_s0 + $0x134] ss:$8 sps:$4 sm:$0xff]  }
   0xd   :  { %v884_v36 = vld [vmem:[%s1400_s0 + $0x60] ss:$8 sps:$4 sm:$0xff]   ;;  %v887_v37 = vld [vmem:[%s1400_s0 + $0x130] ss:$8 sps:$4 sm:$0xff]   ;;  %v888_v38 = vld [vmem:[%s1400_s0 + $0x74] ss:$8 sps:$4 sm:$0xff]  }
   0xe   :  { %452 = vmatpush1.bf16.msra.mxu0 %v840_v4  ;;  %830 = vmatpush1.bf16.msra.mxu1 %v840_v4  ;;  %v891_v39 = vld [vmem:[%s1400_s0 + $0x144] ss:$8 sps:$4 sm:$0xff]   ;;  %v890_v40 = vld [vmem:[%s1400_s0 + $0x70] ss:$8 sps:$4 sm:$0xff]   ;;  %v893_v41 = vld [vmem:[%s1400_s0 + $0x140] ss:$8 sps:$4 sm:$0xff]  }
   0xf   :  { %453 = vmatprep.subr.bf16.mxu0 %v921_v0  ;;  %822 = vmatprep.subr.bf16.mxu1 %v921_v0  ;;  %v894_v42 = vld [vmem:[%s1400_s0 + $0x84] ss:$8 sps:$4 sm:$0xff]   ;;  %v897_v43 = vld [vmem:[%s1400_s0 + $0x154] ss:$8 sps:$4 sm:$0xff]   ;;  %v896_v44 = vld [vmem:[%s1400_s0 + $0x80] ss:$8 sps:$4 sm:$0xff]  }
  0x10   :  { %v899_v45 = vld [vmem:[%s1400_s0 + $0x150] ss:$8 sps:$4 sm:$0xff]   ;;  %v900_v46 = vld [vmem:[%s1400_s0 + $0x94] ss:$8 sps:$4 sm:$0xff]   ;;  %v903_v47 = vld [vmem:[%s1400_s0 + $0x164] ss:$8 sps:$4 sm:$0xff]  }
  0x11   :  { %v902_v48 = vld [vmem:[%s1400_s0 + $0x90] ss:$8 sps:$4 sm:$0xff]   ;;  %v905_v49 = vld [vmem:[%s1400_s0 + $0x160] ss:$8 sps:$4 sm:$0xff]   ;;  %v906_v50 = vld [vmem:[%s1400_s0 + $0xa4] ss:$8 sps:$4 sm:$0xff]  }
  0x12   :  { %454 = vmatpush1.bf16.msra.mxu0 %v841_v7  ;;  %831 = vmatpush1.bf16.msra.mxu1 %v841_v7  ;;  %v909_v51 = vld [vmem:[%s1400_s0 + $0x174] ss:$8 sps:$4 sm:$0xff]   ;;  %v908_v52 = vld [vmem:[%s1400_s0 + $0xa0] ss:$8 sps:$4 sm:$0xff]   ;;  %v911_v53 = vld [vmem:[%s1400_s0 + $0x170] ss:$8 sps:$4 sm:$0xff]  }
  0x13   :  { %455 = vmatprep.subr.bf16.mxu0 %v921_v0  ;;  %823 = vmatprep.subr.bf16.mxu1 %v921_v0  ;;  %v912_v54 = vld [vmem:[%s1400_s0 + $0xb4] ss:$8 sps:$4 sm:$0xff]   ;;  %v915_v55 = vld [vmem:[%s1400_s0 + $0x184] ss:$8 sps:$4 sm:$0xff]   ;;  %v914_v56 = vld [vmem:[%s1400_s0 + $0xb0] ss:$8 sps:$4 sm:$0xff]  }
  0x14   :  { %v917_v57 = vld [vmem:[%s1400_s0 + $0x180] ss:$8 sps:$4 sm:$0xff]   ;;  %v918_v58 = vld [vmem:[%s1400_s0 + $0xc4] ss:$8 sps:$4 sm:$0xff]  }
  0x15   :  { %v920_v59 = vld [vmem:[%s1400_s0 + $0xc0] ss:$8 sps:$4 sm:$0xff]  }
  0x16   :  { %456 = vmatpush1.bf16.msra.mxu0 %v842_v8  ;;  %832 = vmatpush1.bf16.msra.mxu1 %v842_v8  ;;  %v1147_v60 = vld [vmem:[%s1401_s2] ss:$0 sm:$0xff] }
  0x17   :  { %457 = vmatprep.subr.bf16.mxu0 %v921_v0  ;;  %824 = vmatprep.subr.bf16.mxu1 %v921_v0 }
  0x1a   :  { %458 = vmatpush1.bf16.msra.mxu0 %v843_v9  ;;  %833 = vmatpush1.bf16.msra.mxu1 %v843_v9 }
  0x1b   :  { %459 = vmatprep.subr.bf16.mxu0 %v921_v0  ;;  %825 = vmatprep.subr.bf16.mxu1 %v921_v0 }
  0x1e   :  { %460 = vmatpush1.bf16.msra.mxu0 %v844_v10  ;;  %834 = vmatpush1.bf16.msra.mxu1 %v844_v10 }
  0x1f   :  { %461 = vmatprep.subr.bf16.mxu0 %v921_v0  ;;  %826 = vmatprep.subr.bf16.mxu1 %v921_v0 }
  0x22   :  { %462 = vmatpush1.bf16.msra.mxu0 %v845_v11  ;;  %835 = vmatpush1.bf16.msra.mxu1 %v845_v11 }
  0x25   :  { %478 = vmatmul.mubr.bf16.vlgmr.msra.gmra.mrb[0].mxu0 %v846_v12  ;;  %582 = vmatmul.mubr.bf16.vlgmr.msra.gmra.mrb[0].mxu1 %v849_v13 }
  0x26   :  { %794 = vmatprep.mubr.msk.bf16.mxu0 %vm369_vm0, %v852_v14  ;;  %807 = vmatprep.mubr.msk.bf16.mxu1 %vm369_vm0, %v855_v15 }
  0x2d   :  { %486 = vmatmul.mubr.bf16.gmra.mrb[4].mxu0 %v854_v16  ;;  %590 = vmatmul.mubr.bf16.gmra.mrb[4].mxu1 %v857_v17 }
  0x2e   :  { %795 = vmatprep.mubr.msk.bf16.mxu0 %vm369_vm0, %v858_v18  ;;  %808 = vmatprep.mubr.msk.bf16.mxu1 %vm369_vm0, %v861_v19 }
  0x35   :  { %494 = vmatmul.mubr.bf16.gmra.mrb[8].mxu0 %v860_v20  ;;  %598 = vmatmul.mubr.bf16.gmra.mrb[8].mxu1 %v863_v21 }
  0x36   :  { %796 = vmatprep.mubr.msk.bf16.mxu0 %vm369_vm0, %v864_v22  ;;  %809 = vmatprep.mubr.msk.bf16.mxu1 %vm369_vm0, %v867_v23 }
  0x3d   :  { %502 = vmatmul.mubr.bf16.gmra.mrb[12].mxu0 %v866_v24  ;;  %606 = vmatmul.mubr.bf16.gmra.mrb[12].mxu1 %v869_v25 }
  0x3e   :  { %797 = vmatprep.mubr.msk.bf16.mxu0 %vm369_vm0, %v870_v26  ;;  %810 = vmatprep.mubr.msk.bf16.mxu1 %vm369_vm0, %v873_v27 }
  0x45   :  { %510 = vmatmul.mubr.bf16.gmra.mrb[16].mxu0 %v872_v28  ;;  %614 = vmatmul.mubr.bf16.gmra.mrb[16].mxu1 %v875_v29 }
  0x46   :  { %798 = vmatprep.mubr.msk.bf16.mxu0 %vm369_vm0, %v876_v30  ;;  %811 = vmatprep.mubr.msk.bf16.mxu1 %vm369_vm0, %v879_v31 }
  0x4d   :  { %518 = vmatmul.mubr.bf16.gmra.mrb[20].mxu0 %v878_v32  ;;  %622 = vmatmul.mubr.bf16.gmra.mrb[20].mxu1 %v881_v33 }
  0x4e   :  { %799 = vmatprep.mubr.msk.bf16.mxu0 %vm369_vm0, %v882_v34  ;;  %812 = vmatprep.mubr.msk.bf16.mxu1 %vm369_vm0, %v885_v35 }
  0x55   :  { %526 = vmatmul.mubr.bf16.gmra.mrb[24].mxu0 %v884_v36  ;;  %630 = vmatmul.mubr.bf16.gmra.mrb[24].mxu1 %v887_v37 }
  0x56   :  { %800 = vmatprep.mubr.msk.bf16.mxu0 %vm369_vm0, %v888_v38  ;;  %813 = vmatprep.mubr.msk.bf16.mxu1 %vm369_vm0, %v891_v39 }
  0x5d   :  { %534 = vmatmul.mubr.bf16.gmra.mrb[28].mxu0 %v890_v40  ;;  %638 = vmatmul.mubr.bf16.gmra.mrb[28].mxu1 %v893_v41 }
  0x5e   :  { %801 = vmatprep.mubr.msk.bf16.mxu0 %vm369_vm0, %v894_v42  ;;  %814 = vmatprep.mubr.msk.bf16.mxu1 %vm369_vm0, %v897_v43 }
  0x65   :  { %542 = vmatmul.mubr.bf16.gmra.mrb[32].mxu0 %v896_v44  ;;  %646 = vmatmul.mubr.bf16.gmra.mrb[32].mxu1 %v899_v45 }
  0x66   :  { %802 = vmatprep.mubr.msk.bf16.mxu0 %vm369_vm0, %v900_v46  ;;  %815 = vmatprep.mubr.msk.bf16.mxu1 %vm369_vm0, %v903_v47 }
  0x6d   :  { %550 = vmatmul.mubr.bf16.gmra.mrb[36].mxu0 %v902_v48  ;;  %654 = vmatmul.mubr.bf16.gmra.mrb[36].mxu1 %v905_v49 }
  0x6e   :  { %803 = vmatprep.mubr.msk.bf16.mxu0 %vm369_vm0, %v906_v50  ;;  %816 = vmatprep.mubr.msk.bf16.mxu1 %vm369_vm0, %v909_v51 }
  0x75   :  { %558 = vmatmul.mubr.bf16.gmra.mrb[40].mxu0 %v908_v52  ;;  %662 = vmatmul.mubr.bf16.gmra.mrb[40].mxu1 %v911_v53 }
  0x76   :  { %804 = vmatprep.mubr.msk.bf16.mxu0 %vm369_vm0, %v912_v54  ;;  %817 = vmatprep.mubr.msk.bf16.mxu1 %vm369_vm0, %v915_v55 }
  0x7d   :  { %566 = vmatmul.mubr.bf16.gmra.mrb[44].mxu0 %v914_v56  ;;  %670 = vmatmul.mubr.bf16.gmra.mrb[44].mxu1 %v917_v57 }
  0x7e   :  { %805 = vmatprep.mubr.msk.bf16.mxu0 %vm369_vm0, %v918_v58 }
  0x85   :  { %574 = vmatmul.mubr.bf16.gmra.mrb[48].mxu0 %v920_v59 }
  0xf8   :  { %v479_v61 = vpop.f32.mrb[0].mxu0  ;;  %v583_v62 = vpop.f32.mrb[0].mxu1 }
  0xf9   :  { %v480_v63 = vadd.f32 %v1147_v60, %v479_v61  ;;  %v481_v0 = vpop.f32.mrb[1].mxu0  ;;  %v584_v1 = vadd.f32 %v1147_v60, %v583_v62  ;;  %v585_v2 = vpop.f32.mrb[1].mxu1 }
  0xfa   :  { %v482_v3 = vpop.f32.mrb[2].mxu0  ;;  %v586_v4 = vpop.f32.mrb[2].mxu1 }
  0xfb   :  { %679 = vst.msk [vmem:[%s1402_s3] sm:$0xff] %vm678_vm1, %v480_v63  ;;  %v483_v5 = vadd.f32 %v1147_v60, %v482_v3  ;;  %v484_v6 = vpop.f32.mrb[3].mxu0  ;;  %705 = vst.msk [vmem:[%s1402_s3 + $0xd0] sm:$0xff] %vm678_vm1, %v584_v1  ;;  %v587_v7 = vadd.f32 %v1147_v60, %v586_v4  ;;  %v588_v8 = vpop.f32.mrb[3].mxu1 }
  0xfd   :  { %680 = vst.msk [vmem:[%s1402_s3 + $0x8] sm:$0xff] %vm678_vm1, %v483_v5  ;;  %706 = vst.msk [vmem:[%s1402_s3 + $0xd8] sm:$0xff] %vm678_vm1, %v587_v7 }
 0x100   :  { %v487_v9 = vpop.f32.mrb[4].mxu0  ;;  %v591_v10 = vpop.f32.mrb[4].mxu1 }
 0x101   :  { %v488_v11 = vadd.f32 %v1147_v60, %v487_v9  ;;  %v489_v12 = vpop.f32.mrb[5].mxu0  ;;  %v592_v13 = vadd.f32 %v1147_v60, %v591_v10  ;;  %v593_v14 = vpop.f32.mrb[5].mxu1 }
 0x102   :  { %v490_v15 = vpop.f32.mrb[6].mxu0  ;;  %v594_v16 = vpop.f32.mrb[6].mxu1 }
 0x103   :  { %681 = vst.msk [vmem:[%s1402_s3 + $0x10] sm:$0xff] %vm678_vm1, %v488_v11  ;;  %v491_v17 = vadd.f32 %v1147_v60, %v490_v15  ;;  %v492_v18 = vpop.f32.mrb[7].mxu0  ;;  %707 = vst.msk [vmem:[%s1402_s3 + $0xe0] sm:$0xff] %vm678_vm1, %v592_v13  ;;  %v595_v19 = vadd.f32 %v1147_v60, %v594_v16  ;;  %v596_v20 = vpop.f32.mrb[7].mxu1 }
 0x105   :  { %682 = vst.msk [vmem:[%s1402_s3 + $0x18] sm:$0xff] %vm678_vm1, %v491_v17  ;;  %708 = vst.msk [vmem:[%s1402_s3 + $0xe8] sm:$0xff] %vm678_vm1, %v595_v19 }
 0x108   :  { %v495_v21 = vpop.f32.mrb[8].mxu0  ;;  %v599_v22 = vpop.f32.mrb[8].mxu1 }
 0x109   :  { %v496_v23 = vadd.f32 %v1147_v60, %v495_v21  ;;  %v497_v24 = vpop.f32.mrb[9].mxu0  ;;  %v600_v25 = vadd.f32 %v1147_v60, %v599_v22  ;;  %v601_v26 = vpop.f32.mrb[9].mxu1 }
 0x10a   :  { %v498_v27 = vpop.f32.mrb[10].mxu0  ;;  %v602_v28 = vpop.f32.mrb[10].mxu1 }
 0x10b   :  { %683 = vst.msk [vmem:[%s1402_s3 + $0x20] sm:$0xff] %vm678_vm1, %v496_v23  ;;  %v499_v29 = vadd.f32 %v1147_v60, %v498_v27  ;;  %v500_v30 = vpop.f32.mrb[11].mxu0  ;;  %709 = vst.msk [vmem:[%s1402_s3 + $0xf0] sm:$0xff] %vm678_vm1, %v600_v25  ;;  %v603_v31 = vadd.f32 %v1147_v60, %v602_v28  ;;  %v604_v32 = vpop.f32.mrb[11].mxu1 }
 0x10d   :  { %684 = vst.msk [vmem:[%s1402_s3 + $0x28] sm:$0xff] %vm678_vm1, %v499_v29  ;;  %710 = vst.msk [vmem:[%s1402_s3 + $0xf8] sm:$0xff] %vm678_vm1, %v603_v31 }
 0x110   :  { %v503_v33 = vpop.f32.mrb[12].mxu0  ;;  %v607_v34 = vpop.f32.mrb[12].mxu1 }
 0x111   :  { %v504_v35 = vadd.f32 %v1147_v60, %v503_v33  ;;  %v505_v36 = vpop.f32.mrb[13].mxu0  ;;  %v608_v37 = vadd.f32 %v1147_v60, %v607_v34  ;;  %v609_v38 = vpop.f32.mrb[13].mxu1 }
 0x112   :  { %v506_v39 = vpop.f32.mrb[14].mxu0  ;;  %v610_v40 = vpop.f32.mrb[14].mxu1 }
 0x113   :  { %685 = vst.msk [vmem:[%s1402_s3 + $0x30] sm:$0xff] %vm678_vm1, %v504_v35  ;;  %v507_v41 = vadd.f32 %v1147_v60, %v506_v39  ;;  %v508_v42 = vpop.f32.mrb[15].mxu0  ;;  %711 = vst.msk [vmem:[%s1402_s3 + $0x100] sm:$0xff] %vm678_vm1, %v608_v37  ;;  %v611_v43 = vadd.f32 %v1147_v60, %v610_v40  ;;  %v612_v44 = vpop.f32.mrb[15].mxu1 }
 0x115   :  { %686 = vst.msk [vmem:[%s1402_s3 + $0x38] sm:$0xff] %vm678_vm1, %v507_v41  ;;  %712 = vst.msk [vmem:[%s1402_s3 + $0x108] sm:$0xff] %vm678_vm1, %v611_v43 }
 0x118   :  { %v511_v45 = vpop.f32.mrb[16].mxu0  ;;  %v615_v46 = vpop.f32.mrb[16].mxu1 }
 0x119   :  { %v512_v47 = vadd.f32 %v1147_v60, %v511_v45  ;;  %v513_v48 = vpop.f32.mrb[17].mxu0  ;;  %v616_v49 = vadd.f32 %v1147_v60, %v615_v46  ;;  %v617_v50 = vpop.f32.mrb[17].mxu1 }
 0x11a   :  { %v514_v51 = vpop.f32.mrb[18].mxu0  ;;  %v618_v52 = vpop.f32.mrb[18].mxu1 }
 0x11b   :  { %687 = vst.msk [vmem:[%s1402_s3 + $0x40] sm:$0xff] %vm678_vm1, %v512_v47  ;;  %v515_v53 = vadd.f32 %v1147_v60, %v514_v51  ;;  %v516_v54 = vpop.f32.mrb[19].mxu0  ;;  %713 = vst.msk [vmem:[%s1402_s3 + $0x110] sm:$0xff] %vm678_vm1, %v616_v49  ;;  %v619_v55 = vadd.f32 %v1147_v60, %v618_v52  ;;  %v620_v56 = vpop.f32.mrb[19].mxu1 }
 0x11d   :  { %688 = vst.msk [vmem:[%s1402_s3 + $0x48] sm:$0xff] %vm678_vm1, %v515_v53  ;;  %714 = vst.msk [vmem:[%s1402_s3 + $0x118] sm:$0xff] %vm678_vm1, %v619_v55 }
 0x120   :  { %v519_v57 = vpop.f32.mrb[20].mxu0  ;;  %v623_v58 = vpop.f32.mrb[20].mxu1 }
 0x121   :  { %v520_v59 = vadd.f32 %v1147_v60, %v519_v57  ;;  %v521_v61 = vpop.f32.mrb[21].mxu0  ;;  %v624_v62 = vadd.f32 %v1147_v60, %v623_v58  ;;  %v625_v63 = vpop.f32.mrb[21].mxu1 }
 0x122   :  { %v522_v0 = vpop.f32.mrb[22].mxu0  ;;  %v626_v1 = vpop.f32.mrb[22].mxu1 }
 0x123   :  { %689 = vst.msk [vmem:[%s1402_s3 + $0x50] sm:$0xff] %vm678_vm1, %v520_v59  ;;  %v523_v2 = vadd.f32 %v1147_v60, %v522_v0  ;;  %v524_v3 = vpop.f32.mrb[23].mxu0  ;;  %715 = vst.msk [vmem:[%s1402_s3 + $0x120] sm:$0xff] %vm678_vm1, %v624_v62  ;;  %v627_v4 = vadd.f32 %v1147_v60, %v626_v1  ;;  %v628_v5 = vpop.f32.mrb[23].mxu1 }
 0x125   :  { %690 = vst.msk [vmem:[%s1402_s3 + $0x58] sm:$0xff] %vm678_vm1, %v523_v2  ;;  %716 = vst.msk [vmem:[%s1402_s3 + $0x128] sm:$0xff] %vm678_vm1, %v627_v4 }
 0x128   :  { %v527_v6 = vpop.f32.mrb[24].mxu0  ;;  %v631_v7 = vpop.f32.mrb[24].mxu1 }
 0x129   :  { %v528_v8 = vadd.f32 %v1147_v60, %v527_v6  ;;  %v529_v9 = vpop.f32.mrb[25].mxu0  ;;  %v632_v10 = vadd.f32 %v1147_v60, %v631_v7  ;;  %v633_v11 = vpop.f32.mrb[25].mxu1 }
 0x12a   :  { %v530_v12 = vpop.f32.mrb[26].mxu0  ;;  %v634_v13 = vpop.f32.mrb[26].mxu1 }
 0x12b   :  { %691 = vst.msk [vmem:[%s1402_s3 + $0x60] sm:$0xff] %vm678_vm1, %v528_v8  ;;  %v531_v14 = vadd.f32 %v1147_v60, %v530_v12  ;;  %v532_v15 = vpop.f32.mrb[27].mxu0  ;;  %717 = vst.msk [vmem:[%s1402_s3 + $0x130] sm:$0xff] %vm678_vm1, %v632_v10  ;;  %v635_v16 = vadd.f32 %v1147_v60, %v634_v13  ;;  %v636_v17 = vpop.f32.mrb[27].mxu1 }
 0x12d   :  { %692 = vst.msk [vmem:[%s1402_s3 + $0x68] sm:$0xff] %vm678_vm1, %v531_v14  ;;  %718 = vst.msk [vmem:[%s1402_s3 + $0x138] sm:$0xff] %vm678_vm1, %v635_v16 }
 0x130   :  { %v535_v18 = vpop.f32.mrb[28].mxu0  ;;  %v639_v19 = vpop.f32.mrb[28].mxu1 }
 0x131   :  { %v536_v20 = vadd.f32 %v1147_v60, %v535_v18  ;;  %v537_v21 = vpop.f32.mrb[29].mxu0  ;;  %v640_v22 = vadd.f32 %v1147_v60, %v639_v19  ;;  %v641_v23 = vpop.f32.mrb[29].mxu1 }
 0x132   :  { %v538_v24 = vpop.f32.mrb[30].mxu0  ;;  %v642_v25 = vpop.f32.mrb[30].mxu1 }
 0x133   :  { %693 = vst.msk [vmem:[%s1402_s3 + $0x70] sm:$0xff] %vm678_vm1, %v536_v20  ;;  %v539_v26 = vadd.f32 %v1147_v60, %v538_v24  ;;  %v540_v27 = vpop.f32.mrb[31].mxu0  ;;  %719 = vst.msk [vmem:[%s1402_s3 + $0x140] sm:$0xff] %vm678_vm1, %v640_v22  ;;  %v643_v28 = vadd.f32 %v1147_v60, %v642_v25  ;;  %v644_v29 = vpop.f32.mrb[31].mxu1 }
 0x135   :  { %694 = vst.msk [vmem:[%s1402_s3 + $0x78] sm:$0xff] %vm678_vm1, %v539_v26  ;;  %720 = vst.msk [vmem:[%s1402_s3 + $0x148] sm:$0xff] %vm678_vm1, %v643_v28 }
 0x138   :  { %v543_v30 = vpop.f32.mrb[32].mxu0  ;;  %v647_v31 = vpop.f32.mrb[32].mxu1 }
 0x139   :  { %v544_v32 = vadd.f32 %v1147_v60, %v543_v30  ;;  %v545_v33 = vpop.f32.mrb[33].mxu0  ;;  %v648_v34 = vadd.f32 %v1147_v60, %v647_v31  ;;  %v649_v35 = vpop.f32.mrb[33].mxu1 }
 0x13a   :  { %v546_v36 = vpop.f32.mrb[34].mxu0  ;;  %v650_v37 = vpop.f32.mrb[34].mxu1 }
 0x13b   :  { %695 = vst.msk [vmem:[%s1402_s3 + $0x80] sm:$0xff] %vm678_vm1, %v544_v32  ;;  %v547_v38 = vadd.f32 %v1147_v60, %v546_v36  ;;  %v548_v39 = vpop.f32.mrb[35].mxu0  ;;  %721 = vst.msk [vmem:[%s1402_s3 + $0x150] sm:$0xff] %vm678_vm1, %v648_v34  ;;  %v651_v40 = vadd.f32 %v1147_v60, %v650_v37  ;;  %v652_v41 = vpop.f32.mrb[35].mxu1 }
 0x13d   :  { %696 = vst.msk [vmem:[%s1402_s3 + $0x88] sm:$0xff] %vm678_vm1, %v547_v38  ;;  %722 = vst.msk [vmem:[%s1402_s3 + $0x158] sm:$0xff] %vm678_vm1, %v651_v40 }
 0x140   :  { %v551_v42 = vpop.f32.mrb[36].mxu0  ;;  %v655_v43 = vpop.f32.mrb[36].mxu1 }
 0x141   :  { %v552_v44 = vadd.f32 %v1147_v60, %v551_v42  ;;  %v553_v45 = vpop.f32.mrb[37].mxu0  ;;  %v656_v46 = vadd.f32 %v1147_v60, %v655_v43  ;;  %v657_v47 = vpop.f32.mrb[37].mxu1 }
 0x142   :  { %v554_v48 = vpop.f32.mrb[38].mxu0  ;;  %v658_v49 = vpop.f32.mrb[38].mxu1 }
 0x143   :  { %697 = vst.msk [vmem:[%s1402_s3 + $0x90] sm:$0xff] %vm678_vm1, %v552_v44  ;;  %v555_v50 = vadd.f32 %v1147_v60, %v554_v48  ;;  %v556_v51 = vpop.f32.mrb[39].mxu0  ;;  %723 = vst.msk [vmem:[%s1402_s3 + $0x160] sm:$0xff] %vm678_vm1, %v656_v46  ;;  %v659_v52 = vadd.f32 %v1147_v60, %v658_v49  ;;  %v660_v53 = vpop.f32.mrb[39].mxu1 }
 0x145   :  { %698 = vst.msk [vmem:[%s1402_s3 + $0x98] sm:$0xff] %vm678_vm1, %v555_v50  ;;  %724 = vst.msk [vmem:[%s1402_s3 + $0x168] sm:$0xff] %vm678_vm1, %v659_v52 }
 0x148   :  { %v559_v54 = vpop.f32.mrb[40].mxu0  ;;  %v663_v55 = vpop.f32.mrb[40].mxu1 }
 0x149   :  { %v560_v56 = vadd.f32 %v1147_v60, %v559_v54  ;;  %v561_v57 = vpop.f32.mrb[41].mxu0  ;;  %v664_v58 = vadd.f32 %v1147_v60, %v663_v55  ;;  %v665_v59 = vpop.f32.mrb[41].mxu1 }
 0x14a   :  { %v562_v61 = vpop.f32.mrb[42].mxu0  ;;  %v666_v62 = vpop.f32.mrb[42].mxu1 }
 0x14b   :  { %699 = vst.msk [vmem:[%s1402_s3 + $0xa0] sm:$0xff] %vm678_vm1, %v560_v56  ;;  %v563_v63 = vadd.f32 %v1147_v60, %v562_v61  ;;  %v564_v0 = vpop.f32.mrb[43].mxu0  ;;  %725 = vst.msk [vmem:[%s1402_s3 + $0x170] sm:$0xff] %vm678_vm1, %v664_v58  ;;  %v667_v1 = vadd.f32 %v1147_v60, %v666_v62  ;;  %v668_v2 = vpop.f32.mrb[43].mxu1 }
 0x14d   :  { %700 = vst.msk [vmem:[%s1402_s3 + $0xa8] sm:$0xff] %vm678_vm1, %v563_v63  ;;  %726 = vst.msk [vmem:[%s1402_s3 + $0x178] sm:$0xff] %vm678_vm1, %v667_v1 }
 0x150   :  { %v567_v3 = vpop.f32.mrb[44].mxu0  ;;  %v671_v4 = vpop.f32.mrb[44].mxu1 }
 0x151   :  { %v568_v5 = vadd.f32 %v1147_v60, %v567_v3  ;;  %v569_v6 = vpop.f32.mrb[45].mxu0  ;;  %v672_v7 = vadd.f32 %v1147_v60, %v671_v4  ;;  %v673_v8 = vpop.f32.mrb[45].mxu1 }
 0x152   :  { %v570_v9 = vpop.f32.mrb[46].mxu0  ;;  %v674_v10 = vpop.f32.mrb[46].mxu1 }
 0x153   :  { %701 = vst.msk [vmem:[%s1402_s3 + $0xb0] sm:$0xff] %vm678_vm1, %v568_v5  ;;  %v571_v11 = vadd.f32 %v1147_v60, %v570_v9  ;;  %v572_v12 = vpop.f32.mrb[47].mxu0  ;;  %727 = vst.msk [vmem:[%s1402_s3 + $0x180] sm:$0xff] %vm678_vm1, %v672_v7  ;;  %v675_v13 = vadd.f32 %v1147_v60, %v674_v10  ;;  %v676_v14 = vpop.f32.mrb[47].mxu1 }
 0x155   :  { %702 = vst.msk [vmem:[%s1402_s3 + $0xb8] sm:$0xff] %vm678_vm1, %v571_v11  ;;  %728 = vst.msk [vmem:[%s1402_s3 + $0x188] sm:$0xff] %vm678_vm1, %v675_v13 }
 0x158   :  { %v575_v15 = vpop.f32.mrb[48].mxu0 }
 0x159   :  { %v576_v16 = vadd.f32 %v1147_v60, %v575_v15  ;;  %v577_v17 = vpop.f32.mrb[49].mxu0 }
 0x15a   :  { %v578_v18 = vpop.f32.mrb[50].mxu0 }
 0x15b   :  { %703 = vst.msk [vmem:[%s1402_s3 + $0xc0] sm:$0xff] %vm678_vm1, %v576_v16  ;;  %v579_v19 = vadd.f32 %v1147_v60, %v578_v18  ;;  %v580_v20 = vpop.f32.mrb[51].mxu0 }
 0x15d   :  { %704 = vst.msk [vmem:[%s1402_s3 + $0xc8] sm:$0xff] %vm678_vm1, %v579_v19 }

// kernel: _lambda_.26
= control target key start
LH: loop header
LB: loop body
LE: loop exit
PB: predicated region body
PF: predicated region fallthrough
CT: control target
= control target key end

     0   :  { %v1024_v0 = vmov 0   ;;  %vm372_vm0 = vcmask 130048   ;;  %vm781_vm1 = vcmask 64512   ;;  %s1657_s1 = inlined_call_operand.vmem [shape: bf16[144,8], index: 1, kind: input, shape index: {}]   ;;  %s1658_s0 = inlined_call_operand.vmem [shape: bf16[400,144], index: 0, kind: input, shape index: {}]   ;;  %s1659_s2 = inlined_call_operand.vmem [shape: f32[1,8], index: 2, kind: input, shape index: {}]   ;;  %s1660_s3 = inlined_call_operand.vmem [shape: f32[400,8], index: 3, kind: input, shape index: {}]   ;;  %s1661_s4 = inlined_call_operand.vmem [shape: f32[400,8], index: 4, kind: output, shape index: {}]  }
   0x1   :  { %448 = vmatprep.subr.bf16.mxu0 %v1024_v0  ;;  %v940_v1 = vld [vmem:[%s1657_s1] sm:$0xff]   ;;  %921 = vmatprep.subr.bf16.mxu1 %v1024_v0  ;;  %v941_v2 = vld [vmem:[%s1657_s1 + $0x8] sm:$0xff]   ;;  %v942_v3 = vld [vmem:[%s1657_s1 + $0x10] sm:$0xff]  }
   0x2   :  { %449 = vmatpush1.bf16.msra.mxu0 %v940_v1  ;;  %930 = vmatpush1.bf16.msra.mxu1 %v940_v1  ;;  %v943_v4 = vld [vmem:[%s1657_s1 + $0x18] sm:$0xff]   ;;  %v951_v5 = vld [vmem:[%s1658_s0 + $0x4] ss:$8 sps:$4 sm:$0xff]   ;;  %v946_v9 = vld [vmem:[%s1657_s1 + $0x30] sm:$0xff]  }
   0x3   :  { %450 = vmatprep.subr.bf16.mxu0 %v1024_v0  ;;  %922 = vmatprep.subr.bf16.mxu1 %v1024_v0  ;;  %v954_v6 = vld [vmem:[%s1658_s0 + $0xd4] ss:$8 sps:$4 sm:$0xff]   ;;  %v944_v7 = vld [vmem:[%s1657_s1 + $0x20] sm:$0xff]   ;;  %v945_v8 = vld [vmem:[%s1657_s1 + $0x28] sm:$0xff]  }
   0x4   :  { %896 = vmatprep.mubr.msk.bf16.mxu0 %vm372_vm0, %v951_v5  ;;  %909 = vmatprep.mubr.msk.bf16.mxu1 %vm372_vm0, %v954_v6  ;;  %v947_v10 = vld [vmem:[%s1657_s1 + $0x38] sm:$0xff]   ;;  %v948_v11 = vld [vmem:[%s1657_s1 + $0x40] sm:$0xff]   ;;  %v682_v6 = vld [vmem:[%s1660_s3 + $0x8] sm:$0xff] }
   0x5   :  { %v949_v12 = vld [vmem:[%s1658_s0] ss:$8 sps:$4 sm:$0xff]   ;;  %v952_v13 = vld [vmem:[%s1658_s0 + $0xd0] ss:$8 sps:$4 sm:$0xff]   ;;  %v955_v14 = vld [vmem:[%s1658_s0 + $0x14] ss:$8 sps:$4 sm:$0xff]  }
   0x6   :  { %451 = vmatpush1.bf16.msra.mxu0 %v941_v2  ;;  %931 = vmatpush1.bf16.msra.mxu1 %v941_v2  ;;  %v958_v15 = vld [vmem:[%s1658_s0 + $0xe4] ss:$8 sps:$4 sm:$0xff]   ;;  %v957_v16 = vld [vmem:[%s1658_s0 + $0x10] ss:$8 sps:$4 sm:$0xff]   ;;  %v960_v17 = vld [vmem:[%s1658_s0 + $0xe0] ss:$8 sps:$4 sm:$0xff]  }
   0x7   :  { %452 = vmatprep.subr.bf16.mxu0 %v1024_v0  ;;  %923 = vmatprep.subr.bf16.mxu1 %v1024_v0  ;;  %v961_v18 = vld [vmem:[%s1658_s0 + $0x24] ss:$8 sps:$4 sm:$0xff]   ;;  %v964_v19 = vld [vmem:[%s1658_s0 + $0xf4] ss:$8 sps:$4 sm:$0xff]   ;;  %v963_v20 = vld [vmem:[%s1658_s0 + $0x20] ss:$8 sps:$4 sm:$0xff]  }
   0x8   :  { %v966_v21 = vld [vmem:[%s1658_s0 + $0xf0] ss:$8 sps:$4 sm:$0xff]   ;;  %v967_v22 = vld [vmem:[%s1658_s0 + $0x34] ss:$8 sps:$4 sm:$0xff]   ;;  %v970_v23 = vld [vmem:[%s1658_s0 + $0x104] ss:$8 sps:$4 sm:$0xff]  }
   0x9   :  { %v969_v24 = vld [vmem:[%s1658_s0 + $0x30] ss:$8 sps:$4 sm:$0xff]   ;;  %v972_v25 = vld [vmem:[%s1658_s0 + $0x100] ss:$8 sps:$4 sm:$0xff]   ;;  %v973_v26 = vld [vmem:[%s1658_s0 + $0x44] ss:$8 sps:$4 sm:$0xff]  }
   0xa   :  { %453 = vmatpush1.bf16.msra.mxu0 %v942_v3  ;;  %932 = vmatpush1.bf16.msra.mxu1 %v942_v3  ;;  %v976_v27 = vld [vmem:[%s1658_s0 + $0x114] ss:$8 sps:$4 sm:$0xff]   ;;  %v975_v28 = vld [vmem:[%s1658_s0 + $0x40] ss:$8 sps:$4 sm:$0xff]   ;;  %v978_v29 = vld [vmem:[%s1658_s0 + $0x110] ss:$8 sps:$4 sm:$0xff]  }
   0xb   :  { %454 = vmatprep.subr.bf16.mxu0 %v1024_v0  ;;  %924 = vmatprep.subr.bf16.mxu1 %v1024_v0  ;;  %v979_v30 = vld [vmem:[%s1658_s0 + $0x54] ss:$8 sps:$4 sm:$0xff]   ;;  %v982_v31 = vld [vmem:[%s1658_s0 + $0x124] ss:$8 sps:$4 sm:$0xff]   ;;  %v981_v32 = vld [vmem:[%s1658_s0 + $0x50] ss:$8 sps:$4 sm:$0xff]  }
   0xc   :  { %v984_v33 = vld [vmem:[%s1658_s0 + $0x120] ss:$8 sps:$4 sm:$0xff]   ;;  %v985_v34 = vld [vmem:[%s1658_s0 + $0x64] ss:$8 sps:$4 sm:$0xff]   ;;  %v988_v35 = vld [vmem:[%s1658_s0 + $0x134] ss:$8 sps:$4 sm:$0xff]  }
   0xd   :  { %v987_v36 = vld [vmem:[%s1658_s0 + $0x60] ss:$8 sps:$4 sm:$0xff]   ;;  %v990_v37 = vld [vmem:[%s1658_s0 + $0x130] ss:$8 sps:$4 sm:$0xff]   ;;  %v991_v38 = vld [vmem:[%s1658_s0 + $0x74] ss:$8 sps:$4 sm:$0xff]  }
   0xe   :  { %455 = vmatpush1.bf16.msra.mxu0 %v943_v4  ;;  %933 = vmatpush1.bf16.msra.mxu1 %v943_v4  ;;  %v994_v39 = vld [vmem:[%s1658_s0 + $0x144] ss:$8 sps:$4 sm:$0xff]   ;;  %v993_v40 = vld [vmem:[%s1658_s0 + $0x70] ss:$8 sps:$4 sm:$0xff]   ;;  %v996_v41 = vld [vmem:[%s1658_s0 + $0x140] ss:$8 sps:$4 sm:$0xff]  }
   0xf   :  { %456 = vmatprep.subr.bf16.mxu0 %v1024_v0  ;;  %925 = vmatprep.subr.bf16.mxu1 %v1024_v0  ;;  %v997_v42 = vld [vmem:[%s1658_s0 + $0x84] ss:$8 sps:$4 sm:$0xff]   ;;  %v1000_v43 = vld [vmem:[%s1658_s0 + $0x154] ss:$8 sps:$4 sm:$0xff]   ;;  %v999_v44 = vld [vmem:[%s1658_s0 + $0x80] ss:$8 sps:$4 sm:$0xff]  }
  0x10   :  { %v1002_v45 = vld [vmem:[%s1658_s0 + $0x150] ss:$8 sps:$4 sm:$0xff]   ;;  %v1003_v46 = vld [vmem:[%s1658_s0 + $0x94] ss:$8 sps:$4 sm:$0xff]   ;;  %v1006_v47 = vld [vmem:[%s1658_s0 + $0x164] ss:$8 sps:$4 sm:$0xff]  }
  0x11   :  { %v1005_v48 = vld [vmem:[%s1658_s0 + $0x90] ss:$8 sps:$4 sm:$0xff]   ;;  %v1008_v49 = vld [vmem:[%s1658_s0 + $0x160] ss:$8 sps:$4 sm:$0xff]   ;;  %v1009_v50 = vld [vmem:[%s1658_s0 + $0xa4] ss:$8 sps:$4 sm:$0xff]  }
  0x12   :  { %457 = vmatpush1.bf16.msra.mxu0 %v944_v7  ;;  %934 = vmatpush1.bf16.msra.mxu1 %v944_v7  ;;  %v1012_v51 = vld [vmem:[%s1658_s0 + $0x174] ss:$8 sps:$4 sm:$0xff]   ;;  %v1011_v52 = vld [vmem:[%s1658_s0 + $0xa0] ss:$8 sps:$4 sm:$0xff]   ;;  %v1014_v53 = vld [vmem:[%s1658_s0 + $0x170] ss:$8 sps:$4 sm:$0xff]  }
  0x13   :  { %458 = vmatprep.subr.bf16.mxu0 %v1024_v0  ;;  %926 = vmatprep.subr.bf16.mxu1 %v1024_v0  ;;  %v1015_v54 = vld [vmem:[%s1658_s0 + $0xb4] ss:$8 sps:$4 sm:$0xff]   ;;  %v1018_v55 = vld [vmem:[%s1658_s0 + $0x184] ss:$8 sps:$4 sm:$0xff]   ;;  %v1017_v56 = vld [vmem:[%s1658_s0 + $0xb0] ss:$8 sps:$4 sm:$0xff]  }
  0x14   :  { %v1020_v57 = vld [vmem:[%s1658_s0 + $0x180] ss:$8 sps:$4 sm:$0xff]   ;;  %v1021_v58 = vld [vmem:[%s1658_s0 + $0xc4] ss:$8 sps:$4 sm:$0xff]  }
  0x15   :  { %v1023_v59 = vld [vmem:[%s1658_s0 + $0xc0] ss:$8 sps:$4 sm:$0xff]  }
  0x16   :  { %459 = vmatpush1.bf16.msra.mxu0 %v945_v8  ;;  %935 = vmatpush1.bf16.msra.mxu1 %v945_v8  ;;  %v1255_v60 = vld [vmem:[%s1659_s2] ss:$0 sm:$0xff]  ;;  %v708_v8 = vld [vmem:[%s1660_s3 + $0xd8] sm:$0xff] }
  0x17   :  { %460 = vmatprep.subr.bf16.mxu0 %v1024_v0  ;;  %927 = vmatprep.subr.bf16.mxu1 %v1024_v0  ;;  %v681_v62 = vld [vmem:[%s1660_s3] sm:$0xff] }
  0x1a   :  { %461 = vmatpush1.bf16.msra.mxu0 %v946_v9  ;;  %936 = vmatpush1.bf16.msra.mxu1 %v946_v9 }
  0x1b   :  { %462 = vmatprep.subr.bf16.mxu0 %v1024_v0  ;;  %928 = vmatprep.subr.bf16.mxu1 %v1024_v0 }
  0x1e   :  { %463 = vmatpush1.bf16.msra.mxu0 %v947_v10  ;;  %937 = vmatpush1.bf16.msra.mxu1 %v947_v10 }
  0x1f   :  { %464 = vmatprep.subr.bf16.mxu0 %v1024_v0  ;;  %929 = vmatprep.subr.bf16.mxu1 %v1024_v0  ;;  %v707_v0 = vld [vmem:[%s1660_s3 + $0xd0] sm:$0xff] }
  0x22   :  { %465 = vmatpush1.bf16.msra.mxu0 %v948_v11  ;;  %938 = vmatpush1.bf16.msra.mxu1 %v948_v11 }
  0x25   :  { %481 = vmatmul.mubr.bf16.vlgmr.msra.gmra.mrb[0].mxu0 %v949_v12  ;;  %585 = vmatmul.mubr.bf16.vlgmr.msra.gmra.mrb[0].mxu1 %v952_v13 }
  0x26   :  { %897 = vmatprep.mubr.msk.bf16.mxu0 %vm372_vm0, %v955_v14  ;;  %910 = vmatprep.mubr.msk.bf16.mxu1 %vm372_vm0, %v958_v15 }
  0x2d   :  { %489 = vmatmul.mubr.bf16.gmra.mrb[4].mxu0 %v957_v16  ;;  %593 = vmatmul.mubr.bf16.gmra.mrb[4].mxu1 %v960_v17 }
  0x2e   :  { %898 = vmatprep.mubr.msk.bf16.mxu0 %vm372_vm0, %v961_v18  ;;  %911 = vmatprep.mubr.msk.bf16.mxu1 %vm372_vm0, %v964_v19  ;;  %v683_v18 = vld [vmem:[%s1660_s3 + $0x10] sm:$0xff] }
  0x35   :  { %497 = vmatmul.mubr.bf16.gmra.mrb[8].mxu0 %v963_v20  ;;  %601 = vmatmul.mubr.bf16.gmra.mrb[8].mxu1 %v966_v21  ;;  %v709_v20 = vld [vmem:[%s1660_s3 + $0xe0] sm:$0xff] }
  0x36   :  { %899 = vmatprep.mubr.msk.bf16.mxu0 %vm372_vm0, %v967_v22  ;;  %912 = vmatprep.mubr.msk.bf16.mxu1 %vm372_vm0, %v970_v23 }
  0x3d   :  { %505 = vmatmul.mubr.bf16.gmra.mrb[12].mxu0 %v969_v24  ;;  %609 = vmatmul.mubr.bf16.gmra.mrb[12].mxu1 %v972_v25 }
  0x3e   :  { %900 = vmatprep.mubr.msk.bf16.mxu0 %vm372_vm0, %v973_v26  ;;  %913 = vmatprep.mubr.msk.bf16.mxu1 %vm372_vm0, %v976_v27  ;;  %v684_v26 = vld [vmem:[%s1660_s3 + $0x18] sm:$0xff] }
  0x45   :  { %513 = vmatmul.mubr.bf16.gmra.mrb[16].mxu0 %v975_v28  ;;  %617 = vmatmul.mubr.bf16.gmra.mrb[16].mxu1 %v978_v29  ;;  %v710_v28 = vld [vmem:[%s1660_s3 + $0xe8] sm:$0xff] }
  0x46   :  { %901 = vmatprep.mubr.msk.bf16.mxu0 %vm372_vm0, %v979_v30  ;;  %914 = vmatprep.mubr.msk.bf16.mxu1 %vm372_vm0, %v982_v31 }
  0x4d   :  { %521 = vmatmul.mubr.bf16.gmra.mrb[20].mxu0 %v981_v32  ;;  %625 = vmatmul.mubr.bf16.gmra.mrb[20].mxu1 %v984_v33 }
  0x4e   :  { %902 = vmatprep.mubr.msk.bf16.mxu0 %vm372_vm0, %v985_v34  ;;  %915 = vmatprep.mubr.msk.bf16.mxu1 %vm372_vm0, %v988_v35 }
  0x55   :  { %529 = vmatmul.mubr.bf16.gmra.mrb[24].mxu0 %v987_v36  ;;  %633 = vmatmul.mubr.bf16.gmra.mrb[24].mxu1 %v990_v37 }
  0x56   :  { %903 = vmatprep.mubr.msk.bf16.mxu0 %vm372_vm0, %v991_v38  ;;  %916 = vmatprep.mubr.msk.bf16.mxu1 %vm372_vm0, %v994_v39  ;;  %v685_v38 = vld [vmem:[%s1660_s3 + $0x20] sm:$0xff] }
  0x5d   :  { %537 = vmatmul.mubr.bf16.gmra.mrb[28].mxu0 %v993_v40  ;;  %641 = vmatmul.mubr.bf16.gmra.mrb[28].mxu1 %v996_v41  ;;  %v711_v40 = vld [vmem:[%s1660_s3 + $0xf0] sm:$0xff] }
  0x5e   :  { %904 = vmatprep.mubr.msk.bf16.mxu0 %vm372_vm0, %v997_v42  ;;  %917 = vmatprep.mubr.msk.bf16.mxu1 %vm372_vm0, %v1000_v43 }
  0x65   :  { %545 = vmatmul.mubr.bf16.gmra.mrb[32].mxu0 %v999_v44  ;;  %649 = vmatmul.mubr.bf16.gmra.mrb[32].mxu1 %v1002_v45 }
  0x66   :  { %905 = vmatprep.mubr.msk.bf16.mxu0 %vm372_vm0, %v1003_v46  ;;  %918 = vmatprep.mubr.msk.bf16.mxu1 %vm372_vm0, %v1006_v47  ;;  %v686_v46 = vld [vmem:[%s1660_s3 + $0x28] sm:$0xff] }
  0x6d   :  { %553 = vmatmul.mubr.bf16.gmra.mrb[36].mxu0 %v1005_v48  ;;  %657 = vmatmul.mubr.bf16.gmra.mrb[36].mxu1 %v1008_v49  ;;  %v712_v48 = vld [vmem:[%s1660_s3 + $0xf8] sm:$0xff] }
  0x6e   :  { %906 = vmatprep.mubr.msk.bf16.mxu0 %vm372_vm0, %v1009_v50  ;;  %919 = vmatprep.mubr.msk.bf16.mxu1 %vm372_vm0, %v1012_v51 }
  0x75   :  { %561 = vmatmul.mubr.bf16.gmra.mrb[40].mxu0 %v1011_v52  ;;  %665 = vmatmul.mubr.bf16.gmra.mrb[40].mxu1 %v1014_v53 }
  0x76   :  { %907 = vmatprep.mubr.msk.bf16.mxu0 %vm372_vm0, %v1015_v54  ;;  %920 = vmatprep.mubr.msk.bf16.mxu1 %vm372_vm0, %v1018_v55 }
  0x7d   :  { %569 = vmatmul.mubr.bf16.gmra.mrb[44].mxu0 %v1017_v56  ;;  %673 = vmatmul.mubr.bf16.gmra.mrb[44].mxu1 %v1020_v57 }
  0x7e   :  { %908 = vmatprep.mubr.msk.bf16.mxu0 %vm372_vm0, %v1021_v58  ;;  %v687_v58 = vld [vmem:[%s1660_s3 + $0x30] sm:$0xff] }
  0x85   :  { %577 = vmatmul.mubr.bf16.gmra.mrb[48].mxu0 %v1023_v59 }
  0xf8   :  { %v482_v61 = vpop.f32.mrb[0].mxu0  ;;  %v586_v63 = vpop.f32.mrb[0].mxu1 }
  0xf9   :  { %v483_v1 = vadd.f32 %v1255_v60, %v482_v61  ;;  %v484_v2 = vpop.f32.mrb[1].mxu0  ;;  %v587_v3 = vadd.f32 %v1255_v60, %v586_v63  ;;  %v588_v4 = vpop.f32.mrb[1].mxu1  ;;  %v713_v61 = vld [vmem:[%s1660_s3 + $0x100] sm:$0xff] }
  0xfa   :  { %v485_v5 = vpop.f32.mrb[2].mxu0  ;;  %v589_v7 = vpop.f32.mrb[2].mxu1 }
  0xfb   :  { %v731_v9 = vadd.f32 %v681_v62, %v483_v1  ;;  %v486_v10 = vadd.f32 %v1255_v60, %v485_v5  ;;  %v487_v11 = vpop.f32.mrb[3].mxu0  ;;  %v757_v12 = vadd.f32 %v707_v0, %v587_v3  ;;  %v590_v13 = vadd.f32 %v1255_v60, %v589_v7  ;;  %v591_v14 = vpop.f32.mrb[3].mxu1  ;;  %v688_v3 = vld [vmem:[%s1660_s3 + $0x38] sm:$0xff]  ;;  %v714_v5 = vld [vmem:[%s1660_s3 + $0x108] sm:$0xff] }
  0xfd   :  { %782 = vst.msk [vmem:[%s1661_s4] sm:$0xff] %vm781_vm1, %v731_v9  ;;  %v732_v15 = vadd.f32 %v682_v6, %v486_v10  ;;  %808 = vst.msk [vmem:[%s1661_s4 + $0xd0] sm:$0xff] %vm781_vm1, %v757_v12  ;;  %v758_v16 = vadd.f32 %v708_v8, %v590_v13 }
  0xff   :  { %783 = vst.msk [vmem:[%s1661_s4 + $0x8] sm:$0xff] %vm781_vm1, %v732_v15  ;;  %809 = vst.msk [vmem:[%s1661_s4 + $0xd8] sm:$0xff] %vm781_vm1, %v758_v16  ;;  %v689_v15 = vld [vmem:[%s1660_s3 + $0x40] sm:$0xff] }
 0x100   :  { %v490_v17 = vpop.f32.mrb[4].mxu0  ;;  %v594_v19 = vpop.f32.mrb[4].mxu1 }
 0x101   :  { %v491_v21 = vadd.f32 %v1255_v60, %v490_v17  ;;  %v492_v22 = vpop.f32.mrb[5].mxu0  ;;  %v595_v23 = vadd.f32 %v1255_v60, %v594_v19  ;;  %v596_v24 = vpop.f32.mrb[5].mxu1  ;;  %v715_v17 = vld [vmem:[%s1660_s3 + $0x110] sm:$0xff] }
 0x102   :  { %v493_v25 = vpop.f32.mrb[6].mxu0  ;;  %v597_v27 = vpop.f32.mrb[6].mxu1 }
 0x103   :  { %v733_v29 = vadd.f32 %v683_v18, %v491_v21  ;;  %v494_v30 = vadd.f32 %v1255_v60, %v493_v25  ;;  %v495_v31 = vpop.f32.mrb[7].mxu0  ;;  %v759_v32 = vadd.f32 %v709_v20, %v595_v23  ;;  %v598_v33 = vadd.f32 %v1255_v60, %v597_v27  ;;  %v599_v34 = vpop.f32.mrb[7].mxu1  ;;  %v690_v23 = vld [vmem:[%s1660_s3 + $0x48] sm:$0xff]  ;;  %v716_v25 = vld [vmem:[%s1660_s3 + $0x118] sm:$0xff] }
 0x105   :  { %784 = vst.msk [vmem:[%s1661_s4 + $0x10] sm:$0xff] %vm781_vm1, %v733_v29  ;;  %v734_v35 = vadd.f32 %v684_v26, %v494_v30  ;;  %810 = vst.msk [vmem:[%s1661_s4 + $0xe0] sm:$0xff] %vm781_vm1, %v759_v32  ;;  %v760_v36 = vadd.f32 %v710_v28, %v598_v33 }
 0x107   :  { %785 = vst.msk [vmem:[%s1661_s4 + $0x18] sm:$0xff] %vm781_vm1, %v734_v35  ;;  %811 = vst.msk [vmem:[%s1661_s4 + $0xe8] sm:$0xff] %vm781_vm1, %v760_v36  ;;  %v691_v35 = vld [vmem:[%s1660_s3 + $0x50] sm:$0xff] }
 0x108   :  { %v498_v37 = vpop.f32.mrb[8].mxu0  ;;  %v602_v39 = vpop.f32.mrb[8].mxu1 }
 0x109   :  { %v499_v41 = vadd.f32 %v1255_v60, %v498_v37  ;;  %v500_v42 = vpop.f32.mrb[9].mxu0  ;;  %v603_v43 = vadd.f32 %v1255_v60, %v602_v39  ;;  %v604_v44 = vpop.f32.mrb[9].mxu1  ;;  %v717_v37 = vld [vmem:[%s1660_s3 + $0x120] sm:$0xff] }
 0x10a   :  { %v501_v45 = vpop.f32.mrb[10].mxu0  ;;  %v605_v47 = vpop.f32.mrb[10].mxu1 }
 0x10b   :  { %v735_v49 = vadd.f32 %v685_v38, %v499_v41  ;;  %v502_v50 = vadd.f32 %v1255_v60, %v501_v45  ;;  %v503_v51 = vpop.f32.mrb[11].mxu0  ;;  %v761_v52 = vadd.f32 %v711_v40, %v603_v43  ;;  %v606_v53 = vadd.f32 %v1255_v60, %v605_v47  ;;  %v607_v54 = vpop.f32.mrb[11].mxu1  ;;  %v692_v43 = vld [vmem:[%s1660_s3 + $0x58] sm:$0xff]  ;;  %v718_v45 = vld [vmem:[%s1660_s3 + $0x128] sm:$0xff] }
 0x10d   :  { %786 = vst.msk [vmem:[%s1661_s4 + $0x20] sm:$0xff] %vm781_vm1, %v735_v49  ;;  %v736_v55 = vadd.f32 %v686_v46, %v502_v50  ;;  %812 = vst.msk [vmem:[%s1661_s4 + $0xf0] sm:$0xff] %vm781_vm1, %v761_v52  ;;  %v762_v56 = vadd.f32 %v712_v48, %v606_v53 }
 0x10f   :  { %787 = vst.msk [vmem:[%s1661_s4 + $0x28] sm:$0xff] %vm781_vm1, %v736_v55  ;;  %813 = vst.msk [vmem:[%s1661_s4 + $0xf8] sm:$0xff] %vm781_vm1, %v762_v56  ;;  %v693_v55 = vld [vmem:[%s1660_s3 + $0x60] sm:$0xff] }
 0x110   :  { %v506_v57 = vpop.f32.mrb[12].mxu0  ;;  %v610_v59 = vpop.f32.mrb[12].mxu1 }
 0x111   :  { %v507_v62 = vadd.f32 %v1255_v60, %v506_v57  ;;  %v508_v63 = vpop.f32.mrb[13].mxu0  ;;  %v611_v0 = vadd.f32 %v1255_v60, %v610_v59  ;;  %v612_v1 = vpop.f32.mrb[13].mxu1  ;;  %v719_v57 = vld [vmem:[%s1660_s3 + $0x130] sm:$0xff] }
 0x112   :  { %v509_v2 = vpop.f32.mrb[14].mxu0  ;;  %v613_v4 = vpop.f32.mrb[14].mxu1 }
 0x113   :  { %v737_v6 = vadd.f32 %v687_v58, %v507_v62  ;;  %v510_v7 = vadd.f32 %v1255_v60, %v509_v2  ;;  %v511_v8 = vpop.f32.mrb[15].mxu0  ;;  %v763_v9 = vadd.f32 %v713_v61, %v611_v0  ;;  %v614_v10 = vadd.f32 %v1255_v60, %v613_v4  ;;  %v615_v11 = vpop.f32.mrb[15].mxu1  ;;  %v694_v0 = vld [vmem:[%s1660_s3 + $0x68] sm:$0xff]  ;;  %v720_v2 = vld [vmem:[%s1660_s3 + $0x138] sm:$0xff] }
 0x115   :  { %788 = vst.msk [vmem:[%s1661_s4 + $0x30] sm:$0xff] %vm781_vm1, %v737_v6  ;;  %v738_v12 = vadd.f32 %v688_v3, %v510_v7  ;;  %814 = vst.msk [vmem:[%s1661_s4 + $0x100] sm:$0xff] %vm781_vm1, %v763_v9  ;;  %v764_v13 = vadd.f32 %v714_v5, %v614_v10 }
 0x117   :  { %789 = vst.msk [vmem:[%s1661_s4 + $0x38] sm:$0xff] %vm781_vm1, %v738_v12  ;;  %815 = vst.msk [vmem:[%s1661_s4 + $0x108] sm:$0xff] %vm781_vm1, %v764_v13  ;;  %v695_v12 = vld [vmem:[%s1660_s3 + $0x70] sm:$0xff] }
 0x118   :  { %v514_v14 = vpop.f32.mrb[16].mxu0  ;;  %v618_v16 = vpop.f32.mrb[16].mxu1 }
 0x119   :  { %v515_v18 = vadd.f32 %v1255_v60, %v514_v14  ;;  %v516_v19 = vpop.f32.mrb[17].mxu0  ;;  %v619_v20 = vadd.f32 %v1255_v60, %v618_v16  ;;  %v620_v21 = vpop.f32.mrb[17].mxu1  ;;  %v721_v14 = vld [vmem:[%s1660_s3 + $0x140] sm:$0xff] }
 0x11a   :  { %v517_v22 = vpop.f32.mrb[18].mxu0  ;;  %v621_v24 = vpop.f32.mrb[18].mxu1 }
 0x11b   :  { %v739_v26 = vadd.f32 %v689_v15, %v515_v18  ;;  %v518_v27 = vadd.f32 %v1255_v60, %v517_v22  ;;  %v519_v28 = vpop.f32.mrb[19].mxu0  ;;  %v765_v29 = vadd.f32 %v715_v17, %v619_v20  ;;  %v622_v30 = vadd.f32 %v1255_v60, %v621_v24  ;;  %v623_v31 = vpop.f32.mrb[19].mxu1  ;;  %v696_v20 = vld [vmem:[%s1660_s3 + $0x78] sm:$0xff]  ;;  %v722_v22 = vld [vmem:[%s1660_s3 + $0x148] sm:$0xff] }
 0x11d   :  { %790 = vst.msk [vmem:[%s1661_s4 + $0x40] sm:$0xff] %vm781_vm1, %v739_v26  ;;  %v740_v32 = vadd.f32 %v690_v23, %v518_v27  ;;  %816 = vst.msk [vmem:[%s1661_s4 + $0x110] sm:$0xff] %vm781_vm1, %v765_v29  ;;  %v766_v33 = vadd.f32 %v716_v25, %v622_v30 }
 0x11f   :  { %791 = vst.msk [vmem:[%s1661_s4 + $0x48] sm:$0xff] %vm781_vm1, %v740_v32  ;;  %817 = vst.msk [vmem:[%s1661_s4 + $0x118] sm:$0xff] %vm781_vm1, %v766_v33  ;;  %v697_v32 = vld [vmem:[%s1660_s3 + $0x80] sm:$0xff] }
 0x120   :  { %v522_v34 = vpop.f32.mrb[20].mxu0  ;;  %v626_v36 = vpop.f32.mrb[20].mxu1 }
 0x121   :  { %v523_v38 = vadd.f32 %v1255_v60, %v522_v34  ;;  %v524_v39 = vpop.f32.mrb[21].mxu0  ;;  %v627_v40 = vadd.f32 %v1255_v60, %v626_v36  ;;  %v628_v41 = vpop.f32.mrb[21].mxu1  ;;  %v723_v34 = vld [vmem:[%s1660_s3 + $0x150] sm:$0xff] }
 0x122   :  { %v525_v42 = vpop.f32.mrb[22].mxu0  ;;  %v629_v44 = vpop.f32.mrb[22].mxu1 }
 0x123   :  { %v741_v46 = vadd.f32 %v691_v35, %v523_v38  ;;  %v526_v47 = vadd.f32 %v1255_v60, %v525_v42  ;;  %v527_v48 = vpop.f32.mrb[23].mxu0  ;;  %v767_v49 = vadd.f32 %v717_v37, %v627_v40  ;;  %v630_v50 = vadd.f32 %v1255_v60, %v629_v44  ;;  %v631_v51 = vpop.f32.mrb[23].mxu1  ;;  %v698_v40 = vld [vmem:[%s1660_s3 + $0x88] sm:$0xff]  ;;  %v724_v42 = vld [vmem:[%s1660_s3 + $0x158] sm:$0xff] }
 0x125   :  { %792 = vst.msk [vmem:[%s1661_s4 + $0x50] sm:$0xff] %vm781_vm1, %v741_v46  ;;  %v742_v52 = vadd.f32 %v692_v43, %v526_v47  ;;  %818 = vst.msk [vmem:[%s1661_s4 + $0x120] sm:$0xff] %vm781_vm1, %v767_v49  ;;  %v768_v53 = vadd.f32 %v718_v45, %v630_v50 }
 0x127   :  { %793 = vst.msk [vmem:[%s1661_s4 + $0x58] sm:$0xff] %vm781_vm1, %v742_v52  ;;  %819 = vst.msk [vmem:[%s1661_s4 + $0x128] sm:$0xff] %vm781_vm1, %v768_v53  ;;  %v699_v52 = vld [vmem:[%s1660_s3 + $0x90] sm:$0xff] }
 0x128   :  { %v530_v54 = vpop.f32.mrb[24].mxu0  ;;  %v634_v56 = vpop.f32.mrb[24].mxu1 }
 0x129   :  { %v531_v58 = vadd.f32 %v1255_v60, %v530_v54  ;;  %v532_v59 = vpop.f32.mrb[25].mxu0  ;;  %v635_v61 = vadd.f32 %v1255_v60, %v634_v56  ;;  %v636_v62 = vpop.f32.mrb[25].mxu1  ;;  %v725_v54 = vld [vmem:[%s1660_s3 + $0x160] sm:$0xff] }
 0x12a   :  { %v533_v63 = vpop.f32.mrb[26].mxu0  ;;  %v637_v1 = vpop.f32.mrb[26].mxu1 }
 0x12b   :  { %v743_v3 = vadd.f32 %v693_v55, %v531_v58  ;;  %v534_v4 = vadd.f32 %v1255_v60, %v533_v63  ;;  %v535_v5 = vpop.f32.mrb[27].mxu0  ;;  %v769_v6 = vadd.f32 %v719_v57, %v635_v61  ;;  %v638_v7 = vadd.f32 %v1255_v60, %v637_v1  ;;  %v639_v8 = vpop.f32.mrb[27].mxu1  ;;  %v700_v61 = vld [vmem:[%s1660_s3 + $0x98] sm:$0xff]  ;;  %v726_v63 = vld [vmem:[%s1660_s3 + $0x168] sm:$0xff] }
 0x12d   :  { %794 = vst.msk [vmem:[%s1661_s4 + $0x60] sm:$0xff] %vm781_vm1, %v743_v3  ;;  %v744_v9 = vadd.f32 %v694_v0, %v534_v4  ;;  %820 = vst.msk [vmem:[%s1661_s4 + $0x130] sm:$0xff] %vm781_vm1, %v769_v6  ;;  %v770_v10 = vadd.f32 %v720_v2, %v638_v7 }
 0x12f   :  { %795 = vst.msk [vmem:[%s1661_s4 + $0x68] sm:$0xff] %vm781_vm1, %v744_v9  ;;  %821 = vst.msk [vmem:[%s1661_s4 + $0x138] sm:$0xff] %vm781_vm1, %v770_v10  ;;  %v701_v9 = vld [vmem:[%s1660_s3 + $0xa0] sm:$0xff] }
 0x130   :  { %v538_v11 = vpop.f32.mrb[28].mxu0  ;;  %v642_v13 = vpop.f32.mrb[28].mxu1 }
 0x131   :  { %v539_v15 = vadd.f32 %v1255_v60, %v538_v11  ;;  %v540_v16 = vpop.f32.mrb[29].mxu0  ;;  %v643_v17 = vadd.f32 %v1255_v60, %v642_v13  ;;  %v644_v18 = vpop.f32.mrb[29].mxu1  ;;  %v727_v11 = vld [vmem:[%s1660_s3 + $0x170] sm:$0xff] }
 0x132   :  { %v541_v19 = vpop.f32.mrb[30].mxu0  ;;  %v645_v21 = vpop.f32.mrb[30].mxu1 }
 0x133   :  { %v745_v23 = vadd.f32 %v695_v12, %v539_v15  ;;  %v542_v24 = vadd.f32 %v1255_v60, %v541_v19  ;;  %v543_v25 = vpop.f32.mrb[31].mxu0  ;;  %v771_v26 = vadd.f32 %v721_v14, %v643_v17  ;;  %v646_v27 = vadd.f32 %v1255_v60, %v645_v21  ;;  %v647_v28 = vpop.f32.mrb[31].mxu1  ;;  %v702_v17 = vld [vmem:[%s1660_s3 + $0xa8] sm:$0xff]  ;;  %v728_v19 = vld [vmem:[%s1660_s3 + $0x178] sm:$0xff] }
 0x135   :  { %796 = vst.msk [vmem:[%s1661_s4 + $0x70] sm:$0xff] %vm781_vm1, %v745_v23  ;;  %v746_v29 = vadd.f32 %v696_v20, %v542_v24  ;;  %822 = vst.msk [vmem:[%s1661_s4 + $0x140] sm:$0xff] %vm781_vm1, %v771_v26  ;;  %v772_v30 = vadd.f32 %v722_v22, %v646_v27 }
 0x137   :  { %797 = vst.msk [vmem:[%s1661_s4 + $0x78] sm:$0xff] %vm781_vm1, %v746_v29  ;;  %823 = vst.msk [vmem:[%s1661_s4 + $0x148] sm:$0xff] %vm781_vm1, %v772_v30  ;;  %v703_v29 = vld [vmem:[%s1660_s3 + $0xb0] sm:$0xff] }
 0x138   :  { %v546_v31 = vpop.f32.mrb[32].mxu0  ;;  %v650_v33 = vpop.f32.mrb[32].mxu1 }
 0x139   :  { %v547_v35 = vadd.f32 %v1255_v60, %v546_v31  ;;  %v548_v36 = vpop.f32.mrb[33].mxu0  ;;  %v651_v37 = vadd.f32 %v1255_v60, %v650_v33  ;;  %v652_v38 = vpop.f32.mrb[33].mxu1  ;;  %v729_v31 = vld [vmem:[%s1660_s3 + $0x180] sm:$0xff] }
 0x13a   :  { %v549_v39 = vpop.f32.mrb[34].mxu0  ;;  %v653_v41 = vpop.f32.mrb[34].mxu1 }
 0x13b   :  { %v747_v43 = vadd.f32 %v697_v32, %v547_v35  ;;  %v550_v44 = vadd.f32 %v1255_v60, %v549_v39  ;;  %v551_v45 = vpop.f32.mrb[35].mxu0  ;;  %v773_v46 = vadd.f32 %v723_v34, %v651_v37  ;;  %v654_v47 = vadd.f32 %v1255_v60, %v653_v41  ;;  %v655_v48 = vpop.f32.mrb[35].mxu1  ;;  %v704_v37 = vld [vmem:[%s1660_s3 + $0xb8] sm:$0xff]  ;;  %v730_v39 = vld [vmem:[%s1660_s3 + $0x188] sm:$0xff] }
 0x13d   :  { %798 = vst.msk [vmem:[%s1661_s4 + $0x80] sm:$0xff] %vm781_vm1, %v747_v43  ;;  %v748_v49 = vadd.f32 %v698_v40, %v550_v44  ;;  %824 = vst.msk [vmem:[%s1661_s4 + $0x150] sm:$0xff] %vm781_vm1, %v773_v46  ;;  %v774_v50 = vadd.f32 %v724_v42, %v654_v47 }
 0x13f   :  { %799 = vst.msk [vmem:[%s1661_s4 + $0x88] sm:$0xff] %vm781_vm1, %v748_v49  ;;  %825 = vst.msk [vmem:[%s1661_s4 + $0x158] sm:$0xff] %vm781_vm1, %v774_v50  ;;  %v705_v49 = vld [vmem:[%s1660_s3 + $0xc0] sm:$0xff] }
 0x140   :  { %v554_v51 = vpop.f32.mrb[36].mxu0  ;;  %v658_v53 = vpop.f32.mrb[36].mxu1 }
 0x141   :  { %v555_v55 = vadd.f32 %v1255_v60, %v554_v51  ;;  %v556_v56 = vpop.f32.mrb[37].mxu0  ;;  %v659_v57 = vadd.f32 %v1255_v60, %v658_v53  ;;  %v660_v58 = vpop.f32.mrb[37].mxu1  ;;  %v706_v53 = vld [vmem:[%s1660_s3 + $0xc8] sm:$0xff] }
 0x142   :  { %v557_v59 = vpop.f32.mrb[38].mxu0  ;;  %v661_v62 = vpop.f32.mrb[38].mxu1 }
 0x143   :  { %v749_v0 = vadd.f32 %v699_v52, %v555_v55  ;;  %v558_v1 = vadd.f32 %v1255_v60, %v557_v59  ;;  %v559_v2 = vpop.f32.mrb[39].mxu0  ;;  %v775_v3 = vadd.f32 %v725_v54, %v659_v57  ;;  %v662_v4 = vadd.f32 %v1255_v60, %v661_v62  ;;  %v663_v5 = vpop.f32.mrb[39].mxu1 }
 0x145   :  { %800 = vst.msk [vmem:[%s1661_s4 + $0x90] sm:$0xff] %vm781_vm1, %v749_v0  ;;  %v750_v6 = vadd.f32 %v700_v61, %v558_v1  ;;  %826 = vst.msk [vmem:[%s1661_s4 + $0x160] sm:$0xff] %vm781_vm1, %v775_v3  ;;  %v776_v7 = vadd.f32 %v726_v63, %v662_v4 }
 0x147   :  { %801 = vst.msk [vmem:[%s1661_s4 + $0x98] sm:$0xff] %vm781_vm1, %v750_v6  ;;  %827 = vst.msk [vmem:[%s1661_s4 + $0x168] sm:$0xff] %vm781_vm1, %v776_v7 }
 0x148   :  { %v562_v8 = vpop.f32.mrb[40].mxu0  ;;  %v666_v10 = vpop.f32.mrb[40].mxu1 }
 0x149   :  { %v563_v12 = vadd.f32 %v1255_v60, %v562_v8  ;;  %v564_v13 = vpop.f32.mrb[41].mxu0  ;;  %v667_v14 = vadd.f32 %v1255_v60, %v666_v10  ;;  %v668_v15 = vpop.f32.mrb[41].mxu1 }
 0x14a   :  { %v565_v16 = vpop.f32.mrb[42].mxu0  ;;  %v669_v18 = vpop.f32.mrb[42].mxu1 }
 0x14b   :  { %v751_v20 = vadd.f32 %v701_v9, %v563_v12  ;;  %v566_v21 = vadd.f32 %v1255_v60, %v565_v16  ;;  %v567_v22 = vpop.f32.mrb[43].mxu0  ;;  %v777_v23 = vadd.f32 %v727_v11, %v667_v14  ;;  %v670_v24 = vadd.f32 %v1255_v60, %v669_v18  ;;  %v671_v25 = vpop.f32.mrb[43].mxu1 }
 0x14d   :  { %802 = vst.msk [vmem:[%s1661_s4 + $0xa0] sm:$0xff] %vm781_vm1, %v751_v20  ;;  %v752_v26 = vadd.f32 %v702_v17, %v566_v21  ;;  %828 = vst.msk [vmem:[%s1661_s4 + $0x170] sm:$0xff] %vm781_vm1, %v777_v23  ;;  %v778_v27 = vadd.f32 %v728_v19, %v670_v24 }
 0x14f   :  { %803 = vst.msk [vmem:[%s1661_s4 + $0xa8] sm:$0xff] %vm781_vm1, %v752_v26  ;;  %829 = vst.msk [vmem:[%s1661_s4 + $0x178] sm:$0xff] %vm781_vm1, %v778_v27 }
 0x150   :  { %v570_v28 = vpop.f32.mrb[44].mxu0  ;;  %v674_v30 = vpop.f32.mrb[44].mxu1 }
 0x151   :  { %v571_v32 = vadd.f32 %v1255_v60, %v570_v28  ;;  %v572_v33 = vpop.f32.mrb[45].mxu0  ;;  %v675_v34 = vadd.f32 %v1255_v60, %v674_v30  ;;  %v676_v35 = vpop.f32.mrb[45].mxu1 }
 0x152   :  { %v573_v36 = vpop.f32.mrb[46].mxu0  ;;  %v677_v38 = vpop.f32.mrb[46].mxu1 }
 0x153   :  { %v753_v40 = vadd.f32 %v703_v29, %v571_v32  ;;  %v574_v41 = vadd.f32 %v1255_v60, %v573_v36  ;;  %v575_v42 = vpop.f32.mrb[47].mxu0  ;;  %v779_v43 = vadd.f32 %v729_v31, %v675_v34  ;;  %v678_v44 = vadd.f32 %v1255_v60, %v677_v38  ;;  %v679_v45 = vpop.f32.mrb[47].mxu1 }
 0x155   :  { %804 = vst.msk [vmem:[%s1661_s4 + $0xb0] sm:$0xff] %vm781_vm1, %v753_v40  ;;  %v754_v46 = vadd.f32 %v704_v37, %v574_v41  ;;  %830 = vst.msk [vmem:[%s1661_s4 + $0x180] sm:$0xff] %vm781_vm1, %v779_v43  ;;  %v780_v47 = vadd.f32 %v730_v39, %v678_v44 }
 0x157   :  { %805 = vst.msk [vmem:[%s1661_s4 + $0xb8] sm:$0xff] %vm781_vm1, %v754_v46  ;;  %831 = vst.msk [vmem:[%s1661_s4 + $0x188] sm:$0xff] %vm781_vm1, %v780_v47 }
 0x158   :  { %v578_v48 = vpop.f32.mrb[48].mxu0 }
 0x159   :  { %v579_v50 = vadd.f32 %v1255_v60, %v578_v48  ;;  %v580_v51 = vpop.f32.mrb[49].mxu0 }
 0x15a   :  { %v581_v52 = vpop.f32.mrb[50].mxu0 }
 0x15b   :  { %v755_v54 = vadd.f32 %v705_v49, %v579_v50  ;;  %v582_v55 = vadd.f32 %v1255_v60, %v581_v52  ;;  %v583_v56 = vpop.f32.mrb[51].mxu0 }
 0x15d   :  { %806 = vst.msk [vmem:[%s1661_s4 + $0xc0] sm:$0xff] %vm781_vm1, %v755_v54  ;;  %v756_v57 = vadd.f32 %v706_v53, %v582_v55 }
 0x15f   :  { %807 = vst.msk [vmem:[%s1661_s4 + $0xc8] sm:$0xff] %vm781_vm1, %v756_v57 }

// kernel: _lambda_.27
= control target key start
LH: loop header
LB: loop body
LE: loop exit
PB: predicated region body
PF: predicated region fallthrough
CT: control target
= control target key end

     0   :  { %v889_v0 = vmov 0.0   ;;  %vm890_vm0 = vmmov 0   ;;  %vm309_vm1 = vcmask 1043456   ;;  %vm233_vm2 = vcmask 588800   ;;  %s1341_s1 = inlined_call_operand.vmem [shape: bf16[72,8], index: 1, kind: input, shape index: {}]   ;;  %s1342_s0 = inlined_call_operand.vmem [shape: bf16[400,72], index: 0, kind: input, shape index: {}]   ;;  %s1343_s2 = inlined_call_operand.vmem [shape: f32[1,8], index: 2, kind: input, shape index: {}]   ;;  %s1344_s3 = inlined_call_operand.vmem [shape: f32[400,8], index: 3, kind: output, shape index: {}]  }
   0x1   :  { %737 = vmatprep.subr.bf16.mxu0 %v889_v0  ;;  %v859_v1 = vld [vmem:[%s1341_s1] sm:$0xff]   ;;  %847 = vmatprep.subr.bf16.mxu1 %v889_v0  ;;  %v860_v2 = vld [vmem:[%s1341_s1 + $0x8] sm:$0xff]   ;;  %v861_v3 = vld [vmem:[%s1341_s1 + $0x10] sm:$0xff]   ;;  %vm596_vm3 = vcmask 64512  }
   0x2   :  { %747 = vmatprep.mubr.msk.bf16.mxu0 %vm890_vm0, %v889_v0  ;;  %799 = vmatprep.mubr.msk.bf16.mxu1 %vm890_vm0, %v889_v0  ;;  %v862_v4 = vld [vmem:[%s1341_s1 + $0x18] sm:$0xff]   ;;  %v863_v5 = vld [vmem:[%s1341_s1 + $0x20] ss:$0 sps:$4 sm:$0xff]   ;;  %v865_v8 = vld [vmem:[%s1342_s0 + $0x68] sm:$0xff]  }
   0x3   :  { %738 = vmatpush3.bf16.msra.mxu0 %v859_v1  ;;  %852 = vmatpush3.bf16.msra.mxu1 %v859_v1  ;;  %v311_v6 = vsel %vm309_vm1, %v863_v5, 0  ;;  %v864_v7 = vld [vmem:[%s1342_s0] sm:$0xff]   ;;  %v866_v9 = vld [vmem:[%s1342_s0 + $0x8] sm:$0xff]   ;;  %v867_v10 = vld [vmem:[%s1342_s0 + $0x70] sm:$0xff]  }
   0x4   :  { %739 = vmatprep.subr.bf16.mxu0 %v889_v0  ;;  %848 = vmatprep.subr.bf16.mxu1 %v889_v0  ;;  %v868_v11 = vld [vmem:[%s1342_s0 + $0x10] sm:$0xff]   ;;  %v869_v12 = vld [vmem:[%s1342_s0 + $0x78] sm:$0xff]   ;;  %v871_v14 = vld [vmem:[%s1342_s0 + $0x80] sm:$0xff]  }
   0x5   :  { %v870_v13 = vld [vmem:[%s1342_s0 + $0x18] sm:$0xff]   ;;  %v872_v15 = vld [vmem:[%s1342_s0 + $0x20] sm:$0xff]   ;;  %v873_v16 = vld [vmem:[%s1342_s0 + $0x88] sm:$0xff]  }
   0x6   :  { %v874_v17 = vld [vmem:[%s1342_s0 + $0x28] sm:$0xff]   ;;  %v875_v18 = vld [vmem:[%s1342_s0 + $0x90] sm:$0xff]   ;;  %v877_v20 = vld [vmem:[%s1342_s0 + $0x98] sm:$0xff]  }
   0x7   :  { %740 = vmatpush3.bf16.msra.mxu0 %v860_v2  ;;  %853 = vmatpush3.bf16.msra.mxu1 %v860_v2  ;;  %v876_v19 = vld [vmem:[%s1342_s0 + $0x30] sm:$0xff]   ;;  %v878_v21 = vld [vmem:[%s1342_s0 + $0x38] sm:$0xff]   ;;  %v879_v22 = vld [vmem:[%s1342_s0 + $0xa0] sm:$0xff]  }
   0x8   :  { %741 = vmatprep.subr.bf16.mxu0 %v889_v0  ;;  %849 = vmatprep.subr.bf16.mxu1 %v889_v0  ;;  %v880_v23 = vld [vmem:[%s1342_s0 + $0x40] sm:$0xff]   ;;  %v881_v24 = vld [vmem:[%s1342_s0 + $0xa8] sm:$0xff]   ;;  %v883_v26 = vld [vmem:[%s1342_s0 + $0xb0] sm:$0xff]  }
   0x9   :  { %v882_v25 = vld [vmem:[%s1342_s0 + $0x48] sm:$0xff]   ;;  %v884_v27 = vld [vmem:[%s1342_s0 + $0x50] sm:$0xff]   ;;  %v885_v28 = vld [vmem:[%s1342_s0 + $0xb8] sm:$0xff]  }
   0xa   :  { %v886_v29 = vld [vmem:[%s1342_s0 + $0x58] sm:$0xff]   ;;  %v887_v30 = vld [vmem:[%s1342_s0 + $0xc0] sm:$0xff]  }
   0xb   :  { %742 = vmatpush3.bf16.msra.mxu0 %v861_v3  ;;  %854 = vmatpush3.bf16.msra.mxu1 %v861_v3  ;;  %v888_v31 = vld [vmem:[%s1342_s0 + $0x60] sm:$0xff]  }
   0xc   :  { %743 = vmatprep.subr.bf16.mxu0 %v889_v0  ;;  %850 = vmatprep.subr.bf16.mxu1 %v889_v0  ;;  %v1089_v32 = vld [vmem:[%s1343_s2] ss:$0 sm:$0xff] }
   0xf   :  { %744 = vmatpush3.bf16.msra.mxu0 %v862_v4  ;;  %855 = vmatpush3.bf16.msra.mxu1 %v862_v4 }
  0x10   :  { %745 = vmatprep.subr.bf16.mxu0 %v889_v0  ;;  %851 = vmatprep.subr.bf16.mxu1 %v889_v0 }
  0x13   :  { %746 = vmatpush3.bf16.msra.mxu0 %v311_v6  ;;  %856 = vmatpush3.bf16.msra.mxu1 %v311_v6 }
  0x16   :  { %748 = vmatmul.mubr.msk.bf16.vlgmr.msra.gmra.mrb[0].mxu0 %vm233_vm2, %v864_v7  ;;  %800 = vmatmul.mubr.msk.bf16.vlgmr.msra.gmra.mrb[0].mxu1 %vm233_vm2, %v865_v8 }
  0x17   :  { %751 = vmatprep.mubr.msk.bf16.mxu0 %vm890_vm0, %v889_v0  ;;  %803 = vmatprep.mubr.msk.bf16.mxu1 %vm890_vm0, %v889_v0 }
  0x1e   :  { %752 = vmatmul.mubr.msk.bf16.gmra.mrb[4].mxu0 %vm233_vm2, %v866_v9  ;;  %804 = vmatmul.mubr.msk.bf16.gmra.mrb[4].mxu1 %vm233_vm2, %v867_v10 }
  0x1f   :  { %755 = vmatprep.mubr.msk.bf16.mxu0 %vm890_vm0, %v889_v0  ;;  %807 = vmatprep.mubr.msk.bf16.mxu1 %vm890_vm0, %v889_v0 }
  0x26   :  { %756 = vmatmul.mubr.msk.bf16.gmra.mrb[8].mxu0 %vm233_vm2, %v868_v11  ;;  %808 = vmatmul.mubr.msk.bf16.gmra.mrb[8].mxu1 %vm233_vm2, %v869_v12 }
  0x27   :  { %759 = vmatprep.mubr.msk.bf16.mxu0 %vm890_vm0, %v889_v0  ;;  %811 = vmatprep.mubr.msk.bf16.mxu1 %vm890_vm0, %v889_v0 }
  0x2e   :  { %760 = vmatmul.mubr.msk.bf16.gmra.mrb[12].mxu0 %vm233_vm2, %v870_v13  ;;  %812 = vmatmul.mubr.msk.bf16.gmra.mrb[12].mxu1 %vm233_vm2, %v871_v14 }
  0x2f   :  { %763 = vmatprep.mubr.msk.bf16.mxu0 %vm890_vm0, %v889_v0  ;;  %815 = vmatprep.mubr.msk.bf16.mxu1 %vm890_vm0, %v889_v0 }
  0x36   :  { %764 = vmatmul.mubr.msk.bf16.gmra.mrb[16].mxu0 %vm233_vm2, %v872_v15  ;;  %816 = vmatmul.mubr.msk.bf16.gmra.mrb[16].mxu1 %vm233_vm2, %v873_v16 }
  0x37   :  { %767 = vmatprep.mubr.msk.bf16.mxu0 %vm890_vm0, %v889_v0  ;;  %819 = vmatprep.mubr.msk.bf16.mxu1 %vm890_vm0, %v889_v0 }
  0x3e   :  { %768 = vmatmul.mubr.msk.bf16.gmra.mrb[20].mxu0 %vm233_vm2, %v874_v17  ;;  %820 = vmatmul.mubr.msk.bf16.gmra.mrb[20].mxu1 %vm233_vm2, %v875_v18 }
  0x3f   :  { %771 = vmatprep.mubr.msk.bf16.mxu0 %vm890_vm0, %v889_v0  ;;  %823 = vmatprep.mubr.msk.bf16.mxu1 %vm890_vm0, %v889_v0 }
  0x46   :  { %772 = vmatmul.mubr.msk.bf16.gmra.mrb[24].mxu0 %vm233_vm2, %v876_v19  ;;  %824 = vmatmul.mubr.msk.bf16.gmra.mrb[24].mxu1 %vm233_vm2, %v877_v20 }
  0x47   :  { %775 = vmatprep.mubr.msk.bf16.mxu0 %vm890_vm0, %v889_v0  ;;  %827 = vmatprep.mubr.msk.bf16.mxu1 %vm890_vm0, %v889_v0 }
  0x4e   :  { %776 = vmatmul.mubr.msk.bf16.gmra.mrb[28].mxu0 %vm233_vm2, %v878_v21  ;;  %828 = vmatmul.mubr.msk.bf16.gmra.mrb[28].mxu1 %vm233_vm2, %v879_v22 }
  0x4f   :  { %779 = vmatprep.mubr.msk.bf16.mxu0 %vm890_vm0, %v889_v0  ;;  %831 = vmatprep.mubr.msk.bf16.mxu1 %vm890_vm0, %v889_v0 }
  0x56   :  { %780 = vmatmul.mubr.msk.bf16.gmra.mrb[32].mxu0 %vm233_vm2, %v880_v23  ;;  %832 = vmatmul.mubr.msk.bf16.gmra.mrb[32].mxu1 %vm233_vm2, %v881_v24 }
  0x57   :  { %783 = vmatprep.mubr.msk.bf16.mxu0 %vm890_vm0, %v889_v0  ;;  %835 = vmatprep.mubr.msk.bf16.mxu1 %vm890_vm0, %v889_v0 }
  0x5e   :  { %784 = vmatmul.mubr.msk.bf16.gmra.mrb[36].mxu0 %vm233_vm2, %v882_v25  ;;  %836 = vmatmul.mubr.msk.bf16.gmra.mrb[36].mxu1 %vm233_vm2, %v883_v26 }
  0x5f   :  { %787 = vmatprep.mubr.msk.bf16.mxu0 %vm890_vm0, %v889_v0  ;;  %839 = vmatprep.mubr.msk.bf16.mxu1 %vm890_vm0, %v889_v0 }
  0x66   :  { %788 = vmatmul.mubr.msk.bf16.gmra.mrb[40].mxu0 %vm233_vm2, %v884_v27  ;;  %840 = vmatmul.mubr.msk.bf16.gmra.mrb[40].mxu1 %vm233_vm2, %v885_v28 }
  0x67   :  { %791 = vmatprep.mubr.msk.bf16.mxu0 %vm890_vm0, %v889_v0  ;;  %843 = vmatprep.mubr.msk.bf16.mxu1 %vm890_vm0, %v889_v0 }
  0x6e   :  { %792 = vmatmul.mubr.msk.bf16.gmra.mrb[44].mxu0 %vm233_vm2, %v886_v29  ;;  %844 = vmatmul.mubr.msk.bf16.gmra.mrb[44].mxu1 %vm233_vm2, %v887_v30 }
  0x6f   :  { %795 = vmatprep.mubr.msk.bf16.mxu0 %vm890_vm0, %v889_v0 }
  0x76   :  { %796 = vmatmul.mubr.msk.bf16.gmra.mrb[48].mxu0 %vm233_vm2, %v888_v31 }
  0xe9   :  { %v347_v33 = vpop.f32.mrb[0].mxu0  ;;  %v451_v34 = vpop.f32.mrb[0].mxu1 }
  0xea   :  { %v348_v35 = vadd.f32 %v1089_v32, %v347_v33  ;;  %v749_v36 = vpop.f32.mrb[1].mxu0  ;;  %v452_v37 = vadd.f32 %v1089_v32, %v451_v34  ;;  %v801_v38 = vpop.f32.mrb[1].mxu1 }
  0xeb   :  { %v350_v39 = vpop.f32.mrb[2].mxu0  ;;  %v454_v40 = vpop.f32.mrb[2].mxu1 }
  0xec   :  { %v546_v41 = vmax.f32 %v348_v35, 0.0  ;;  %v351_v42 = vadd.f32 %v1089_v32, %v350_v39  ;;  %v750_v43 = vpop.f32.mrb[3].mxu0  ;;  %v572_v44 = vmax.f32 %v452_v37, 0.0  ;;  %v455_v45 = vadd.f32 %v1089_v32, %v454_v40  ;;  %v802_v46 = vpop.f32.mrb[3].mxu1 }
  0xee   :  { %597 = vst.msk [vmem:[%s1344_s3] sm:$0xff] %vm596_vm3, %v546_v41  ;;  %v547_v47 = vmax.f32 %v351_v42, 0.0  ;;  %623 = vst.msk [vmem:[%s1344_s3 + $0xd0] sm:$0xff] %vm596_vm3, %v572_v44  ;;  %v573_v48 = vmax.f32 %v455_v45, 0.0 }
  0xf0   :  { %598 = vst.msk [vmem:[%s1344_s3 + $0x8] sm:$0xff] %vm596_vm3, %v547_v47  ;;  %624 = vst.msk [vmem:[%s1344_s3 + $0xd8] sm:$0xff] %vm596_vm3, %v573_v48 }
  0xf1   :  { %v355_v49 = vpop.f32.mrb[4].mxu0  ;;  %v459_v50 = vpop.f32.mrb[4].mxu1 }
  0xf2   :  { %v356_v51 = vadd.f32 %v1089_v32, %v355_v49  ;;  %v753_v52 = vpop.f32.mrb[5].mxu0  ;;  %v460_v53 = vadd.f32 %v1089_v32, %v459_v50  ;;  %v805_v54 = vpop.f32.mrb[5].mxu1 }
  0xf3   :  { %v358_v55 = vpop.f32.mrb[6].mxu0  ;;  %v462_v56 = vpop.f32.mrb[6].mxu1 }
  0xf4   :  { %v548_v57 = vmax.f32 %v356_v51, 0.0  ;;  %v359_v58 = vadd.f32 %v1089_v32, %v358_v55  ;;  %v754_v59 = vpop.f32.mrb[7].mxu0  ;;  %v574_v60 = vmax.f32 %v460_v53, 0.0  ;;  %v463_v61 = vadd.f32 %v1089_v32, %v462_v56  ;;  %v806_v62 = vpop.f32.mrb[7].mxu1 }
  0xf6   :  { %599 = vst.msk [vmem:[%s1344_s3 + $0x10] sm:$0xff] %vm596_vm3, %v548_v57  ;;  %v549_v63 = vmax.f32 %v359_v58, 0.0  ;;  %625 = vst.msk [vmem:[%s1344_s3 + $0xe0] sm:$0xff] %vm596_vm3, %v574_v60  ;;  %v575_v0 = vmax.f32 %v463_v61, 0.0 }
  0xf8   :  { %600 = vst.msk [vmem:[%s1344_s3 + $0x18] sm:$0xff] %vm596_vm3, %v549_v63  ;;  %626 = vst.msk [vmem:[%s1344_s3 + $0xe8] sm:$0xff] %vm596_vm3, %v575_v0 }
  0xf9   :  { %v363_v1 = vpop.f32.mrb[8].mxu0  ;;  %v467_v2 = vpop.f32.mrb[8].mxu1 }
  0xfa   :  { %v364_v3 = vadd.f32 %v1089_v32, %v363_v1  ;;  %v757_v4 = vpop.f32.mrb[9].mxu0  ;;  %v468_v5 = vadd.f32 %v1089_v32, %v467_v2  ;;  %v809_v6 = vpop.f32.mrb[9].mxu1 }
  0xfb   :  { %v366_v7 = vpop.f32.mrb[10].mxu0  ;;  %v470_v8 = vpop.f32.mrb[10].mxu1 }
  0xfc   :  { %v550_v9 = vmax.f32 %v364_v3, 0.0  ;;  %v367_v10 = vadd.f32 %v1089_v32, %v366_v7  ;;  %v758_v11 = vpop.f32.mrb[11].mxu0  ;;  %v576_v12 = vmax.f32 %v468_v5, 0.0  ;;  %v471_v13 = vadd.f32 %v1089_v32, %v470_v8  ;;  %v810_v14 = vpop.f32.mrb[11].mxu1 }
  0xfe   :  { %601 = vst.msk [vmem:[%s1344_s3 + $0x20] sm:$0xff] %vm596_vm3, %v550_v9  ;;  %v551_v15 = vmax.f32 %v367_v10, 0.0  ;;  %627 = vst.msk [vmem:[%s1344_s3 + $0xf0] sm:$0xff] %vm596_vm3, %v576_v12  ;;  %v577_v16 = vmax.f32 %v471_v13, 0.0 }
 0x100   :  { %602 = vst.msk [vmem:[%s1344_s3 + $0x28] sm:$0xff] %vm596_vm3, %v551_v15  ;;  %628 = vst.msk [vmem:[%s1344_s3 + $0xf8] sm:$0xff] %vm596_vm3, %v577_v16 }
 0x101   :  { %v371_v17 = vpop.f32.mrb[12].mxu0  ;;  %v475_v18 = vpop.f32.mrb[12].mxu1 }
 0x102   :  { %v372_v19 = vadd.f32 %v1089_v32, %v371_v17  ;;  %v761_v20 = vpop.f32.mrb[13].mxu0  ;;  %v476_v21 = vadd.f32 %v1089_v32, %v475_v18  ;;  %v813_v22 = vpop.f32.mrb[13].mxu1 }
 0x103   :  { %v374_v23 = vpop.f32.mrb[14].mxu0  ;;  %v478_v24 = vpop.f32.mrb[14].mxu1 }
 0x104   :  { %v552_v25 = vmax.f32 %v372_v19, 0.0  ;;  %v375_v26 = vadd.f32 %v1089_v32, %v374_v23  ;;  %v762_v27 = vpop.f32.mrb[15].mxu0  ;;  %v578_v28 = vmax.f32 %v476_v21, 0.0  ;;  %v479_v29 = vadd.f32 %v1089_v32, %v478_v24  ;;  %v814_v30 = vpop.f32.mrb[15].mxu1 }
 0x106   :  { %603 = vst.msk [vmem:[%s1344_s3 + $0x30] sm:$0xff] %vm596_vm3, %v552_v25  ;;  %v553_v31 = vmax.f32 %v375_v26, 0.0  ;;  %629 = vst.msk [vmem:[%s1344_s3 + $0x100] sm:$0xff] %vm596_vm3, %v578_v28  ;;  %v579_v33 = vmax.f32 %v479_v29, 0.0 }
 0x108   :  { %604 = vst.msk [vmem:[%s1344_s3 + $0x38] sm:$0xff] %vm596_vm3, %v553_v31  ;;  %630 = vst.msk [vmem:[%s1344_s3 + $0x108] sm:$0xff] %vm596_vm3, %v579_v33 }
 0x109   :  { %v379_v34 = vpop.f32.mrb[16].mxu0  ;;  %v483_v35 = vpop.f32.mrb[16].mxu1 }
 0x10a   :  { %v380_v36 = vadd.f32 %v1089_v32, %v379_v34  ;;  %v765_v37 = vpop.f32.mrb[17].mxu0  ;;  %v484_v38 = vadd.f32 %v1089_v32, %v483_v35  ;;  %v817_v39 = vpop.f32.mrb[17].mxu1 }
 0x10b   :  { %v382_v40 = vpop.f32.mrb[18].mxu0  ;;  %v486_v41 = vpop.f32.mrb[18].mxu1 }
 0x10c   :  { %v554_v42 = vmax.f32 %v380_v36, 0.0  ;;  %v383_v43 = vadd.f32 %v1089_v32, %v382_v40  ;;  %v766_v44 = vpop.f32.mrb[19].mxu0  ;;  %v580_v45 = vmax.f32 %v484_v38, 0.0  ;;  %v487_v46 = vadd.f32 %v1089_v32, %v486_v41  ;;  %v818_v47 = vpop.f32.mrb[19].mxu1 }
 0x10e   :  { %605 = vst.msk [vmem:[%s1344_s3 + $0x40] sm:$0xff] %vm596_vm3, %v554_v42  ;;  %v555_v48 = vmax.f32 %v383_v43, 0.0  ;;  %631 = vst.msk [vmem:[%s1344_s3 + $0x110] sm:$0xff] %vm596_vm3, %v580_v45  ;;  %v581_v49 = vmax.f32 %v487_v46, 0.0 }
 0x110   :  { %606 = vst.msk [vmem:[%s1344_s3 + $0x48] sm:$0xff] %vm596_vm3, %v555_v48  ;;  %632 = vst.msk [vmem:[%s1344_s3 + $0x118] sm:$0xff] %vm596_vm3, %v581_v49 }
 0x111   :  { %v387_v50 = vpop.f32.mrb[20].mxu0  ;;  %v491_v51 = vpop.f32.mrb[20].mxu1 }
 0x112   :  { %v388_v52 = vadd.f32 %v1089_v32, %v387_v50  ;;  %v769_v53 = vpop.f32.mrb[21].mxu0  ;;  %v492_v54 = vadd.f32 %v1089_v32, %v491_v51  ;;  %v821_v55 = vpop.f32.mrb[21].mxu1 }
 0x113   :  { %v390_v56 = vpop.f32.mrb[22].mxu0  ;;  %v494_v57 = vpop.f32.mrb[22].mxu1 }
 0x114   :  { %v556_v58 = vmax.f32 %v388_v52, 0.0  ;;  %v391_v59 = vadd.f32 %v1089_v32, %v390_v56  ;;  %v770_v60 = vpop.f32.mrb[23].mxu0  ;;  %v582_v61 = vmax.f32 %v492_v54, 0.0  ;;  %v495_v62 = vadd.f32 %v1089_v32, %v494_v57  ;;  %v822_v63 = vpop.f32.mrb[23].mxu1 }
 0x116   :  { %607 = vst.msk [vmem:[%s1344_s3 + $0x50] sm:$0xff] %vm596_vm3, %v556_v58  ;;  %v557_v0 = vmax.f32 %v391_v59, 0.0  ;;  %633 = vst.msk [vmem:[%s1344_s3 + $0x120] sm:$0xff] %vm596_vm3, %v582_v61  ;;  %v583_v1 = vmax.f32 %v495_v62, 0.0 }
 0x118   :  { %608 = vst.msk [vmem:[%s1344_s3 + $0x58] sm:$0xff] %vm596_vm3, %v557_v0  ;;  %634 = vst.msk [vmem:[%s1344_s3 + $0x128] sm:$0xff] %vm596_vm3, %v583_v1 }
 0x119   :  { %v395_v2 = vpop.f32.mrb[24].mxu0  ;;  %v499_v3 = vpop.f32.mrb[24].mxu1 }
 0x11a   :  { %v396_v4 = vadd.f32 %v1089_v32, %v395_v2  ;;  %v773_v5 = vpop.f32.mrb[25].mxu0  ;;  %v500_v6 = vadd.f32 %v1089_v32, %v499_v3  ;;  %v825_v7 = vpop.f32.mrb[25].mxu1 }
 0x11b   :  { %v398_v8 = vpop.f32.mrb[26].mxu0  ;;  %v502_v9 = vpop.f32.mrb[26].mxu1 }
 0x11c   :  { %v558_v10 = vmax.f32 %v396_v4, 0.0  ;;  %v399_v11 = vadd.f32 %v1089_v32, %v398_v8  ;;  %v774_v12 = vpop.f32.mrb[27].mxu0  ;;  %v584_v13 = vmax.f32 %v500_v6, 0.0  ;;  %v503_v14 = vadd.f32 %v1089_v32, %v502_v9  ;;  %v826_v15 = vpop.f32.mrb[27].mxu1 }
 0x11e   :  { %609 = vst.msk [vmem:[%s1344_s3 + $0x60] sm:$0xff] %vm596_vm3, %v558_v10  ;;  %v559_v16 = vmax.f32 %v399_v11, 0.0  ;;  %635 = vst.msk [vmem:[%s1344_s3 + $0x130] sm:$0xff] %vm596_vm3, %v584_v13  ;;  %v585_v17 = vmax.f32 %v503_v14, 0.0 }
 0x120   :  { %610 = vst.msk [vmem:[%s1344_s3 + $0x68] sm:$0xff] %vm596_vm3, %v559_v16  ;;  %636 = vst.msk [vmem:[%s1344_s3 + $0x138] sm:$0xff] %vm596_vm3, %v585_v17 }
 0x121   :  { %v403_v18 = vpop.f32.mrb[28].mxu0  ;;  %v507_v19 = vpop.f32.mrb[28].mxu1 }
 0x122   :  { %v404_v20 = vadd.f32 %v1089_v32, %v403_v18  ;;  %v777_v21 = vpop.f32.mrb[29].mxu0  ;;  %v508_v22 = vadd.f32 %v1089_v32, %v507_v19  ;;  %v829_v23 = vpop.f32.mrb[29].mxu1 }
 0x123   :  { %v406_v24 = vpop.f32.mrb[30].mxu0  ;;  %v510_v25 = vpop.f32.mrb[30].mxu1 }
 0x124   :  { %v560_v26 = vmax.f32 %v404_v20, 0.0  ;;  %v407_v27 = vadd.f32 %v1089_v32, %v406_v24  ;;  %v778_v28 = vpop.f32.mrb[31].mxu0  ;;  %v586_v29 = vmax.f32 %v508_v22, 0.0  ;;  %v511_v30 = vadd.f32 %v1089_v32, %v510_v25  ;;  %v830_v31 = vpop.f32.mrb[31].mxu1 }
 0x126   :  { %611 = vst.msk [vmem:[%s1344_s3 + $0x70] sm:$0xff] %vm596_vm3, %v560_v26  ;;  %v561_v33 = vmax.f32 %v407_v27, 0.0  ;;  %637 = vst.msk [vmem:[%s1344_s3 + $0x140] sm:$0xff] %vm596_vm3, %v586_v29  ;;  %v587_v34 = vmax.f32 %v511_v30, 0.0 }
 0x128   :  { %612 = vst.msk [vmem:[%s1344_s3 + $0x78] sm:$0xff] %vm596_vm3, %v561_v33  ;;  %638 = vst.msk [vmem:[%s1344_s3 + $0x148] sm:$0xff] %vm596_vm3, %v587_v34 }
 0x129   :  { %v411_v35 = vpop.f32.mrb[32].mxu0  ;;  %v515_v36 = vpop.f32.mrb[32].mxu1 }
 0x12a   :  { %v412_v37 = vadd.f32 %v1089_v32, %v411_v35  ;;  %v781_v38 = vpop.f32.mrb[33].mxu0  ;;  %v516_v39 = vadd.f32 %v1089_v32, %v515_v36  ;;  %v833_v40 = vpop.f32.mrb[33].mxu1 }
 0x12b   :  { %v414_v41 = vpop.f32.mrb[34].mxu0  ;;  %v518_v42 = vpop.f32.mrb[34].mxu1 }
 0x12c   :  { %v562_v43 = vmax.f32 %v412_v37, 0.0  ;;  %v415_v44 = vadd.f32 %v1089_v32, %v414_v41  ;;  %v782_v45 = vpop.f32.mrb[35].mxu0  ;;  %v588_v46 = vmax.f32 %v516_v39, 0.0  ;;  %v519_v47 = vadd.f32 %v1089_v32, %v518_v42  ;;  %v834_v48 = vpop.f32.mrb[35].mxu1 }
 0x12e   :  { %613 = vst.msk [vmem:[%s1344_s3 + $0x80] sm:$0xff] %vm596_vm3, %v562_v43  ;;  %v563_v49 = vmax.f32 %v415_v44, 0.0  ;;  %639 = vst.msk [vmem:[%s1344_s3 + $0x150] sm:$0xff] %vm596_vm3, %v588_v46  ;;  %v589_v50 = vmax.f32 %v519_v47, 0.0 }
 0x130   :  { %614 = vst.msk [vmem:[%s1344_s3 + $0x88] sm:$0xff] %vm596_vm3, %v563_v49  ;;  %640 = vst.msk [vmem:[%s1344_s3 + $0x158] sm:$0xff] %vm596_vm3, %v589_v50 }
 0x131   :  { %v419_v51 = vpop.f32.mrb[36].mxu0  ;;  %v523_v52 = vpop.f32.mrb[36].mxu1 }
 0x132   :  { %v420_v53 = vadd.f32 %v1089_v32, %v419_v51  ;;  %v785_v54 = vpop.f32.mrb[37].mxu0  ;;  %v524_v55 = vadd.f32 %v1089_v32, %v523_v52  ;;  %v837_v56 = vpop.f32.mrb[37].mxu1 }
 0x133   :  { %v422_v57 = vpop.f32.mrb[38].mxu0  ;;  %v526_v58 = vpop.f32.mrb[38].mxu1 }
 0x134   :  { %v564_v59 = vmax.f32 %v420_v53, 0.0  ;;  %v423_v60 = vadd.f32 %v1089_v32, %v422_v57  ;;  %v786_v61 = vpop.f32.mrb[39].mxu0  ;;  %v590_v62 = vmax.f32 %v524_v55, 0.0  ;;  %v527_v63 = vadd.f32 %v1089_v32, %v526_v58  ;;  %v838_v0 = vpop.f32.mrb[39].mxu1 }
 0x136   :  { %615 = vst.msk [vmem:[%s1344_s3 + $0x90] sm:$0xff] %vm596_vm3, %v564_v59  ;;  %v565_v1 = vmax.f32 %v423_v60, 0.0  ;;  %641 = vst.msk [vmem:[%s1344_s3 + $0x160] sm:$0xff] %vm596_vm3, %v590_v62  ;;  %v591_v2 = vmax.f32 %v527_v63, 0.0 }
 0x138   :  { %616 = vst.msk [vmem:[%s1344_s3 + $0x98] sm:$0xff] %vm596_vm3, %v565_v1  ;;  %642 = vst.msk [vmem:[%s1344_s3 + $0x168] sm:$0xff] %vm596_vm3, %v591_v2 }
 0x139   :  { %v427_v3 = vpop.f32.mrb[40].mxu0  ;;  %v531_v4 = vpop.f32.mrb[40].mxu1 }
 0x13a   :  { %v428_v5 = vadd.f32 %v1089_v32, %v427_v3  ;;  %v789_v6 = vpop.f32.mrb[41].mxu0  ;;  %v532_v7 = vadd.f32 %v1089_v32, %v531_v4  ;;  %v841_v8 = vpop.f32.mrb[41].mxu1 }
 0x13b   :  { %v430_v9 = vpop.f32.mrb[42].mxu0  ;;  %v534_v10 = vpop.f32.mrb[42].mxu1 }
 0x13c   :  { %v566_v11 = vmax.f32 %v428_v5, 0.0  ;;  %v431_v12 = vadd.f32 %v1089_v32, %v430_v9  ;;  %v790_v13 = vpop.f32.mrb[43].mxu0  ;;  %v592_v14 = vmax.f32 %v532_v7, 0.0  ;;  %v535_v15 = vadd.f32 %v1089_v32, %v534_v10  ;;  %v842_v16 = vpop.f32.mrb[43].mxu1 }
 0x13e   :  { %617 = vst.msk [vmem:[%s1344_s3 + $0xa0] sm:$0xff] %vm596_vm3, %v566_v11  ;;  %v567_v17 = vmax.f32 %v431_v12, 0.0  ;;  %643 = vst.msk [vmem:[%s1344_s3 + $0x170] sm:$0xff] %vm596_vm3, %v592_v14  ;;  %v593_v18 = vmax.f32 %v535_v15, 0.0 }
 0x140   :  { %618 = vst.msk [vmem:[%s1344_s3 + $0xa8] sm:$0xff] %vm596_vm3, %v567_v17  ;;  %644 = vst.msk [vmem:[%s1344_s3 + $0x178] sm:$0xff] %vm596_vm3, %v593_v18 }
 0x141   :  { %v435_v19 = vpop.f32.mrb[44].mxu0  ;;  %v539_v20 = vpop.f32.mrb[44].mxu1 }
 0x142   :  { %v436_v21 = vadd.f32 %v1089_v32, %v435_v19  ;;  %v793_v22 = vpop.f32.mrb[45].mxu0  ;;  %v540_v23 = vadd.f32 %v1089_v32, %v539_v20  ;;  %v845_v24 = vpop.f32.mrb[45].mxu1 }
 0x143   :  { %v438_v25 = vpop.f32.mrb[46].mxu0  ;;  %v542_v26 = vpop.f32.mrb[46].mxu1 }
 0x144   :  { %v568_v27 = vmax.f32 %v436_v21, 0.0  ;;  %v439_v28 = vadd.f32 %v1089_v32, %v438_v25  ;;  %v794_v29 = vpop.f32.mrb[47].mxu0  ;;  %v594_v30 = vmax.f32 %v540_v23, 0.0  ;;  %v543_v31 = vadd.f32 %v1089_v32, %v542_v26  ;;  %v846_v33 = vpop.f32.mrb[47].mxu1 }
 0x146   :  { %619 = vst.msk [vmem:[%s1344_s3 + $0xb0] sm:$0xff] %vm596_vm3, %v568_v27  ;;  %v569_v34 = vmax.f32 %v439_v28, 0.0  ;;  %645 = vst.msk [vmem:[%s1344_s3 + $0x180] sm:$0xff] %vm596_vm3, %v594_v30  ;;  %v595_v35 = vmax.f32 %v543_v31, 0.0 }
 0x148   :  { %620 = vst.msk [vmem:[%s1344_s3 + $0xb8] sm:$0xff] %vm596_vm3, %v569_v34  ;;  %646 = vst.msk [vmem:[%s1344_s3 + $0x188] sm:$0xff] %vm596_vm3, %v595_v35 }
 0x149   :  { %v443_v36 = vpop.f32.mrb[48].mxu0 }
 0x14a   :  { %v444_v37 = vadd.f32 %v1089_v32, %v443_v36  ;;  %v797_v38 = vpop.f32.mrb[49].mxu0 }
 0x14b   :  { %v446_v39 = vpop.f32.mrb[50].mxu0 }
 0x14c   :  { %v570_v40 = vmax.f32 %v444_v37, 0.0  ;;  %v447_v41 = vadd.f32 %v1089_v32, %v446_v39  ;;  %v798_v42 = vpop.f32.mrb[51].mxu0 }
 0x14e   :  { %621 = vst.msk [vmem:[%s1344_s3 + $0xc0] sm:$0xff] %vm596_vm3, %v570_v40  ;;  %v571_v43 = vmax.f32 %v447_v41, 0.0 }
 0x150   :  { %622 = vst.msk [vmem:[%s1344_s3 + $0xc8] sm:$0xff] %vm596_vm3, %v571_v43 }

// kernel: _lambda_.28
= control target key start
LH: loop header
LB: loop body
LE: loop exit
PB: predicated region body
PF: predicated region fallthrough
CT: control target
= control target key end

     0   :  { %v942_v0 = vmov 0.0   ;;  %vm943_vm0 = vmmov 0   ;;  %vm312_vm1 = vcmask 1043456   ;;  %vm236_vm2 = vcmask 588800   ;;  %s1549_s1 = inlined_call_operand.vmem [shape: bf16[72,8], index: 1, kind: input, shape index: {}]   ;;  %s1550_s0 = inlined_call_operand.vmem [shape: bf16[400,72], index: 0, kind: input, shape index: {}]   ;;  %s1551_s2 = inlined_call_operand.vmem [shape: f32[1,8], index: 2, kind: input, shape index: {}]   ;;  %s1552_s3 = inlined_call_operand.vmem [shape: f32[400,8], index: 3, kind: input, shape index: {}]   ;;  %s1553_s4 = inlined_call_operand.vmem [shape: f32[400,8], index: 4, kind: output, shape index: {}]  }
   0x1   :  { %790 = vmatprep.subr.bf16.mxu0 %v942_v0  ;;  %v912_v1 = vld [vmem:[%s1549_s1] sm:$0xff]   ;;  %900 = vmatprep.subr.bf16.mxu1 %v942_v0  ;;  %v913_v2 = vld [vmem:[%s1549_s1 + $0x8] sm:$0xff]   ;;  %v914_v3 = vld [vmem:[%s1549_s1 + $0x10] sm:$0xff]   ;;  %vm649_vm3 = vcmask 64512  }
   0x2   :  { %800 = vmatprep.mubr.msk.bf16.mxu0 %vm943_vm0, %v942_v0  ;;  %852 = vmatprep.mubr.msk.bf16.mxu1 %vm943_vm0, %v942_v0  ;;  %v915_v4 = vld [vmem:[%s1549_s1 + $0x18] sm:$0xff]   ;;  %v916_v5 = vld [vmem:[%s1549_s1 + $0x20] ss:$0 sps:$4 sm:$0xff]   ;;  %v918_v8 = vld [vmem:[%s1550_s0 + $0x68] sm:$0xff]  }
   0x3   :  { %791 = vmatpush3.bf16.msra.mxu0 %v912_v1  ;;  %905 = vmatpush3.bf16.msra.mxu1 %v912_v1  ;;  %v314_v6 = vsel %vm312_vm1, %v916_v5, 0  ;;  %v917_v7 = vld [vmem:[%s1550_s0] sm:$0xff]   ;;  %v919_v9 = vld [vmem:[%s1550_s0 + $0x8] sm:$0xff]   ;;  %v920_v10 = vld [vmem:[%s1550_s0 + $0x70] sm:$0xff]  }
   0x4   :  { %792 = vmatprep.subr.bf16.mxu0 %v942_v0  ;;  %901 = vmatprep.subr.bf16.mxu1 %v942_v0  ;;  %v921_v11 = vld [vmem:[%s1550_s0 + $0x10] sm:$0xff]   ;;  %v922_v12 = vld [vmem:[%s1550_s0 + $0x78] sm:$0xff]   ;;  %v924_v14 = vld [vmem:[%s1550_s0 + $0x80] sm:$0xff]  }
   0x5   :  { %v923_v13 = vld [vmem:[%s1550_s0 + $0x18] sm:$0xff]   ;;  %v925_v15 = vld [vmem:[%s1550_s0 + $0x20] sm:$0xff]   ;;  %v926_v16 = vld [vmem:[%s1550_s0 + $0x88] sm:$0xff]  }
   0x6   :  { %v927_v17 = vld [vmem:[%s1550_s0 + $0x28] sm:$0xff]   ;;  %v928_v18 = vld [vmem:[%s1550_s0 + $0x90] sm:$0xff]   ;;  %v930_v20 = vld [vmem:[%s1550_s0 + $0x98] sm:$0xff]  }
   0x7   :  { %793 = vmatpush3.bf16.msra.mxu0 %v913_v2  ;;  %906 = vmatpush3.bf16.msra.mxu1 %v913_v2  ;;  %v929_v19 = vld [vmem:[%s1550_s0 + $0x30] sm:$0xff]   ;;  %v931_v21 = vld [vmem:[%s1550_s0 + $0x38] sm:$0xff]   ;;  %v932_v22 = vld [vmem:[%s1550_s0 + $0xa0] sm:$0xff]  }
   0x8   :  { %794 = vmatprep.subr.bf16.mxu0 %v942_v0  ;;  %902 = vmatprep.subr.bf16.mxu1 %v942_v0  ;;  %v933_v23 = vld [vmem:[%s1550_s0 + $0x40] sm:$0xff]   ;;  %v934_v24 = vld [vmem:[%s1550_s0 + $0xa8] sm:$0xff]   ;;  %v936_v26 = vld [vmem:[%s1550_s0 + $0xb0] sm:$0xff]  }
   0x9   :  { %v935_v25 = vld [vmem:[%s1550_s0 + $0x48] sm:$0xff]   ;;  %v937_v27 = vld [vmem:[%s1550_s0 + $0x50] sm:$0xff]   ;;  %v938_v28 = vld [vmem:[%s1550_s0 + $0xb8] sm:$0xff]  }
   0xa   :  { %v939_v29 = vld [vmem:[%s1550_s0 + $0x58] sm:$0xff]   ;;  %v940_v30 = vld [vmem:[%s1550_s0 + $0xc0] sm:$0xff]   ;;  %v575_v36 = vld [vmem:[%s1552_s3 + $0xd0] sm:$0xff] }
   0xb   :  { %795 = vmatpush3.bf16.msra.mxu0 %v914_v3  ;;  %907 = vmatpush3.bf16.msra.mxu1 %v914_v3  ;;  %v941_v31 = vld [vmem:[%s1550_s0 + $0x60] sm:$0xff]   ;;  %v550_v42 = vld [vmem:[%s1552_s3 + $0x8] sm:$0xff]  ;;  %v576_v44 = vld [vmem:[%s1552_s3 + $0xd8] sm:$0xff] }
   0xc   :  { %796 = vmatprep.subr.bf16.mxu0 %v942_v0  ;;  %903 = vmatprep.subr.bf16.mxu1 %v942_v0  ;;  %v1147_v32 = vld [vmem:[%s1551_s2] ss:$0 sm:$0xff]  ;;  %v551_v54 = vld [vmem:[%s1552_s3 + $0x10] sm:$0xff]  ;;  %v552_v62 = vld [vmem:[%s1552_s3 + $0x18] sm:$0xff] }
   0xd   :  { %v549_v34 = vld [vmem:[%s1552_s3] sm:$0xff] }
   0xe   :  { %v577_v56 = vld [vmem:[%s1552_s3 + $0xe0] sm:$0xff] }
   0xf   :  { %797 = vmatpush3.bf16.msra.mxu0 %v915_v4  ;;  %908 = vmatpush3.bf16.msra.mxu1 %v915_v4 }
  0x10   :  { %798 = vmatprep.subr.bf16.mxu0 %v942_v0  ;;  %904 = vmatprep.subr.bf16.mxu1 %v942_v0 }
  0x13   :  { %799 = vmatpush3.bf16.msra.mxu0 %v314_v6  ;;  %909 = vmatpush3.bf16.msra.mxu1 %v314_v6 }
  0x16   :  { %801 = vmatmul.mubr.msk.bf16.vlgmr.msra.gmra.mrb[0].mxu0 %vm236_vm2, %v917_v7  ;;  %853 = vmatmul.mubr.msk.bf16.vlgmr.msra.gmra.mrb[0].mxu1 %vm236_vm2, %v918_v8 }
  0x17   :  { %804 = vmatprep.mubr.msk.bf16.mxu0 %vm943_vm0, %v942_v0  ;;  %856 = vmatprep.mubr.msk.bf16.mxu1 %vm943_vm0, %v942_v0 }
  0x1e   :  { %805 = vmatmul.mubr.msk.bf16.gmra.mrb[4].mxu0 %vm236_vm2, %v919_v9  ;;  %857 = vmatmul.mubr.msk.bf16.gmra.mrb[4].mxu1 %vm236_vm2, %v920_v10  ;;  %v553_v10 = vld [vmem:[%s1552_s3 + $0x20] sm:$0xff] }
  0x1f   :  { %808 = vmatprep.mubr.msk.bf16.mxu0 %vm943_vm0, %v942_v0  ;;  %860 = vmatprep.mubr.msk.bf16.mxu1 %vm943_vm0, %v942_v0 }
  0x26   :  { %809 = vmatmul.mubr.msk.bf16.gmra.mrb[8].mxu0 %vm236_vm2, %v921_v11  ;;  %861 = vmatmul.mubr.msk.bf16.gmra.mrb[8].mxu1 %vm236_vm2, %v922_v12  ;;  %v579_v12 = vld [vmem:[%s1552_s3 + $0xf0] sm:$0xff] }
  0x27   :  { %812 = vmatprep.mubr.msk.bf16.mxu0 %vm943_vm0, %v942_v0  ;;  %864 = vmatprep.mubr.msk.bf16.mxu1 %vm943_vm0, %v942_v0 }
  0x2e   :  { %813 = vmatmul.mubr.msk.bf16.gmra.mrb[12].mxu0 %vm236_vm2, %v923_v13  ;;  %865 = vmatmul.mubr.msk.bf16.gmra.mrb[12].mxu1 %vm236_vm2, %v924_v14 }
  0x2f   :  { %816 = vmatprep.mubr.msk.bf16.mxu0 %vm943_vm0, %v942_v0  ;;  %868 = vmatprep.mubr.msk.bf16.mxu1 %vm943_vm0, %v942_v0 }
  0x36   :  { %817 = vmatmul.mubr.msk.bf16.gmra.mrb[16].mxu0 %vm236_vm2, %v925_v15  ;;  %869 = vmatmul.mubr.msk.bf16.gmra.mrb[16].mxu1 %vm236_vm2, %v926_v16 }
  0x37   :  { %820 = vmatprep.mubr.msk.bf16.mxu0 %vm943_vm0, %v942_v0  ;;  %872 = vmatprep.mubr.msk.bf16.mxu1 %vm943_vm0, %v942_v0 }
  0x3e   :  { %821 = vmatmul.mubr.msk.bf16.gmra.mrb[20].mxu0 %vm236_vm2, %v927_v17  ;;  %873 = vmatmul.mubr.msk.bf16.gmra.mrb[20].mxu1 %vm236_vm2, %v928_v18  ;;  %v554_v18 = vld [vmem:[%s1552_s3 + $0x28] sm:$0xff] }
  0x3f   :  { %824 = vmatprep.mubr.msk.bf16.mxu0 %vm943_vm0, %v942_v0  ;;  %876 = vmatprep.mubr.msk.bf16.mxu1 %vm943_vm0, %v942_v0 }
  0x46   :  { %825 = vmatmul.mubr.msk.bf16.gmra.mrb[24].mxu0 %vm236_vm2, %v929_v19  ;;  %877 = vmatmul.mubr.msk.bf16.gmra.mrb[24].mxu1 %vm236_vm2, %v930_v20  ;;  %v580_v20 = vld [vmem:[%s1552_s3 + $0xf8] sm:$0xff] }
  0x47   :  { %828 = vmatprep.mubr.msk.bf16.mxu0 %vm943_vm0, %v942_v0  ;;  %880 = vmatprep.mubr.msk.bf16.mxu1 %vm943_vm0, %v942_v0 }
  0x4e   :  { %829 = vmatmul.mubr.msk.bf16.gmra.mrb[28].mxu0 %vm236_vm2, %v931_v21  ;;  %881 = vmatmul.mubr.msk.bf16.gmra.mrb[28].mxu1 %vm236_vm2, %v932_v22 }
  0x4f   :  { %832 = vmatprep.mubr.msk.bf16.mxu0 %vm943_vm0, %v942_v0  ;;  %884 = vmatprep.mubr.msk.bf16.mxu1 %vm943_vm0, %v942_v0 }
  0x56   :  { %833 = vmatmul.mubr.msk.bf16.gmra.mrb[32].mxu0 %vm236_vm2, %v933_v23  ;;  %885 = vmatmul.mubr.msk.bf16.gmra.mrb[32].mxu1 %vm236_vm2, %v934_v24 }
  0x57   :  { %836 = vmatprep.mubr.msk.bf16.mxu0 %vm943_vm0, %v942_v0  ;;  %888 = vmatprep.mubr.msk.bf16.mxu1 %vm943_vm0, %v942_v0 }
  0x5e   :  { %837 = vmatmul.mubr.msk.bf16.gmra.mrb[36].mxu0 %vm236_vm2, %v935_v25  ;;  %889 = vmatmul.mubr.msk.bf16.gmra.mrb[36].mxu1 %vm236_vm2, %v936_v26 }
  0x5f   :  { %840 = vmatprep.mubr.msk.bf16.mxu0 %vm943_vm0, %v942_v0  ;;  %892 = vmatprep.mubr.msk.bf16.mxu1 %vm943_vm0, %v942_v0 }
  0x66   :  { %841 = vmatmul.mubr.msk.bf16.gmra.mrb[40].mxu0 %vm236_vm2, %v937_v27  ;;  %893 = vmatmul.mubr.msk.bf16.gmra.mrb[40].mxu1 %vm236_vm2, %v938_v28 }
  0x67   :  { %844 = vmatprep.mubr.msk.bf16.mxu0 %vm943_vm0, %v942_v0  ;;  %896 = vmatprep.mubr.msk.bf16.mxu1 %vm943_vm0, %v942_v0 }
  0x6e   :  { %845 = vmatmul.mubr.msk.bf16.gmra.mrb[44].mxu0 %vm236_vm2, %v939_v29  ;;  %897 = vmatmul.mubr.msk.bf16.gmra.mrb[44].mxu1 %vm236_vm2, %v940_v30  ;;  %v555_v30 = vld [vmem:[%s1552_s3 + $0x30] sm:$0xff] }
  0x6f   :  { %848 = vmatprep.mubr.msk.bf16.mxu0 %vm943_vm0, %v942_v0  ;;  %v578_v0 = vld [vmem:[%s1552_s3 + $0xe8] sm:$0xff] }
  0x76   :  { %849 = vmatmul.mubr.msk.bf16.gmra.mrb[48].mxu0 %vm236_vm2, %v941_v31 }
  0xe9   :  { %v350_v33 = vpop.f32.mrb[0].mxu0  ;;  %v454_v35 = vpop.f32.mrb[0].mxu1 }
  0xea   :  { %v351_v37 = vadd.f32 %v1147_v32, %v350_v33  ;;  %v802_v38 = vpop.f32.mrb[1].mxu0  ;;  %v455_v39 = vadd.f32 %v1147_v32, %v454_v35  ;;  %v854_v40 = vpop.f32.mrb[1].mxu1  ;;  %v581_v33 = vld [vmem:[%s1552_s3 + $0x100] sm:$0xff] }
  0xeb   :  { %v353_v41 = vpop.f32.mrb[2].mxu0  ;;  %v457_v43 = vpop.f32.mrb[2].mxu1 }
  0xec   :  { %v599_v45 = vadd.f32 %v549_v34, %v351_v37  ;;  %v354_v46 = vadd.f32 %v1147_v32, %v353_v41  ;;  %v803_v47 = vpop.f32.mrb[3].mxu0  ;;  %v625_v48 = vadd.f32 %v575_v36, %v455_v39  ;;  %v458_v49 = vadd.f32 %v1147_v32, %v457_v43  ;;  %v855_v50 = vpop.f32.mrb[3].mxu1  ;;  %v556_v39 = vld [vmem:[%s1552_s3 + $0x38] sm:$0xff]  ;;  %v582_v41 = vld [vmem:[%s1552_s3 + $0x108] sm:$0xff] }
  0xee   :  { %650 = vst.msk [vmem:[%s1553_s4] sm:$0xff] %vm649_vm3, %v599_v45  ;;  %v600_v51 = vadd.f32 %v550_v42, %v354_v46  ;;  %676 = vst.msk [vmem:[%s1553_s4 + $0xd0] sm:$0xff] %vm649_vm3, %v625_v48  ;;  %v626_v52 = vadd.f32 %v576_v44, %v458_v49 }
  0xf0   :  { %651 = vst.msk [vmem:[%s1553_s4 + $0x8] sm:$0xff] %vm649_vm3, %v600_v51  ;;  %677 = vst.msk [vmem:[%s1553_s4 + $0xd8] sm:$0xff] %vm649_vm3, %v626_v52  ;;  %v557_v51 = vld [vmem:[%s1552_s3 + $0x40] sm:$0xff] }
  0xf1   :  { %v358_v53 = vpop.f32.mrb[4].mxu0  ;;  %v462_v55 = vpop.f32.mrb[4].mxu1 }
  0xf2   :  { %v359_v57 = vadd.f32 %v1147_v32, %v358_v53  ;;  %v806_v58 = vpop.f32.mrb[5].mxu0  ;;  %v463_v59 = vadd.f32 %v1147_v32, %v462_v55  ;;  %v858_v60 = vpop.f32.mrb[5].mxu1  ;;  %v583_v53 = vld [vmem:[%s1552_s3 + $0x110] sm:$0xff] }
  0xf3   :  { %v361_v61 = vpop.f32.mrb[6].mxu0  ;;  %v465_v63 = vpop.f32.mrb[6].mxu1 }
  0xf4   :  { %v601_v1 = vadd.f32 %v551_v54, %v359_v57  ;;  %v362_v2 = vadd.f32 %v1147_v32, %v361_v61  ;;  %v807_v3 = vpop.f32.mrb[7].mxu0  ;;  %v627_v4 = vadd.f32 %v577_v56, %v463_v59  ;;  %v466_v5 = vadd.f32 %v1147_v32, %v465_v63  ;;  %v859_v6 = vpop.f32.mrb[7].mxu1  ;;  %v558_v59 = vld [vmem:[%s1552_s3 + $0x48] sm:$0xff]  ;;  %v584_v61 = vld [vmem:[%s1552_s3 + $0x118] sm:$0xff] }
  0xf6   :  { %652 = vst.msk [vmem:[%s1553_s4 + $0x10] sm:$0xff] %vm649_vm3, %v601_v1  ;;  %v602_v7 = vadd.f32 %v552_v62, %v362_v2  ;;  %678 = vst.msk [vmem:[%s1553_s4 + $0xe0] sm:$0xff] %vm649_vm3, %v627_v4  ;;  %v628_v8 = vadd.f32 %v578_v0, %v466_v5 }
  0xf8   :  { %653 = vst.msk [vmem:[%s1553_s4 + $0x18] sm:$0xff] %vm649_vm3, %v602_v7  ;;  %679 = vst.msk [vmem:[%s1553_s4 + $0xe8] sm:$0xff] %vm649_vm3, %v628_v8  ;;  %v559_v7 = vld [vmem:[%s1552_s3 + $0x50] sm:$0xff] }
  0xf9   :  { %v366_v9 = vpop.f32.mrb[8].mxu0  ;;  %v470_v11 = vpop.f32.mrb[8].mxu1 }
  0xfa   :  { %v367_v13 = vadd.f32 %v1147_v32, %v366_v9  ;;  %v810_v14 = vpop.f32.mrb[9].mxu0  ;;  %v471_v15 = vadd.f32 %v1147_v32, %v470_v11  ;;  %v862_v16 = vpop.f32.mrb[9].mxu1  ;;  %v585_v9 = vld [vmem:[%s1552_s3 + $0x120] sm:$0xff] }
  0xfb   :  { %v369_v17 = vpop.f32.mrb[10].mxu0  ;;  %v473_v19 = vpop.f32.mrb[10].mxu1 }
  0xfc   :  { %v603_v21 = vadd.f32 %v553_v10, %v367_v13  ;;  %v370_v22 = vadd.f32 %v1147_v32, %v369_v17  ;;  %v811_v23 = vpop.f32.mrb[11].mxu0  ;;  %v629_v24 = vadd.f32 %v579_v12, %v471_v15  ;;  %v474_v25 = vadd.f32 %v1147_v32, %v473_v19  ;;  %v863_v26 = vpop.f32.mrb[11].mxu1  ;;  %v560_v15 = vld [vmem:[%s1552_s3 + $0x58] sm:$0xff]  ;;  %v586_v17 = vld [vmem:[%s1552_s3 + $0x128] sm:$0xff] }
  0xfe   :  { %654 = vst.msk [vmem:[%s1553_s4 + $0x20] sm:$0xff] %vm649_vm3, %v603_v21  ;;  %v604_v27 = vadd.f32 %v554_v18, %v370_v22  ;;  %680 = vst.msk [vmem:[%s1553_s4 + $0xf0] sm:$0xff] %vm649_vm3, %v629_v24  ;;  %v630_v28 = vadd.f32 %v580_v20, %v474_v25 }
 0x100   :  { %655 = vst.msk [vmem:[%s1553_s4 + $0x28] sm:$0xff] %vm649_vm3, %v604_v27  ;;  %681 = vst.msk [vmem:[%s1553_s4 + $0xf8] sm:$0xff] %vm649_vm3, %v630_v28  ;;  %v561_v27 = vld [vmem:[%s1552_s3 + $0x60] sm:$0xff] }
 0x101   :  { %v374_v29 = vpop.f32.mrb[12].mxu0  ;;  %v478_v31 = vpop.f32.mrb[12].mxu1 }
 0x102   :  { %v375_v34 = vadd.f32 %v1147_v32, %v374_v29  ;;  %v814_v35 = vpop.f32.mrb[13].mxu0  ;;  %v479_v36 = vadd.f32 %v1147_v32, %v478_v31  ;;  %v866_v37 = vpop.f32.mrb[13].mxu1  ;;  %v587_v29 = vld [vmem:[%s1552_s3 + $0x130] sm:$0xff] }
 0x103   :  { %v377_v38 = vpop.f32.mrb[14].mxu0  ;;  %v481_v40 = vpop.f32.mrb[14].mxu1 }
 0x104   :  { %v605_v42 = vadd.f32 %v555_v30, %v375_v34  ;;  %v378_v43 = vadd.f32 %v1147_v32, %v377_v38  ;;  %v815_v44 = vpop.f32.mrb[15].mxu0  ;;  %v631_v45 = vadd.f32 %v581_v33, %v479_v36  ;;  %v482_v46 = vadd.f32 %v1147_v32, %v481_v40  ;;  %v867_v47 = vpop.f32.mrb[15].mxu1  ;;  %v562_v36 = vld [vmem:[%s1552_s3 + $0x68] sm:$0xff]  ;;  %v588_v38 = vld [vmem:[%s1552_s3 + $0x138] sm:$0xff] }
 0x106   :  { %656 = vst.msk [vmem:[%s1553_s4 + $0x30] sm:$0xff] %vm649_vm3, %v605_v42  ;;  %v606_v48 = vadd.f32 %v556_v39, %v378_v43  ;;  %682 = vst.msk [vmem:[%s1553_s4 + $0x100] sm:$0xff] %vm649_vm3, %v631_v45  ;;  %v632_v49 = vadd.f32 %v582_v41, %v482_v46 }
 0x108   :  { %657 = vst.msk [vmem:[%s1553_s4 + $0x38] sm:$0xff] %vm649_vm3, %v606_v48  ;;  %683 = vst.msk [vmem:[%s1553_s4 + $0x108] sm:$0xff] %vm649_vm3, %v632_v49  ;;  %v563_v48 = vld [vmem:[%s1552_s3 + $0x70] sm:$0xff] }
 0x109   :  { %v382_v50 = vpop.f32.mrb[16].mxu0  ;;  %v486_v52 = vpop.f32.mrb[16].mxu1 }
 0x10a   :  { %v383_v54 = vadd.f32 %v1147_v32, %v382_v50  ;;  %v818_v55 = vpop.f32.mrb[17].mxu0  ;;  %v487_v56 = vadd.f32 %v1147_v32, %v486_v52  ;;  %v870_v57 = vpop.f32.mrb[17].mxu1  ;;  %v589_v50 = vld [vmem:[%s1552_s3 + $0x140] sm:$0xff] }
 0x10b   :  { %v385_v58 = vpop.f32.mrb[18].mxu0  ;;  %v489_v60 = vpop.f32.mrb[18].mxu1 }
 0x10c   :  { %v607_v62 = vadd.f32 %v557_v51, %v383_v54  ;;  %v386_v63 = vadd.f32 %v1147_v32, %v385_v58  ;;  %v819_v0 = vpop.f32.mrb[19].mxu0  ;;  %v633_v1 = vadd.f32 %v583_v53, %v487_v56  ;;  %v490_v2 = vadd.f32 %v1147_v32, %v489_v60  ;;  %v871_v3 = vpop.f32.mrb[19].mxu1  ;;  %v564_v56 = vld [vmem:[%s1552_s3 + $0x78] sm:$0xff]  ;;  %v590_v58 = vld [vmem:[%s1552_s3 + $0x148] sm:$0xff] }
 0x10e   :  { %658 = vst.msk [vmem:[%s1553_s4 + $0x40] sm:$0xff] %vm649_vm3, %v607_v62  ;;  %v608_v4 = vadd.f32 %v558_v59, %v386_v63  ;;  %684 = vst.msk [vmem:[%s1553_s4 + $0x110] sm:$0xff] %vm649_vm3, %v633_v1  ;;  %v634_v5 = vadd.f32 %v584_v61, %v490_v2 }
 0x110   :  { %659 = vst.msk [vmem:[%s1553_s4 + $0x48] sm:$0xff] %vm649_vm3, %v608_v4  ;;  %685 = vst.msk [vmem:[%s1553_s4 + $0x118] sm:$0xff] %vm649_vm3, %v634_v5  ;;  %v565_v4 = vld [vmem:[%s1552_s3 + $0x80] sm:$0xff] }
 0x111   :  { %v390_v6 = vpop.f32.mrb[20].mxu0  ;;  %v494_v8 = vpop.f32.mrb[20].mxu1 }
 0x112   :  { %v391_v10 = vadd.f32 %v1147_v32, %v390_v6  ;;  %v822_v11 = vpop.f32.mrb[21].mxu0  ;;  %v495_v12 = vadd.f32 %v1147_v32, %v494_v8  ;;  %v874_v13 = vpop.f32.mrb[21].mxu1  ;;  %v591_v6 = vld [vmem:[%s1552_s3 + $0x150] sm:$0xff] }
 0x113   :  { %v393_v14 = vpop.f32.mrb[22].mxu0  ;;  %v497_v16 = vpop.f32.mrb[22].mxu1 }
 0x114   :  { %v609_v18 = vadd.f32 %v559_v7, %v391_v10  ;;  %v394_v19 = vadd.f32 %v1147_v32, %v393_v14  ;;  %v823_v20 = vpop.f32.mrb[23].mxu0  ;;  %v635_v21 = vadd.f32 %v585_v9, %v495_v12  ;;  %v498_v22 = vadd.f32 %v1147_v32, %v497_v16  ;;  %v875_v23 = vpop.f32.mrb[23].mxu1  ;;  %v566_v12 = vld [vmem:[%s1552_s3 + $0x88] sm:$0xff]  ;;  %v592_v14 = vld [vmem:[%s1552_s3 + $0x158] sm:$0xff] }
 0x116   :  { %660 = vst.msk [vmem:[%s1553_s4 + $0x50] sm:$0xff] %vm649_vm3, %v609_v18  ;;  %v610_v24 = vadd.f32 %v560_v15, %v394_v19  ;;  %686 = vst.msk [vmem:[%s1553_s4 + $0x120] sm:$0xff] %vm649_vm3, %v635_v21  ;;  %v636_v25 = vadd.f32 %v586_v17, %v498_v22 }
 0x118   :  { %661 = vst.msk [vmem:[%s1553_s4 + $0x58] sm:$0xff] %vm649_vm3, %v610_v24  ;;  %687 = vst.msk [vmem:[%s1553_s4 + $0x128] sm:$0xff] %vm649_vm3, %v636_v25  ;;  %v567_v24 = vld [vmem:[%s1552_s3 + $0x90] sm:$0xff] }
 0x119   :  { %v398_v26 = vpop.f32.mrb[24].mxu0  ;;  %v502_v28 = vpop.f32.mrb[24].mxu1 }
 0x11a   :  { %v399_v30 = vadd.f32 %v1147_v32, %v398_v26  ;;  %v826_v31 = vpop.f32.mrb[25].mxu0  ;;  %v503_v33 = vadd.f32 %v1147_v32, %v502_v28  ;;  %v878_v34 = vpop.f32.mrb[25].mxu1  ;;  %v593_v26 = vld [vmem:[%s1552_s3 + $0x160] sm:$0xff] }
 0x11b   :  { %v401_v35 = vpop.f32.mrb[26].mxu0  ;;  %v505_v37 = vpop.f32.mrb[26].mxu1 }
 0x11c   :  { %v611_v39 = vadd.f32 %v561_v27, %v399_v30  ;;  %v402_v40 = vadd.f32 %v1147_v32, %v401_v35  ;;  %v827_v41 = vpop.f32.mrb[27].mxu0  ;;  %v637_v42 = vadd.f32 %v587_v29, %v503_v33  ;;  %v506_v43 = vadd.f32 %v1147_v32, %v505_v37  ;;  %v879_v44 = vpop.f32.mrb[27].mxu1  ;;  %v568_v33 = vld [vmem:[%s1552_s3 + $0x98] sm:$0xff]  ;;  %v594_v35 = vld [vmem:[%s1552_s3 + $0x168] sm:$0xff] }
 0x11e   :  { %662 = vst.msk [vmem:[%s1553_s4 + $0x60] sm:$0xff] %vm649_vm3, %v611_v39  ;;  %v612_v45 = vadd.f32 %v562_v36, %v402_v40  ;;  %688 = vst.msk [vmem:[%s1553_s4 + $0x130] sm:$0xff] %vm649_vm3, %v637_v42  ;;  %v638_v46 = vadd.f32 %v588_v38, %v506_v43 }
 0x120   :  { %663 = vst.msk [vmem:[%s1553_s4 + $0x68] sm:$0xff] %vm649_vm3, %v612_v45  ;;  %689 = vst.msk [vmem:[%s1553_s4 + $0x138] sm:$0xff] %vm649_vm3, %v638_v46  ;;  %v569_v45 = vld [vmem:[%s1552_s3 + $0xa0] sm:$0xff] }
 0x121   :  { %v406_v47 = vpop.f32.mrb[28].mxu0  ;;  %v510_v49 = vpop.f32.mrb[28].mxu1 }
 0x122   :  { %v407_v51 = vadd.f32 %v1147_v32, %v406_v47  ;;  %v830_v52 = vpop.f32.mrb[29].mxu0  ;;  %v511_v53 = vadd.f32 %v1147_v32, %v510_v49  ;;  %v882_v54 = vpop.f32.mrb[29].mxu1  ;;  %v595_v47 = vld [vmem:[%s1552_s3 + $0x170] sm:$0xff] }
 0x123   :  { %v409_v55 = vpop.f32.mrb[30].mxu0  ;;  %v513_v57 = vpop.f32.mrb[30].mxu1 }
 0x124   :  { %v613_v59 = vadd.f32 %v563_v48, %v407_v51  ;;  %v410_v60 = vadd.f32 %v1147_v32, %v409_v55  ;;  %v831_v61 = vpop.f32.mrb[31].mxu0  ;;  %v639_v62 = vadd.f32 %v589_v50, %v511_v53  ;;  %v514_v63 = vadd.f32 %v1147_v32, %v513_v57  ;;  %v883_v0 = vpop.f32.mrb[31].mxu1  ;;  %v570_v53 = vld [vmem:[%s1552_s3 + $0xa8] sm:$0xff]  ;;  %v596_v55 = vld [vmem:[%s1552_s3 + $0x178] sm:$0xff] }
 0x126   :  { %664 = vst.msk [vmem:[%s1553_s4 + $0x70] sm:$0xff] %vm649_vm3, %v613_v59  ;;  %v614_v1 = vadd.f32 %v564_v56, %v410_v60  ;;  %690 = vst.msk [vmem:[%s1553_s4 + $0x140] sm:$0xff] %vm649_vm3, %v639_v62  ;;  %v640_v2 = vadd.f32 %v590_v58, %v514_v63 }
 0x128   :  { %665 = vst.msk [vmem:[%s1553_s4 + $0x78] sm:$0xff] %vm649_vm3, %v614_v1  ;;  %691 = vst.msk [vmem:[%s1553_s4 + $0x148] sm:$0xff] %vm649_vm3, %v640_v2  ;;  %v571_v1 = vld [vmem:[%s1552_s3 + $0xb0] sm:$0xff] }
 0x129   :  { %v414_v3 = vpop.f32.mrb[32].mxu0  ;;  %v518_v5 = vpop.f32.mrb[32].mxu1 }
 0x12a   :  { %v415_v7 = vadd.f32 %v1147_v32, %v414_v3  ;;  %v834_v8 = vpop.f32.mrb[33].mxu0  ;;  %v519_v9 = vadd.f32 %v1147_v32, %v518_v5  ;;  %v886_v10 = vpop.f32.mrb[33].mxu1  ;;  %v597_v3 = vld [vmem:[%s1552_s3 + $0x180] sm:$0xff] }
 0x12b   :  { %v417_v11 = vpop.f32.mrb[34].mxu0  ;;  %v521_v13 = vpop.f32.mrb[34].mxu1 }
 0x12c   :  { %v615_v15 = vadd.f32 %v565_v4, %v415_v7  ;;  %v418_v16 = vadd.f32 %v1147_v32, %v417_v11  ;;  %v835_v17 = vpop.f32.mrb[35].mxu0  ;;  %v641_v18 = vadd.f32 %v591_v6, %v519_v9  ;;  %v522_v19 = vadd.f32 %v1147_v32, %v521_v13  ;;  %v887_v20 = vpop.f32.mrb[35].mxu1  ;;  %v572_v9 = vld [vmem:[%s1552_s3 + $0xb8] sm:$0xff]  ;;  %v598_v11 = vld [vmem:[%s1552_s3 + $0x188] sm:$0xff] }
 0x12e   :  { %666 = vst.msk [vmem:[%s1553_s4 + $0x80] sm:$0xff] %vm649_vm3, %v615_v15  ;;  %v616_v21 = vadd.f32 %v566_v12, %v418_v16  ;;  %692 = vst.msk [vmem:[%s1553_s4 + $0x150] sm:$0xff] %vm649_vm3, %v641_v18  ;;  %v642_v22 = vadd.f32 %v592_v14, %v522_v19 }
 0x130   :  { %667 = vst.msk [vmem:[%s1553_s4 + $0x88] sm:$0xff] %vm649_vm3, %v616_v21  ;;  %693 = vst.msk [vmem:[%s1553_s4 + $0x158] sm:$0xff] %vm649_vm3, %v642_v22  ;;  %v573_v21 = vld [vmem:[%s1552_s3 + $0xc0] sm:$0xff] }
 0x131   :  { %v422_v23 = vpop.f32.mrb[36].mxu0  ;;  %v526_v25 = vpop.f32.mrb[36].mxu1 }
 0x132   :  { %v423_v27 = vadd.f32 %v1147_v32, %v422_v23  ;;  %v838_v28 = vpop.f32.mrb[37].mxu0  ;;  %v527_v29 = vadd.f32 %v1147_v32, %v526_v25  ;;  %v890_v30 = vpop.f32.mrb[37].mxu1  ;;  %v574_v25 = vld [vmem:[%s1552_s3 + $0xc8] sm:$0xff] }
 0x133   :  { %v425_v31 = vpop.f32.mrb[38].mxu0  ;;  %v529_v34 = vpop.f32.mrb[38].mxu1 }
 0x134   :  { %v617_v36 = vadd.f32 %v567_v24, %v423_v27  ;;  %v426_v37 = vadd.f32 %v1147_v32, %v425_v31  ;;  %v839_v38 = vpop.f32.mrb[39].mxu0  ;;  %v643_v39 = vadd.f32 %v593_v26, %v527_v29  ;;  %v530_v40 = vadd.f32 %v1147_v32, %v529_v34  ;;  %v891_v41 = vpop.f32.mrb[39].mxu1 }
 0x136   :  { %668 = vst.msk [vmem:[%s1553_s4 + $0x90] sm:$0xff] %vm649_vm3, %v617_v36  ;;  %v618_v42 = vadd.f32 %v568_v33, %v426_v37  ;;  %694 = vst.msk [vmem:[%s1553_s4 + $0x160] sm:$0xff] %vm649_vm3, %v643_v39  ;;  %v644_v43 = vadd.f32 %v594_v35, %v530_v40 }
 0x138   :  { %669 = vst.msk [vmem:[%s1553_s4 + $0x98] sm:$0xff] %vm649_vm3, %v618_v42  ;;  %695 = vst.msk [vmem:[%s1553_s4 + $0x168] sm:$0xff] %vm649_vm3, %v644_v43 }
 0x139   :  { %v430_v44 = vpop.f32.mrb[40].mxu0  ;;  %v534_v46 = vpop.f32.mrb[40].mxu1 }
 0x13a   :  { %v431_v48 = vadd.f32 %v1147_v32, %v430_v44  ;;  %v842_v49 = vpop.f32.mrb[41].mxu0  ;;  %v535_v50 = vadd.f32 %v1147_v32, %v534_v46  ;;  %v894_v51 = vpop.f32.mrb[41].mxu1 }
 0x13b   :  { %v433_v52 = vpop.f32.mrb[42].mxu0  ;;  %v537_v54 = vpop.f32.mrb[42].mxu1 }
 0x13c   :  { %v619_v56 = vadd.f32 %v569_v45, %v431_v48  ;;  %v434_v57 = vadd.f32 %v1147_v32, %v433_v52  ;;  %v843_v58 = vpop.f32.mrb[43].mxu0  ;;  %v645_v59 = vadd.f32 %v595_v47, %v535_v50  ;;  %v538_v60 = vadd.f32 %v1147_v32, %v537_v54  ;;  %v895_v61 = vpop.f32.mrb[43].mxu1 }
 0x13e   :  { %670 = vst.msk [vmem:[%s1553_s4 + $0xa0] sm:$0xff] %vm649_vm3, %v619_v56  ;;  %v620_v62 = vadd.f32 %v570_v53, %v434_v57  ;;  %696 = vst.msk [vmem:[%s1553_s4 + $0x170] sm:$0xff] %vm649_vm3, %v645_v59  ;;  %v646_v63 = vadd.f32 %v596_v55, %v538_v60 }
 0x140   :  { %671 = vst.msk [vmem:[%s1553_s4 + $0xa8] sm:$0xff] %vm649_vm3, %v620_v62  ;;  %697 = vst.msk [vmem:[%s1553_s4 + $0x178] sm:$0xff] %vm649_vm3, %v646_v63 }
 0x141   :  { %v438_v0 = vpop.f32.mrb[44].mxu0  ;;  %v542_v2 = vpop.f32.mrb[44].mxu1 }
 0x142   :  { %v439_v4 = vadd.f32 %v1147_v32, %v438_v0  ;;  %v846_v5 = vpop.f32.mrb[45].mxu0  ;;  %v543_v6 = vadd.f32 %v1147_v32, %v542_v2  ;;  %v898_v7 = vpop.f32.mrb[45].mxu1 }
 0x143   :  { %v441_v8 = vpop.f32.mrb[46].mxu0  ;;  %v545_v10 = vpop.f32.mrb[46].mxu1 }
 0x144   :  { %v621_v12 = vadd.f32 %v571_v1, %v439_v4  ;;  %v442_v13 = vadd.f32 %v1147_v32, %v441_v8  ;;  %v847_v14 = vpop.f32.mrb[47].mxu0  ;;  %v647_v15 = vadd.f32 %v597_v3, %v543_v6  ;;  %v546_v16 = vadd.f32 %v1147_v32, %v545_v10  ;;  %v899_v17 = vpop.f32.mrb[47].mxu1 }
 0x146   :  { %672 = vst.msk [vmem:[%s1553_s4 + $0xb0] sm:$0xff] %vm649_vm3, %v621_v12  ;;  %v622_v18 = vadd.f32 %v572_v9, %v442_v13  ;;  %698 = vst.msk [vmem:[%s1553_s4 + $0x180] sm:$0xff] %vm649_vm3, %v647_v15  ;;  %v648_v19 = vadd.f32 %v598_v11, %v546_v16 }
 0x148   :  { %673 = vst.msk [vmem:[%s1553_s4 + $0xb8] sm:$0xff] %vm649_vm3, %v622_v18  ;;  %699 = vst.msk [vmem:[%s1553_s4 + $0x188] sm:$0xff] %vm649_vm3, %v648_v19 }
 0x149   :  { %v446_v20 = vpop.f32.mrb[48].mxu0 }
 0x14a   :  { %v447_v22 = vadd.f32 %v1147_v32, %v446_v20  ;;  %v850_v23 = vpop.f32.mrb[49].mxu0 }
 0x14b   :  { %v449_v24 = vpop.f32.mrb[50].mxu0 }
 0x14c   :  { %v623_v26 = vadd.f32 %v573_v21, %v447_v22  ;;  %v450_v27 = vadd.f32 %v1147_v32, %v449_v24  ;;  %v851_v28 = vpop.f32.mrb[51].mxu0 }
 0x14e   :  { %674 = vst.msk [vmem:[%s1553_s4 + $0xc0] sm:$0xff] %vm649_vm3, %v623_v26  ;;  %v624_v29 = vadd.f32 %v574_v25, %v450_v27 }
 0x150   :  { %675 = vst.msk [vmem:[%s1553_s4 + $0xc8] sm:$0xff] %vm649_vm3, %v624_v29 }

// kernel: _lambda_.30
= control target key start
LH: loop header
LB: loop body
LE: loop exit
PB: predicated region body
PF: predicated region fallthrough
CT: control target
= control target key end

     0   :  { %s1098_s12 = smov 0   ;;  %s1403_s0 = inlined_call_operand.vmem [shape: bf16[1600,72], index: 0, kind: input, shape index: {}]   ;;  %s1404_s1 = inlined_call_operand.vmem [shape: bf16[72,4], index: 1, kind: input, shape index: {}]   ;;  %s1405_s2 = inlined_call_operand.vmem [shape: f32[1,4], index: 2, kind: input, shape index: {}]   ;;  %s1406_s3 = inlined_call_operand.vmem [shape: f32[1600,4], index: 3, kind: output, shape index: {}]  }
   0x1 LB: > { %s813_s13 = sadd.s32 4294967295, %s1074_s12   ;;  %p817_p0 = scmp.ge.s32.totalorder %s1074_s12, 1  ;;  %s1074_s12 = sphi %s1098_s12, %s13_s12  }
   0x2   : > { %p138_p1 = scmp.lt.s32.totalorder %s1074_s12, 5 }
   0x4   : > { %p139_p2 = pnand %p817_p0, %p138_p1 }
   0x5   : > { %v1038_v0 = vld [vmem:[%s1404_s1] sm:$0xff] (!%p139_p2)   ;;  %v1076_v1 = vmov (!%p139_p2), 0.0   ;;  %v1039_v2 = vld [vmem:[%s1404_s1 + $0x8] sm:$0xff] (!%p139_p2)   ;;  %s162_s18 = smul.u32 (!%p139_p2), 50, %s813_s13  ;;  %vm1077_vm0 = vmmov (!%p139_p2), 0   ;;  %v1040_v3 = vld [vmem:[%s1404_s1 + $0x10] sm:$0xff] (!%p139_p2)  }
   0x6   : > { %142 = sbr.rel (%p139_p2) target bundleno = 339 (0x153), region = 32  ;;  %908 = vmatprep.subr.bf16.mxu0 (!%p139_p2), %v1076_v1  ;;  %1018 = vmatprep.subr.bf16.mxu1 (!%p139_p2), %v1076_v1  ;;  %v1041_v4 = vld [vmem:[%s1404_s1 + $0x18] sm:$0xff] (!%p139_p2)   ;;  %v1042_v5 = vld [vmem:[%s1404_s1 + $0x20] ss:$0 sps:$4 sm:$0xff] (!%p139_p2)   ;;  %vm469_vm1 = vcmask (!%p139_p2), 1043456   ;;  %vm393_vm2 = vcmask (!%p139_p2), 588800  }
   0x7   : > { %909 = vmatpush3.bf16.msra.mxu0 (!%p139_p2), %v1038_v0  ;;  %1023 = vmatpush3.bf16.msra.mxu1 (!%p139_p2), %v1038_v0  ;;  %p163_p3 = scmp.lt.s32.totalorder (!%p139_p2), %s162_s18, 199  ;;  %v471_v6 = vsel (!%p139_p2), %vm469_vm1, %v1042_v5, 0  ;;  %v1243_v32 = vld [vmem:[%s1405_s2] ss:$0 sm:$0xff] (!%p139_p2)  ;;  %vm706_vm3 = vcmask (!%p139_p2), 31744  }
   0x8   : > { %910 = vmatprep.subr.bf16.mxu0 (!%p139_p2), %v1076_v1  ;;  %1019 = vmatprep.subr.bf16.mxu1 (!%p139_p2), %v1076_v1 }
   0x9   : > { %918 = vmatprep.mubr.msk.bf16.mxu0 (!%p139_p2), %vm1077_vm0, %v1076_v1  ;;  %970 = vmatprep.mubr.msk.bf16.mxu1 (!%p139_p2), %vm1077_vm0, %v1076_v1 }
   0xb   : > { %911 = vmatpush3.bf16.msra.mxu0 (!%p139_p2), %v1039_v2  ;;  %1024 = vmatpush3.bf16.msra.mxu1 (!%p139_p2), %v1039_v2 }
   0xc   : > { %912 = vmatprep.subr.bf16.mxu0 (!%p139_p2), %v1076_v1  ;;  %1020 = vmatprep.subr.bf16.mxu1 (!%p139_p2), %v1076_v1 }
   0xd   : > { %s1408_s18 = smov (!%p163_p3, %s162_s18), 199 }
   0xe   : > { %s818_s21 = sshll.u32 %s1408_s18, 2  ;;  %s819_s29 = sshll.u32 %s1408_s18, 3 }
   0xf   : > { %913 = vmatpush3.bf16.msra.mxu0 %v1040_v3  ;;  %1025 = vmatpush3.bf16.msra.mxu1 %v1040_v3  ;;  %s1134_s26 = scalar_lea.vmem %s1403_s0, %s818_s21  ;;  %s1248_s7 = scalar_lea.vmem %s1406_s3, %s819_s29 }
  0x10   : > { %914 = vmatprep.subr.bf16.mxu0 %v1076_v1  ;;  %1021 = vmatprep.subr.bf16.mxu1 %v1076_v1  ;;  %v1043_v7 = vld [vmem:[%s1134_s26] sm:$0xff]   ;;  %v1044_v8 = vld [vmem:[%s1134_s26 + $0x68] sm:$0xff]   ;;  %v1046_v10 = vld [vmem:[%s1134_s26 + $0x70] sm:$0xff]  }
  0x11   : > { %v1045_v9 = vld [vmem:[%s1134_s26 + $0x8] sm:$0xff]   ;;  %v1047_v11 = vld [vmem:[%s1134_s26 + $0x10] sm:$0xff]   ;;  %v1048_v12 = vld [vmem:[%s1134_s26 + $0x78] sm:$0xff]  }
  0x12   : > { %v1049_v13 = vld [vmem:[%s1134_s26 + $0x18] sm:$0xff]   ;;  %v1050_v14 = vld [vmem:[%s1134_s26 + $0x80] sm:$0xff]   ;;  %v1052_v16 = vld [vmem:[%s1134_s26 + $0x88] sm:$0xff]  }
  0x13   : > { %915 = vmatpush3.bf16.msra.mxu0 %v1041_v4  ;;  %1026 = vmatpush3.bf16.msra.mxu1 %v1041_v4  ;;  %v1051_v15 = vld [vmem:[%s1134_s26 + $0x20] sm:$0xff]   ;;  %v1053_v17 = vld [vmem:[%s1134_s26 + $0x28] sm:$0xff]   ;;  %v1054_v18 = vld [vmem:[%s1134_s26 + $0x90] sm:$0xff]  }
  0x14   : > { %916 = vmatprep.subr.bf16.mxu0 %v1076_v1  ;;  %1022 = vmatprep.subr.bf16.mxu1 %v1076_v1  ;;  %v1055_v19 = vld [vmem:[%s1134_s26 + $0x30] sm:$0xff]   ;;  %v1056_v20 = vld [vmem:[%s1134_s26 + $0x98] sm:$0xff]   ;;  %v1058_v22 = vld [vmem:[%s1134_s26 + $0xa0] sm:$0xff]  }
  0x15   : > { %v1057_v21 = vld [vmem:[%s1134_s26 + $0x38] sm:$0xff]   ;;  %v1059_v23 = vld [vmem:[%s1134_s26 + $0x40] sm:$0xff]   ;;  %v1060_v24 = vld [vmem:[%s1134_s26 + $0xa8] sm:$0xff]  }
  0x16   : > { %v1061_v25 = vld [vmem:[%s1134_s26 + $0x48] sm:$0xff]   ;;  %v1062_v26 = vld [vmem:[%s1134_s26 + $0xb0] sm:$0xff]   ;;  %v1064_v28 = vld [vmem:[%s1134_s26 + $0xb8] sm:$0xff]  }
  0x17   : > { %917 = vmatpush3.bf16.msra.mxu0 %v471_v6  ;;  %1027 = vmatpush3.bf16.msra.mxu1 %v471_v6  ;;  %v1063_v27 = vld [vmem:[%s1134_s26 + $0x50] sm:$0xff]   ;;  %v1065_v29 = vld [vmem:[%s1134_s26 + $0x58] sm:$0xff]   ;;  %v1066_v30 = vld [vmem:[%s1134_s26 + $0xc0] sm:$0xff]  }
  0x18   : > { %v1067_v31 = vld [vmem:[%s1134_s26 + $0x60] sm:$0xff]  }
  0x1a   : > { %919 = vmatmul.mubr.msk.bf16.vlgmr.msra.gmra.mrb[0].mxu0 %vm393_vm2, %v1043_v7  ;;  %971 = vmatmul.mubr.msk.bf16.vlgmr.msra.gmra.mrb[0].mxu1 %vm393_vm2, %v1044_v8 }
  0x1b   : > { %922 = vmatprep.mubr.msk.bf16.mxu0 %vm1077_vm0, %v1076_v1  ;;  %974 = vmatprep.mubr.msk.bf16.mxu1 %vm1077_vm0, %v1076_v1 }
  0x22   : > { %923 = vmatmul.mubr.msk.bf16.gmra.mrb[4].mxu0 %vm393_vm2, %v1045_v9  ;;  %975 = vmatmul.mubr.msk.bf16.gmra.mrb[4].mxu1 %vm393_vm2, %v1046_v10 }
  0x23   : > { %926 = vmatprep.mubr.msk.bf16.mxu0 %vm1077_vm0, %v1076_v1  ;;  %978 = vmatprep.mubr.msk.bf16.mxu1 %vm1077_vm0, %v1076_v1 }
  0x2a   : > { %927 = vmatmul.mubr.msk.bf16.gmra.mrb[8].mxu0 %vm393_vm2, %v1047_v11  ;;  %979 = vmatmul.mubr.msk.bf16.gmra.mrb[8].mxu1 %vm393_vm2, %v1048_v12 }
  0x2b   : > { %930 = vmatprep.mubr.msk.bf16.mxu0 %vm1077_vm0, %v1076_v1  ;;  %982 = vmatprep.mubr.msk.bf16.mxu1 %vm1077_vm0, %v1076_v1 }
  0x32   : > { %931 = vmatmul.mubr.msk.bf16.gmra.mrb[12].mxu0 %vm393_vm2, %v1049_v13  ;;  %983 = vmatmul.mubr.msk.bf16.gmra.mrb[12].mxu1 %vm393_vm2, %v1050_v14 }
  0x33   : > { %934 = vmatprep.mubr.msk.bf16.mxu0 %vm1077_vm0, %v1076_v1  ;;  %986 = vmatprep.mubr.msk.bf16.mxu1 %vm1077_vm0, %v1076_v1 }
  0x3a   : > { %935 = vmatmul.mubr.msk.bf16.gmra.mrb[16].mxu0 %vm393_vm2, %v1051_v15  ;;  %987 = vmatmul.mubr.msk.bf16.gmra.mrb[16].mxu1 %vm393_vm2, %v1052_v16 }
  0x3b   : > { %938 = vmatprep.mubr.msk.bf16.mxu0 %vm1077_vm0, %v1076_v1  ;;  %990 = vmatprep.mubr.msk.bf16.mxu1 %vm1077_vm0, %v1076_v1 }
  0x42   : > { %939 = vmatmul.mubr.msk.bf16.gmra.mrb[20].mxu0 %vm393_vm2, %v1053_v17  ;;  %991 = vmatmul.mubr.msk.bf16.gmra.mrb[20].mxu1 %vm393_vm2, %v1054_v18 }
  0x43   : > { %942 = vmatprep.mubr.msk.bf16.mxu0 %vm1077_vm0, %v1076_v1  ;;  %994 = vmatprep.mubr.msk.bf16.mxu1 %vm1077_vm0, %v1076_v1 }
  0x4a   : > { %943 = vmatmul.mubr.msk.bf16.gmra.mrb[24].mxu0 %vm393_vm2, %v1055_v19  ;;  %995 = vmatmul.mubr.msk.bf16.gmra.mrb[24].mxu1 %vm393_vm2, %v1056_v20 }
  0x4b   : > { %946 = vmatprep.mubr.msk.bf16.mxu0 %vm1077_vm0, %v1076_v1  ;;  %998 = vmatprep.mubr.msk.bf16.mxu1 %vm1077_vm0, %v1076_v1 }
  0x52   : > { %947 = vmatmul.mubr.msk.bf16.gmra.mrb[28].mxu0 %vm393_vm2, %v1057_v21  ;;  %999 = vmatmul.mubr.msk.bf16.gmra.mrb[28].mxu1 %vm393_vm2, %v1058_v22 }
  0x53   : > { %950 = vmatprep.mubr.msk.bf16.mxu0 %vm1077_vm0, %v1076_v1  ;;  %1002 = vmatprep.mubr.msk.bf16.mxu1 %vm1077_vm0, %v1076_v1 }
  0x5a   : > { %951 = vmatmul.mubr.msk.bf16.gmra.mrb[32].mxu0 %vm393_vm2, %v1059_v23  ;;  %1003 = vmatmul.mubr.msk.bf16.gmra.mrb[32].mxu1 %vm393_vm2, %v1060_v24 }
  0x5b   : > { %954 = vmatprep.mubr.msk.bf16.mxu0 %vm1077_vm0, %v1076_v1  ;;  %1006 = vmatprep.mubr.msk.bf16.mxu1 %vm1077_vm0, %v1076_v1 }
  0x62   : > { %955 = vmatmul.mubr.msk.bf16.gmra.mrb[36].mxu0 %vm393_vm2, %v1061_v25  ;;  %1007 = vmatmul.mubr.msk.bf16.gmra.mrb[36].mxu1 %vm393_vm2, %v1062_v26 }
  0x63   : > { %958 = vmatprep.mubr.msk.bf16.mxu0 %vm1077_vm0, %v1076_v1  ;;  %1010 = vmatprep.mubr.msk.bf16.mxu1 %vm1077_vm0, %v1076_v1 }
  0x6a   : > { %959 = vmatmul.mubr.msk.bf16.gmra.mrb[40].mxu0 %vm393_vm2, %v1063_v27  ;;  %1011 = vmatmul.mubr.msk.bf16.gmra.mrb[40].mxu1 %vm393_vm2, %v1064_v28 }
  0x6b   : > { %962 = vmatprep.mubr.msk.bf16.mxu0 %vm1077_vm0, %v1076_v1  ;;  %1014 = vmatprep.mubr.msk.bf16.mxu1 %vm1077_vm0, %v1076_v1 }
  0x72   : > { %963 = vmatmul.mubr.msk.bf16.gmra.mrb[44].mxu0 %vm393_vm2, %v1065_v29  ;;  %1015 = vmatmul.mubr.msk.bf16.gmra.mrb[44].mxu1 %vm393_vm2, %v1066_v30 }
  0x73   : > { %966 = vmatprep.mubr.msk.bf16.mxu0 %vm1077_vm0, %v1076_v1 }
  0x7a   : > { %967 = vmatmul.mubr.msk.bf16.gmra.mrb[48].mxu0 %vm393_vm2, %v1067_v31 }
  0xed   : > { %v507_v33 = vpop.f32.mrb[0].mxu0  ;;  %v611_v34 = vpop.f32.mrb[0].mxu1 }
  0xee   : > { %v508_v35 = vadd.f32 %v1243_v32, %v507_v33  ;;  %v920_v36 = vpop.f32.mrb[1].mxu0  ;;  %v612_v37 = vadd.f32 %v1243_v32, %v611_v34  ;;  %v972_v38 = vpop.f32.mrb[1].mxu1 }
  0xef   : > { %v510_v39 = vpop.f32.mrb[2].mxu0  ;;  %v614_v40 = vpop.f32.mrb[2].mxu1 }
  0xf0   : > { %707 = vst.msk [vmem:[%s1248_s7] sm:$0xff] %vm706_vm3, %v508_v35  ;;  %v511_v41 = vadd.f32 %v1243_v32, %v510_v39  ;;  %v921_v42 = vpop.f32.mrb[3].mxu0  ;;  %733 = vst.msk [vmem:[%s1248_s7 + $0xd0] sm:$0xff] %vm706_vm3, %v612_v37  ;;  %v615_v43 = vadd.f32 %v1243_v32, %v614_v40  ;;  %v973_v44 = vpop.f32.mrb[3].mxu1 }
  0xf2   : > { %708 = vst.msk [vmem:[%s1248_s7 + $0x8] sm:$0xff] %vm706_vm3, %v511_v41  ;;  %734 = vst.msk [vmem:[%s1248_s7 + $0xd8] sm:$0xff] %vm706_vm3, %v615_v43 }
  0xf5   : > { %v515_v45 = vpop.f32.mrb[4].mxu0  ;;  %v619_v46 = vpop.f32.mrb[4].mxu1 }
  0xf6   : > { %v516_v47 = vadd.f32 %v1243_v32, %v515_v45  ;;  %v924_v48 = vpop.f32.mrb[5].mxu0  ;;  %v620_v49 = vadd.f32 %v1243_v32, %v619_v46  ;;  %v976_v50 = vpop.f32.mrb[5].mxu1 }
  0xf7   : > { %v518_v51 = vpop.f32.mrb[6].mxu0  ;;  %v622_v52 = vpop.f32.mrb[6].mxu1 }
  0xf8   : > { %709 = vst.msk [vmem:[%s1248_s7 + $0x10] sm:$0xff] %vm706_vm3, %v516_v47  ;;  %v519_v53 = vadd.f32 %v1243_v32, %v518_v51  ;;  %v925_v54 = vpop.f32.mrb[7].mxu0  ;;  %735 = vst.msk [vmem:[%s1248_s7 + $0xe0] sm:$0xff] %vm706_vm3, %v620_v49  ;;  %v623_v55 = vadd.f32 %v1243_v32, %v622_v52  ;;  %v977_v56 = vpop.f32.mrb[7].mxu1 }
  0xfa   : > { %710 = vst.msk [vmem:[%s1248_s7 + $0x18] sm:$0xff] %vm706_vm3, %v519_v53  ;;  %736 = vst.msk [vmem:[%s1248_s7 + $0xe8] sm:$0xff] %vm706_vm3, %v623_v55 }
  0xfd   : > { %v523_v57 = vpop.f32.mrb[8].mxu0  ;;  %v627_v58 = vpop.f32.mrb[8].mxu1 }
  0xfe   : > { %v524_v59 = vadd.f32 %v1243_v32, %v523_v57  ;;  %v928_v60 = vpop.f32.mrb[9].mxu0  ;;  %v628_v61 = vadd.f32 %v1243_v32, %v627_v58  ;;  %v980_v62 = vpop.f32.mrb[9].mxu1 }
  0xff   : > { %v526_v63 = vpop.f32.mrb[10].mxu0  ;;  %v630_v0 = vpop.f32.mrb[10].mxu1 }
 0x100   : > { %711 = vst.msk [vmem:[%s1248_s7 + $0x20] sm:$0xff] %vm706_vm3, %v524_v59  ;;  %v527_v1 = vadd.f32 %v1243_v32, %v526_v63  ;;  %v929_v2 = vpop.f32.mrb[11].mxu0  ;;  %737 = vst.msk [vmem:[%s1248_s7 + $0xf0] sm:$0xff] %vm706_vm3, %v628_v61  ;;  %v631_v3 = vadd.f32 %v1243_v32, %v630_v0  ;;  %v981_v4 = vpop.f32.mrb[11].mxu1 }
 0x102   : > { %712 = vst.msk [vmem:[%s1248_s7 + $0x28] sm:$0xff] %vm706_vm3, %v527_v1  ;;  %738 = vst.msk [vmem:[%s1248_s7 + $0xf8] sm:$0xff] %vm706_vm3, %v631_v3 }
 0x105   : > { %v531_v5 = vpop.f32.mrb[12].mxu0  ;;  %v635_v6 = vpop.f32.mrb[12].mxu1 }
 0x106   : > { %v532_v7 = vadd.f32 %v1243_v32, %v531_v5  ;;  %v932_v8 = vpop.f32.mrb[13].mxu0  ;;  %v636_v9 = vadd.f32 %v1243_v32, %v635_v6  ;;  %v984_v10 = vpop.f32.mrb[13].mxu1 }
 0x107   : > { %v534_v11 = vpop.f32.mrb[14].mxu0  ;;  %v638_v12 = vpop.f32.mrb[14].mxu1 }
 0x108   : > { %713 = vst.msk [vmem:[%s1248_s7 + $0x30] sm:$0xff] %vm706_vm3, %v532_v7  ;;  %v535_v13 = vadd.f32 %v1243_v32, %v534_v11  ;;  %v933_v14 = vpop.f32.mrb[15].mxu0  ;;  %739 = vst.msk [vmem:[%s1248_s7 + $0x100] sm:$0xff] %vm706_vm3, %v636_v9  ;;  %v639_v15 = vadd.f32 %v1243_v32, %v638_v12  ;;  %v985_v16 = vpop.f32.mrb[15].mxu1 }
 0x10a   : > { %714 = vst.msk [vmem:[%s1248_s7 + $0x38] sm:$0xff] %vm706_vm3, %v535_v13  ;;  %740 = vst.msk [vmem:[%s1248_s7 + $0x108] sm:$0xff] %vm706_vm3, %v639_v15 }
 0x10d   : > { %v539_v17 = vpop.f32.mrb[16].mxu0  ;;  %v643_v18 = vpop.f32.mrb[16].mxu1 }
 0x10e   : > { %v540_v19 = vadd.f32 %v1243_v32, %v539_v17  ;;  %v936_v20 = vpop.f32.mrb[17].mxu0  ;;  %v644_v21 = vadd.f32 %v1243_v32, %v643_v18  ;;  %v988_v22 = vpop.f32.mrb[17].mxu1 }
 0x10f   : > { %v542_v23 = vpop.f32.mrb[18].mxu0  ;;  %v646_v24 = vpop.f32.mrb[18].mxu1 }
 0x110   : > { %715 = vst.msk [vmem:[%s1248_s7 + $0x40] sm:$0xff] %vm706_vm3, %v540_v19  ;;  %v543_v25 = vadd.f32 %v1243_v32, %v542_v23  ;;  %v937_v26 = vpop.f32.mrb[19].mxu0  ;;  %741 = vst.msk [vmem:[%s1248_s7 + $0x110] sm:$0xff] %vm706_vm3, %v644_v21  ;;  %v647_v27 = vadd.f32 %v1243_v32, %v646_v24  ;;  %v989_v28 = vpop.f32.mrb[19].mxu1 }
 0x112   : > { %716 = vst.msk [vmem:[%s1248_s7 + $0x48] sm:$0xff] %vm706_vm3, %v543_v25  ;;  %742 = vst.msk [vmem:[%s1248_s7 + $0x118] sm:$0xff] %vm706_vm3, %v647_v27 }
 0x115   : > { %v547_v29 = vpop.f32.mrb[20].mxu0  ;;  %v651_v30 = vpop.f32.mrb[20].mxu1 }
 0x116   : > { %v548_v31 = vadd.f32 %v1243_v32, %v547_v29  ;;  %v940_v33 = vpop.f32.mrb[21].mxu0  ;;  %v652_v34 = vadd.f32 %v1243_v32, %v651_v30  ;;  %v992_v35 = vpop.f32.mrb[21].mxu1 }
 0x117   : > { %v550_v36 = vpop.f32.mrb[22].mxu0  ;;  %v654_v37 = vpop.f32.mrb[22].mxu1 }
 0x118   : > { %717 = vst.msk [vmem:[%s1248_s7 + $0x50] sm:$0xff] %vm706_vm3, %v548_v31  ;;  %v551_v38 = vadd.f32 %v1243_v32, %v550_v36  ;;  %v941_v39 = vpop.f32.mrb[23].mxu0  ;;  %743 = vst.msk [vmem:[%s1248_s7 + $0x120] sm:$0xff] %vm706_vm3, %v652_v34  ;;  %v655_v40 = vadd.f32 %v1243_v32, %v654_v37  ;;  %v993_v41 = vpop.f32.mrb[23].mxu1 }
 0x11a   : > { %718 = vst.msk [vmem:[%s1248_s7 + $0x58] sm:$0xff] %vm706_vm3, %v551_v38  ;;  %744 = vst.msk [vmem:[%s1248_s7 + $0x128] sm:$0xff] %vm706_vm3, %v655_v40 }
 0x11d   : > { %v555_v42 = vpop.f32.mrb[24].mxu0  ;;  %v659_v43 = vpop.f32.mrb[24].mxu1 }
 0x11e   : > { %v556_v44 = vadd.f32 %v1243_v32, %v555_v42  ;;  %v944_v45 = vpop.f32.mrb[25].mxu0  ;;  %v660_v46 = vadd.f32 %v1243_v32, %v659_v43  ;;  %v996_v47 = vpop.f32.mrb[25].mxu1 }
 0x11f   : > { %v558_v48 = vpop.f32.mrb[26].mxu0  ;;  %v662_v49 = vpop.f32.mrb[26].mxu1 }
 0x120   : > { %719 = vst.msk [vmem:[%s1248_s7 + $0x60] sm:$0xff] %vm706_vm3, %v556_v44  ;;  %v559_v50 = vadd.f32 %v1243_v32, %v558_v48  ;;  %v945_v51 = vpop.f32.mrb[27].mxu0  ;;  %745 = vst.msk [vmem:[%s1248_s7 + $0x130] sm:$0xff] %vm706_vm3, %v660_v46  ;;  %v663_v52 = vadd.f32 %v1243_v32, %v662_v49  ;;  %v997_v53 = vpop.f32.mrb[27].mxu1 }
 0x122   : > { %720 = vst.msk [vmem:[%s1248_s7 + $0x68] sm:$0xff] %vm706_vm3, %v559_v50  ;;  %746 = vst.msk [vmem:[%s1248_s7 + $0x138] sm:$0xff] %vm706_vm3, %v663_v52 }
 0x125   : > { %v563_v54 = vpop.f32.mrb[28].mxu0  ;;  %v667_v55 = vpop.f32.mrb[28].mxu1 }
 0x126   : > { %v564_v56 = vadd.f32 %v1243_v32, %v563_v54  ;;  %v948_v57 = vpop.f32.mrb[29].mxu0  ;;  %v668_v58 = vadd.f32 %v1243_v32, %v667_v55  ;;  %v1000_v59 = vpop.f32.mrb[29].mxu1 }
 0x127   : > { %v566_v60 = vpop.f32.mrb[30].mxu0  ;;  %v670_v61 = vpop.f32.mrb[30].mxu1 }
 0x128   : > { %721 = vst.msk [vmem:[%s1248_s7 + $0x70] sm:$0xff] %vm706_vm3, %v564_v56  ;;  %v567_v62 = vadd.f32 %v1243_v32, %v566_v60  ;;  %v949_v63 = vpop.f32.mrb[31].mxu0  ;;  %747 = vst.msk [vmem:[%s1248_s7 + $0x140] sm:$0xff] %vm706_vm3, %v668_v58  ;;  %v671_v0 = vadd.f32 %v1243_v32, %v670_v61  ;;  %v1001_v1 = vpop.f32.mrb[31].mxu1 }
 0x12a   : > { %722 = vst.msk [vmem:[%s1248_s7 + $0x78] sm:$0xff] %vm706_vm3, %v567_v62  ;;  %748 = vst.msk [vmem:[%s1248_s7 + $0x148] sm:$0xff] %vm706_vm3, %v671_v0 }
 0x12d   : > { %v571_v2 = vpop.f32.mrb[32].mxu0  ;;  %v675_v3 = vpop.f32.mrb[32].mxu1 }
 0x12e   : > { %v572_v4 = vadd.f32 %v1243_v32, %v571_v2  ;;  %v952_v5 = vpop.f32.mrb[33].mxu0  ;;  %v676_v6 = vadd.f32 %v1243_v32, %v675_v3  ;;  %v1004_v7 = vpop.f32.mrb[33].mxu1 }
 0x12f   : > { %v574_v8 = vpop.f32.mrb[34].mxu0  ;;  %v678_v9 = vpop.f32.mrb[34].mxu1 }
 0x130   : > { %723 = vst.msk [vmem:[%s1248_s7 + $0x80] sm:$0xff] %vm706_vm3, %v572_v4  ;;  %v575_v10 = vadd.f32 %v1243_v32, %v574_v8  ;;  %v953_v11 = vpop.f32.mrb[35].mxu0  ;;  %749 = vst.msk [vmem:[%s1248_s7 + $0x150] sm:$0xff] %vm706_vm3, %v676_v6  ;;  %v679_v12 = vadd.f32 %v1243_v32, %v678_v9  ;;  %v1005_v13 = vpop.f32.mrb[35].mxu1 }
 0x132   : > { %724 = vst.msk [vmem:[%s1248_s7 + $0x88] sm:$0xff] %vm706_vm3, %v575_v10  ;;  %750 = vst.msk [vmem:[%s1248_s7 + $0x158] sm:$0xff] %vm706_vm3, %v679_v12 }
 0x135   : > { %v579_v14 = vpop.f32.mrb[36].mxu0  ;;  %v683_v15 = vpop.f32.mrb[36].mxu1 }
 0x136   : > { %v580_v16 = vadd.f32 %v1243_v32, %v579_v14  ;;  %v956_v17 = vpop.f32.mrb[37].mxu0  ;;  %v684_v18 = vadd.f32 %v1243_v32, %v683_v15  ;;  %v1008_v19 = vpop.f32.mrb[37].mxu1 }
 0x137   : > { %v582_v20 = vpop.f32.mrb[38].mxu0  ;;  %v686_v21 = vpop.f32.mrb[38].mxu1 }
 0x138   : > { %725 = vst.msk [vmem:[%s1248_s7 + $0x90] sm:$0xff] %vm706_vm3, %v580_v16  ;;  %v583_v22 = vadd.f32 %v1243_v32, %v582_v20  ;;  %v957_v23 = vpop.f32.mrb[39].mxu0  ;;  %751 = vst.msk [vmem:[%s1248_s7 + $0x160] sm:$0xff] %vm706_vm3, %v684_v18  ;;  %v687_v24 = vadd.f32 %v1243_v32, %v686_v21  ;;  %v1009_v25 = vpop.f32.mrb[39].mxu1 }
 0x13a   : > { %726 = vst.msk [vmem:[%s1248_s7 + $0x98] sm:$0xff] %vm706_vm3, %v583_v22  ;;  %752 = vst.msk [vmem:[%s1248_s7 + $0x168] sm:$0xff] %vm706_vm3, %v687_v24 }
 0x13d   : > { %v587_v26 = vpop.f32.mrb[40].mxu0  ;;  %v691_v27 = vpop.f32.mrb[40].mxu1 }
 0x13e   : > { %v588_v28 = vadd.f32 %v1243_v32, %v587_v26  ;;  %v960_v29 = vpop.f32.mrb[41].mxu0  ;;  %v692_v30 = vadd.f32 %v1243_v32, %v691_v27  ;;  %v1012_v31 = vpop.f32.mrb[41].mxu1 }
 0x13f   : > { %v590_v33 = vpop.f32.mrb[42].mxu0  ;;  %v694_v34 = vpop.f32.mrb[42].mxu1 }
 0x140   : > { %727 = vst.msk [vmem:[%s1248_s7 + $0xa0] sm:$0xff] %vm706_vm3, %v588_v28  ;;  %v591_v35 = vadd.f32 %v1243_v32, %v590_v33  ;;  %v961_v36 = vpop.f32.mrb[43].mxu0  ;;  %753 = vst.msk [vmem:[%s1248_s7 + $0x170] sm:$0xff] %vm706_vm3, %v692_v30  ;;  %v695_v37 = vadd.f32 %v1243_v32, %v694_v34  ;;  %v1013_v38 = vpop.f32.mrb[43].mxu1 }
 0x142   : > { %728 = vst.msk [vmem:[%s1248_s7 + $0xa8] sm:$0xff] %vm706_vm3, %v591_v35  ;;  %754 = vst.msk [vmem:[%s1248_s7 + $0x178] sm:$0xff] %vm706_vm3, %v695_v37 }
 0x145   : > { %v595_v39 = vpop.f32.mrb[44].mxu0  ;;  %v699_v40 = vpop.f32.mrb[44].mxu1 }
 0x146   : > { %v596_v41 = vadd.f32 %v1243_v32, %v595_v39  ;;  %v964_v42 = vpop.f32.mrb[45].mxu0  ;;  %v700_v43 = vadd.f32 %v1243_v32, %v699_v40  ;;  %v1016_v44 = vpop.f32.mrb[45].mxu1 }
 0x147   : > { %v598_v45 = vpop.f32.mrb[46].mxu0  ;;  %v702_v46 = vpop.f32.mrb[46].mxu1 }
 0x148   : > { %729 = vst.msk [vmem:[%s1248_s7 + $0xb0] sm:$0xff] %vm706_vm3, %v596_v41  ;;  %v599_v47 = vadd.f32 %v1243_v32, %v598_v45  ;;  %v965_v48 = vpop.f32.mrb[47].mxu0  ;;  %755 = vst.msk [vmem:[%s1248_s7 + $0x180] sm:$0xff] %vm706_vm3, %v700_v43  ;;  %v703_v49 = vadd.f32 %v1243_v32, %v702_v46  ;;  %v1017_v50 = vpop.f32.mrb[47].mxu1 }
 0x14a   : > { %730 = vst.msk [vmem:[%s1248_s7 + $0xb8] sm:$0xff] %vm706_vm3, %v599_v47  ;;  %756 = vst.msk [vmem:[%s1248_s7 + $0x188] sm:$0xff] %vm706_vm3, %v703_v49 }
 0x14d   : > { %v603_v51 = vpop.f32.mrb[48].mxu0 }
 0x14e   : > { %v604_v52 = vadd.f32 %v1243_v32, %v603_v51  ;;  %v968_v53 = vpop.f32.mrb[49].mxu0 }
 0x14f   : > { %v606_v54 = vpop.f32.mrb[50].mxu0 }
 0x150   : > { %731 = vst.msk [vmem:[%s1248_s7 + $0xc0] sm:$0xff] %vm706_vm3, %v604_v52  ;;  %v607_v55 = vadd.f32 %v1243_v32, %v606_v54  ;;  %v969_v56 = vpop.f32.mrb[51].mxu0 }
 0x152   : > { %732 = vst.msk [vmem:[%s1248_s7 + $0xc8] sm:$0xff] %vm706_vm3, %v607_v55 }
 0x153 PF: > { %s13_s12 = sadd.s32 1, %s1074_s12  }
 0x154   : > { %p10_p4 = scmp.ge.s32.totalorder %s13_s12, 6  }
 0x156   :  { %12 = sbr.rel (!%p10_p4) target bundleno = 1 (0x1), region = 62 }

// kernel: _lambda_.31
= control target key start
LH: loop header
LB: loop body
LE: loop exit
PB: predicated region body
PF: predicated region fallthrough
CT: control target
= control target key end

     0   :  { %s1651_s23 = smov 0   ;;  %s2172_s0 = inlined_call_operand.vmem [shape: bf16[1600,72], index: 0, kind: input, shape index: {}]   ;;  %s2173_s1 = inlined_call_operand.vmem [shape: bf16[72,4], index: 1, kind: input, shape index: {}]   ;;  %s2174_s2 = inlined_call_operand.vmem [shape: f32[1,4], index: 2, kind: input, shape index: {}]   ;;  %s2175_s3 = inlined_call_operand.vmem [shape: f32[1600,4], index: 3, kind: input, shape index: {}]   ;;  %s2176_s4 = inlined_call_operand.vmem [shape: f32[1,4], index: 4, kind: input, shape index: {}]   ;;  %s2177_s5 = inlined_call_operand.<no memory space> [shape: f32[1,1], index: 5, kind: input, shape index: {}]   ;;  %s2178_s6 = inlined_call_operand.vmem [shape: f32[1600,1], index: 6, kind: output, shape index: {}]  }
   0x1   :  { %v11_v0 = vstv %s2177_s5 }
   0x2   :  { %12 = vst [vmem:[#allocation2] sm:$0x1] %v11_v0 }
   0x3 LB: > { %s1345_s24 = sadd.s32 4294967295, %s1609_s23   ;;  %p1349_p0 = scmp.ge.s32.totalorder %s1609_s23, 1  ;;  %s1609_s23 = sphi %s1651_s23, %s18_s23  }
   0x4   : > { %p226_p1 = scmp.lt.s32.totalorder %s1609_s23, 5 }
   0x6   : > { %p227_p2 = pnand %p1349_p0, %p226_p1 }
   0x7   : > { %v1573_v1 = vld [vmem:[%s2173_s1] sm:$0xff] (!%p227_p2)   ;;  %v1611_v2 = vmov (!%p227_p2), 0.0   ;;  %v1574_v3 = vld [vmem:[%s2173_s1 + $0x8] sm:$0xff] (!%p227_p2)   ;;  %s261_s28 = smul.u32 (!%p227_p2), 50, %s1345_s24  ;;  %vm1612_vm0 = vmmov (!%p227_p2), 0   ;;  %v1575_v4 = vld [vmem:[%s2173_s1 + $0x10] sm:$0xff] (!%p227_p2)  }
   0x8   : > { %230 = sbr.rel (%p227_p2) target bundleno = 496 (0x1f0), region = 44  ;;  %1443 = vmatprep.subr.bf16.mxu0 (!%p227_p2), %v1611_v2  ;;  %1553 = vmatprep.subr.bf16.mxu1 (!%p227_p2), %v1611_v2  ;;  %v1576_v5 = vld [vmem:[%s2173_s1 + $0x18] sm:$0xff] (!%p227_p2)   ;;  %v1577_v6 = vld [vmem:[%s2173_s1 + $0x20] ss:$0 sps:$4 sm:$0xff] (!%p227_p2)   ;;  %vm574_vm1 = vcmask (!%p227_p2), 1043456   ;;  %vm498_vm2 = vcmask (!%p227_p2), 588800  }
   0x9   : > { %1444 = vmatpush3.bf16.msra.mxu0 (!%p227_p2), %v1573_v1  ;;  %1558 = vmatpush3.bf16.msra.mxu1 (!%p227_p2), %v1573_v1  ;;  %p262_p3 = scmp.lt.s32.totalorder (!%p227_p2), %s261_s28, 199  ;;  %v576_v7 = vsel (!%p227_p2), %vm574_vm1, %v1577_v6, 0  ;;  %v1803_v33 = vld [vmem:[%s2174_s2] ss:$0 sm:$0xff] (!%p227_p2)  ;;  %vm1018_vm3 = vcmask (!%p227_p2), 31744   ;;  %vm1226_vm4 = vcmask (!%p227_p2), 7168  }
   0xa   : > { %1445 = vmatprep.subr.bf16.mxu0 (!%p227_p2), %v1611_v2  ;;  %1554 = vmatprep.subr.bf16.mxu1 (!%p227_p2), %v1611_v2  ;;  %v1816_v52 = vld [vmem:[%s2176_s4] ss:$0 sm:$0xff] (!%p227_p2) }
   0xb   : > { %1453 = vmatprep.mubr.msk.bf16.mxu0 (!%p227_p2), %vm1612_vm0, %v1611_v2  ;;  %1505 = vmatprep.mubr.msk.bf16.mxu1 (!%p227_p2), %vm1612_vm0, %v1611_v2 }
   0xd   : > { %1446 = vmatpush3.bf16.msra.mxu0 (!%p227_p2), %v1574_v3  ;;  %1559 = vmatpush3.bf16.msra.mxu1 (!%p227_p2), %v1574_v3 }
   0xe   : > { %1447 = vmatprep.subr.bf16.mxu0 (!%p227_p2), %v1611_v2  ;;  %1555 = vmatprep.subr.bf16.mxu1 (!%p227_p2), %v1611_v2 }
   0xf   : > { %s2180_s28 = smov (!%p262_p3, %s261_s28), 199 }
  0x10   : > { %s1350_s7 = sshll.u32 %s2180_s28, 2  ;;  %s1351_s15 = sshll.u32 %s2180_s28, 3 }
  0x11   : > { %1448 = vmatpush3.bf16.msra.mxu0 %v1575_v4  ;;  %1560 = vmatpush3.bf16.msra.mxu1 %v1575_v4  ;;  %s1687_s12 = scalar_lea.vmem %s2172_s0, %s1350_s7  ;;  %s1798_s18 = scalar_lea.vmem %s2175_s3, %s1351_s15 }
  0x12   : > { %1449 = vmatprep.subr.bf16.mxu0 %v1611_v2  ;;  %1556 = vmatprep.subr.bf16.mxu1 %v1611_v2  ;;  %v1578_v8 = vld [vmem:[%s1687_s12] sm:$0xff]   ;;  %v1579_v9 = vld [vmem:[%s1687_s12 + $0x68] sm:$0xff]   ;;  %v1581_v11 = vld [vmem:[%s1687_s12 + $0x70] sm:$0xff]   ;;  %s2017_s26 = scalar_lea.vmem %s2178_s6, %s1351_s15 }
  0x13   : > { %v1580_v10 = vld [vmem:[%s1687_s12 + $0x8] sm:$0xff]   ;;  %v1582_v12 = vld [vmem:[%s1687_s12 + $0x10] sm:$0xff]   ;;  %v1583_v13 = vld [vmem:[%s1687_s12 + $0x78] sm:$0xff]  }
  0x14   : > { %v1584_v14 = vld [vmem:[%s1687_s12 + $0x18] sm:$0xff]   ;;  %v1585_v15 = vld [vmem:[%s1687_s12 + $0x80] sm:$0xff]   ;;  %v1587_v17 = vld [vmem:[%s1687_s12 + $0x88] sm:$0xff]  }
  0x15   : > { %1450 = vmatpush3.bf16.msra.mxu0 %v1576_v5  ;;  %1561 = vmatpush3.bf16.msra.mxu1 %v1576_v5  ;;  %v1586_v16 = vld [vmem:[%s1687_s12 + $0x20] sm:$0xff]   ;;  %v1588_v18 = vld [vmem:[%s1687_s12 + $0x28] sm:$0xff]   ;;  %v1589_v19 = vld [vmem:[%s1687_s12 + $0x90] sm:$0xff]  }
  0x16   : > { %1451 = vmatprep.subr.bf16.mxu0 %v1611_v2  ;;  %1557 = vmatprep.subr.bf16.mxu1 %v1611_v2  ;;  %v1590_v20 = vld [vmem:[%s1687_s12 + $0x30] sm:$0xff]   ;;  %v1591_v21 = vld [vmem:[%s1687_s12 + $0x98] sm:$0xff]   ;;  %v1593_v23 = vld [vmem:[%s1687_s12 + $0xa0] sm:$0xff]  }
  0x17   : > { %v1592_v22 = vld [vmem:[%s1687_s12 + $0x38] sm:$0xff]   ;;  %v1594_v24 = vld [vmem:[%s1687_s12 + $0x40] sm:$0xff]   ;;  %v1595_v25 = vld [vmem:[%s1687_s12 + $0xa8] sm:$0xff]  }
  0x18   : > { %v1596_v26 = vld [vmem:[%s1687_s12 + $0x48] sm:$0xff]   ;;  %v1597_v27 = vld [vmem:[%s1687_s12 + $0xb0] sm:$0xff]   ;;  %v1599_v29 = vld [vmem:[%s1687_s12 + $0xb8] sm:$0xff]  }
  0x19   : > { %1452 = vmatpush3.bf16.msra.mxu0 %v576_v7  ;;  %1562 = vmatpush3.bf16.msra.mxu1 %v576_v7  ;;  %v1598_v28 = vld [vmem:[%s1687_s12 + $0x50] sm:$0xff]   ;;  %v1600_v30 = vld [vmem:[%s1687_s12 + $0x58] sm:$0xff]   ;;  %v1602_v31 = vld [vmem:[%s1687_s12 + $0xc0] sm:$0xff]  }
  0x1a   : > { %v1601_v32 = vld [vmem:[%s1687_s12 + $0x60] sm:$0xff]   ;;  %v837_v37 = vld [vmem:[%s1798_s18 + $0xd0] sm:$0xff]  ;;  %v812_v43 = vld [vmem:[%s1798_s18 + $0x8] sm:$0xff] }
  0x1b   : > { %v811_v35 = vld [vmem:[%s1798_s18] sm:$0xff]  ;;  %v838_v45 = vld [vmem:[%s1798_s18 + $0xd8] sm:$0xff]  ;;  %v813_v62 = vld [vmem:[%s1798_s18 + $0x10] sm:$0xff] }
  0x1c   : > { %1454 = vmatmul.mubr.msk.bf16.vlgmr.msra.gmra.mrb[0].mxu0 %vm498_vm2, %v1578_v8  ;;  %1506 = vmatmul.mubr.msk.bf16.vlgmr.msra.gmra.mrb[0].mxu1 %vm498_vm2, %v1579_v9  ;;  %v839_v0 = vld [vmem:[%s1798_s18 + $0xe0] sm:$0xff]  ;;  %v814_v8 = vld [vmem:[%s1798_s18 + $0x18] sm:$0xff] }
  0x1d   : > { %1457 = vmatprep.mubr.msk.bf16.mxu0 %vm1612_vm0, %v1611_v2  ;;  %1509 = vmatprep.mubr.msk.bf16.mxu1 %vm1612_vm0, %v1611_v2 }
  0x24   : > { %1458 = vmatmul.mubr.msk.bf16.gmra.mrb[4].mxu0 %vm498_vm2, %v1580_v10  ;;  %1510 = vmatmul.mubr.msk.bf16.gmra.mrb[4].mxu1 %vm498_vm2, %v1581_v11 }
  0x25   : > { %1461 = vmatprep.mubr.msk.bf16.mxu0 %vm1612_vm0, %v1611_v2  ;;  %1513 = vmatprep.mubr.msk.bf16.mxu1 %vm1612_vm0, %v1611_v2 }
  0x2c   : > { %1462 = vmatmul.mubr.msk.bf16.gmra.mrb[8].mxu0 %vm498_vm2, %v1582_v12  ;;  %1514 = vmatmul.mubr.msk.bf16.gmra.mrb[8].mxu1 %vm498_vm2, %v1583_v13 }
  0x2d   : > { %1465 = vmatprep.mubr.msk.bf16.mxu0 %vm1612_vm0, %v1611_v2  ;;  %1517 = vmatprep.mubr.msk.bf16.mxu1 %vm1612_vm0, %v1611_v2 }
  0x34   : > { %1466 = vmatmul.mubr.msk.bf16.gmra.mrb[12].mxu0 %vm498_vm2, %v1584_v14  ;;  %1518 = vmatmul.mubr.msk.bf16.gmra.mrb[12].mxu1 %vm498_vm2, %v1585_v15 }
  0x35   : > { %1469 = vmatprep.mubr.msk.bf16.mxu0 %vm1612_vm0, %v1611_v2  ;;  %1521 = vmatprep.mubr.msk.bf16.mxu1 %vm1612_vm0, %v1611_v2 }
  0x3c   : > { %1470 = vmatmul.mubr.msk.bf16.gmra.mrb[16].mxu0 %vm498_vm2, %v1586_v16  ;;  %1522 = vmatmul.mubr.msk.bf16.gmra.mrb[16].mxu1 %vm498_vm2, %v1587_v17  ;;  %v840_v16 = vld [vmem:[%s1798_s18 + $0xe8] sm:$0xff] }
  0x3d   : > { %1473 = vmatprep.mubr.msk.bf16.mxu0 %vm1612_vm0, %v1611_v2  ;;  %1525 = vmatprep.mubr.msk.bf16.mxu1 %vm1612_vm0, %v1611_v2 }
  0x44   : > { %1474 = vmatmul.mubr.msk.bf16.gmra.mrb[20].mxu0 %vm498_vm2, %v1588_v18  ;;  %1526 = vmatmul.mubr.msk.bf16.gmra.mrb[20].mxu1 %vm498_vm2, %v1589_v19 }
  0x45   : > { %1477 = vmatprep.mubr.msk.bf16.mxu0 %vm1612_vm0, %v1611_v2  ;;  %1529 = vmatprep.mubr.msk.bf16.mxu1 %vm1612_vm0, %v1611_v2 }
  0x4c   : > { %1478 = vmatmul.mubr.msk.bf16.gmra.mrb[24].mxu0 %vm498_vm2, %v1590_v20  ;;  %1530 = vmatmul.mubr.msk.bf16.gmra.mrb[24].mxu1 %vm498_vm2, %v1591_v21 }
  0x4d   : > { %1481 = vmatprep.mubr.msk.bf16.mxu0 %vm1612_vm0, %v1611_v2  ;;  %1533 = vmatprep.mubr.msk.bf16.mxu1 %vm1612_vm0, %v1611_v2 }
  0x54   : > { %1482 = vmatmul.mubr.msk.bf16.gmra.mrb[28].mxu0 %vm498_vm2, %v1592_v22  ;;  %1534 = vmatmul.mubr.msk.bf16.gmra.mrb[28].mxu1 %vm498_vm2, %v1593_v23 }
  0x55   : > { %1485 = vmatprep.mubr.msk.bf16.mxu0 %vm1612_vm0, %v1611_v2  ;;  %1537 = vmatprep.mubr.msk.bf16.mxu1 %vm1612_vm0, %v1611_v2 }
  0x5c   : > { %1486 = vmatmul.mubr.msk.bf16.gmra.mrb[32].mxu0 %vm498_vm2, %v1594_v24  ;;  %1538 = vmatmul.mubr.msk.bf16.gmra.mrb[32].mxu1 %vm498_vm2, %v1595_v25 }
  0x5d   : > { %1489 = vmatprep.mubr.msk.bf16.mxu0 %vm1612_vm0, %v1611_v2  ;;  %1541 = vmatprep.mubr.msk.bf16.mxu1 %vm1612_vm0, %v1611_v2 }
  0x64   : > { %1490 = vmatmul.mubr.msk.bf16.gmra.mrb[36].mxu0 %vm498_vm2, %v1596_v26  ;;  %1542 = vmatmul.mubr.msk.bf16.gmra.mrb[36].mxu1 %vm498_vm2, %v1597_v27 }
  0x65   : > { %1493 = vmatprep.mubr.msk.bf16.mxu0 %vm1612_vm0, %v1611_v2  ;;  %1545 = vmatprep.mubr.msk.bf16.mxu1 %vm1612_vm0, %v1611_v2 }
  0x6c   : > { %1494 = vmatmul.mubr.msk.bf16.gmra.mrb[40].mxu0 %vm498_vm2, %v1598_v28  ;;  %1546 = vmatmul.mubr.msk.bf16.gmra.mrb[40].mxu1 %vm498_vm2, %v1599_v29  ;;  %v815_v29 = vld [vmem:[%s1798_s18 + $0x20] sm:$0xff] }
  0x6d   : > { %1497 = vmatprep.mubr.msk.bf16.mxu0 %vm1612_vm0, %v1611_v2  ;;  %1549 = vmatprep.mubr.msk.bf16.mxu1 %vm1612_vm0, %v1611_v2 }
  0x74   : > { %1498 = vmatmul.mubr.msk.bf16.gmra.mrb[44].mxu0 %vm498_vm2, %v1600_v30  ;;  %1550 = vmatmul.mubr.msk.bf16.gmra.mrb[44].mxu1 %vm498_vm2, %v1602_v31  ;;  %v841_v31 = vld [vmem:[%s1798_s18 + $0xf0] sm:$0xff] }
  0x75   : > { %1501 = vmatprep.mubr.msk.bf16.mxu0 %vm1612_vm0, %v1611_v2 }
  0x7c   : > { %1502 = vmatmul.mubr.msk.bf16.gmra.mrb[48].mxu0 %vm498_vm2, %v1601_v32 }
  0xef   : > { %v612_v34 = vpop.f32.mrb[0].mxu0  ;;  %v716_v36 = vpop.f32.mrb[0].mxu1 }
  0xf0   : > { %v613_v38 = vadd.f32 %v1803_v33, %v612_v34  ;;  %v1455_v39 = vpop.f32.mrb[1].mxu0  ;;  %v717_v40 = vadd.f32 %v1803_v33, %v716_v36  ;;  %v1507_v41 = vpop.f32.mrb[1].mxu1 }
  0xf1   : > { %v615_v42 = vpop.f32.mrb[2].mxu0  ;;  %v719_v44 = vpop.f32.mrb[2].mxu1 }
  0xf2   : > { %v861_v46 = vadd.f32 %v811_v35, %v613_v38  ;;  %v887_v47 = vadd.f32 %v837_v37, %v717_v40  ;;  %v616_v48 = vadd.f32 %v1803_v33, %v615_v42  ;;  %v1456_v49 = vpop.f32.mrb[3].mxu0  ;;  %v720_v50 = vadd.f32 %v1803_v33, %v719_v44  ;;  %v1508_v51 = vpop.f32.mrb[3].mxu1  ;;  %v816_v40 = vld [vmem:[%s1798_s18 + $0x28] sm:$0xff]  ;;  %v842_v44 = vld [vmem:[%s1798_s18 + $0xf8] sm:$0xff] }
  0xf4   : > { %v911_v53 = vmax.f32 %v861_v46, 0.0  ;;  %v937_v54 = vmax.f32 %v887_v47, 0.0  ;;  %v862_v55 = vadd.f32 %v812_v43, %v616_v48  ;;  %v888_v56 = vadd.f32 %v838_v45, %v720_v50 }
  0xf6   : > { %v938_v57 = vmax.f32 %v888_v56, 0.0  ;;  %v968_v58 = vmul.f32 %v1816_v52, %v911_v53  ;;  %v994_v59 = vmul.f32 %v1816_v52, %v937_v54  ;;  %v912_v60 = vmax.f32 %v862_v55, 0.0 }
  0xf7   : > { %v620_v61 = vpop.f32.mrb[4].mxu0  ;;  %v724_v63 = vpop.f32.mrb[4].mxu1 }
  0xf8   : > { %v621_v1 = vadd.f32 %v1803_v33, %v620_v61  ;;  %v1459_v2 = vpop.f32.mrb[5].mxu0  ;;  %v1019_v3 = vsel %vm1018_vm3, %v968_v58, 0.0  ;;  %v725_v4 = vadd.f32 %v1803_v33, %v724_v63  ;;  %v995_v5 = vmul.f32 %v1816_v52, %v938_v57  ;;  %v1511_v6 = vpop.f32.mrb[5].mxu1 }
  0xf9   : > { %1020 = vadd.xlane.f32.xlu0 %v1019_v3  ;;  %v623_v7 = vpop.f32.mrb[6].mxu0  ;;  %v1097_v9 = vsel %vm1018_vm3, %v994_v59, 0.0  ;;  %v727_v10 = vpop.f32.mrb[6].mxu1  ;;  %v969_v22 = vmul.f32 %v1816_v52, %v912_v60  ;;  %v843_v2 = vld [vmem:[%s1798_s18 + $0x100] sm:$0xff] }
  0xfa   : > { %v863_v11 = vadd.f32 %v813_v62, %v621_v1  ;;  %v624_v12 = vadd.f32 %v1803_v33, %v623_v7  ;;  %v1460_v13 = vpop.f32.mrb[7].mxu0  ;;  %v889_v14 = vadd.f32 %v839_v0, %v725_v4  ;;  %v1100_v15 = vsel %vm1018_vm3, %v995_v5, 0.0  ;;  %v1512_v17 = vpop.f32.mrb[7].mxu1  ;;  %v817_v0 = vld [vmem:[%s1798_s18 + $0x30] sm:$0xff] }
  0xfb   : > { %1101 = vadd.xlane.f32.xlu1 %v1100_v15  ;;  %v728_v18 = vadd.f32 %v1803_v33, %v727_v10  ;;  %v1022_v35 = vsel %vm1018_vm3, %v969_v22, 0.0  ;;  %v844_v13 = vld [vmem:[%s1798_s18 + $0x108] sm:$0xff] }
  0xfc   : > { %v913_v19 = vmax.f32 %v863_v11, 0.0  ;;  %v864_v20 = vadd.f32 %v814_v8, %v624_v12  ;;  %v939_v21 = vmax.f32 %v889_v14, 0.0 }
  0xfd   : > { %1098 = vadd.xlane.f32.xlu0 %v1097_v9  ;;  %v890_v23 = vadd.f32 %v840_v16, %v728_v18  ;;  %v818_v9 = vld [vmem:[%s1798_s18 + $0x38] sm:$0xff] }
  0xfe   : > { %v914_v24 = vmax.f32 %v864_v20, 0.0  ;;  %v970_v25 = vmul.f32 %v1816_v52, %v913_v19  ;;  %v996_v26 = vmul.f32 %v1816_v52, %v939_v21 }
  0xff   : > { %v940_v27 = vmax.f32 %v890_v23, 0.0  ;;  %v628_v28 = vpop.f32.mrb[8].mxu0  ;;  %v732_v30 = vpop.f32.mrb[8].mxu1 }
 0x100   : > { %v629_v32 = vadd.f32 %v1803_v33, %v628_v28  ;;  %v1463_v34 = vpop.f32.mrb[9].mxu0  ;;  %v1025_v36 = vsel %vm1018_vm3, %v970_v25, 0.0  ;;  %v733_v37 = vadd.f32 %v1803_v33, %v732_v30  ;;  %v1515_v38 = vpop.f32.mrb[9].mxu1  ;;  %v1103_v41 = vsel %vm1018_vm3, %v996_v26, 0.0 }
 0x101   : > { %1023 = vadd.xlane.f32.xlu0 %v1022_v35  ;;  %1026 = vadd.xlane.f32.xlu1 %v1025_v36  ;;  %v631_v39 = vpop.f32.mrb[10].mxu0  ;;  %v971_v42 = vmul.f32 %v1816_v52, %v914_v24  ;;  %v735_v43 = vpop.f32.mrb[10].mxu1  ;;  %v997_v45 = vmul.f32 %v1816_v52, %v940_v27  ;;  %v845_v35 = vld [vmem:[%s1798_s18 + $0x110] sm:$0xff] }
 0x102   : > { %v865_v46 = vadd.f32 %v815_v29, %v629_v32  ;;  %v632_v47 = vadd.f32 %v1803_v33, %v631_v39  ;;  %v1464_v48 = vpop.f32.mrb[11].mxu0  ;;  %v891_v49 = vadd.f32 %v841_v31, %v733_v37  ;;  %v736_v50 = vadd.f32 %v1803_v33, %v735_v43  ;;  %v1516_v51 = vpop.f32.mrb[11].mxu1  ;;  %v819_v32 = vld [vmem:[%s1798_s18 + $0x40] sm:$0xff] }
 0x103   : > { %v1028_v53 = vsel %vm1018_vm3, %v971_v42, 0.0  ;;  %v1106_v58 = vsel %vm1018_vm3, %v997_v45, 0.0  ;;  %v820_v42 = vld [vmem:[%s1798_s18 + $0x48] sm:$0xff] }
 0x104   : > { %v915_v54 = vmax.f32 %v865_v46, 0.0  ;;  %v866_v55 = vadd.f32 %v816_v40, %v632_v47  ;;  %v941_v56 = vmax.f32 %v891_v49, 0.0  ;;  %v892_v57 = vadd.f32 %v842_v44, %v736_v50  ;;  %v846_v46 = vld [vmem:[%s1798_s18 + $0x118] sm:$0xff] }
 0x105   : > { %1104 = vadd.xlane.f32.xlu0 %v1103_v41  ;;  %1029 = vadd.xlane.f32.xlu1 %v1028_v53 }
 0x106   : > { %v916_v59 = vmax.f32 %v866_v55, 0.0  ;;  %v942_v60 = vmax.f32 %v892_v57, 0.0  ;;  %v972_v61 = vmul.f32 %v1816_v52, %v915_v54  ;;  %v998_v62 = vmul.f32 %v1816_v52, %v941_v56 }
 0x107   : > { %v636_v63 = vpop.f32.mrb[12].mxu0  ;;  %v740_v1 = vpop.f32.mrb[12].mxu1 }
 0x108   : > { %v637_v3 = vadd.f32 %v1803_v33, %v636_v63  ;;  %v1467_v4 = vpop.f32.mrb[13].mxu0  ;;  %v1031_v5 = vsel %vm1018_vm3, %v972_v61, 0.0  ;;  %v741_v6 = vadd.f32 %v1803_v33, %v740_v1  ;;  %v1519_v7 = vpop.f32.mrb[13].mxu1  ;;  %v1109_v10 = vsel %vm1018_vm3, %v998_v62, 0.0 }
 0x109   : > { %1107 = vadd.xlane.f32.xlu1 %v1106_v58  ;;  %1032 = vadd.xlane.f32.xlu0 %v1031_v5  ;;  %v639_v8 = vpop.f32.mrb[14].mxu0  ;;  %v973_v11 = vmul.f32 %v1816_v52, %v916_v59  ;;  %v743_v12 = vpop.f32.mrb[14].mxu1  ;;  %v999_v14 = vmul.f32 %v1816_v52, %v942_v60  ;;  %v847_v4 = vld [vmem:[%s1798_s18 + $0x120] sm:$0xff] }
 0x10a   : > { %v867_v15 = vadd.f32 %v817_v0, %v637_v3  ;;  %v640_v16 = vadd.f32 %v1803_v33, %v639_v8  ;;  %v1468_v17 = vpop.f32.mrb[15].mxu0  ;;  %v893_v18 = vadd.f32 %v843_v2, %v741_v6  ;;  %v744_v19 = vadd.f32 %v1803_v33, %v743_v12  ;;  %v1520_v20 = vpop.f32.mrb[15].mxu1  ;;  %v821_v2 = vld [vmem:[%s1798_s18 + $0x50] sm:$0xff] }
 0x10b   : > { %v1034_v21 = vsel %vm1018_vm3, %v973_v11, 0.0  ;;  %v1112_v26 = vsel %vm1018_vm3, %v999_v14, 0.0  ;;  %v822_v11 = vld [vmem:[%s1798_s18 + $0x58] sm:$0xff] }
 0x10c   : > { %v917_v22 = vmax.f32 %v867_v15, 0.0  ;;  %v868_v23 = vadd.f32 %v818_v9, %v640_v16  ;;  %v943_v24 = vmax.f32 %v893_v18, 0.0  ;;  %v894_v25 = vadd.f32 %v844_v13, %v744_v19  ;;  %v848_v15 = vld [vmem:[%s1798_s18 + $0x128] sm:$0xff] }
 0x10d   : > { %1110 = vadd.xlane.f32.xlu0 %v1109_v10  ;;  %1035 = vadd.xlane.f32.xlu1 %v1034_v21 }
 0x10e   : > { %v918_v27 = vmax.f32 %v868_v23, 0.0  ;;  %v944_v28 = vmax.f32 %v894_v25, 0.0  ;;  %v974_v29 = vmul.f32 %v1816_v52, %v917_v22  ;;  %v1000_v30 = vmul.f32 %v1816_v52, %v943_v24 }
 0x10f   : > { %v644_v31 = vpop.f32.mrb[16].mxu0  ;;  %v748_v34 = vpop.f32.mrb[16].mxu1 }
 0x110   : > { %v645_v36 = vadd.f32 %v1803_v33, %v644_v31  ;;  %v1471_v37 = vpop.f32.mrb[17].mxu0  ;;  %v1037_v38 = vsel %vm1018_vm3, %v974_v29, 0.0  ;;  %v749_v39 = vadd.f32 %v1803_v33, %v748_v34  ;;  %v1523_v40 = vpop.f32.mrb[17].mxu1  ;;  %v1115_v43 = vsel %vm1018_vm3, %v1000_v30, 0.0 }
 0x111   : > { %1113 = vadd.xlane.f32.xlu1 %v1112_v26  ;;  %1038 = vadd.xlane.f32.xlu0 %v1037_v38  ;;  %v647_v41 = vpop.f32.mrb[18].mxu0  ;;  %v975_v44 = vmul.f32 %v1816_v52, %v918_v27  ;;  %v751_v45 = vpop.f32.mrb[18].mxu1  ;;  %v1001_v47 = vmul.f32 %v1816_v52, %v944_v28  ;;  %v849_v37 = vld [vmem:[%s1798_s18 + $0x130] sm:$0xff] }
 0x112   : > { %v869_v48 = vadd.f32 %v819_v32, %v645_v36  ;;  %v648_v49 = vadd.f32 %v1803_v33, %v647_v41  ;;  %v1472_v50 = vpop.f32.mrb[19].mxu0  ;;  %v895_v51 = vadd.f32 %v845_v35, %v749_v39  ;;  %v752_v53 = vadd.f32 %v1803_v33, %v751_v45  ;;  %v1524_v54 = vpop.f32.mrb[19].mxu1  ;;  %v823_v35 = vld [vmem:[%s1798_s18 + $0x60] sm:$0xff] }
 0x113   : > { %v1040_v55 = vsel %vm1018_vm3, %v975_v44, 0.0  ;;  %v1118_v60 = vsel %vm1018_vm3, %v1001_v47, 0.0  ;;  %v824_v44 = vld [vmem:[%s1798_s18 + $0x68] sm:$0xff] }
 0x114   : > { %v919_v56 = vmax.f32 %v869_v48, 0.0  ;;  %v870_v57 = vadd.f32 %v820_v42, %v648_v49  ;;  %v945_v58 = vmax.f32 %v895_v51, 0.0  ;;  %v896_v59 = vadd.f32 %v846_v46, %v752_v53  ;;  %v850_v48 = vld [vmem:[%s1798_s18 + $0x138] sm:$0xff] }
 0x115   : > { %1116 = vadd.xlane.f32.xlu0 %v1115_v43  ;;  %1041 = vadd.xlane.f32.xlu1 %v1040_v55 }
 0x116   : > { %v920_v61 = vmax.f32 %v870_v57, 0.0  ;;  %v946_v62 = vmax.f32 %v896_v59, 0.0  ;;  %v976_v63 = vmul.f32 %v1816_v52, %v919_v56  ;;  %v1002_v0 = vmul.f32 %v1816_v52, %v945_v58 }
 0x117   : > { %v652_v1 = vpop.f32.mrb[20].mxu0  ;;  %v756_v3 = vpop.f32.mrb[20].mxu1 }
 0x118   : > { %v653_v5 = vadd.f32 %v1803_v33, %v652_v1  ;;  %v1475_v6 = vpop.f32.mrb[21].mxu0  ;;  %v1043_v7 = vsel %vm1018_vm3, %v976_v63, 0.0  ;;  %v757_v8 = vadd.f32 %v1803_v33, %v756_v3  ;;  %v1527_v9 = vpop.f32.mrb[21].mxu1  ;;  %v1121_v12 = vsel %vm1018_vm3, %v1002_v0, 0.0 }
 0x119   : > { %1119 = vadd.xlane.f32.xlu1 %v1118_v60  ;;  %1044 = vadd.xlane.f32.xlu0 %v1043_v7  ;;  %v655_v10 = vpop.f32.mrb[22].mxu0  ;;  %v977_v13 = vmul.f32 %v1816_v52, %v920_v61  ;;  %v759_v14 = vpop.f32.mrb[22].mxu1  ;;  %v1003_v16 = vmul.f32 %v1816_v52, %v946_v62  ;;  %v851_v6 = vld [vmem:[%s1798_s18 + $0x140] sm:$0xff] }
 0x11a   : > { %v871_v17 = vadd.f32 %v821_v2, %v653_v5  ;;  %v656_v18 = vadd.f32 %v1803_v33, %v655_v10  ;;  %v1476_v19 = vpop.f32.mrb[23].mxu0  ;;  %v897_v20 = vadd.f32 %v847_v4, %v757_v8  ;;  %v760_v21 = vadd.f32 %v1803_v33, %v759_v14  ;;  %v1528_v22 = vpop.f32.mrb[23].mxu1  ;;  %v825_v4 = vld [vmem:[%s1798_s18 + $0x70] sm:$0xff] }
 0x11b   : > { %v1046_v23 = vsel %vm1018_vm3, %v977_v13, 0.0  ;;  %v1124_v28 = vsel %vm1018_vm3, %v1003_v16, 0.0  ;;  %v826_v13 = vld [vmem:[%s1798_s18 + $0x78] sm:$0xff] }
 0x11c   : > { %v921_v24 = vmax.f32 %v871_v17, 0.0  ;;  %v872_v25 = vadd.f32 %v822_v11, %v656_v18  ;;  %v947_v26 = vmax.f32 %v897_v20, 0.0  ;;  %v898_v27 = vadd.f32 %v848_v15, %v760_v21  ;;  %v852_v17 = vld [vmem:[%s1798_s18 + $0x148] sm:$0xff] }
 0x11d   : > { %1122 = vadd.xlane.f32.xlu0 %v1121_v12  ;;  %1047 = vadd.xlane.f32.xlu1 %v1046_v23 }
 0x11e   : > { %v922_v29 = vmax.f32 %v872_v25, 0.0  ;;  %v948_v30 = vmax.f32 %v898_v27, 0.0  ;;  %v978_v31 = vmul.f32 %v1816_v52, %v921_v24  ;;  %v1004_v32 = vmul.f32 %v1816_v52, %v947_v26 }
 0x11f   : > { %v660_v34 = vpop.f32.mrb[24].mxu0  ;;  %v764_v36 = vpop.f32.mrb[24].mxu1 }
 0x120   : > { %v661_v38 = vadd.f32 %v1803_v33, %v660_v34  ;;  %v1479_v39 = vpop.f32.mrb[25].mxu0  ;;  %v1049_v40 = vsel %vm1018_vm3, %v978_v31, 0.0  ;;  %v765_v41 = vadd.f32 %v1803_v33, %v764_v36  ;;  %v1531_v42 = vpop.f32.mrb[25].mxu1  ;;  %v1127_v45 = vsel %vm1018_vm3, %v1004_v32, 0.0 }
 0x121   : > { %1125 = vadd.xlane.f32.xlu1 %v1124_v28  ;;  %1050 = vadd.xlane.f32.xlu0 %v1049_v40  ;;  %v663_v43 = vpop.f32.mrb[26].mxu0  ;;  %v979_v46 = vmul.f32 %v1816_v52, %v922_v29  ;;  %v767_v47 = vpop.f32.mrb[26].mxu1  ;;  %v1005_v49 = vmul.f32 %v1816_v52, %v948_v30  ;;  %v853_v39 = vld [vmem:[%s1798_s18 + $0x150] sm:$0xff] }
 0x122   : > { %v873_v50 = vadd.f32 %v823_v35, %v661_v38  ;;  %v664_v51 = vadd.f32 %v1803_v33, %v663_v43  ;;  %v1480_v53 = vpop.f32.mrb[27].mxu0  ;;  %v899_v54 = vadd.f32 %v849_v37, %v765_v41  ;;  %v768_v55 = vadd.f32 %v1803_v33, %v767_v47  ;;  %v1532_v56 = vpop.f32.mrb[27].mxu1  ;;  %v827_v37 = vld [vmem:[%s1798_s18 + $0x80] sm:$0xff] }
 0x123   : > { %v1052_v57 = vsel %vm1018_vm3, %v979_v46, 0.0  ;;  %v1130_v62 = vsel %vm1018_vm3, %v1005_v49, 0.0  ;;  %v828_v46 = vld [vmem:[%s1798_s18 + $0x88] sm:$0xff] }
 0x124   : > { %v923_v58 = vmax.f32 %v873_v50, 0.0  ;;  %v874_v59 = vadd.f32 %v824_v44, %v664_v51  ;;  %v949_v60 = vmax.f32 %v899_v54, 0.0  ;;  %v900_v61 = vadd.f32 %v850_v48, %v768_v55  ;;  %v854_v50 = vld [vmem:[%s1798_s18 + $0x158] sm:$0xff] }
 0x125   : > { %1128 = vadd.xlane.f32.xlu0 %v1127_v45  ;;  %1053 = vadd.xlane.f32.xlu1 %v1052_v57 }
 0x126   : > { %v924_v63 = vmax.f32 %v874_v59, 0.0  ;;  %v950_v0 = vmax.f32 %v900_v61, 0.0  ;;  %v980_v1 = vmul.f32 %v1816_v52, %v923_v58  ;;  %v1006_v2 = vmul.f32 %v1816_v52, %v949_v60 }
 0x127   : > { %v668_v3 = vpop.f32.mrb[28].mxu0  ;;  %v772_v5 = vpop.f32.mrb[28].mxu1 }
 0x128   : > { %v669_v7 = vadd.f32 %v1803_v33, %v668_v3  ;;  %v1483_v8 = vpop.f32.mrb[29].mxu0  ;;  %v1055_v9 = vsel %vm1018_vm3, %v980_v1, 0.0  ;;  %v773_v10 = vadd.f32 %v1803_v33, %v772_v5  ;;  %v1535_v11 = vpop.f32.mrb[29].mxu1  ;;  %v1133_v14 = vsel %vm1018_vm3, %v1006_v2, 0.0 }
 0x129   : > { %1131 = vadd.xlane.f32.xlu1 %v1130_v62  ;;  %1056 = vadd.xlane.f32.xlu0 %v1055_v9  ;;  %v671_v12 = vpop.f32.mrb[30].mxu0  ;;  %v981_v15 = vmul.f32 %v1816_v52, %v924_v63  ;;  %v775_v16 = vpop.f32.mrb[30].mxu1  ;;  %v1007_v18 = vmul.f32 %v1816_v52, %v950_v0  ;;  %v855_v8 = vld [vmem:[%s1798_s18 + $0x160] sm:$0xff] }
 0x12a   : > { %v875_v19 = vadd.f32 %v825_v4, %v669_v7  ;;  %v672_v20 = vadd.f32 %v1803_v33, %v671_v12  ;;  %v1484_v21 = vpop.f32.mrb[31].mxu0  ;;  %v901_v22 = vadd.f32 %v851_v6, %v773_v10  ;;  %v776_v23 = vadd.f32 %v1803_v33, %v775_v16  ;;  %v1536_v24 = vpop.f32.mrb[31].mxu1  ;;  %v829_v6 = vld [vmem:[%s1798_s18 + $0x90] sm:$0xff] }
 0x12b   : > { %v1058_v25 = vsel %vm1018_vm3, %v981_v15, 0.0  ;;  %v1136_v30 = vsel %vm1018_vm3, %v1007_v18, 0.0  ;;  %v830_v15 = vld [vmem:[%s1798_s18 + $0x98] sm:$0xff] }
 0x12c   : > { %v925_v26 = vmax.f32 %v875_v19, 0.0  ;;  %v876_v27 = vadd.f32 %v826_v13, %v672_v20  ;;  %v951_v28 = vmax.f32 %v901_v22, 0.0  ;;  %v902_v29 = vadd.f32 %v852_v17, %v776_v23  ;;  %v856_v19 = vld [vmem:[%s1798_s18 + $0x168] sm:$0xff] }
 0x12d   : > { %1134 = vadd.xlane.f32.xlu0 %v1133_v14  ;;  %1059 = vadd.xlane.f32.xlu1 %v1058_v25 }
 0x12e   : > { %v926_v31 = vmax.f32 %v876_v27, 0.0  ;;  %v952_v32 = vmax.f32 %v902_v29, 0.0  ;;  %v982_v34 = vmul.f32 %v1816_v52, %v925_v26  ;;  %v1008_v35 = vmul.f32 %v1816_v52, %v951_v28 }
 0x12f   : > { %v676_v36 = vpop.f32.mrb[32].mxu0  ;;  %v780_v38 = vpop.f32.mrb[32].mxu1 }
 0x130   : > { %v677_v40 = vadd.f32 %v1803_v33, %v676_v36  ;;  %v1487_v41 = vpop.f32.mrb[33].mxu0  ;;  %v1061_v42 = vsel %vm1018_vm3, %v982_v34, 0.0  ;;  %v781_v43 = vadd.f32 %v1803_v33, %v780_v38  ;;  %v1539_v44 = vpop.f32.mrb[33].mxu1  ;;  %v1139_v47 = vsel %vm1018_vm3, %v1008_v35, 0.0 }
 0x131   : > { %1137 = vadd.xlane.f32.xlu1 %v1136_v30  ;;  %1062 = vadd.xlane.f32.xlu0 %v1061_v42  ;;  %v679_v45 = vpop.f32.mrb[34].mxu0  ;;  %v983_v48 = vmul.f32 %v1816_v52, %v926_v31  ;;  %v783_v49 = vpop.f32.mrb[34].mxu1  ;;  %v1009_v51 = vmul.f32 %v1816_v52, %v952_v32  ;;  %v857_v41 = vld [vmem:[%s1798_s18 + $0x170] sm:$0xff] }
 0x132   : > { %v877_v53 = vadd.f32 %v827_v37, %v677_v40  ;;  %v680_v54 = vadd.f32 %v1803_v33, %v679_v45  ;;  %v1488_v55 = vpop.f32.mrb[35].mxu0  ;;  %v903_v56 = vadd.f32 %v853_v39, %v781_v43  ;;  %v784_v57 = vadd.f32 %v1803_v33, %v783_v49  ;;  %v1540_v58 = vpop.f32.mrb[35].mxu1  ;;  %v831_v39 = vld [vmem:[%s1798_s18 + $0xa0] sm:$0xff] }
 0x133   : > { %v1064_v59 = vsel %vm1018_vm3, %v983_v48, 0.0  ;;  %v1142_v0 = vsel %vm1018_vm3, %v1009_v51, 0.0  ;;  %v832_v48 = vld [vmem:[%s1798_s18 + $0xa8] sm:$0xff] }
 0x134   : > { %v927_v60 = vmax.f32 %v877_v53, 0.0  ;;  %v878_v61 = vadd.f32 %v828_v46, %v680_v54  ;;  %v953_v62 = vmax.f32 %v903_v56, 0.0  ;;  %v904_v63 = vadd.f32 %v854_v50, %v784_v57  ;;  %v858_v53 = vld [vmem:[%s1798_s18 + $0x178] sm:$0xff] }
 0x135   : > { %1140 = vadd.xlane.f32.xlu0 %v1139_v47  ;;  %1065 = vadd.xlane.f32.xlu1 %v1064_v59 }
 0x136   : > { %v928_v1 = vmax.f32 %v878_v61, 0.0  ;;  %v954_v2 = vmax.f32 %v904_v63, 0.0  ;;  %v984_v3 = vmul.f32 %v1816_v52, %v927_v60  ;;  %v1010_v4 = vmul.f32 %v1816_v52, %v953_v62 }
 0x137   : > { %v684_v5 = vpop.f32.mrb[36].mxu0  ;;  %v788_v7 = vpop.f32.mrb[36].mxu1 }
 0x138   : > { %v685_v9 = vadd.f32 %v1803_v33, %v684_v5  ;;  %v1491_v10 = vpop.f32.mrb[37].mxu0  ;;  %v1067_v11 = vsel %vm1018_vm3, %v984_v3, 0.0  ;;  %v789_v12 = vadd.f32 %v1803_v33, %v788_v7  ;;  %v1543_v13 = vpop.f32.mrb[37].mxu1  ;;  %v1145_v16 = vsel %vm1018_vm3, %v1010_v4, 0.0 }
 0x139   : > { %1143 = vadd.xlane.f32.xlu1 %v1142_v0  ;;  %1068 = vadd.xlane.f32.xlu0 %v1067_v11  ;;  %v687_v14 = vpop.f32.mrb[38].mxu0  ;;  %v985_v17 = vmul.f32 %v1816_v52, %v928_v1  ;;  %v791_v18 = vpop.f32.mrb[38].mxu1  ;;  %v1011_v20 = vmul.f32 %v1816_v52, %v954_v2 }
 0x13a   : > { %v879_v21 = vadd.f32 %v829_v6, %v685_v9  ;;  %v688_v22 = vadd.f32 %v1803_v33, %v687_v14  ;;  %v1492_v23 = vpop.f32.mrb[39].mxu0  ;;  %v905_v24 = vadd.f32 %v855_v8, %v789_v12  ;;  %v792_v25 = vadd.f32 %v1803_v33, %v791_v18  ;;  %v1544_v26 = vpop.f32.mrb[39].mxu1  ;;  %v833_v8 = vld [vmem:[%s1798_s18 + $0xb0] sm:$0xff] }
 0x13b   : > { %v1070_v27 = vsel %vm1018_vm3, %v985_v17, 0.0  ;;  %v1148_v32 = vsel %vm1018_vm3, %v1011_v20, 0.0 }
 0x13c   : > { %v929_v28 = vmax.f32 %v879_v21, 0.0  ;;  %v880_v29 = vadd.f32 %v830_v15, %v688_v22  ;;  %v955_v30 = vmax.f32 %v905_v24, 0.0  ;;  %v906_v31 = vadd.f32 %v856_v19, %v792_v25  ;;  %v859_v25 = vld [vmem:[%s1798_s18 + $0x180] sm:$0xff] }
 0x13d   : > { %1146 = vadd.xlane.f32.xlu0 %v1145_v16  ;;  %1071 = vadd.xlane.f32.xlu1 %v1070_v27  ;;  %v834_v16 = vld [vmem:[%s1798_s18 + $0xb8] sm:$0xff] }
 0x13e   : > { %v930_v34 = vmax.f32 %v880_v29, 0.0  ;;  %v956_v35 = vmax.f32 %v906_v31, 0.0  ;;  %v986_v36 = vmul.f32 %v1816_v52, %v929_v28  ;;  %v1012_v37 = vmul.f32 %v1816_v52, %v955_v30 }
 0x13f   : > { %v692_v38 = vpop.f32.mrb[40].mxu0  ;;  %v796_v40 = vpop.f32.mrb[40].mxu1 }
 0x140   : > { %v693_v42 = vadd.f32 %v1803_v33, %v692_v38  ;;  %v1495_v43 = vpop.f32.mrb[41].mxu0  ;;  %v1073_v44 = vsel %vm1018_vm3, %v986_v36, 0.0  ;;  %v797_v45 = vadd.f32 %v1803_v33, %v796_v40  ;;  %v1547_v46 = vpop.f32.mrb[41].mxu1  ;;  %v1151_v49 = vsel %vm1018_vm3, %v1012_v37, 0.0  ;;  %v835_v36 = vld [vmem:[%s1798_s18 + $0xc0] sm:$0xff]  ;;  %v860_v37 = vld [vmem:[%s1798_s18 + $0x188] sm:$0xff] }
 0x141   : > { %1149 = vadd.xlane.f32.xlu1 %v1148_v32  ;;  %1074 = vadd.xlane.f32.xlu0 %v1073_v44  ;;  %v695_v47 = vpop.f32.mrb[42].mxu0  ;;  %v987_v50 = vmul.f32 %v1816_v52, %v930_v34  ;;  %v799_v51 = vpop.f32.mrb[42].mxu1  ;;  %v1013_v54 = vmul.f32 %v1816_v52, %v956_v35  ;;  %v836_v43 = vld [vmem:[%s1798_s18 + $0xc8] sm:$0xff] }
 0x142   : > { %v881_v55 = vadd.f32 %v831_v39, %v693_v42  ;;  %v696_v56 = vadd.f32 %v1803_v33, %v695_v47  ;;  %v1496_v57 = vpop.f32.mrb[43].mxu0  ;;  %v907_v58 = vadd.f32 %v857_v41, %v797_v45  ;;  %v800_v59 = vadd.f32 %v1803_v33, %v799_v51  ;;  %v1548_v60 = vpop.f32.mrb[43].mxu1 }
 0x143   : > { %v1076_v61 = vsel %vm1018_vm3, %v987_v50, 0.0  ;;  %v1154_v2 = vsel %vm1018_vm3, %v1013_v54, 0.0 }
 0x144   : > { %v931_v62 = vmax.f32 %v881_v55, 0.0  ;;  %v882_v63 = vadd.f32 %v832_v48, %v696_v56  ;;  %v957_v0 = vmax.f32 %v907_v58, 0.0  ;;  %v908_v1 = vadd.f32 %v858_v53, %v800_v59 }
 0x145   : > { %1152 = vadd.xlane.f32.xlu0 %v1151_v49  ;;  %1077 = vadd.xlane.f32.xlu1 %v1076_v61 }
 0x146   : > { %v932_v3 = vmax.f32 %v882_v63, 0.0  ;;  %v958_v4 = vmax.f32 %v908_v1, 0.0  ;;  %v988_v5 = vmul.f32 %v1816_v52, %v931_v62  ;;  %v1014_v6 = vmul.f32 %v1816_v52, %v957_v0  ;;  %v2010_v62 = vld [vmem:[#allocation2] ss:$0 sm:$0xff] }
 0x147   : > { %v700_v7 = vpop.f32.mrb[44].mxu0  ;;  %v804_v9 = vpop.f32.mrb[44].mxu1 }
 0x148   : > { %v701_v10 = vadd.f32 %v1803_v33, %v700_v7  ;;  %v1499_v11 = vpop.f32.mrb[45].mxu0  ;;  %v1079_v12 = vsel %vm1018_vm3, %v988_v5, 0.0  ;;  %v989_v13 = vmul.f32 %v1816_v52, %v932_v3  ;;  %v1551_v14 = vpop.f32.mrb[45].mxu1  ;;  %v1157_v17 = vsel %vm1018_vm3, %v1014_v6, 0.0 }
 0x149   : > { %1155 = vadd.xlane.f32.xlu1 %v1154_v2  ;;  %1080 = vadd.xlane.f32.xlu0 %v1079_v12  ;;  %v703_v15 = vpop.f32.mrb[46].mxu0  ;;  %v807_v18 = vpop.f32.mrb[46].mxu1  ;;  %v805_v22 = vadd.f32 %v1803_v33, %v804_v9  ;;  %v1015_v23 = vmul.f32 %v1816_v52, %v958_v4 }
 0x14a   : > { %v883_v19 = vadd.f32 %v833_v8, %v701_v10  ;;  %v704_v20 = vadd.f32 %v1803_v33, %v703_v15  ;;  %v1500_v21 = vpop.f32.mrb[47].mxu0  ;;  %v1552_v24 = vpop.f32.mrb[47].mxu1  ;;  %v1082_v28 = vsel %vm1018_vm3, %v989_v13, 0.0  ;;  %v808_v29 = vadd.f32 %v1803_v33, %v807_v18 }
 0x14b   : > { %v909_v31 = vadd.f32 %v859_v25, %v805_v22  ;;  %v1160_v32 = vsel %vm1018_vm3, %v1015_v23, 0.0 }
 0x14c   : > { %v933_v26 = vmax.f32 %v883_v19, 0.0  ;;  %v884_v27 = vadd.f32 %v834_v16, %v704_v20  ;;  %v910_v48 = vadd.f32 %v860_v37, %v808_v29 }
 0x14d   : > { %1158 = vadd.xlane.f32.xlu0 %v1157_v17  ;;  %1083 = vadd.xlane.f32.xlu1 %v1082_v28  ;;  %v959_v45 = vmax.f32 %v909_v31, 0.0 }
 0x14e   : > { %v934_v30 = vmax.f32 %v884_v27, 0.0  ;;  %v990_v34 = vmul.f32 %v1816_v52, %v933_v26  ;;  %v960_v54 = vmax.f32 %v910_v48, 0.0 }
 0x14f   : > { %v708_v35 = vpop.f32.mrb[48].mxu0  ;;  %v1016_v56 = vmul.f32 %v1816_v52, %v959_v45 }
 0x150   : > { %v709_v38 = vadd.f32 %v1803_v33, %v708_v35  ;;  %v1503_v39 = vpop.f32.mrb[49].mxu0  ;;  %v1085_v40 = vsel %vm1018_vm3, %v990_v34, 0.0  ;;  %v991_v41 = vmul.f32 %v1816_v52, %v934_v30  ;;  %v1017_v60 = vmul.f32 %v1816_v52, %v960_v54 }
 0x151   : > { %1161 = vadd.xlane.f32.xlu1 %v1160_v32  ;;  %1086 = vadd.xlane.f32.xlu0 %v1085_v40  ;;  %v711_v42 = vpop.f32.mrb[50].mxu0  ;;  %v1163_v59 = vsel %vm1018_vm3, %v1016_v56, 0.0 }
 0x152   : > { %v885_v44 = vadd.f32 %v835_v36, %v709_v38  ;;  %v712_v46 = vadd.f32 %v1803_v33, %v711_v42  ;;  %v1504_v47 = vpop.f32.mrb[51].mxu0  ;;  %v1088_v51 = vsel %vm1018_vm3, %v991_v41, 0.0  ;;  %v1166_v61 = vsel %vm1018_vm3, %v1017_v60, 0.0 }
 0x154   : > { %v935_v49 = vmax.f32 %v885_v44, 0.0  ;;  %v886_v50 = vadd.f32 %v836_v43, %v712_v46 }
 0x155   : > { %1089 = vadd.xlane.f32.xlu1 %v1088_v51 }
 0x156   : > { %v936_v53 = vmax.f32 %v886_v50, 0.0  ;;  %v992_v55 = vmul.f32 %v1816_v52, %v935_v49 }
 0x158   : > { %v1091_v57 = vsel %vm1018_vm3, %v992_v55, 0.0  ;;  %v993_v58 = vmul.f32 %v1816_v52, %v936_v53 }
 0x159   : > { %1092 = vadd.xlane.f32.xlu0 %v1091_v57 }
 0x15a   : > { %v1094_v33 = vsel %vm1018_vm3, %v993_v58, 0.0 }
 0x15b   : > { %1095 = vadd.xlane.f32.xlu1 %v1094_v33 }
 0x15d   : > { %1164 = vadd.xlane.f32.xlu0 %v1163_v59 }
 0x15f   : > { %1167 = vadd.xlane.f32.xlu1 %v1166_v61 }
 0x186   : > { %v1021_v52 = vpop.xlane.xlu0 %1020 }
 0x187   : > { %v1176_v63 = vadd.f32 %v2010_v62, %v1021_v52 }
 0x188   : > { %v1102_v0 = vpop.xlane.xlu1 %1101 }
 0x189   : > { %1227 = vst.msk [vmem:[%s2017_s26] sm:$0xff] %vm1226_vm4, %v1176_v63  ;;  %v1203_v1 = vadd.f32 %v2010_v62, %v1102_v0 }
 0x18a   : > { %v1099_v2 = vpop.xlane.xlu0 %1098 }
 0x18b   : > { %1254 = vst.msk [vmem:[%s2017_s26 + $0xd8] sm:$0xff] %vm1226_vm4, %v1203_v1  ;;  %v1202_v3 = vadd.f32 %v2010_v62, %v1099_v2 }
 0x18d   : > { %1253 = vst.msk [vmem:[%s2017_s26 + $0xd0] sm:$0xff] %vm1226_vm4, %v1202_v3 }
 0x18e   : > { %v1024_v4 = vpop.xlane.xlu0 %1023  ;;  %v1027_v5 = vpop.xlane.xlu1 %1026 }
 0x18f   : > { %v1177_v6 = vadd.f32 %v2010_v62, %v1024_v4  ;;  %v1178_v7 = vadd.f32 %v2010_v62, %v1027_v5 }
 0x191   : > { %1228 = vst.msk [vmem:[%s2017_s26 + $0x8] sm:$0xff] %vm1226_vm4, %v1177_v6  ;;  %1229 = vst.msk [vmem:[%s2017_s26 + $0x10] sm:$0xff] %vm1226_vm4, %v1178_v7 }
 0x192   : > { %v1105_v8 = vpop.xlane.xlu0 %1104  ;;  %v1030_v9 = vpop.xlane.xlu1 %1029 }
 0x193   : > { %v1204_v10 = vadd.f32 %v2010_v62, %v1105_v8  ;;  %v1179_v11 = vadd.f32 %v2010_v62, %v1030_v9 }
 0x195   : > { %1255 = vst.msk [vmem:[%s2017_s26 + $0xe0] sm:$0xff] %vm1226_vm4, %v1204_v10  ;;  %1230 = vst.msk [vmem:[%s2017_s26 + $0x18] sm:$0xff] %vm1226_vm4, %v1179_v11 }
 0x196   : > { %v1108_v12 = vpop.xlane.xlu1 %1107  ;;  %v1033_v13 = vpop.xlane.xlu0 %1032 }
 0x197   : > { %v1205_v14 = vadd.f32 %v2010_v62, %v1108_v12  ;;  %v1180_v15 = vadd.f32 %v2010_v62, %v1033_v13 }
 0x199   : > { %1256 = vst.msk [vmem:[%s2017_s26 + $0xe8] sm:$0xff] %vm1226_vm4, %v1205_v14  ;;  %1231 = vst.msk [vmem:[%s2017_s26 + $0x20] sm:$0xff] %vm1226_vm4, %v1180_v15 }
 0x19a   : > { %v1111_v16 = vpop.xlane.xlu0 %1110  ;;  %v1036_v17 = vpop.xlane.xlu1 %1035 }
 0x19b   : > { %v1206_v18 = vadd.f32 %v2010_v62, %v1111_v16  ;;  %v1181_v19 = vadd.f32 %v2010_v62, %v1036_v17 }
 0x19d   : > { %1257 = vst.msk [vmem:[%s2017_s26 + $0xf0] sm:$0xff] %vm1226_vm4, %v1206_v18  ;;  %1232 = vst.msk [vmem:[%s2017_s26 + $0x28] sm:$0xff] %vm1226_vm4, %v1181_v19 }
 0x19e   : > { %v1114_v20 = vpop.xlane.xlu1 %1113  ;;  %v1039_v21 = vpop.xlane.xlu0 %1038 }
 0x19f   : > { %v1207_v22 = vadd.f32 %v2010_v62, %v1114_v20  ;;  %v1182_v23 = vadd.f32 %v2010_v62, %v1039_v21 }
 0x1a1   : > { %1258 = vst.msk [vmem:[%s2017_s26 + $0xf8] sm:$0xff] %vm1226_vm4, %v1207_v22  ;;  %1233 = vst.msk [vmem:[%s2017_s26 + $0x30] sm:$0xff] %vm1226_vm4, %v1182_v23 }
 0x1a2   : > { %v1117_v24 = vpop.xlane.xlu0 %1116  ;;  %v1042_v25 = vpop.xlane.xlu1 %1041 }
 0x1a3   : > { %v1208_v26 = vadd.f32 %v2010_v62, %v1117_v24  ;;  %v1183_v27 = vadd.f32 %v2010_v62, %v1042_v25 }
 0x1a5   : > { %1259 = vst.msk [vmem:[%s2017_s26 + $0x100] sm:$0xff] %vm1226_vm4, %v1208_v26  ;;  %1234 = vst.msk [vmem:[%s2017_s26 + $0x38] sm:$0xff] %vm1226_vm4, %v1183_v27 }
 0x1a6   : > { %v1120_v28 = vpop.xlane.xlu1 %1119  ;;  %v1045_v29 = vpop.xlane.xlu0 %1044 }
 0x1a7   : > { %v1209_v30 = vadd.f32 %v2010_v62, %v1120_v28  ;;  %v1184_v31 = vadd.f32 %v2010_v62, %v1045_v29 }
 0x1a9   : > { %1260 = vst.msk [vmem:[%s2017_s26 + $0x108] sm:$0xff] %vm1226_vm4, %v1209_v30  ;;  %1235 = vst.msk [vmem:[%s2017_s26 + $0x40] sm:$0xff] %vm1226_vm4, %v1184_v31 }
 0x1aa   : > { %v1123_v32 = vpop.xlane.xlu0 %1122  ;;  %v1048_v34 = vpop.xlane.xlu1 %1047 }
 0x1ab   : > { %v1210_v35 = vadd.f32 %v2010_v62, %v1123_v32  ;;  %v1185_v36 = vadd.f32 %v2010_v62, %v1048_v34 }
 0x1ad   : > { %1261 = vst.msk [vmem:[%s2017_s26 + $0x110] sm:$0xff] %vm1226_vm4, %v1210_v35  ;;  %1236 = vst.msk [vmem:[%s2017_s26 + $0x48] sm:$0xff] %vm1226_vm4, %v1185_v36 }
 0x1ae   : > { %v1126_v37 = vpop.xlane.xlu1 %1125  ;;  %v1051_v38 = vpop.xlane.xlu0 %1050 }
 0x1af   : > { %v1211_v39 = vadd.f32 %v2010_v62, %v1126_v37  ;;  %v1186_v40 = vadd.f32 %v2010_v62, %v1051_v38 }
 0x1b1   : > { %1262 = vst.msk [vmem:[%s2017_s26 + $0x118] sm:$0xff] %vm1226_vm4, %v1211_v39  ;;  %1237 = vst.msk [vmem:[%s2017_s26 + $0x50] sm:$0xff] %vm1226_vm4, %v1186_v40 }
 0x1b2   : > { %v1129_v41 = vpop.xlane.xlu0 %1128  ;;  %v1054_v42 = vpop.xlane.xlu1 %1053 }
 0x1b3   : > { %v1212_v43 = vadd.f32 %v2010_v62, %v1129_v41  ;;  %v1187_v44 = vadd.f32 %v2010_v62, %v1054_v42 }
 0x1b5   : > { %1263 = vst.msk [vmem:[%s2017_s26 + $0x120] sm:$0xff] %vm1226_vm4, %v1212_v43  ;;  %1238 = vst.msk [vmem:[%s2017_s26 + $0x58] sm:$0xff] %vm1226_vm4, %v1187_v44 }
 0x1b6   : > { %v1132_v45 = vpop.xlane.xlu1 %1131  ;;  %v1057_v46 = vpop.xlane.xlu0 %1056 }
 0x1b7   : > { %v1213_v47 = vadd.f32 %v2010_v62, %v1132_v45  ;;  %v1188_v48 = vadd.f32 %v2010_v62, %v1057_v46 }
 0x1b9   : > { %1264 = vst.msk [vmem:[%s2017_s26 + $0x128] sm:$0xff] %vm1226_vm4, %v1213_v47  ;;  %1239 = vst.msk [vmem:[%s2017_s26 + $0x60] sm:$0xff] %vm1226_vm4, %v1188_v48 }
 0x1ba   : > { %v1135_v49 = vpop.xlane.xlu0 %1134  ;;  %v1060_v50 = vpop.xlane.xlu1 %1059 }
 0x1bb   : > { %v1214_v51 = vadd.f32 %v2010_v62, %v1135_v49  ;;  %v1189_v53 = vadd.f32 %v2010_v62, %v1060_v50 }
 0x1bd   : > { %1265 = vst.msk [vmem:[%s2017_s26 + $0x130] sm:$0xff] %vm1226_vm4, %v1214_v51  ;;  %1240 = vst.msk [vmem:[%s2017_s26 + $0x68] sm:$0xff] %vm1226_vm4, %v1189_v53 }
 0x1be   : > { %v1138_v54 = vpop.xlane.xlu1 %1137  ;;  %v1063_v55 = vpop.xlane.xlu0 %1062 }
 0x1bf   : > { %v1215_v56 = vadd.f32 %v2010_v62, %v1138_v54  ;;  %v1190_v57 = vadd.f32 %v2010_v62, %v1063_v55 }
 0x1c1   : > { %1266 = vst.msk [vmem:[%s2017_s26 + $0x138] sm:$0xff] %vm1226_vm4, %v1215_v56  ;;  %1241 = vst.msk [vmem:[%s2017_s26 + $0x70] sm:$0xff] %vm1226_vm4, %v1190_v57 }
 0x1c2   : > { %v1141_v58 = vpop.xlane.xlu0 %1140  ;;  %v1066_v33 = vpop.xlane.xlu1 %1065 }
 0x1c3   : > { %v1216_v59 = vadd.f32 %v2010_v62, %v1141_v58  ;;  %v1191_v60 = vadd.f32 %v2010_v62, %v1066_v33 }
 0x1c5   : > { %1267 = vst.msk [vmem:[%s2017_s26 + $0x140] sm:$0xff] %vm1226_vm4, %v1216_v59  ;;  %1242 = vst.msk [vmem:[%s2017_s26 + $0x78] sm:$0xff] %vm1226_vm4, %v1191_v60 }
 0x1c6   : > { %v1144_v61 = vpop.xlane.xlu1 %1143  ;;  %v1069_v52 = vpop.xlane.xlu0 %1068 }
 0x1c7   : > { %v1217_v63 = vadd.f32 %v2010_v62, %v1144_v61  ;;  %v1192_v0 = vadd.f32 %v2010_v62, %v1069_v52 }
 0x1c9   : > { %1268 = vst.msk [vmem:[%s2017_s26 + $0x148] sm:$0xff] %vm1226_vm4, %v1217_v63  ;;  %1243 = vst.msk [vmem:[%s2017_s26 + $0x80] sm:$0xff] %vm1226_vm4, %v1192_v0 }
 0x1ca   : > { %v1147_v1 = vpop.xlane.xlu0 %1146  ;;  %v1072_v2 = vpop.xlane.xlu1 %1071 }
 0x1cb   : > { %v1218_v3 = vadd.f32 %v2010_v62, %v1147_v1  ;;  %v1193_v4 = vadd.f32 %v2010_v62, %v1072_v2 }
 0x1cd   : > { %1269 = vst.msk [vmem:[%s2017_s26 + $0x150] sm:$0xff] %vm1226_vm4, %v1218_v3  ;;  %1244 = vst.msk [vmem:[%s2017_s26 + $0x88] sm:$0xff] %vm1226_vm4, %v1193_v4 }
 0x1ce   : > { %v1150_v5 = vpop.xlane.xlu1 %1149  ;;  %v1075_v6 = vpop.xlane.xlu0 %1074 }
 0x1cf   : > { %v1219_v7 = vadd.f32 %v2010_v62, %v1150_v5  ;;  %v1194_v8 = vadd.f32 %v2010_v62, %v1075_v6 }
 0x1d1   : > { %1270 = vst.msk [vmem:[%s2017_s26 + $0x158] sm:$0xff] %vm1226_vm4, %v1219_v7  ;;  %1245 = vst.msk [vmem:[%s2017_s26 + $0x90] sm:$0xff] %vm1226_vm4, %v1194_v8 }
 0x1d2   : > { %v1153_v9 = vpop.xlane.xlu0 %1152  ;;  %v1078_v10 = vpop.xlane.xlu1 %1077 }
 0x1d3   : > { %v1220_v11 = vadd.f32 %v2010_v62, %v1153_v9  ;;  %v1195_v12 = vadd.f32 %v2010_v62, %v1078_v10 }
 0x1d5   : > { %1271 = vst.msk [vmem:[%s2017_s26 + $0x160] sm:$0xff] %vm1226_vm4, %v1220_v11  ;;  %1246 = vst.msk [vmem:[%s2017_s26 + $0x98] sm:$0xff] %vm1226_vm4, %v1195_v12 }
 0x1d6   : > { %v1156_v13 = vpop.xlane.xlu1 %1155  ;;  %v1081_v14 = vpop.xlane.xlu0 %1080 }
 0x1d7   : > { %v1221_v15 = vadd.f32 %v2010_v62, %v1156_v13  ;;  %v1196_v16 = vadd.f32 %v2010_v62, %v1081_v14 }
 0x1d9   : > { %1272 = vst.msk [vmem:[%s2017_s26 + $0x168] sm:$0xff] %vm1226_vm4, %v1221_v15  ;;  %1247 = vst.msk [vmem:[%s2017_s26 + $0xa0] sm:$0xff] %vm1226_vm4, %v1196_v16 }
 0x1da   : > { %v1159_v17 = vpop.xlane.xlu0 %1158  ;;  %v1084_v18 = vpop.xlane.xlu1 %1083 }
 0x1db   : > { %v1222_v19 = vadd.f32 %v2010_v62, %v1159_v17  ;;  %v1197_v20 = vadd.f32 %v2010_v62, %v1084_v18 }
 0x1dd   : > { %1273 = vst.msk [vmem:[%s2017_s26 + $0x170] sm:$0xff] %vm1226_vm4, %v1222_v19  ;;  %1248 = vst.msk [vmem:[%s2017_s26 + $0xa8] sm:$0xff] %vm1226_vm4, %v1197_v20 }
 0x1de   : > { %v1162_v21 = vpop.xlane.xlu1 %1161  ;;  %v1087_v22 = vpop.xlane.xlu0 %1086 }
 0x1df   : > { %v1223_v23 = vadd.f32 %v2010_v62, %v1162_v21  ;;  %v1198_v24 = vadd.f32 %v2010_v62, %v1087_v22 }
 0x1e1   : > { %1274 = vst.msk [vmem:[%s2017_s26 + $0x178] sm:$0xff] %vm1226_vm4, %v1223_v23  ;;  %1249 = vst.msk [vmem:[%s2017_s26 + $0xb0] sm:$0xff] %vm1226_vm4, %v1198_v24 }
 0x1e2   : > { %v1090_v25 = vpop.xlane.xlu1 %1089 }
 0x1e3   : > { %v1199_v26 = vadd.f32 %v2010_v62, %v1090_v25 }
 0x1e5   : > { %1250 = vst.msk [vmem:[%s2017_s26 + $0xb8] sm:$0xff] %vm1226_vm4, %v1199_v26 }
 0x1e6   : > { %v1093_v27 = vpop.xlane.xlu0 %1092 }
 0x1e7   : > { %v1200_v28 = vadd.f32 %v2010_v62, %v1093_v27 }
 0x1e8   : > { %v1096_v29 = vpop.xlane.xlu1 %1095 }
 0x1e9   : > { %1251 = vst.msk [vmem:[%s2017_s26 + $0xc0] sm:$0xff] %vm1226_vm4, %v1200_v28  ;;  %v1201_v30 = vadd.f32 %v2010_v62, %v1096_v29 }
 0x1ea   : > { %v1165_v31 = vpop.xlane.xlu0 %1164 }
 0x1eb   : > { %1252 = vst.msk [vmem:[%s2017_s26 + $0xc8] sm:$0xff] %vm1226_vm4, %v1201_v30  ;;  %v1224_v32 = vadd.f32 %v2010_v62, %v1165_v31 }
 0x1ec   : > { %v1168_v34 = vpop.xlane.xlu1 %1167 }
 0x1ed   : > { %1275 = vst.msk [vmem:[%s2017_s26 + $0x180] sm:$0xff] %vm1226_vm4, %v1224_v32  ;;  %v1225_v35 = vadd.f32 %v2010_v62, %v1168_v34 }
 0x1ef   : > { %1276 = vst.msk [vmem:[%s2017_s26 + $0x188] sm:$0xff] %vm1226_vm4, %v1225_v35 }
 0x1f0 PF: > { %s18_s23 = sadd.s32 1, %s1609_s23  }
 0x1f1   : > { %p15_p4 = scmp.ge.s32.totalorder %s18_s23, 6  }
 0x1f3   :  { %17 = sbr.rel (!%p15_p4) target bundleno = 3 (0x3), region = 77 }

</bundles_post_ra>
